<compile_context>
chip_gen: v7x
topology: tpu7x:2x2x1
jax: 0.10.0
libtpu: 0.0.40
codegen_flags: <defaults>
</compile_context>

<pallas_src>
import numpy as np
import jax
import jax.numpy as jnp
from jax.experimental import pallas as pl
from jax.experimental.pallas import tpu as pltpu


# ------------------------------------------------------------------ skeleton constants

ADJ_MID_EDGES = [[0, 2], [1, 2], [2, 3], [3, 4], [3, 5], [3, 7], [3, 6], [6, 8], [7, 9], [8, 10],
                 [9, 11], [2, 12], [2, 13], [2, 14], [2, 15], [2, 16], [2, 17], [2, 18], [2, 19],
                 [2, 20], [2, 21], [2, 22], [2, 23], [2, 24], [2, 25], [2, 26], [2, 27], [2, 28],
                 [2, 29], [2, 30], [2, 31], [2, 32], [2, 33], [2, 34], [2, 35], [2, 36], [2, 37],
                 [2, 38], [2, 39], [2, 40], [2, 41], [2, 42], [2, 43], [2, 44], [2, 45], [5, 46],
                 [46, 47], [47, 48], [46, 49], [49, 50], [46, 51], [51, 52], [46, 53], [53, 54],
                 [46, 55], [55, 56], [4, 57], [57, 58], [58, 59], [57, 60], [60, 61], [57, 62],
                 [62, 63], [57, 64], [64, 65], [57, 66], [66, 67]]

ADJ_LOW_EDGES = [[0, 1], [1, 2], [2, 3], [3, 4], [4, 5], [1, 6], [1, 7], [1, 8], [1, 9], [1, 10],
                 [1, 11], [1, 12], [1, 13], [1, 14], [1, 15], [1, 16], [1, 17], [1, 18], [1, 19],
                 [1, 20], [1, 21], [1, 22], [2, 23], [23, 24], [24, 25], [23, 26], [26, 27],
                 [23, 28], [28, 29], [23, 30], [30, 31], [23, 32], [32, 33]]

MID_GROUP = [0, 1, 2, 3, 5, 6, 4, 7, 8, 9, 10, 11, 12, 20, 13, 19, 14, 18, 15, 17, 16, 38, 21, 25,
             22, 24, 23, 26, 27, 29, 28, 30, 31, 34, 32, 35, 33, 36, 37, 39, 40, 41, 42, 43, 44,
             45, 46, 57, 47, 58, 48, 59, 49, 60, 50, 61, 51, 62, 52, 63, 53, 64, 54, 65, 55, 66,
             56, 67]

INV_LOW = [0, 0, 1, 1, 2, 2, 3, 3, 4, 4, 5, 5, 6, 7, 8, 9, 10, 9, 8, 7, 6, 11, 12, 13, 12, 11, 13,
           14, 15, 14, 15, 16, 17, 18, 16, 17, 18, 19, 10, 19, 20, 20, 21, 21, 22, 22, 23, 24, 25,
           26, 27, 28, 29, 30, 31, 32, 33, 23, 24, 25, 26, 27, 28, 29, 30, 31, 32, 33]

INV_MID = [2, 0, 0, 1, 1, 3, 3, 5, 4, 5, 4, 7, 6, 7, 6, 9, 8, 11, 11, 9, 10, 10, 8, 12, 12, 13, 13,
           14, 14, 15, 15, 16, 17, 17, 18, 18, 19, 19, 20, 20, 21, 21, 22, 22, 23, 23, 24, 24, 25,
           25, 26, 26, 27, 27, 28, 28, 29, 30, 30, 31, 32, 32, 31, 33, 33, 34, 35, 35, 34, 36, 36,
           37, 37, 38, 29, 38, 39, 39, 40, 40, 16, 41, 41, 42, 42, 43, 43, 44, 44, 45, 45, 46, 47,
           47, 48, 48, 49, 49, 50, 50, 51, 51, 52, 52, 53, 53, 54, 54, 55, 55, 56, 56, 57, 58, 58,
           59, 59, 60, 60, 61, 61, 62, 62, 63, 63, 64, 64, 65, 65, 66, 66, 67, 67]

# nodes_group constructor parameter (group_size > 1, flattened length 136 -> 68 pooled nodes).
NODES_GROUP = [[2 * i, 2 * i + 1] for i in range(66)] + [[132, 131], [130, 132]]
HIGH_GROUP = sum(NODES_GROUP, [])


def adj_mx_from_edges(num_pts, edges):
    a = np.zeros((num_pts, num_pts), dtype=np.float32)
    for i, j in edges:
        a[i, j] = 1.0
        a[j, i] = 1.0
    a = a + np.eye(num_pts, dtype=np.float32)          # self loops
    a = a / a.sum(axis=1, keepdims=True)               # row normalize
    return a


def pool_matrix(group, n_in):
    """AvgPool1d(k=2,s=2) over gathered nodes as a dense (len(group)//2, n_in) operator."""
    n_out = len(group) // 2
    p = np.zeros((n_out, n_in), dtype=np.float32)
    for m in range(n_out):
        p[m, group[2 * m]] += 0.5
        p[m, group[2 * m + 1]] += 0.5
    return p


def unpool_matrix(inv, n_in):
    """Gather x[inv] as a dense (len(inv), n_in) 0/1 operator."""
    u = np.zeros((len(inv), n_in), dtype=np.float32)
    for i, j in enumerate(inv):
        u[i, j] = 1.0
    return u


def rep_block_diag(w, batch):
    """kron(I_B, W): apply the same per-batch weight to batch-folded (N, B*Cin) activations."""
    return jnp.kron(jnp.eye(batch, dtype=w.dtype), w)


# ------------------------------------------------------------------ fused Pallas kernel

def _graph_sh_fused_kernel(
    x_ref,                     # (133, B*Cin)   batch folded into lanes
    adj_ref,                   # (133, 133)     row-normalized adjacency
    adjmid_ref,                # (68, 68)
    a2_ref,                    # (68, 133)      adj_mid @ P_high  (pool folded into gconv2)
    a3_ref,                    # (34, 68)       adj_low @ P_mid   (pool folded into gconv3)
    ulow_ref,                  # (68, 34)       unpool 34 -> 68
    umid_ref,                  # (133, 68)      unpool 68 -> 133
    w0_ref, b0_ref,            # (B*Cin, B*hid), (1, B*hid)            BN-folded, block-diag
    w1_ref, b1_ref,            # (L, B*hid,  B*hid1), (L, 1, B*hid1)
    w2_ref, b2_ref,            # (L, B*hid1, B*hid2), (L, 1, B*hid2)
    w3_ref, b3_ref,            # (L, B*hid2, B*hid2), (L, 1, B*hid2)
    w4_ref, b4_ref,            # (L, B*hid2, B*hid1), (L, 1, B*hid1)
    w5_ref, b5_ref,            # (L, B*hid1, B*hid ), (L, 1, B*hid )
    wt_ref, bt_ref,            # (L, B*hid, B*Cout), (1, B*Cout)   fused conv_l @ out-slice
    o_ref,                     # (133, B*Cout)
):
    f32 = jnp.float32
    x = x_ref[...].astype(f32)               # (133, B*Cin)
    adj = adj_ref[...]
    adj_mid = adjmid_ref[...]
    a2 = a2_ref[...]
    a3 = a3_ref[...]
    u_low = ulow_ref[...]
    u_mid = umid_ref[...]

    def mm(a, b):
        return jnp.dot(a, b, preferred_element_type=f32)

    def gconv(a, z, w, b):                    # relu(A @ (z @ W') + b'), BN folded into W', b'
        return jnp.maximum(mm(a, mm(z, w)) + b, 0.0)

    # Input _GraphConv (B*Cin == 4): VPU broadcast-MAC instead of a nearly-empty MXU pass.
    w0 = w0_ref[...]
    xw = x[:, 0:1] * w0[0:1, :]
    for c in range(1, w0.shape[0]):
        xw = xw + x[:, c:c + 1] * w0[c:c + 1, :]
    h = jnp.maximum(mm(adj, xw) + b0_ref[...], 0.0)            # (133, B*hid)

    num_layers = w1_ref.shape[0]
    acc = jnp.zeros((h.shape[0], o_ref.shape[-1]), f32)        # (133, B*Cout) fused tail acc

    for l in range(num_layers):                                # statically unrolled
        skip1 = h
        skip2 = gconv(adj,     skip1, w1_ref[l], b1_ref[l])                    # (133, B*hid1)
        skip3 = gconv(a2,      skip2, w2_ref[l], b2_ref[l])                    # (68,  B*hid2)
        out34 = gconv(a3,      skip3, w3_ref[l], b3_ref[l])                    # (34,  B*hid2)
        out68 = gconv(adj_mid, mm(u_low, out34) + skip3, w4_ref[l], b4_ref[l]) # (68,  B*hid1)
        h = gconv(adj, mm(u_mid, out68) + skip2, w5_ref[l], b5_ref[l]) + skip1 # (133, B*hid)
        acc = acc + mm(h, wt_ref[l])                                           # (133, B*Cout)

    o_ref[...] = (acc + bt_ref[...]).astype(o_ref.dtype)


def graph_sh_forward(ops, x):
    B, N, cin = x.shape
    bcout = ops["wt"].shape[-1]        # B * Cout
    cout = bcout // B

    # Fold the batch into the lane axis: (B, N, Cin) -> (N, B*Cin). Pure layout plumbing.
    x2d = jnp.transpose(x, (1, 0, 2)).reshape(N, B * cin)

    operands = (
        x2d, ops["adj"], ops["adj_mid"], ops["a2"], ops["a3"], ops["u_low"], ops["u_mid"],
        ops["w0"], ops["b0"],
        ops["w1s"], ops["b1s"], ops["w2s"], ops["b2s"], ops["w3s"], ops["b3s"],
        ops["w4s"], ops["b4s"], ops["w5s"], ops["b5s"],
        ops["wt"], ops["bt"],
    )

    def full_spec(a):                  # whole array as one VMEM block
        return pl.BlockSpec(a.shape, lambda i, _nd=a.ndim: (0,) * _nd)

    out2d = pl.pallas_call(
        _graph_sh_fused_kernel,
        out_shape=jax.ShapeDtypeStruct((N, bcout), jnp.float32),
        grid=(1,),
        in_specs=[full_spec(a) for a in operands],
        out_specs=pl.BlockSpec((N, bcout), lambda i: (0, 0)),
        compiler_params=pltpu.CompilerParams(dimension_semantics=("arbitrary",)),
    )(*operands)

    out = out2d.reshape(N, B, cout).transpose(1, 0, 2)         # back to (B, N, Cout)
    return out[:, :23, :], out[:, 23:91, :], out[:, 91:112, :], out[:, 112:, :]


# ------------------------------------------------------------------ parameter init & folding

def init_gconv_params(key, cin, cout):
    kw, kb = jax.random.split(key)
    w = jax.random.normal(kw, (cin, cout), jnp.float32) * (1.0 / np.sqrt(cin))
    b = jax.random.normal(kb, (cout,), jnp.float32) * 0.01
    eps = 1e-5
    gamma = jnp.ones((cout,), jnp.float32)
    beta = jnp.zeros((cout,), jnp.float32)
    run_mean = jnp.zeros((cout,), jnp.float32)
    run_var = jnp.ones((cout,), jnp.float32)
    scale = gamma / jnp.sqrt(run_var + eps)
    shift = beta - run_mean * scale
    return {"w": w, "b": b, "bn_scale": scale, "bn_shift": shift}


def init_linear_params(key, cin, cout):
    kw, kb = jax.random.split(key)
    w = jax.random.normal(kw, (cin, cout), jnp.float32) * (1.0 / np.sqrt(cin))
    b = jax.random.normal(kb, (cout,), jnp.float32) * 0.01
    return {"w": w, "b": b}


def init_graphsh_params(key, hid_dim, coords_dim=(2, 3), num_layers=4):
    hid1 = int(hid_dim * 1.5)
    hid2 = hid_dim * 2
    keys = jax.random.split(key, 2 + num_layers * 6)
    params = {"gconv_input": init_gconv_params(keys[0], coords_dim[0], hid_dim),
              "gconv_output": init_linear_params(keys[1], hid_dim, coords_dim[1]),
              "hourglass": [], "conv": []}
    ki = 2
    for _ in range(num_layers):
        hg = {"g1": init_gconv_params(keys[ki + 0], hid_dim, hid1),
              "g2": init_gconv_params(keys[ki + 1], hid1, hid2),
              "g3": init_gconv_params(keys[ki + 2], hid2, hid2),
              "g4": init_gconv_params(keys[ki + 3], hid2, hid1),
              "g5": init_gconv_params(keys[ki + 4], hid1, hid_dim)}
        params["hourglass"].append(hg)
        params["conv"].append(init_linear_params(keys[ki + 5], hid_dim, hid_dim // num_layers))
        ki += 6
    return params


def _fold_gconv(p):
    # relu((A(xW)+b)*s + t) == relu(A(x(W*s)) + (b*s + t))
    w = p["w"] * p["bn_scale"][None, :]
    b = p["b"] * p["bn_scale"] + p["bn_shift"]
    return w, b


def fold_params(raw, adj_high_np, num_layers, batch):
    """Build the single-kernel operand set: BN/bias folded, pool/unpool as dense operators,
    the conv_l -> concat -> gconv_output tail fused into per-layer (hid x 3) matrices, and the
    batch folded into block-diagonal kron(I_B, W) weights so the whole batch runs in one pass."""
    adj_mid_np = adj_mx_from_edges(68, ADJ_MID_EDGES)
    adj_low_np = adj_mx_from_edges(34, ADJ_LOW_EDGES)
    p_high = pool_matrix(HIGH_GROUP, 133)
    p_mid = pool_matrix(MID_GROUP, 68)

    ops = {
        "adj": jnp.asarray(adj_high_np),
        "adj_mid": jnp.asarray(adj_mid_np),
        "a2": jnp.asarray(adj_mid_np @ p_high),
        "a3": jnp.asarray(adj_low_np @ p_mid),
        "u_low": jnp.asarray(unpool_matrix(INV_LOW, 34)),
        "u_mid": jnp.asarray(unpool_matrix(INV_MID, 68)),
    }

    w0, b0 = _fold_gconv(raw["gconv_input"])
    ops["w0"] = rep_block_diag(w0, batch)
    ops["b0"] = jnp.tile(b0, batch).reshape(1, -1)

    for name in ("1", "2", "3", "4", "5"):
        ws, bs = [], []
        for l in range(num_layers):
            w, b = _fold_gconv(raw["hourglass"][l]["g" + name])
            ws.append(rep_block_diag(w, batch))
            bs.append(jnp.tile(b, batch).reshape(1, -1))
        ops["w" + name + "s"] = jnp.stack(ws)     # (L, B*cin, B*cout)
        ops["b" + name + "s"] = jnp.stack(bs)     # (L, 1, B*cout)

    # Tail:  concat_l(out_l @ Wc_l + bc_l) @ Wout + bout
    #      == sum_l out_l @ (Wc_l @ Wout_slice_l) + (bout + sum_l bc_l @ Wout_slice_l)
    wout = raw["gconv_output"]["w"]               # (hid, 3)
    bout = raw["gconv_output"]["b"]               # (3,)
    c = wout.shape[0] // num_layers
    wts, bt = [], bout
    for l in range(num_layers):
        wslice = wout[l * c:(l + 1) * c, :]
        wts.append(rep_block_diag(raw["conv"][l]["w"] @ wslice, batch))
        bt = bt + raw["conv"][l]["b"] @ wslice
    ops["wt"] = jnp.stack(wts)                    # (L, B*hid, B*3)
    ops["bt"] = jnp.tile(bt, batch).reshape(1, -1)  # (1, B*3)
    return ops


# ------------------------------------------------------------------ plain-JAX reference (unfused)

def reference_forward(raw, adj_high, adj_mid, adj_low, x, num_layers):
    def gcn(adj, p, z):
        h = jnp.einsum("nm,bmc->bnc", adj, jnp.einsum("bnc,cd->bnd", z, p["w"])) + p["b"]
        h = h * p["bn_scale"] + p["bn_shift"]
        return jnp.maximum(h, 0.0)

    def pool(z):
        grp = HIGH_GROUP if z.shape[1] == 133 else MID_GROUP
        g = z[:, np.array(grp)]
        b, m, ch = g.shape
        return g.reshape(b, m // 2, 2, ch).mean(axis=2)

    def unpool(z):
        inv = INV_MID if z.shape[1] == 68 else INV_LOW
        return z[:, np.array(inv)]

    out = gcn(adj_high, raw["gconv_input"], x)
    fs = []
    for l in range(num_layers):
        hg = raw["hourglass"][l]
        skip1 = out
        skip2 = gcn(adj_high, hg["g1"], skip1)
        skip3 = gcn(adj_mid, hg["g2"], pool(skip2))
        o = gcn(adj_low, hg["g3"], pool(skip3))
        o = gcn(adj_mid, hg["g4"], unpool(o) + skip3)
        o = gcn(adj_high, hg["g5"], unpool(o) + skip2)
        out = o + skip1
        cl = raw["conv"][l]
        fs.append(jnp.einsum("bnc,cd->bnd", out, cl["w"]) + cl["b"])
    f_out = jnp.concatenate(fs, axis=2)
    go = raw["gconv_output"]
    return jnp.einsum("bnc,cd->bnd", f_out, go["w"]) + go["b"]


# ------------------------------------------------------------------ main

if __name__ == "__main__":
    B, N, HID, NUM_LAYERS = 2, 133, 16, 4
    key = jax.random.PRNGKey(0)
    k_param, k_x = jax.random.split(key)

    # 133-node skeleton adjacency (constructor argument) -- simple chain graph.
    adj_high_np = adj_mx_from_edges(N, [[i, i + 1] for i in range(N - 1)])

    raw_params = init_graphsh_params(k_param, HID, coords_dim=(2, 3), num_layers=NUM_LAYERS)
    ops = fold_params(raw_params, adj_high_np, NUM_LAYERS, B)

    x = jax.random.normal(k_x, (B, N, 2), jnp.float32)   # (batch, nodes, 2-D input coords)

    fwd = jax.jit(graph_sh_forward)
    outs = jax.block_until_ready(fwd(ops, x))

    expected = [(B, 23, 3), (B, 68, 3), (B, 21, 3), (B, 21, 3)]
    assert [tuple(o.shape) for o in outs] == expected, [o.shape for o in outs]
    assert all(bool(jnp.all(jnp.isfinite(o))) for o in outs)

    # Validate the fused (batch-folded, block-diagonal) kernel against the unfused reference.
    ref = reference_forward(raw_params, jnp.asarray(adj_high_np),
                            jnp.asarray(adj_mx_from_edges(68, ADJ_MID_EDGES)),
                            jnp.asarray(adj_mx_from_edges(34, ADJ_LOW_EDGES)),
                            x, NUM_LAYERS)
    fused_full = jnp.concatenate(outs, axis=1)
    max_err = float(jnp.max(jnp.abs(fused_full - ref)))
    assert jnp.allclose(fused_full, ref, rtol=1e-3, atol=1e-3), max_err

    print("KERNEL_OK")
</pallas_src>

<mosaic_0001>
module attributes {stable_mosaic.version = 11 : i64} {
  func.func @_graph_sh_fused_kernel(%arg0: i32, %arg1: memref<133x4xf32, #tpu.memory_space<vmem>>, %arg2: memref<133x133xf32, #tpu.memory_space<vmem>>, %arg3: memref<68x68xf32, #tpu.memory_space<vmem>>, %arg4: memref<68x133xf32, #tpu.memory_space<vmem>>, %arg5: memref<34x68xf32, #tpu.memory_space<vmem>>, %arg6: memref<68x34xf32, #tpu.memory_space<vmem>>, %arg7: memref<133x68xf32, #tpu.memory_space<vmem>>, %arg8: memref<4x32xf32, #tpu.memory_space<vmem>>, %arg9: memref<1x32xf32, #tpu.memory_space<vmem>>, %arg10: memref<4x32x48xf32, #tpu.memory_space<vmem>>, %arg11: memref<4x1x48xf32, #tpu.memory_space<vmem>>, %arg12: memref<4x48x64xf32, #tpu.memory_space<vmem>>, %arg13: memref<4x1x64xf32, #tpu.memory_space<vmem>>, %arg14: memref<4x64x64xf32, #tpu.memory_space<vmem>>, %arg15: memref<4x1x64xf32, #tpu.memory_space<vmem>>, %arg16: memref<4x64x48xf32, #tpu.memory_space<vmem>>, %arg17: memref<4x1x48xf32, #tpu.memory_space<vmem>>, %arg18: memref<4x48x32xf32, #tpu.memory_space<vmem>>, %arg19: memref<4x1x32xf32, #tpu.memory_space<vmem>>, %arg20: memref<4x32x6xf32, #tpu.memory_space<vmem>>, %arg21: memref<1x6xf32, #tpu.memory_space<vmem>>, %arg22: memref<133x6xf32, #tpu.memory_space<vmem>>) attributes {dimension_semantics = [#tpu.dimension_semantics<arbitrary>], iteration_bounds = array<i64: 1>, scalar_prefetch = 0 : i64, scratch_operands = 0 : i64, tpu.core_type = #tpu.core_type<tc>, window_params = [{pipeline_mode = #tpu.pipeline_mode<synchronous>, transform_indices = @transform_0, window_bounds = array<i64: 133, 4>}, {pipeline_mode = #tpu.pipeline_mode<synchronous>, transform_indices = @transform_1, window_bounds = array<i64: 133, 133>}, {pipeline_mode = #tpu.pipeline_mode<synchronous>, transform_indices = @transform_2, window_bounds = array<i64: 68, 68>}, {pipeline_mode = #tpu.pipeline_mode<synchronous>, transform_indices = @transform_3, window_bounds = array<i64: 68, 133>}, {pipeline_mode = #tpu.pipeline_mode<synchronous>, transform_indices = @transform_4, window_bounds = array<i64: 34, 68>}, {pipeline_mode = #tpu.pipeline_mode<synchronous>, transform_indices = @transform_5, window_bounds = array<i64: 68, 34>}, {pipeline_mode = #tpu.pipeline_mode<synchronous>, transform_indices = @transform_6, window_bounds = array<i64: 133, 68>}, {pipeline_mode = #tpu.pipeline_mode<synchronous>, transform_indices = @transform_7, window_bounds = array<i64: 4, 32>}, {pipeline_mode = #tpu.pipeline_mode<synchronous>, transform_indices = @transform_8, window_bounds = array<i64: 1, 32>}, {pipeline_mode = #tpu.pipeline_mode<synchronous>, transform_indices = @transform_9, window_bounds = array<i64: 4, 32, 48>}, {pipeline_mode = #tpu.pipeline_mode<synchronous>, transform_indices = @transform_10, window_bounds = array<i64: 4, 1, 48>}, {pipeline_mode = #tpu.pipeline_mode<synchronous>, transform_indices = @transform_11, window_bounds = array<i64: 4, 48, 64>}, {pipeline_mode = #tpu.pipeline_mode<synchronous>, transform_indices = @transform_12, window_bounds = array<i64: 4, 1, 64>}, {pipeline_mode = #tpu.pipeline_mode<synchronous>, transform_indices = @transform_13, window_bounds = array<i64: 4, 64, 64>}, {pipeline_mode = #tpu.pipeline_mode<synchronous>, transform_indices = @transform_14, window_bounds = array<i64: 4, 1, 64>}, {pipeline_mode = #tpu.pipeline_mode<synchronous>, transform_indices = @transform_15, window_bounds = array<i64: 4, 64, 48>}, {pipeline_mode = #tpu.pipeline_mode<synchronous>, transform_indices = @transform_16, window_bounds = array<i64: 4, 1, 48>}, {pipeline_mode = #tpu.pipeline_mode<synchronous>, transform_indices = @transform_17, window_bounds = array<i64: 4, 48, 32>}, {pipeline_mode = #tpu.pipeline_mode<synchronous>, transform_indices = @transform_18, window_bounds = array<i64: 4, 1, 32>}, {pipeline_mode = #tpu.pipeline_mode<synchronous>, transform_indices = @transform_19, window_bounds = array<i64: 4, 32, 6>}, {pipeline_mode = #tpu.pipeline_mode<synchronous>, transform_indices = @transform_20, window_bounds = array<i64: 1, 6>}, {pipeline_mode = #tpu.pipeline_mode<synchronous>, transform_indices = @transform_21, window_bounds = array<i64: 133, 6>}]} {
    %c0 = arith.constant 0 : index
    %c0_0 = arith.constant 0 : index
    %0 = vector.load %arg1[%c0, %c0_0] : memref<133x4xf32, #tpu.memory_space<vmem>>, vector<133x4xf32>
    %c0_1 = arith.constant 0 : index
    %c0_2 = arith.constant 0 : index
    %1 = vector.load %arg2[%c0_1, %c0_2] : memref<133x133xf32, #tpu.memory_space<vmem>>, vector<133x133xf32>
    %c0_3 = arith.constant 0 : index
    %c0_4 = arith.constant 0 : index
    %2 = vector.load %arg3[%c0_3, %c0_4] : memref<68x68xf32, #tpu.memory_space<vmem>>, vector<68x68xf32>
    %c0_5 = arith.constant 0 : index
    %c0_6 = arith.constant 0 : index
    %3 = vector.load %arg4[%c0_5, %c0_6] : memref<68x133xf32, #tpu.memory_space<vmem>>, vector<68x133xf32>
    %c0_7 = arith.constant 0 : index
    %c0_8 = arith.constant 0 : index
    %4 = vector.load %arg5[%c0_7, %c0_8] : memref<34x68xf32, #tpu.memory_space<vmem>>, vector<34x68xf32>
    %c0_9 = arith.constant 0 : index
    %c0_10 = arith.constant 0 : index
    %5 = vector.load %arg6[%c0_9, %c0_10] : memref<68x34xf32, #tpu.memory_space<vmem>>, vector<68x34xf32>
    %c0_11 = arith.constant 0 : index
    %c0_12 = arith.constant 0 : index
    %6 = vector.load %arg7[%c0_11, %c0_12] : memref<133x68xf32, #tpu.memory_space<vmem>>, vector<133x68xf32>
    %c0_13 = arith.constant 0 : index
    %c0_14 = arith.constant 0 : index
    %7 = vector.load %arg8[%c0_13, %c0_14] : memref<4x32xf32, #tpu.memory_space<vmem>>, vector<4x32xf32>
    %8 = vector.extract_strided_slice %0 {offsets = [0, 0], sizes = [133, 1], strides = [1, 1]} : vector<133x4xf32> to vector<133x1xf32>
    %9 = vector.extract_strided_slice %7 {offsets = [0, 0], sizes = [1, 32], strides = [1, 1]} : vector<4x32xf32> to vector<1x32xf32>
    %10 = vector.broadcast %8 : vector<133x1xf32> to vector<133x32xf32>
    %11 = vector.broadcast %9 : vector<1x32xf32> to vector<133x32xf32>
    %12 = arith.mulf %10, %11 : vector<133x32xf32>
    %13 = vector.extract_strided_slice %0 {offsets = [0, 1], sizes = [133, 1], strides = [1, 1]} : vector<133x4xf32> to vector<133x1xf32>
    %14 = vector.extract_strided_slice %7 {offsets = [1, 0], sizes = [1, 32], strides = [1, 1]} : vector<4x32xf32> to vector<1x32xf32>
    %15 = vector.broadcast %13 : vector<133x1xf32> to vector<133x32xf32>
    %16 = vector.broadcast %14 : vector<1x32xf32> to vector<133x32xf32>
    %17 = arith.mulf %15, %16 : vector<133x32xf32>
    %18 = arith.addf %12, %17 : vector<133x32xf32>
    %19 = vector.extract_strided_slice %0 {offsets = [0, 2], sizes = [133, 1], strides = [1, 1]} : vector<133x4xf32> to vector<133x1xf32>
    %20 = vector.extract_strided_slice %7 {offsets = [2, 0], sizes = [1, 32], strides = [1, 1]} : vector<4x32xf32> to vector<1x32xf32>
    %21 = vector.broadcast %19 : vector<133x1xf32> to vector<133x32xf32>
    %22 = vector.broadcast %20 : vector<1x32xf32> to vector<133x32xf32>
    %23 = arith.mulf %21, %22 : vector<133x32xf32>
    %24 = arith.addf %18, %23 : vector<133x32xf32>
    %25 = vector.extract_strided_slice %0 {offsets = [0, 3], sizes = [133, 1], strides = [1, 1]} : vector<133x4xf32> to vector<133x1xf32>
    %26 = vector.extract_strided_slice %7 {offsets = [3, 0], sizes = [1, 32], strides = [1, 1]} : vector<4x32xf32> to vector<1x32xf32>
    %27 = vector.broadcast %25 : vector<133x1xf32> to vector<133x32xf32>
    %28 = vector.broadcast %26 : vector<1x32xf32> to vector<133x32xf32>
    %29 = arith.mulf %27, %28 : vector<133x32xf32>
    %30 = arith.addf %24, %29 : vector<133x32xf32>
    %cst = arith.constant dense<0.000000e+00> : vector<133x32xf32>
    %31 = tpu.matmul %1, %30, %cst {dimension_numbers = #tpu.dot_dimension_numbers<[1], [0], [0], [1], [0, 0, 1, 1], [], []>} : vector<133x133xf32>, vector<133x32xf32>, vector<133x32xf32> -> vector<133x32xf32>
    %c0_15 = arith.constant 0 : index
    %c0_16 = arith.constant 0 : index
    %32 = vector.load %arg9[%c0_15, %c0_16] : memref<1x32xf32, #tpu.memory_space<vmem>>, vector<1x32xf32>
    %33 = vector.broadcast %32 : vector<1x32xf32> to vector<133x32xf32>
    %34 = arith.addf %31, %33 : vector<133x32xf32>
    %cst_17 = arith.constant 0.000000e+00 : f32
    %35 = vector.broadcast %cst_17 : f32 to vector<133x32xf32>
    %36 = arith.maximumf %34, %35 : vector<133x32xf32>
    %cst_18 = arith.constant 0.000000e+00 : f32
    %37 = vector.broadcast %cst_18 : f32 to vector<133x6xf32>
    %c0_19 = arith.constant 0 : index
    %c0_20 = arith.constant 0 : index
    %c0_21 = arith.constant 0 : index
    %38 = vector.load %arg10[%c0_19, %c0_20, %c0_21] : memref<4x32x48xf32, #tpu.memory_space<vmem>>, vector<1x32x48xf32>
    %39 = vector.shape_cast %38 : vector<1x32x48xf32> to vector<32x48xf32>
    %c0_22 = arith.constant 0 : index
    %c0_23 = arith.constant 0 : index
    %c0_24 = arith.constant 0 : index
    %40 = vector.load %arg11[%c0_22, %c0_23, %c0_24] : memref<4x1x48xf32, #tpu.memory_space<vmem>>, vector<1x1x48xf32>
    %41 = vector.shape_cast %40 : vector<1x1x48xf32> to vector<1x48xf32>
    %cst_25 = arith.constant dense<0.000000e+00> : vector<133x48xf32>
    %42 = tpu.matmul %36, %39, %cst_25 {dimension_numbers = #tpu.dot_dimension_numbers<[1], [0], [0], [1], [0, 0, 1, 1], [], []>} : vector<133x32xf32>, vector<32x48xf32>, vector<133x48xf32> -> vector<133x48xf32>
    %cst_26 = arith.constant dense<0.000000e+00> : vector<133x48xf32>
    %43 = tpu.matmul %1, %42, %cst_26 {dimension_numbers = #tpu.dot_dimension_numbers<[1], [0], [0], [1], [0, 0, 1, 1], [], []>} : vector<133x133xf32>, vector<133x48xf32>, vector<133x48xf32> -> vector<133x48xf32>
    %44 = vector.broadcast %41 : vector<1x48xf32> to vector<133x48xf32>
    %45 = arith.addf %43, %44 : vector<133x48xf32>
    %cst_27 = arith.constant 0.000000e+00 : f32
    %46 = vector.broadcast %cst_27 : f32 to vector<133x48xf32>
    %47 = arith.maximumf %45, %46 : vector<133x48xf32>
    %c0_28 = arith.constant 0 : index
    %c0_29 = arith.constant 0 : index
    %c0_30 = arith.constant 0 : index
    %48 = vector.load %arg12[%c0_28, %c0_29, %c0_30] : memref<4x48x64xf32, #tpu.memory_space<vmem>>, vector<1x48x64xf32>
    %49 = vector.shape_cast %48 : vector<1x48x64xf32> to vector<48x64xf32>
    %c0_31 = arith.constant 0 : index
    %c0_32 = arith.constant 0 : index
    %c0_33 = arith.constant 0 : index
    %50 = vector.load %arg13[%c0_31, %c0_32, %c0_33] : memref<4x1x64xf32, #tpu.memory_space<vmem>>, vector<1x1x64xf32>
    %51 = vector.shape_cast %50 : vector<1x1x64xf32> to vector<1x64xf32>
    %cst_34 = arith.constant dense<0.000000e+00> : vector<133x64xf32>
    %52 = tpu.matmul %47, %49, %cst_34 {dimension_numbers = #tpu.dot_dimension_numbers<[1], [0], [0], [1], [0, 0, 1, 1], [], []>} : vector<133x48xf32>, vector<48x64xf32>, vector<133x64xf32> -> vector<133x64xf32>
    %cst_35 = arith.constant dense<0.000000e+00> : vector<68x64xf32>
    %53 = tpu.matmul %3, %52, %cst_35 {dimension_numbers = #tpu.dot_dimension_numbers<[1], [0], [0], [1], [0, 0, 1, 1], [], []>} : vector<68x133xf32>, vector<133x64xf32>, vector<68x64xf32> -> vector<68x64xf32>
    %54 = vector.broadcast %51 : vector<1x64xf32> to vector<68x64xf32>
    %55 = arith.addf %53, %54 : vector<68x64xf32>
    %cst_36 = arith.constant 0.000000e+00 : f32
    %56 = vector.broadcast %cst_36 : f32 to vector<68x64xf32>
    %57 = arith.maximumf %55, %56 : vector<68x64xf32>
    %c0_37 = arith.constant 0 : index
    %c0_38 = arith.constant 0 : index
    %c0_39 = arith.constant 0 : index
    %58 = vector.load %arg14[%c0_37, %c0_38, %c0_39] : memref<4x64x64xf32, #tpu.memory_space<vmem>>, vector<1x64x64xf32>
    %59 = vector.shape_cast %58 : vector<1x64x64xf32> to vector<64x64xf32>
    %c0_40 = arith.constant 0 : index
    %c0_41 = arith.constant 0 : index
    %c0_42 = arith.constant 0 : index
    %60 = vector.load %arg15[%c0_40, %c0_41, %c0_42] : memref<4x1x64xf32, #tpu.memory_space<vmem>>, vector<1x1x64xf32>
    %61 = vector.shape_cast %60 : vector<1x1x64xf32> to vector<1x64xf32>
    %cst_43 = arith.constant dense<0.000000e+00> : vector<68x64xf32>
    %62 = tpu.matmul %57, %59, %cst_43 {dimension_numbers = #tpu.dot_dimension_numbers<[1], [0], [0], [1], [0, 0, 1, 1], [], []>} : vector<68x64xf32>, vector<64x64xf32>, vector<68x64xf32> -> vector<68x64xf32>
    %cst_44 = arith.constant dense<0.000000e+00> : vector<34x64xf32>
    %63 = tpu.matmul %4, %62, %cst_44 {dimension_numbers = #tpu.dot_dimension_numbers<[1], [0], [0], [1], [0, 0, 1, 1], [], []>} : vector<34x68xf32>, vector<68x64xf32>, vector<34x64xf32> -> vector<34x64xf32>
    %64 = vector.broadcast %61 : vector<1x64xf32> to vector<34x64xf32>
    %65 = arith.addf %63, %64 : vector<34x64xf32>
    %cst_45 = arith.constant 0.000000e+00 : f32
    %66 = vector.broadcast %cst_45 : f32 to vector<34x64xf32>
    %67 = arith.maximumf %65, %66 : vector<34x64xf32>
    %cst_46 = arith.constant dense<0.000000e+00> : vector<68x64xf32>
    %68 = tpu.matmul %5, %67, %cst_46 {dimension_numbers = #tpu.dot_dimension_numbers<[1], [0], [0], [1], [0, 0, 1, 1], [], []>} : vector<68x34xf32>, vector<34x64xf32>, vector<68x64xf32> -> vector<68x64xf32>
    %69 = arith.addf %68, %57 : vector<68x64xf32>
    %c0_47 = arith.constant 0 : index
    %c0_48 = arith.constant 0 : index
    %c0_49 = arith.constant 0 : index
    %70 = vector.load %arg16[%c0_47, %c0_48, %c0_49] : memref<4x64x48xf32, #tpu.memory_space<vmem>>, vector<1x64x48xf32>
    %71 = vector.shape_cast %70 : vector<1x64x48xf32> to vector<64x48xf32>
    %c0_50 = arith.constant 0 : index
    %c0_51 = arith.constant 0 : index
    %c0_52 = arith.constant 0 : index
    %72 = vector.load %arg17[%c0_50, %c0_51, %c0_52] : memref<4x1x48xf32, #tpu.memory_space<vmem>>, vector<1x1x48xf32>
    %73 = vector.shape_cast %72 : vector<1x1x48xf32> to vector<1x48xf32>
    %cst_53 = arith.constant dense<0.000000e+00> : vector<68x48xf32>
    %74 = tpu.matmul %69, %71, %cst_53 {dimension_numbers = #tpu.dot_dimension_numbers<[1], [0], [0], [1], [0, 0, 1, 1], [], []>} : vector<68x64xf32>, vector<64x48xf32>, vector<68x48xf32> -> vector<68x48xf32>
    %cst_54 = arith.constant dense<0.000000e+00> : vector<68x48xf32>
    %75 = tpu.matmul %2, %74, %cst_54 {dimension_numbers = #tpu.dot_dimension_numbers<[1], [0], [0], [1], [0, 0, 1, 1], [], []>} : vector<68x68xf32>, vector<68x48xf32>, vector<68x48xf32> -> vector<68x48xf32>
    %76 = vector.broadcast %73 : vector<1x48xf32> to vector<68x48xf32>
    %77 = arith.addf %75, %76 : vector<68x48xf32>
    %cst_55 = arith.constant 0.000000e+00 : f32
    %78 = vector.broadcast %cst_55 : f32 to vector<68x48xf32>
    %79 = arith.maximumf %77, %78 : vector<68x48xf32>
    %cst_56 = arith.constant dense<0.000000e+00> : vector<133x48xf32>
    %80 = tpu.matmul %6, %79, %cst_56 {dimension_numbers = #tpu.dot_dimension_numbers<[1], [0], [0], [1], [0, 0, 1, 1], [], []>} : vector<133x68xf32>, vector<68x48xf32>, vector<133x48xf32> -> vector<133x48xf32>
    %81 = arith.addf %80, %47 : vector<133x48xf32>
    %c0_57 = arith.constant 0 : index
    %c0_58 = arith.constant 0 : index
    %c0_59 = arith.constant 0 : index
    %82 = vector.load %arg18[%c0_57, %c0_58, %c0_59] : memref<4x48x32xf32, #tpu.memory_space<vmem>>, vector<1x48x32xf32>
    %83 = vector.shape_cast %82 : vector<1x48x32xf32> to vector<48x32xf32>
    %c0_60 = arith.constant 0 : index
    %c0_61 = arith.constant 0 : index
    %c0_62 = arith.constant 0 : index
    %84 = vector.load %arg19[%c0_60, %c0_61, %c0_62] : memref<4x1x32xf32, #tpu.memory_space<vmem>>, vector<1x1x32xf32>
    %85 = vector.shape_cast %84 : vector<1x1x32xf32> to vector<1x32xf32>
    %cst_63 = arith.constant dense<0.000000e+00> : vector<133x32xf32>
    %86 = tpu.matmul %81, %83, %cst_63 {dimension_numbers = #tpu.dot_dimension_numbers<[1], [0], [0], [1], [0, 0, 1, 1], [], []>} : vector<133x48xf32>, vector<48x32xf32>, vector<133x32xf32> -> vector<133x32xf32>
    %cst_64 = arith.constant dense<0.000000e+00> : vector<133x32xf32>
    %87 = tpu.matmul %1, %86, %cst_64 {dimension_numbers = #tpu.dot_dimension_numbers<[1], [0], [0], [1], [0, 0, 1, 1], [], []>} : vector<133x133xf32>, vector<133x32xf32>, vector<133x32xf32> -> vector<133x32xf32>
    %88 = vector.broadcast %85 : vector<1x32xf32> to vector<133x32xf32>
    %89 = arith.addf %87, %88 : vector<133x32xf32>
    %cst_65 = arith.constant 0.000000e+00 : f32
    %90 = vector.broadcast %cst_65 : f32 to vector<133x32xf32>
    %91 = arith.maximumf %89, %90 : vector<133x32xf32>
    %92 = arith.addf %91, %36 : vector<133x32xf32>
    %c0_66 = arith.constant 0 : index
    %c0_67 = arith.constant 0 : index
    %c0_68 = arith.constant 0 : index
    %93 = vector.load %arg20[%c0_66, %c0_67, %c0_68] : memref<4x32x6xf32, #tpu.memory_space<vmem>>, vector<1x32x6xf32>
    %94 = vector.shape_cast %93 : vector<1x32x6xf32> to vector<32x6xf32>
    %cst_69 = arith.constant dense<0.000000e+00> : vector<133x6xf32>
    %95 = tpu.matmul %92, %94, %cst_69 {dimension_numbers = #tpu.dot_dimension_numbers<[1], [0], [0], [1], [0, 0, 1, 1], [], []>} : vector<133x32xf32>, vector<32x6xf32>, vector<133x6xf32> -> vector<133x6xf32>
    %96 = arith.addf %37, %95 : vector<133x6xf32>
    %c1 = arith.constant 1 : index
    %c0_70 = arith.constant 0 : index
    %c0_71 = arith.constant 0 : index
    %97 = vector.load %arg10[%c1, %c0_70, %c0_71] : memref<4x32x48xf32, #tpu.memory_space<vmem>>, vector<1x32x48xf32>
    %98 = vector.shape_cast %97 : vector<1x32x48xf32> to vector<32x48xf32>
    %c1_72 = arith.constant 1 : index
    %c0_73 = arith.constant 0 : index
    %c0_74 = arith.constant 0 : index
    %99 = vector.load %arg11[%c1_72, %c0_73, %c0_74] : memref<4x1x48xf32, #tpu.memory_space<vmem>>, vector<1x1x48xf32>
    %100 = vector.shape_cast %99 : vector<1x1x48xf32> to vector<1x48xf32>
    %cst_75 = arith.constant dense<0.000000e+00> : vector<133x48xf32>
    %101 = tpu.matmul %92, %98, %cst_75 {dimension_numbers = #tpu.dot_dimension_numbers<[1], [0], [0], [1], [0, 0, 1, 1], [], []>} : vector<133x32xf32>, vector<32x48xf32>, vector<133x48xf32> -> vector<133x48xf32>
    %cst_76 = arith.constant dense<0.000000e+00> : vector<133x48xf32>
    %102 = tpu.matmul %1, %101, %cst_76 {dimension_numbers = #tpu.dot_dimension_numbers<[1], [0], [0], [1], [0, 0, 1, 1], [], []>} : vector<133x133xf32>, vector<133x48xf32>, vector<133x48xf32> -> vector<133x48xf32>
    %103 = vector.broadcast %100 : vector<1x48xf32> to vector<133x48xf32>
    %104 = arith.addf %102, %103 : vector<133x48xf32>
    %cst_77 = arith.constant 0.000000e+00 : f32
    %105 = vector.broadcast %cst_77 : f32 to vector<133x48xf32>
    %106 = arith.maximumf %104, %105 : vector<133x48xf32>
    %c1_78 = arith.constant 1 : index
    %c0_79 = arith.constant 0 : index
    %c0_80 = arith.constant 0 : index
    %107 = vector.load %arg12[%c1_78, %c0_79, %c0_80] : memref<4x48x64xf32, #tpu.memory_space<vmem>>, vector<1x48x64xf32>
    %108 = vector.shape_cast %107 : vector<1x48x64xf32> to vector<48x64xf32>
    %c1_81 = arith.constant 1 : index
    %c0_82 = arith.constant 0 : index
    %c0_83 = arith.constant 0 : index
    %109 = vector.load %arg13[%c1_81, %c0_82, %c0_83] : memref<4x1x64xf32, #tpu.memory_space<vmem>>, vector<1x1x64xf32>
    %110 = vector.shape_cast %109 : vector<1x1x64xf32> to vector<1x64xf32>
    %cst_84 = arith.constant dense<0.000000e+00> : vector<133x64xf32>
    %111 = tpu.matmul %106, %108, %cst_84 {dimension_numbers = #tpu.dot_dimension_numbers<[1], [0], [0], [1], [0, 0, 1, 1], [], []>} : vector<133x48xf32>, vector<48x64xf32>, vector<133x64xf32> -> vector<133x64xf32>
    %cst_85 = arith.constant dense<0.000000e+00> : vector<68x64xf32>
    %112 = tpu.matmul %3, %111, %cst_85 {dimension_numbers = #tpu.dot_dimension_numbers<[1], [0], [0], [1], [0, 0, 1, 1], [], []>} : vector<68x133xf32>, vector<133x64xf32>, vector<68x64xf32> -> vector<68x64xf32>
    %113 = vector.broadcast %110 : vector<1x64xf32> to vector<68x64xf32>
    %114 = arith.addf %112, %113 : vector<68x64xf32>
    %cst_86 = arith.constant 0.000000e+00 : f32
    %115 = vector.broadcast %cst_86 : f32 to vector<68x64xf32>
    %116 = arith.maximumf %114, %115 : vector<68x64xf32>
    %c1_87 = arith.constant 1 : index
    %c0_88 = arith.constant 0 : index
    %c0_89 = arith.constant 0 : index
    %117 = vector.load %arg14[%c1_87, %c0_88, %c0_89] : memref<4x64x64xf32, #tpu.memory_space<vmem>>, vector<1x64x64xf32>
    %118 = vector.shape_cast %117 : vector<1x64x64xf32> to vector<64x64xf32>
    %c1_90 = arith.constant 1 : index
    %c0_91 = arith.constant 0 : index
    %c0_92 = arith.constant 0 : index
    %119 = vector.load %arg15[%c1_90, %c0_91, %c0_92] : memref<4x1x64xf32, #tpu.memory_space<vmem>>, vector<1x1x64xf32>
    %120 = vector.shape_cast %119 : vector<1x1x64xf32> to vector<1x64xf32>
    %cst_93 = arith.constant dense<0.000000e+00> : vector<68x64xf32>
    %121 = tpu.matmul %116, %118, %cst_93 {dimension_numbers = #tpu.dot_dimension_numbers<[1], [0], [0], [1], [0, 0, 1, 1], [], []>} : vector<68x64xf32>, vector<64x64xf32>, vector<68x64xf32> -> vector<68x64xf32>
    %cst_94 = arith.constant dense<0.000000e+00> : vector<34x64xf32>
    %122 = tpu.matmul %4, %121, %cst_94 {dimension_numbers = #tpu.dot_dimension_numbers<[1], [0], [0], [1], [0, 0, 1, 1], [], []>} : vector<34x68xf32>, vector<68x64xf32>, vector<34x64xf32> -> vector<34x64xf32>
    %123 = vector.broadcast %120 : vector<1x64xf32> to vector<34x64xf32>
    %124 = arith.addf %122, %123 : vector<34x64xf32>
    %cst_95 = arith.constant 0.000000e+00 : f32
    %125 = vector.broadcast %cst_95 : f32 to vector<34x64xf32>
    %126 = arith.maximumf %124, %125 : vector<34x64xf32>
    %cst_96 = arith.constant dense<0.000000e+00> : vector<68x64xf32>
    %127 = tpu.matmul %5, %126, %cst_96 {dimension_numbers = #tpu.dot_dimension_numbers<[1], [0], [0], [1], [0, 0, 1, 1], [], []>} : vector<68x34xf32>, vector<34x64xf32>, vector<68x64xf32> -> vector<68x64xf32>
    %128 = arith.addf %127, %116 : vector<68x64xf32>
    %c1_97 = arith.constant 1 : index
    %c0_98 = arith.constant 0 : index
    %c0_99 = arith.constant 0 : index
    %129 = vector.load %arg16[%c1_97, %c0_98, %c0_99] : memref<4x64x48xf32, #tpu.memory_space<vmem>>, vector<1x64x48xf32>
    %130 = vector.shape_cast %129 : vector<1x64x48xf32> to vector<64x48xf32>
    %c1_100 = arith.constant 1 : index
    %c0_101 = arith.constant 0 : index
    %c0_102 = arith.constant 0 : index
    %131 = vector.load %arg17[%c1_100, %c0_101, %c0_102] : memref<4x1x48xf32, #tpu.memory_space<vmem>>, vector<1x1x48xf32>
    %132 = vector.shape_cast %131 : vector<1x1x48xf32> to vector<1x48xf32>
    %cst_103 = arith.constant dense<0.000000e+00> : vector<68x48xf32>
    %133 = tpu.matmul %128, %130, %cst_103 {dimension_numbers = #tpu.dot_dimension_numbers<[1], [0], [0], [1], [0, 0, 1, 1], [], []>} : vector<68x64xf32>, vector<64x48xf32>, vector<68x48xf32> -> vector<68x48xf32>
    %cst_104 = arith.constant dense<0.000000e+00> : vector<68x48xf32>
    %134 = tpu.matmul %2, %133, %cst_104 {dimension_numbers = #tpu.dot_dimension_numbers<[1], [0], [0], [1], [0, 0, 1, 1], [], []>} : vector<68x68xf32>, vector<68x48xf32>, vector<68x48xf32> -> vector<68x48xf32>
    %135 = vector.broadcast %132 : vector<1x48xf32> to vector<68x48xf32>
    %136 = arith.addf %134, %135 : vector<68x48xf32>
    %cst_105 = arith.constant 0.000000e+00 : f32
    %137 = vector.broadcast %cst_105 : f32 to vector<68x48xf32>
    %138 = arith.maximumf %136, %137 : vector<68x48xf32>
    %cst_106 = arith.constant dense<0.000000e+00> : vector<133x48xf32>
    %139 = tpu.matmul %6, %138, %cst_106 {dimension_numbers = #tpu.dot_dimension_numbers<[1], [0], [0], [1], [0, 0, 1, 1], [], []>} : vector<133x68xf32>, vector<68x48xf32>, vector<133x48xf32> -> vector<133x48xf32>
    %140 = arith.addf %139, %106 : vector<133x48xf32>
    %c1_107 = arith.constant 1 : index
    %c0_108 = arith.constant 0 : index
    %c0_109 = arith.constant 0 : index
    %141 = vector.load %arg18[%c1_107, %c0_108, %c0_109] : memref<4x48x32xf32, #tpu.memory_space<vmem>>, vector<1x48x32xf32>
    %142 = vector.shape_cast %141 : vector<1x48x32xf32> to vector<48x32xf32>
    %c1_110 = arith.constant 1 : index
    %c0_111 = arith.constant 0 : index
    %c0_112 = arith.constant 0 : index
    %143 = vector.load %arg19[%c1_110, %c0_111, %c0_112] : memref<4x1x32xf32, #tpu.memory_space<vmem>>, vector<1x1x32xf32>
    %144 = vector.shape_cast %143 : vector<1x1x32xf32> to vector<1x32xf32>
    %cst_113 = arith.constant dense<0.000000e+00> : vector<133x32xf32>
    %145 = tpu.matmul %140, %142, %cst_113 {dimension_numbers = #tpu.dot_dimension_numbers<[1], [0], [0], [1], [0, 0, 1, 1], [], []>} : vector<133x48xf32>, vector<48x32xf32>, vector<133x32xf32> -> vector<133x32xf32>
    %cst_114 = arith.constant dense<0.000000e+00> : vector<133x32xf32>
    %146 = tpu.matmul %1, %145, %cst_114 {dimension_numbers = #tpu.dot_dimension_numbers<[1], [0], [0], [1], [0, 0, 1, 1], [], []>} : vector<133x133xf32>, vector<133x32xf32>, vector<133x32xf32> -> vector<133x32xf32>
    %147 = vector.broadcast %144 : vector<1x32xf32> to vector<133x32xf32>
    %148 = arith.addf %146, %147 : vector<133x32xf32>
    %cst_115 = arith.constant 0.000000e+00 : f32
    %149 = vector.broadcast %cst_115 : f32 to vector<133x32xf32>
    %150 = arith.maximumf %148, %149 : vector<133x32xf32>
    %151 = arith.addf %150, %92 : vector<133x32xf32>
    %c1_116 = arith.constant 1 : index
    %c0_117 = arith.constant 0 : index
    %c0_118 = arith.constant 0 : index
    %152 = vector.load %arg20[%c1_116, %c0_117, %c0_118] : memref<4x32x6xf32, #tpu.memory_space<vmem>>, vector<1x32x6xf32>
    %153 = vector.shape_cast %152 : vector<1x32x6xf32> to vector<32x6xf32>
    %cst_119 = arith.constant dense<0.000000e+00> : vector<133x6xf32>
    %154 = tpu.matmul %151, %153, %cst_119 {dimension_numbers = #tpu.dot_dimension_numbers<[1], [0], [0], [1], [0, 0, 1, 1], [], []>} : vector<133x32xf32>, vector<32x6xf32>, vector<133x6xf32> -> vector<133x6xf32>
    %155 = arith.addf %96, %154 : vector<133x6xf32>
    %c2 = arith.constant 2 : index
    %c0_120 = arith.constant 0 : index
    %c0_121 = arith.constant 0 : index
    %156 = vector.load %arg10[%c2, %c0_120, %c0_121] : memref<4x32x48xf32, #tpu.memory_space<vmem>>, vector<1x32x48xf32>
    %157 = vector.shape_cast %156 : vector<1x32x48xf32> to vector<32x48xf32>
    %c2_122 = arith.constant 2 : index
    %c0_123 = arith.constant 0 : index
    %c0_124 = arith.constant 0 : index
    %158 = vector.load %arg11[%c2_122, %c0_123, %c0_124] : memref<4x1x48xf32, #tpu.memory_space<vmem>>, vector<1x1x48xf32>
    %159 = vector.shape_cast %158 : vector<1x1x48xf32> to vector<1x48xf32>
    %cst_125 = arith.constant dense<0.000000e+00> : vector<133x48xf32>
    %160 = tpu.matmul %151, %157, %cst_125 {dimension_numbers = #tpu.dot_dimension_numbers<[1], [0], [0], [1], [0, 0, 1, 1], [], []>} : vector<133x32xf32>, vector<32x48xf32>, vector<133x48xf32> -> vector<133x48xf32>
    %cst_126 = arith.constant dense<0.000000e+00> : vector<133x48xf32>
    %161 = tpu.matmul %1, %160, %cst_126 {dimension_numbers = #tpu.dot_dimension_numbers<[1], [0], [0], [1], [0, 0, 1, 1], [], []>} : vector<133x133xf32>, vector<133x48xf32>, vector<133x48xf32> -> vector<133x48xf32>
    %162 = vector.broadcast %159 : vector<1x48xf32> to vector<133x48xf32>
    %163 = arith.addf %161, %162 : vector<133x48xf32>
    %cst_127 = arith.constant 0.000000e+00 : f32
    %164 = vector.broadcast %cst_127 : f32 to vector<133x48xf32>
    %165 = arith.maximumf %163, %164 : vector<133x48xf32>
    %c2_128 = arith.constant 2 : index
    %c0_129 = arith.constant 0 : index
    %c0_130 = arith.constant 0 : index
    %166 = vector.load %arg12[%c2_128, %c0_129, %c0_130] : memref<4x48x64xf32, #tpu.memory_space<vmem>>, vector<1x48x64xf32>
    %167 = vector.shape_cast %166 : vector<1x48x64xf32> to vector<48x64xf32>
    %c2_131 = arith.constant 2 : index
    %c0_132 = arith.constant 0 : index
    %c0_133 = arith.constant 0 : index
    %168 = vector.load %arg13[%c2_131, %c0_132, %c0_133] : memref<4x1x64xf32, #tpu.memory_space<vmem>>, vector<1x1x64xf32>
    %169 = vector.shape_cast %168 : vector<1x1x64xf32> to vector<1x64xf32>
    %cst_134 = arith.constant dense<0.000000e+00> : vector<133x64xf32>
    %170 = tpu.matmul %165, %167, %cst_134 {dimension_numbers = #tpu.dot_dimension_numbers<[1], [0], [0], [1], [0, 0, 1, 1], [], []>} : vector<133x48xf32>, vector<48x64xf32>, vector<133x64xf32> -> vector<133x64xf32>
    %cst_135 = arith.constant dense<0.000000e+00> : vector<68x64xf32>
    %171 = tpu.matmul %3, %170, %cst_135 {dimension_numbers = #tpu.dot_dimension_numbers<[1], [0], [0], [1], [0, 0, 1, 1], [], []>} : vector<68x133xf32>, vector<133x64xf32>, vector<68x64xf32> -> vector<68x64xf32>
    %172 = vector.broadcast %169 : vector<1x64xf32> to vector<68x64xf32>
    %173 = arith.addf %171, %172 : vector<68x64xf32>
    %cst_136 = arith.constant 0.000000e+00 : f32
    %174 = vector.broadcast %cst_136 : f32 to vector<68x64xf32>
    %175 = arith.maximumf %173, %174 : vector<68x64xf32>
    %c2_137 = arith.constant 2 : index
    %c0_138 = arith.constant 0 : index
    %c0_139 = arith.constant 0 : index
    %176 = vector.load %arg14[%c2_137, %c0_138, %c0_139] : memref<4x64x64xf32, #tpu.memory_space<vmem>>, vector<1x64x64xf32>
    %177 = vector.shape_cast %176 : vector<1x64x64xf32> to vector<64x64xf32>
    %c2_140 = arith.constant 2 : index
    %c0_141 = arith.constant 0 : index
    %c0_142 = arith.constant 0 : index
    %178 = vector.load %arg15[%c2_140, %c0_141, %c0_142] : memref<4x1x64xf32, #tpu.memory_space<vmem>>, vector<1x1x64xf32>
    %179 = vector.shape_cast %178 : vector<1x1x64xf32> to vector<1x64xf32>
    %cst_143 = arith.constant dense<0.000000e+00> : vector<68x64xf32>
    %180 = tpu.matmul %175, %177, %cst_143 {dimension_numbers = #tpu.dot_dimension_numbers<[1], [0], [0], [1], [0, 0, 1, 1], [], []>} : vector<68x64xf32>, vector<64x64xf32>, vector<68x64xf32> -> vector<68x64xf32>
    %cst_144 = arith.constant dense<0.000000e+00> : vector<34x64xf32>
    %181 = tpu.matmul %4, %180, %cst_144 {dimension_numbers = #tpu.dot_dimension_numbers<[1], [0], [0], [1], [0, 0, 1, 1], [], []>} : vector<34x68xf32>, vector<68x64xf32>, vector<34x64xf32> -> vector<34x64xf32>
    %182 = vector.broadcast %179 : vector<1x64xf32> to vector<34x64xf32>
    %183 = arith.addf %181, %182 : vector<34x64xf32>
    %cst_145 = arith.constant 0.000000e+00 : f32
    %184 = vector.broadcast %cst_145 : f32 to vector<34x64xf32>
    %185 = arith.maximumf %183, %184 : vector<34x64xf32>
    %cst_146 = arith.constant dense<0.000000e+00> : vector<68x64xf32>
    %186 = tpu.matmul %5, %185, %cst_146 {dimension_numbers = #tpu.dot_dimension_numbers<[1], [0], [0], [1], [0, 0, 1, 1], [], []>} : vector<68x34xf32>, vector<34x64xf32>, vector<68x64xf32> -> vector<68x64xf32>
    %187 = arith.addf %186, %175 : vector<68x64xf32>
    %c2_147 = arith.constant 2 : index
    %c0_148 = arith.constant 0 : index
    %c0_149 = arith.constant 0 : index
    %188 = vector.load %arg16[%c2_147, %c0_148, %c0_149] : memref<4x64x48xf32, #tpu.memory_space<vmem>>, vector<1x64x48xf32>
    %189 = vector.shape_cast %188 : vector<1x64x48xf32> to vector<64x48xf32>
    %c2_150 = arith.constant 2 : index
    %c0_151 = arith.constant 0 : index
    %c0_152 = arith.constant 0 : index
    %190 = vector.load %arg17[%c2_150, %c0_151, %c0_152] : memref<4x1x48xf32, #tpu.memory_space<vmem>>, vector<1x1x48xf32>
    %191 = vector.shape_cast %190 : vector<1x1x48xf32> to vector<1x48xf32>
    %cst_153 = arith.constant dense<0.000000e+00> : vector<68x48xf32>
    %192 = tpu.matmul %187, %189, %cst_153 {dimension_numbers = #tpu.dot_dimension_numbers<[1], [0], [0], [1], [0, 0, 1, 1], [], []>} : vector<68x64xf32>, vector<64x48xf32>, vector<68x48xf32> -> vector<68x48xf32>
    %cst_154 = arith.constant dense<0.000000e+00> : vector<68x48xf32>
    %193 = tpu.matmul %2, %192, %cst_154 {dimension_numbers = #tpu.dot_dimension_numbers<[1], [0], [0], [1], [0, 0, 1, 1], [], []>} : vector<68x68xf32>, vector<68x48xf32>, vector<68x48xf32> -> vector<68x48xf32>
    %194 = vector.broadcast %191 : vector<1x48xf32> to vector<68x48xf32>
    %195 = arith.addf %193, %194 : vector<68x48xf32>
    %cst_155 = arith.constant 0.000000e+00 : f32
    %196 = vector.broadcast %cst_155 : f32 to vector<68x48xf32>
    %197 = arith.maximumf %195, %196 : vector<68x48xf32>
    %cst_156 = arith.constant dense<0.000000e+00> : vector<133x48xf32>
    %198 = tpu.matmul %6, %197, %cst_156 {dimension_numbers = #tpu.dot_dimension_numbers<[1], [0], [0], [1], [0, 0, 1, 1], [], []>} : vector<133x68xf32>, vector<68x48xf32>, vector<133x48xf32> -> vector<133x48xf32>
    %199 = arith.addf %198, %165 : vector<133x48xf32>
    %c2_157 = arith.constant 2 : index
    %c0_158 = arith.constant 0 : index
    %c0_159 = arith.constant 0 : index
    %200 = vector.load %arg18[%c2_157, %c0_158, %c0_159] : memref<4x48x32xf32, #tpu.memory_space<vmem>>, vector<1x48x32xf32>
    %201 = vector.shape_cast %200 : vector<1x48x32xf32> to vector<48x32xf32>
    %c2_160 = arith.constant 2 : index
    %c0_161 = arith.constant 0 : index
    %c0_162 = arith.constant 0 : index
    %202 = vector.load %arg19[%c2_160, %c0_161, %c0_162] : memref<4x1x32xf32, #tpu.memory_space<vmem>>, vector<1x1x32xf32>
    %203 = vector.shape_cast %202 : vector<1x1x32xf32> to vector<1x32xf32>
    %cst_163 = arith.constant dense<0.000000e+00> : vector<133x32xf32>
    %204 = tpu.matmul %199, %201, %cst_163 {dimension_numbers = #tpu.dot_dimension_numbers<[1], [0], [0], [1], [0, 0, 1, 1], [], []>} : vector<133x48xf32>, vector<48x32xf32>, vector<133x32xf32> -> vector<133x32xf32>
    %cst_164 = arith.constant dense<0.000000e+00> : vector<133x32xf32>
    %205 = tpu.matmul %1, %204, %cst_164 {dimension_numbers = #tpu.dot_dimension_numbers<[1], [0], [0], [1], [0, 0, 1, 1], [], []>} : vector<133x133xf32>, vector<133x32xf32>, vector<133x32xf32> -> vector<133x32xf32>
    %206 = vector.broadcast %203 : vector<1x32xf32> to vector<133x32xf32>
    %207 = arith.addf %205, %206 : vector<133x32xf32>
    %cst_165 = arith.constant 0.000000e+00 : f32
    %208 = vector.broadcast %cst_165 : f32 to vector<133x32xf32>
    %209 = arith.maximumf %207, %208 : vector<133x32xf32>
    %210 = arith.addf %209, %151 : vector<133x32xf32>
    %c2_166 = arith.constant 2 : index
    %c0_167 = arith.constant 0 : index
    %c0_168 = arith.constant 0 : index
    %211 = vector.load %arg20[%c2_166, %c0_167, %c0_168] : memref<4x32x6xf32, #tpu.memory_space<vmem>>, vector<1x32x6xf32>
    %212 = vector.shape_cast %211 : vector<1x32x6xf32> to vector<32x6xf32>
    %cst_169 = arith.constant dense<0.000000e+00> : vector<133x6xf32>
    %213 = tpu.matmul %210, %212, %cst_169 {dimension_numbers = #tpu.dot_dimension_numbers<[1], [0], [0], [1], [0, 0, 1, 1], [], []>} : vector<133x32xf32>, vector<32x6xf32>, vector<133x6xf32> -> vector<133x6xf32>
    %214 = arith.addf %155, %213 : vector<133x6xf32>
    %c3 = arith.constant 3 : index
    %c0_170 = arith.constant 0 : index
    %c0_171 = arith.constant 0 : index
    %215 = vector.load %arg10[%c3, %c0_170, %c0_171] : memref<4x32x48xf32, #tpu.memory_space<vmem>>, vector<1x32x48xf32>
    %216 = vector.shape_cast %215 : vector<1x32x48xf32> to vector<32x48xf32>
    %c3_172 = arith.constant 3 : index
    %c0_173 = arith.constant 0 : index
    %c0_174 = arith.constant 0 : index
    %217 = vector.load %arg11[%c3_172, %c0_173, %c0_174] : memref<4x1x48xf32, #tpu.memory_space<vmem>>, vector<1x1x48xf32>
    %218 = vector.shape_cast %217 : vector<1x1x48xf32> to vector<1x48xf32>
    %cst_175 = arith.constant dense<0.000000e+00> : vector<133x48xf32>
    %219 = tpu.matmul %210, %216, %cst_175 {dimension_numbers = #tpu.dot_dimension_numbers<[1], [0], [0], [1], [0, 0, 1, 1], [], []>} : vector<133x32xf32>, vector<32x48xf32>, vector<133x48xf32> -> vector<133x48xf32>
    %cst_176 = arith.constant dense<0.000000e+00> : vector<133x48xf32>
    %220 = tpu.matmul %1, %219, %cst_176 {dimension_numbers = #tpu.dot_dimension_numbers<[1], [0], [0], [1], [0, 0, 1, 1], [], []>} : vector<133x133xf32>, vector<133x48xf32>, vector<133x48xf32> -> vector<133x48xf32>
    %221 = vector.broadcast %218 : vector<1x48xf32> to vector<133x48xf32>
    %222 = arith.addf %220, %221 : vector<133x48xf32>
    %cst_177 = arith.constant 0.000000e+00 : f32
    %223 = vector.broadcast %cst_177 : f32 to vector<133x48xf32>
    %224 = arith.maximumf %222, %223 : vector<133x48xf32>
    %c3_178 = arith.constant 3 : index
    %c0_179 = arith.constant 0 : index
    %c0_180 = arith.constant 0 : index
    %225 = vector.load %arg12[%c3_178, %c0_179, %c0_180] : memref<4x48x64xf32, #tpu.memory_space<vmem>>, vector<1x48x64xf32>
    %226 = vector.shape_cast %225 : vector<1x48x64xf32> to vector<48x64xf32>
    %c3_181 = arith.constant 3 : index
    %c0_182 = arith.constant 0 : index
    %c0_183 = arith.constant 0 : index
    %227 = vector.load %arg13[%c3_181, %c0_182, %c0_183] : memref<4x1x64xf32, #tpu.memory_space<vmem>>, vector<1x1x64xf32>
    %228 = vector.shape_cast %227 : vector<1x1x64xf32> to vector<1x64xf32>
    %cst_184 = arith.constant dense<0.000000e+00> : vector<133x64xf32>
    %229 = tpu.matmul %224, %226, %cst_184 {dimension_numbers = #tpu.dot_dimension_numbers<[1], [0], [0], [1], [0, 0, 1, 1], [], []>} : vector<133x48xf32>, vector<48x64xf32>, vector<133x64xf32> -> vector<133x64xf32>
    %cst_185 = arith.constant dense<0.000000e+00> : vector<68x64xf32>
    %230 = tpu.matmul %3, %229, %cst_185 {dimension_numbers = #tpu.dot_dimension_numbers<[1], [0], [0], [1], [0, 0, 1, 1], [], []>} : vector<68x133xf32>, vector<133x64xf32>, vector<68x64xf32> -> vector<68x64xf32>
    %231 = vector.broadcast %228 : vector<1x64xf32> to vector<68x64xf32>
    %232 = arith.addf %230, %231 : vector<68x64xf32>
    %cst_186 = arith.constant 0.000000e+00 : f32
    %233 = vector.broadcast %cst_186 : f32 to vector<68x64xf32>
    %234 = arith.maximumf %232, %233 : vector<68x64xf32>
    %c3_187 = arith.constant 3 : index
    %c0_188 = arith.constant 0 : index
    %c0_189 = arith.constant 0 : index
    %235 = vector.load %arg14[%c3_187, %c0_188, %c0_189] : memref<4x64x64xf32, #tpu.memory_space<vmem>>, vector<1x64x64xf32>
    %236 = vector.shape_cast %235 : vector<1x64x64xf32> to vector<64x64xf32>
    %c3_190 = arith.constant 3 : index
    %c0_191 = arith.constant 0 : index
    %c0_192 = arith.constant 0 : index
    %237 = vector.load %arg15[%c3_190, %c0_191, %c0_192] : memref<4x1x64xf32, #tpu.memory_space<vmem>>, vector<1x1x64xf32>
    %238 = vector.shape_cast %237 : vector<1x1x64xf32> to vector<1x64xf32>
    %cst_193 = arith.constant dense<0.000000e+00> : vector<68x64xf32>
    %239 = tpu.matmul %234, %236, %cst_193 {dimension_numbers = #tpu.dot_dimension_numbers<[1], [0], [0], [1], [0, 0, 1, 1], [], []>} : vector<68x64xf32>, vector<64x64xf32>, vector<68x64xf32> -> vector<68x64xf32>
    %cst_194 = arith.constant dense<0.000000e+00> : vector<34x64xf32>
    %240 = tpu.matmul %4, %239, %cst_194 {dimension_numbers = #tpu.dot_dimension_numbers<[1], [0], [0], [1], [0, 0, 1, 1], [], []>} : vector<34x68xf32>, vector<68x64xf32>, vector<34x64xf32> -> vector<34x64xf32>
    %241 = vector.broadcast %238 : vector<1x64xf32> to vector<34x64xf32>
    %242 = arith.addf %240, %241 : vector<34x64xf32>
    %cst_195 = arith.constant 0.000000e+00 : f32
    %243 = vector.broadcast %cst_195 : f32 to vector<34x64xf32>
    %244 = arith.maximumf %242, %243 : vector<34x64xf32>
    %cst_196 = arith.constant dense<0.000000e+00> : vector<68x64xf32>
    %245 = tpu.matmul %5, %244, %cst_196 {dimension_numbers = #tpu.dot_dimension_numbers<[1], [0], [0], [1], [0, 0, 1, 1], [], []>} : vector<68x34xf32>, vector<34x64xf32>, vector<68x64xf32> -> vector<68x64xf32>
    %246 = arith.addf %245, %234 : vector<68x64xf32>
    %c3_197 = arith.constant 3 : index
    %c0_198 = arith.constant 0 : index
    %c0_199 = arith.constant 0 : index
    %247 = vector.load %arg16[%c3_197, %c0_198, %c0_199] : memref<4x64x48xf32, #tpu.memory_space<vmem>>, vector<1x64x48xf32>
    %248 = vector.shape_cast %247 : vector<1x64x48xf32> to vector<64x48xf32>
    %c3_200 = arith.constant 3 : index
    %c0_201 = arith.constant 0 : index
    %c0_202 = arith.constant 0 : index
    %249 = vector.load %arg17[%c3_200, %c0_201, %c0_202] : memref<4x1x48xf32, #tpu.memory_space<vmem>>, vector<1x1x48xf32>
    %250 = vector.shape_cast %249 : vector<1x1x48xf32> to vector<1x48xf32>
    %cst_203 = arith.constant dense<0.000000e+00> : vector<68x48xf32>
    %251 = tpu.matmul %246, %248, %cst_203 {dimension_numbers = #tpu.dot_dimension_numbers<[1], [0], [0], [1], [0, 0, 1, 1], [], []>} : vector<68x64xf32>, vector<64x48xf32>, vector<68x48xf32> -> vector<68x48xf32>
    %cst_204 = arith.constant dense<0.000000e+00> : vector<68x48xf32>
    %252 = tpu.matmul %2, %251, %cst_204 {dimension_numbers = #tpu.dot_dimension_numbers<[1], [0], [0], [1], [0, 0, 1, 1], [], []>} : vector<68x68xf32>, vector<68x48xf32>, vector<68x48xf32> -> vector<68x48xf32>
    %253 = vector.broadcast %250 : vector<1x48xf32> to vector<68x48xf32>
    %254 = arith.addf %252, %253 : vector<68x48xf32>
    %cst_205 = arith.constant 0.000000e+00 : f32
    %255 = vector.broadcast %cst_205 : f32 to vector<68x48xf32>
    %256 = arith.maximumf %254, %255 : vector<68x48xf32>
    %cst_206 = arith.constant dense<0.000000e+00> : vector<133x48xf32>
    %257 = tpu.matmul %6, %256, %cst_206 {dimension_numbers = #tpu.dot_dimension_numbers<[1], [0], [0], [1], [0, 0, 1, 1], [], []>} : vector<133x68xf32>, vector<68x48xf32>, vector<133x48xf32> -> vector<133x48xf32>
    %258 = arith.addf %257, %224 : vector<133x48xf32>
    %c3_207 = arith.constant 3 : index
    %c0_208 = arith.constant 0 : index
    %c0_209 = arith.constant 0 : index
    %259 = vector.load %arg18[%c3_207, %c0_208, %c0_209] : memref<4x48x32xf32, #tpu.memory_space<vmem>>, vector<1x48x32xf32>
    %260 = vector.shape_cast %259 : vector<1x48x32xf32> to vector<48x32xf32>
    %c3_210 = arith.constant 3 : index
    %c0_211 = arith.constant 0 : index
    %c0_212 = arith.constant 0 : index
    %261 = vector.load %arg19[%c3_210, %c0_211, %c0_212] : memref<4x1x32xf32, #tpu.memory_space<vmem>>, vector<1x1x32xf32>
    %262 = vector.shape_cast %261 : vector<1x1x32xf32> to vector<1x32xf32>
    %cst_213 = arith.constant dense<0.000000e+00> : vector<133x32xf32>
    %263 = tpu.matmul %258, %260, %cst_213 {dimension_numbers = #tpu.dot_dimension_numbers<[1], [0], [0], [1], [0, 0, 1, 1], [], []>} : vector<133x48xf32>, vector<48x32xf32>, vector<133x32xf32> -> vector<133x32xf32>
    %cst_214 = arith.constant dense<0.000000e+00> : vector<133x32xf32>
    %264 = tpu.matmul %1, %263, %cst_214 {dimension_numbers = #tpu.dot_dimension_numbers<[1], [0], [0], [1], [0, 0, 1, 1], [], []>} : vector<133x133xf32>, vector<133x32xf32>, vector<133x32xf32> -> vector<133x32xf32>
    %265 = vector.broadcast %262 : vector<1x32xf32> to vector<133x32xf32>
    %266 = arith.addf %264, %265 : vector<133x32xf32>
    %cst_215 = arith.constant 0.000000e+00 : f32
    %267 = vector.broadcast %cst_215 : f32 to vector<133x32xf32>
    %268 = arith.maximumf %266, %267 : vector<133x32xf32>
    %269 = arith.addf %268, %210 : vector<133x32xf32>
    %c3_216 = arith.constant 3 : index
    %c0_217 = arith.constant 0 : index
    %c0_218 = arith.constant 0 : index
    %270 = vector.load %arg20[%c3_216, %c0_217, %c0_218] : memref<4x32x6xf32, #tpu.memory_space<vmem>>, vector<1x32x6xf32>
    %271 = vector.shape_cast %270 : vector<1x32x6xf32> to vector<32x6xf32>
    %cst_219 = arith.constant dense<0.000000e+00> : vector<133x6xf32>
    %272 = tpu.matmul %269, %271, %cst_219 {dimension_numbers = #tpu.dot_dimension_numbers<[1], [0], [0], [1], [0, 0, 1, 1], [], []>} : vector<133x32xf32>, vector<32x6xf32>, vector<133x6xf32> -> vector<133x6xf32>
    %273 = arith.addf %214, %272 : vector<133x6xf32>
    %c0_220 = arith.constant 0 : index
    %c0_221 = arith.constant 0 : index
    %274 = vector.load %arg21[%c0_220, %c0_221] : memref<1x6xf32, #tpu.memory_space<vmem>>, vector<1x6xf32>
    %275 = vector.broadcast %274 : vector<1x6xf32> to vector<133x6xf32>
    %276 = arith.addf %273, %275 : vector<133x6xf32>
    %c0_222 = arith.constant 0 : index
    %c0_223 = arith.constant 0 : index
    %277 = vector.load %arg22[%c0_222, %c0_223] : memref<133x6xf32, #tpu.memory_space<vmem>>, vector<133x6xf32>
    tpu.vector_store %arg22[%c0_222, %c0_223], %276 {strides = array<i32>} : memref<133x6xf32, #tpu.memory_space<vmem>>, vector<133x6xf32>,
    return
  }
  func.func @transform_0(%arg0: i32) -> (i32, i32) {
    %c0_i32 = arith.constant 0 : i32
    %c0_i32_0 = arith.constant 0 : i32
    %c0_i32_1 = arith.constant 0 : i32
    return %c0_i32, %c0_i32_0 : i32, i32
  }
  func.func @transform_1(%arg0: i32) -> (i32, i32) {
    %c0_i32 = arith.constant 0 : i32
    %c0_i32_0 = arith.constant 0 : i32
    %c0_i32_1 = arith.constant 0 : i32
    return %c0_i32, %c0_i32_0 : i32, i32
  }
  func.func @transform_2(%arg0: i32) -> (i32, i32) {
    %c0_i32 = arith.constant 0 : i32
    %c0_i32_0 = arith.constant 0 : i32
    %c0_i32_1 = arith.constant 0 : i32
    return %c0_i32, %c0_i32_0 : i32, i32
  }
  func.func @transform_3(%arg0: i32) -> (i32, i32) {
    %c0_i32 = arith.constant 0 : i32
    %c0_i32_0 = arith.constant 0 : i32
    %c0_i32_1 = arith.constant 0 : i32
    return %c0_i32, %c0_i32_0 : i32, i32
  }
  func.func @transform_4(%arg0: i32) -> (i32, i32) {
    %c0_i32 = arith.constant 0 : i32
    %c0_i32_0 = arith.constant 0 : i32
    %c0_i32_1 = arith.constant 0 : i32
    return %c0_i32, %c0_i32_0 : i32, i32
  }
  func.func @transform_5(%arg0: i32) -> (i32, i32) {
    %c0_i32 = arith.constant 0 : i32
    %c0_i32_0 = arith.constant 0 : i32
    %c0_i32_1 = arith.constant 0 : i32
    return %c0_i32, %c0_i32_0 : i32, i32
  }
  func.func @transform_6(%arg0: i32) -> (i32, i32) {
    %c0_i32 = arith.constant 0 : i32
    %c0_i32_0 = arith.constant 0 : i32
    %c0_i32_1 = arith.constant 0 : i32
    return %c0_i32, %c0_i32_0 : i32, i32
  }
  func.func @transform_7(%arg0: i32) -> (i32, i32) {
    %c0_i32 = arith.constant 0 : i32
    %c0_i32_0 = arith.constant 0 : i32
    %c0_i32_1 = arith.constant 0 : i32
    return %c0_i32, %c0_i32_0 : i32, i32
  }
  func.func @transform_8(%arg0: i32) -> (i32, i32) {
    %c0_i32 = arith.constant 0 : i32
    %c0_i32_0 = arith.constant 0 : i32
    %c0_i32_1 = arith.constant 0 : i32
    return %c0_i32, %c0_i32_0 : i32, i32
  }
  func.func @transform_9(%arg0: i32) -> (i32, i32, i32) {
    %c0_i32 = arith.constant 0 : i32
    %c0_i32_0 = arith.constant 0 : i32
    %c0_i32_1 = arith.constant 0 : i32
    %c0_i32_2 = arith.constant 0 : i32
    return %c0_i32, %c0_i32_0, %c0_i32_1 : i32, i32, i32
  }
  func.func @transform_10(%arg0: i32) -> (i32, i32, i32) {
    %c0_i32 = arith.constant 0 : i32
    %c0_i32_0 = arith.constant 0 : i32
    %c0_i32_1 = arith.constant 0 : i32
    %c0_i32_2 = arith.constant 0 : i32
    return %c0_i32, %c0_i32_0, %c0_i32_1 : i32, i32, i32
  }
  func.func @transform_11(%arg0: i32) -> (i32, i32, i32) {
    %c0_i32 = arith.constant 0 : i32
    %c0_i32_0 = arith.constant 0 : i32
    %c0_i32_1 = arith.constant 0 : i32
    %c0_i32_2 = arith.constant 0 : i32
    return %c0_i32, %c0_i32_0, %c0_i32_1 : i32, i32, i32
  }
  func.func @transform_12(%arg0: i32) -> (i32, i32, i32) {
    %c0_i32 = arith.constant 0 : i32
    %c0_i32_0 = arith.constant 0 : i32
    %c0_i32_1 = arith.constant 0 : i32
    %c0_i32_2 = arith.constant 0 : i32
    return %c0_i32, %c0_i32_0, %c0_i32_1 : i32, i32, i32
  }
  func.func @transform_13(%arg0: i32) -> (i32, i32, i32) {
    %c0_i32 = arith.constant 0 : i32
    %c0_i32_0 = arith.constant 0 : i32
    %c0_i32_1 = arith.constant 0 : i32
    %c0_i32_2 = arith.constant 0 : i32
    return %c0_i32, %c0_i32_0, %c0_i32_1 : i32, i32, i32
  }
  func.func @transform_14(%arg0: i32) -> (i32, i32, i32) {
    %c0_i32 = arith.constant 0 : i32
    %c0_i32_0 = arith.constant 0 : i32
    %c0_i32_1 = arith.constant 0 : i32
    %c0_i32_2 = arith.constant 0 : i32
    return %c0_i32, %c0_i32_0, %c0_i32_1 : i32, i32, i32
  }
  func.func @transform_15(%arg0: i32) -> (i32, i32, i32) {
    %c0_i32 = arith.constant 0 : i32
    %c0_i32_0 = arith.constant 0 : i32
    %c0_i32_1 = arith.constant 0 : i32
    %c0_i32_2 = arith.constant 0 : i32
    return %c0_i32, %c0_i32_0, %c0_i32_1 : i32, i32, i32
  }
  func.func @transform_16(%arg0: i32) -> (i32, i32, i32) {
    %c0_i32 = arith.constant 0 : i32
    %c0_i32_0 = arith.constant 0 : i32
    %c0_i32_1 = arith.constant 0 : i32
    %c0_i32_2 = arith.constant 0 : i32
    return %c0_i32, %c0_i32_0, %c0_i32_1 : i32, i32, i32
  }
  func.func @transform_17(%arg0: i32) -> (i32, i32, i32) {
    %c0_i32 = arith.constant 0 : i32
    %c0_i32_0 = arith.constant 0 : i32
    %c0_i32_1 = arith.constant 0 : i32
    %c0_i32_2 = arith.constant 0 : i32
    return %c0_i32, %c0_i32_0, %c0_i32_1 : i32, i32, i32
  }
  func.func @transform_18(%arg0: i32) -> (i32, i32, i32) {
    %c0_i32 = arith.constant 0 : i32
    %c0_i32_0 = arith.constant 0 : i32
    %c0_i32_1 = arith.constant 0 : i32
    %c0_i32_2 = arith.constant 0 : i32
    return %c0_i32, %c0_i32_0, %c0_i32_1 : i32, i32, i32
  }
  func.func @transform_19(%arg0: i32) -> (i32, i32, i32) {
    %c0_i32 = arith.constant 0 : i32
    %c0_i32_0 = arith.constant 0 : i32
    %c0_i32_1 = arith.constant 0 : i32
    %c0_i32_2 = arith.constant 0 : i32
    return %c0_i32, %c0_i32_0, %c0_i32_1 : i32, i32, i32
  }
  func.func @transform_20(%arg0: i32) -> (i32, i32) {
    %c0_i32 = arith.constant 0 : i32
    %c0_i32_0 = arith.constant 0 : i32
    %c0_i32_1 = arith.constant 0 : i32
    return %c0_i32, %c0_i32_0 : i32, i32
  }
  func.func @transform_21(%arg0: i32) -> (i32, i32) {
    %c0_i32 = arith.constant 0 : i32
    %c0_i32_0 = arith.constant 0 : i32
    %c0_i32_1 = arith.constant 0 : i32
    return %c0_i32, %c0_i32_0 : i32, i32
  }
}

</mosaic_0001>

<bundles_post_ra>
// kernel: graph_sh_forward.1
= control target key start
LH: loop header
LB: loop body
LE: loop exit
PB: predicated region body
PF: predicated region fallthrough
CT: control target
= control target key end

     0   :  { %s20440_s0 = inlined_call_operand.vmem [shape: f32[133,4], index: 0, kind: input, shape index: {}]   ;;  %s20441_s1 = inlined_call_operand.vmem [shape: f32[133,133], index: 1, kind: input, shape index: {}]   ;;  %s20442_s2 = inlined_call_operand.hbm [shape: f32[68,68], index: 2, kind: input, shape index: {}]   ;;  %s20443_s3 = inlined_call_operand.vmem [shape: f32[68,133], index: 3, kind: input, shape index: {}]   ;;  %s20444_s4 = inlined_call_operand.hbm [shape: f32[34,68], index: 4, kind: input, shape index: {}]   ;;  %s20445_s5 = inlined_call_operand.vmem [shape: f32[68,34], index: 5, kind: input, shape index: {}]   ;;  %s20446_s6 = inlined_call_operand.vmem [shape: f32[133,68], index: 6, kind: input, shape index: {}]   ;;  %s20447_s7 = inlined_call_operand.vmem [shape: f32[4,32], index: 7, kind: input, shape index: {}]   ;;  %s20448_s8 = inlined_call_operand.vmem [shape: f32[1,32], index: 8, kind: input, shape index: {}]   ;;  %s20449_s9 = inlined_call_operand.vmem [shape: f32[4,32,48], index: 9, kind: input, shape index: {}]   ;;  %s20450_s10 = inlined_call_operand.vmem [shape: f32[4,1,48], index: 10, kind: input, shape index: {}]   ;;  %s20451_s11 = inlined_call_operand.vmem [shape: f32[4,48,64], index: 11, kind: input, shape index: {}]   ;;  %s20452_s12 = inlined_call_operand.hbm [shape: f32[4,1,64], index: 12, kind: input, shape index: {}]   ;;  %s20453_s13 = inlined_call_operand.vmem [shape: f32[4,64,64], index: 13, kind: input, shape index: {}]   ;;  %s20454_s14 = inlined_call_operand.hbm [shape: f32[4,1,64], index: 14, kind: input, shape index: {}]   ;;  %s20455_s15 = inlined_call_operand.vmem [shape: f32[4,64,48], index: 15, kind: input, shape index: {}]   ;;  %s20456_s16 = inlined_call_operand.hbm [shape: f32[4,1,48], index: 16, kind: input, shape index: {}]   ;;  %s20457_s17 = inlined_call_operand.vmem [shape: f32[4,48,32], index: 17, kind: input, shape index: {}]   ;;  %s20458_s18 = inlined_call_operand.hbm [shape: f32[4,1,32], index: 18, kind: input, shape index: {}]   ;;  %s20459_s19 = inlined_call_operand.vmem [shape: f32[4,32,6], index: 19, kind: input, shape index: {}]   ;;  %s20460_s20 = inlined_call_operand.hbm [shape: f32[1,6], index: 20, kind: input, shape index: {}]   ;;  %s20461_s21 = inlined_call_operand.vmem [shape: f32[133,6], index: 21, kind: output, shape index: {}]  }
   0x1   :  { %20631 = sst [smem:[#allocation39_spill]] %s20440_s0 }
   0x2   :  { %20632 = sst [smem:[#allocation40_spill]] %s20441_s1 }
   0x3   :  { %20633 = sst [smem:[#allocation41_spill]] %s20442_s2 }
   0x4   :  { %20634 = sst [smem:[#allocation42_spill]] %s20443_s3 }
   0x5   :  { %20635 = sst [smem:[#allocation43_spill]] %s20444_s4 }
   0x6   :  { %20636 = sst [smem:[#allocation44_spill]] %s20445_s5 }
   0x7   :  { %20637 = sst [smem:[#allocation45_spill]] %s20459_s19 }
   0x8   :  { %20638 = sst [smem:[#allocation46_spill]] %s20461_s21 }
   0x9   :  { %26 = vsyncpa [#allocation3], 0 }
   0xa   :  { %27 = vsyncpa [#allocation5], 0 }
   0xb   :  { %28 = vsyncpa [#allocation8], 0 }
   0xc   :  { %29 = vsyncpa [#allocation11], 0  ;;  %s14430_s2 = smov [#allocation4]   ;;  %s20639_s3 = sld [smem:[#allocation43_spill]] }
   0xd   :  { %s53_s25 = sshll.u32 %s14430_s2, 4  ;;  %s54_s25 = int_to_ptr.vmem [resolvable:$true] %s53_s25 }
  0x12   :  { %s14268_s28 = scalar_lea.hbm %s20639_s3, 640 }
  0x13   :  { %p14269_p0 = scmp.ne.s32.totalorder %s20639_s3, %s14268_s28  ;;  %p14272_p1 = scmp.lt.u32.totalorder %s14268_s28, %s20639_s3 }
  0x15   :  { %p14274_p2 = pnand %p14272_p1, %p14269_p0 }
  0x17   :  { %14277 = shalt.err (!%p14274_p2)
}
  0x18   :  { %s14278_s5 = scalar_lea.vmem %s54_s25, 640  ;;  %p14283_p4 = scmp.lt.s32.totalorder %s54_s25, %s54_s25 }
  0x19   :  { %p14279_p3 = scmp.ne.s32.totalorder %s54_s25, %s14278_s5  ;;  %p14284_p5 = scmp.lt.s32.totalorder %s14278_s5, %s14278_s5 }
  0x1b   :  { %p14285_p6 = por %p14284_p5, %p14283_p4 }
  0x1d   :  { %p14286_p7 = pnand %p14285_p6, %p14279_p3 }
  0x1f   :  { %14289 = shalt.err (!%p14286_p7)
}
  0x20   :  { %s20470_s22 = smov 128   ;;  %s14432_s23 = smov 8  }
  0x21   :  { %59 = dma.hbm_to_vmem [thread:$0]  %s20639_s3, 640, %s54_s25, [#allocation5], %s20470_s22, %s20470_s22, %s14432_s23  }
  0x22   :  { %s14433_s2 = smov [#allocation7]   ;;  %s14434_s27 = smov [#allocation10]  }
  0x23   :  { %s93_s26 = sshll.u32 %s14433_s2, 4  ;;  %s121_s28 = sshll.u32 %s14434_s27, 4  ;;  %s94_s26 = int_to_ptr.vmem [resolvable:$true] %s93_s26  ;;  %s122_s28 = int_to_ptr.vmem [resolvable:$true] %s121_s28 }
  0x24   :  { %s14290_s4 = scalar_lea.hbm %s20454_s14, 64 }
  0x25   :  { %p14291_p8 = scmp.ne.s32.totalorder %s20454_s14, %s14290_s4  ;;  %p14294_p9 = scmp.lt.u32.totalorder %s14290_s4, %s20454_s14 }
  0x27   :  { %p14296_p10 = pnand %p14294_p9, %p14291_p8 }
  0x29   :  { %14299 = shalt.err (!%p14296_p10)
}
  0x2a   :  { %s14300_s25 = scalar_lea.vmem %s94_s26, 64  ;;  %p14305_p12 = scmp.lt.s32.totalorder %s94_s26, %s94_s26 }
  0x2b   :  { %p14301_p11 = scmp.ne.s32.totalorder %s94_s26, %s14300_s25  ;;  %p14306_p13 = scmp.lt.s32.totalorder %s14300_s25, %s14300_s25 }
  0x2d   :  { %p14307_p0 = por %p14306_p13, %p14305_p12 }
  0x2f   :  { %p14308_p1 = pnand %p14307_p0, %p14301_p11 }
  0x31   :  { %14311 = shalt.err (!%p14308_p1)
}
  0x32   :  { %s14435_s3 = smov 16   ;;  %s14436_s1 = smov 1  }
  0x33   :  { %99 = dma.hbm_to_vmem [thread:$0]  %s20454_s14, 64, %s94_s26, [#allocation8], %s14435_s3, %s14435_s3, %s14436_s1  }
  0x34   :  { %s14312_s27 = scalar_lea.hbm %s20458_s18, 64 }
  0x35   :  { %p14313_p2 = scmp.ne.s32.totalorder %s20458_s18, %s14312_s27  ;;  %p14316_p3 = scmp.lt.u32.totalorder %s14312_s27, %s20458_s18 }
  0x37   :  { %p14318_p4 = pnand %p14316_p3, %p14313_p2 }
  0x39   :  { %14321 = shalt.err (!%p14318_p4)
}
  0x3a   :  { %s14322_s5 = scalar_lea.vmem %s122_s28, 64  ;;  %p14327_p6 = scmp.lt.s32.totalorder %s122_s28, %s122_s28 }
  0x3b   :  { %p14323_p5 = scmp.ne.s32.totalorder %s122_s28, %s14322_s5  ;;  %p14328_p7 = scmp.lt.s32.totalorder %s14322_s5, %s14322_s5 }
  0x3d   :  { %p14329_p8 = por %p14328_p7, %p14327_p6 }
  0x3f   :  { %p14330_p9 = pnand %p14329_p8, %p14323_p5 }
  0x41   :  { %14333 = shalt.err (!%p14330_p9)
}
  0x42   :  { %127 = dma.hbm_to_vmem [thread:$0]  %s20458_s18, 64, %s122_s28, [#allocation11], %s14435_s3, %s14435_s3, %s14436_s1  }
  0x43   :  { %s14437_s25 = smov [#allocation2]   ;;  %s14438_s2 = smov [#allocation6]  }
  0x44   :  { %s39_s24 = sshll.u32 %s14437_s25, 4  ;;  %s79_s19 = sshll.u32 %s14438_s2, 4  ;;  %s40_s24 = int_to_ptr.vmem [resolvable:$true] %s39_s24  ;;  %s80_s19 = int_to_ptr.vmem [resolvable:$true] %s79_s19 }
  0x45   :  { %s20640_s29 = sld [smem:[#allocation41_spill]] }
  0x4b   :  { %s14334_s0 = scalar_lea.hbm %s20640_s29, 1152 }
  0x4c   :  { %p14335_p10 = scmp.ne.s32.totalorder %s20640_s29, %s14334_s0  ;;  %p14338_p11 = scmp.lt.u32.totalorder %s14334_s0, %s20640_s29 }
  0x4e   :  { %p14340_p12 = pnand %p14338_p11, %p14335_p10 }
  0x50   :  { %14343 = shalt.err (!%p14340_p12)
}
  0x51   :  { %s14344_s18 = scalar_lea.vmem %s40_s24, 1152  ;;  %p14349_p0 = scmp.lt.s32.totalorder %s40_s24, %s40_s24 }
  0x52   :  { %p14345_p13 = scmp.ne.s32.totalorder %s40_s24, %s14344_s18  ;;  %p14350_p1 = scmp.lt.s32.totalorder %s14344_s18, %s14344_s18 }
  0x54   :  { %p14351_p2 = por %p14350_p1, %p14349_p0 }
  0x56   :  { %p14352_p3 = pnand %p14351_p2, %p14345_p13 }
  0x58   :  { %14355 = shalt.err (!%p14352_p3)
}
  0x59   :  { %s20641_s28 = smov 128   ;;  %s14356_s2 = scalar_lea.hbm %s20452_s12, 64 }
  0x5a   :  { %45 = dma.hbm_to_vmem [thread:$0]  %s20640_s29, 1152, %s40_s24, [#allocation3], %s20641_s28, %s20641_s28, %s14432_s23  }
  0x5b   :  { %p14357_p4 = scmp.ne.s32.totalorder %s20452_s12, %s14356_s2  ;;  %p14360_p5 = scmp.lt.u32.totalorder %s14356_s2, %s20452_s12 }
  0x5d   :  { %p14362_p6 = pnand %p14360_p5, %p14357_p4 }
  0x5f   :  { %14365 = shalt.err (!%p14362_p6)
}
  0x60   :  { %s14366_s30 = scalar_lea.vmem %s80_s19, 64  ;;  %p14371_p8 = scmp.lt.s32.totalorder %s80_s19, %s80_s19 }
  0x61   :  { %p14367_p7 = scmp.ne.s32.totalorder %s80_s19, %s14366_s30  ;;  %p14372_p9 = scmp.lt.s32.totalorder %s14366_s30, %s14366_s30 }
  0x63   :  { %p14373_p10 = por %p14372_p9, %p14371_p8 }
  0x65   :  { %p14374_p11 = pnand %p14373_p10, %p14367_p7 }
  0x67   :  { %14377 = shalt.err (!%p14374_p11)
}
  0x68   :  { %85 = dma.hbm_to_vmem [thread:$0]  %s20452_s12, 64, %s80_s19, [#allocation5], %s14435_s3, %s14435_s3, %s14436_s1  }
  0x69   :  { %s14439_s29 = smov [#allocation9]   ;;  %s14440_s18 = smov [#allocation12]  }
  0x6a   :  { %s107_s5 = sshll.u32 %s14439_s29, 4  ;;  %s136_s28 = sshll.u32 %s14440_s18, 4  ;;  %s108_s5 = int_to_ptr.vmem [resolvable:$true] %s107_s5  ;;  %s137_s28 = int_to_ptr.vmem [resolvable:$true] %s136_s28 }
  0x6b   :  { %s14378_s25 = scalar_lea.hbm %s20456_s16, 64 }
  0x6c   :  { %p14379_p12 = scmp.ne.s32.totalorder %s20456_s16, %s14378_s25  ;;  %p14382_p13 = scmp.lt.u32.totalorder %s14378_s25, %s20456_s16 }
  0x6e   :  { %p14384_p0 = pnand %p14382_p13, %p14379_p12 }
  0x70   :  { %14387 = shalt.err (!%p14384_p0)
}
  0x71   :  { %s14388_s12 = scalar_lea.vmem %s108_s5, 64  ;;  %p14393_p2 = scmp.lt.s32.totalorder %s108_s5, %s108_s5 }
  0x72   :  { %p14389_p1 = scmp.ne.s32.totalorder %s108_s5, %s14388_s12  ;;  %p14394_p3 = scmp.lt.s32.totalorder %s14388_s12, %s14388_s12 }
  0x74   :  { %p14395_p4 = por %p14394_p3, %p14393_p2 }
  0x76   :  { %p14396_p5 = pnand %p14395_p4, %p14389_p1 }
  0x78   :  { %14399 = shalt.err (!%p14396_p5)
}
  0x79   :  { %113 = dma.hbm_to_vmem [thread:$0]  %s20456_s16, 64, %s108_s5, [#allocation8], %s14435_s3, %s14435_s3, %s14436_s1  }
  0x7a   :  { %s14400_s23 = scalar_lea.hbm %s20460_s20, 16 }
  0x7b   :  { %p14401_p6 = scmp.ne.s32.totalorder %s20460_s20, %s14400_s23  ;;  %p14404_p7 = scmp.lt.u32.totalorder %s14400_s23, %s20460_s20 }
  0x7d   :  { %p14406_p8 = pnand %p14404_p7, %p14401_p6 }
  0x7f   :  { %14409 = shalt.err (!%p14406_p8)
}
  0x80   :  { %s14410_s26 = scalar_lea.vmem %s137_s28, 16  ;;  %s14414_s25 = scalar_lea.vmem %s137_s28, 32 }
  0x81   :  { %p14411_p9 = scmp.ne.s32.totalorder %s137_s28, %s14410_s26  ;;  %p14415_p10 = scmp.lt.s32.totalorder %s137_s28, %s137_s28 }
  0x82   :  { %p14416_p11 = scmp.lt.s32.totalorder %s14414_s25, %s14410_s26 }
  0x84   :  { %p14417_p12 = por %p14416_p11, %p14415_p10 }
  0x86   :  { %p14418_p13 = pnand %p14417_p12, %p14411_p9 }
  0x88   :  { %14421 = shalt.err (!%p14418_p13)
}
  0x89   :  { %139 = dma.hbm_to_vmem [thread:$0]  %s20460_s20, 16, %s137_s28, [#allocation11]  }
  0x8a   :  { %14422 = dma.done.wait [#allocation3], 1152  }
  0x8b   :  { %14423 = vsyncadd [#allocation3], 4294966144 }
  0x8c   :  { %14424 = dma.done.wait [#allocation5], 704  }
  0x8d   :  { %14425 = vsyncadd [#allocation5], 4294966592 }
  0x8e   :  { %14426 = dma.done.wait [#allocation8], 128  }
  0x8f   :  { %14427 = vsyncadd [#allocation8], 4294967168 }
  0x90   :  { %14428 = dma.done.wait [#allocation11], 80  }
  0x91   :  { %14429 = vsyncadd [#allocation11], 4294967216  ;;  %v14441_v0 = vmov 1   ;;  %v14442_v1 = vmov 0   ;;  %s20642_s22 = sld [smem:[#allocation39_spill]]  ;;  %v14443_v5 = vmov 2   ;;  %v356_v41 = vlaneseq }
  0x92   :  { %13920 = vset.pattern.permute.xlu1 %v14441_v0  ;;  %13919 = vset.pattern.permute.xlu0 %v14442_v1  ;;  %v14444_v12 = vmov 3   ;;  %v20517_v16 = vmov 0.0|0.0   ;;  %v270_v49 = vld [vmem:[%s20447_s7] sm:$0xf]  ;;  %s20643_s18 = sld [smem:[#allocation40_spill]]  ;;  %vm702_vm0 = vcmask 39936  }
  0x93   :  { %13187 = vmatprep.subr.bf16.mxu0 %v20517_v16  ;;  %13211 = vmatprep.subr.bf16.mxu1 %v20517_v16  ;;  %v357_v44 = vshrl.u32 %v356_v41, 7  ;;  %vm754_vm1 = vcmask 1044480   ;;  %vm14447_vm2 = vmmov 0   ;;  %vm930_vm3 = vcmask 261120   ;;  %s20647_s16 = sld [smem:[#allocation42_spill]]  ;;  %s20648_s26 = sld [smem:[#allocation44_spill]] }
  0x94   :  { %vm1315_vm4 = vcmask 392192   ;;  %vm1681_vm5 = vcmask 523264   ;;  %vm1841_vm6 = vcmask 1043456   ;;  %vm1825_vm7 = vcmask 556032   ;;  %s20723_s29 = sld [smem:[#allocation45_spill]]  ;;  %s20853_s2 = sld [smem:[#allocation46_spill]] }
  0x95   :  { %v447_v47 = vsub.s32 1, %v357_v44  ;;  %v358_v48 = vsub.s32 0, %v357_v44  ;;  %v553_v50 = vsub.s32 2, %v357_v44  ;;  %v659_v52 = vsub.s32 3, %v357_v44 }
  0x96   :  { %vm1968_vm8 = vcmask 1041408   ;;  %vm1940_vm9 = vcmask 277504   ;;  %vm9473_vm10 = vcmask 48128   ;;  %vm9490_vm11 = vcmask 45056  }
  0x97   :  { %v161_v2 = vld [vmem:[%s20642_s22] sm:$0xff]  ;;  %v162_v3 = vld [vmem:[%s20642_s22 + $0x8] sm:$0xff]  ;;  %v164_v4 = vld [vmem:[%s20642_s22 + $0x18] sm:$0xff]  ;;  %v14812_v53 = vrot.slane %v270_v49, %v447_v47  ;;  %v14814_v54 = vrot.slane %v270_v49, %v358_v48  ;;  %v14817_v56 = vrot.slane %v270_v49, %v553_v50  ;;  %v14824_v60 = vrot.slane %v270_v49, %v659_v52 }
  0x98   :  { %378 = vperm.xlu1 %13920, %v161_v2   ;;  %273 = vperm.xlu0 %13919, %v161_v2   ;;  %v167_v6 = vld [vmem:[%s20642_s22 + $0x30] sm:$0xff]  ;;  %v14682_v8 = vld [vmem:[%s20642_s22 + $0x48] sm:$0xff]  ;;  %v165_v9 = vld [vmem:[%s20642_s22 + $0x20] sm:$0xff] }
  0x99   :  { %v163_v7 = vld [vmem:[%s20642_s22 + $0x10] sm:$0xff]  ;;  %v14693_v10 = vld [vmem:[%s20642_s22 + $0x38] sm:$0xff]  ;;  %v14706_v13 = vld [vmem:[%s20642_s22 + $0x68] sm:$0xff] }
  0x9a   :  { %v14699_v11 = vld [vmem:[%s20642_s22 + $0x50] sm:$0xff]  ;;  %v166_v14 = vld [vmem:[%s20642_s22 + $0x28] sm:$0xff]  ;;  %v14721_v15 = vld [vmem:[%s20642_s22 + $0x60] sm:$0xff] }
  0x9b   :  { %v14737_v17 = vld [vmem:[%s20642_s22 + $0x78] sm:$0xff]  ;;  %v169_v18 = vld [vmem:[%s20642_s22 + $0x40] sm:$0xff]  ;;  %v175_v38 = vld [vmem:[%s20642_s22 + $0x70] sm:$0xff] }
  0x9c   :  { %382 = vperm.xlu1 %13920, %v162_v3   ;;  %278 = vperm.xlu0 %13919, %v162_v3   ;;  %v14752_v19 = vld [vmem:[%s20642_s22 + $0x80] sm:$0x1f]  ;;  %v172_v20 = vld [vmem:[%s20642_s22 + $0x58] sm:$0xff] }
  0xa0   :  { %13921 = vset.pattern.permute.xlu1 %v14443_v5  ;;  %288 = vperm.xlu0 %13919, %v164_v4  }
  0xa1   :  { %488 = vperm.xlu1 %13921, %v162_v3  }
  0xa4   :  { %303 = vperm.xlu0 %13919, %v167_v6  }
  0xa5   :  { %13922 = vset.pattern.permute.xlu1 %v14442_v1 }
  0xa6   :  { %283 = vperm.xlu1 %13922, %v163_v7  }
  0xa8   :  { %318 = vperm.xlu0 %13919, %v14682_v8  }
  0xaa   :  { %13923 = vset.pattern.permute.xlu1 %v14441_v0 }
  0xab   :  { %386 = vperm.xlu1 %13923, %v163_v7  }
  0xac   :  { %13935 = vset.pattern.permute.xlu0 %v14441_v0 }
  0xad   :  { %394 = vperm.xlu0 %13935, %v165_v9  }
  0xaf   :  { %390 = vperm.xlu1 %13923, %v164_v4  }
  0xb1   :  { %406 = vperm.xlu0 %13935, %v14693_v10  }
  0xb3   :  { %13924 = vset.pattern.permute.xlu1 %v14444_v12 }
  0xb4   :  { %594 = vperm.xlu1 %13924, %v162_v3  }
  0xb5   :  { %418 = vperm.xlu0 %13935, %v14699_v11  }
  0xb8   :  { %13925 = vset.pattern.permute.xlu1 %v14443_v5 }
  0xb9   :  { %492 = vperm.xlu1 %13925, %v163_v7   ;;  %430 = vperm.xlu0 %13935, %v14706_v13  }
  0xbd   :  { %13926 = vset.pattern.permute.xlu1 %v14442_v1  ;;  %13945 = vset.pattern.permute.xlu0 %v14444_v12 }
  0xbe   :  { %293 = vperm.xlu1 %13926, %v165_v9   ;;  %590 = vperm.xlu0 %13945, %v161_v2  }
  0xc2   :  { %298 = vperm.xlu1 %13926, %v166_v14   ;;  %602 = vperm.xlu0 %13945, %v164_v4  }
  0xc6   :  { %13927 = vset.pattern.permute.xlu1 %v14441_v0  ;;  %614 = vperm.xlu0 %13945, %v167_v6  }
  0xc7   :  { %398 = vperm.xlu1 %13927, %v166_v14  }
  0xca   :  { %626 = vperm.xlu0 %13945, %v14682_v8  }
  0xcb   :  { %13928 = vset.pattern.permute.xlu1 %v14444_v12 }
  0xcc   :  { %598 = vperm.xlu1 %13928, %v163_v7  }
  0xce   :  { %638 = vperm.xlu0 %13945, %v14721_v15  }
  0xd0   :  { %13929 = vset.pattern.permute.xlu1 %v14443_v5 }
  0xd1   :  { %500 = vperm.xlu1 %13929, %v165_v9  }
  0xd2   :  { %13950 = vset.pattern.permute.xlu0 %v14443_v5 }
  0xd3   :  { %484 = vperm.xlu0 %13950, %v161_v2  }
  0xd5   :  { %504 = vperm.xlu1 %13929, %v166_v14  }
  0xd7   :  { %496 = vperm.xlu0 %13950, %v164_v4  }
  0xd9   :  { %13930 = vset.pattern.permute.xlu1 %v14442_v1 }
  0xda   :  { %308 = vperm.xlu1 %13930, %v14693_v10  }
  0xdb   :  { %508 = vperm.xlu0 %13950, %v167_v6  }
  0xde   :  { %13931 = vset.pattern.permute.xlu1 %v14441_v0 }
  0xdf   :  { %402 = vperm.xlu1 %13931, %v167_v6   ;;  %520 = vperm.xlu0 %13950, %v14682_v8  }
  0xe3   :  { %13932 = vset.pattern.permute.xlu1 %v14444_v12  ;;  %532 = vperm.xlu0 %13950, %v14721_v15  }
  0xe4   :  { %606 = vperm.xlu1 %13932, %v165_v9  }
  0xe7   :  { %544 = vperm.xlu0 %13950, %v14737_v17  }
  0xe8   :  { %610 = vperm.xlu1 %13932, %v166_v14  }
  0xeb   :  { %13953 = vset.pattern.permute.xlu0 %v14442_v1 }
  0xec   :  { %13933 = vset.pattern.permute.xlu1 %v14443_v5  ;;  %333 = vperm.xlu0 %13953, %v14721_v15  }
  0xed   :  { %512 = vperm.xlu1 %13933, %v14693_v10  }
  0xf0   :  { %348 = vperm.xlu0 %13953, %v14737_v17  }
  0xf1   :  { %13934 = vset.pattern.permute.xlu1 %v14442_v1 }
  0xf2   :  { %313 = vperm.xlu1 %13934, %v169_v18  }
  0xf4   :  { %353 = vperm.xlu0 %13953, %v14752_v19  }
  0xf6   :  { %13936 = vset.pattern.permute.xlu1 %v14441_v0 }
  0xf7   :  { %410 = vperm.xlu1 %13936, %v169_v18  }
  0xf8   :  { %13957 = vset.pattern.permute.xlu0 %v14444_v12 }
  0xf9   :  { %654 = vperm.xlu0 %13957, %v14752_v19  }
  0xfb   :  { %414 = vperm.xlu1 %13936, %v14682_v8  }
  0xff   :  { %13937 = vset.pattern.permute.xlu1 %v14444_v12 }
 0x100   :  { %618 = vperm.xlu1 %13937, %v14693_v10  }
 0x104   :  { %13938 = vset.pattern.permute.xlu1 %v14443_v5 }
 0x105   :  { %516 = vperm.xlu1 %13938, %v169_v18  }
 0x109   :  { %13939 = vset.pattern.permute.xlu1 %v14442_v1 }
 0x10a   :  { %323 = vperm.xlu1 %13939, %v14699_v11  }
 0x10e   :  { %328 = vperm.xlu1 %13939, %v172_v20  }
 0x112   :  { %13940 = vset.pattern.permute.xlu1 %v14441_v0 }
 0x113   :  { %422 = vperm.xlu1 %13940, %v172_v20  }
 0x117   :  { %13941 = vset.pattern.permute.xlu1 %v14444_v12  ;;  %v379_v21 = vpop.permute.xlu1 %378  ;;  %v274_v22 = vpop.permute.xlu0 %273 }
 0x118   :  { %622 = vperm.xlu1 %13941, %v169_v18   ;;  %v449_v61 = vmul.f32 %v14812_v53, %v379_v21  ;;  %v360_v62 = vmul.f32 %v14814_v54, %v274_v22 }
 0x11a   :  { %v466_v9 = vadd.f32 %v449_v61, %v360_v62 }
 0x11b   :  { %v383_v23 = vpop.permute.xlu1 %382  ;;  %v279_v24 = vpop.permute.xlu0 %278 }
 0x11c   :  { %13942 = vset.pattern.permute.xlu1 %v14443_v5  ;;  %v450_v57 = vmul.f32 %v14812_v53, %v383_v23  ;;  %v361_v58 = vmul.f32 %v14814_v54, %v279_v24 }
 0x11d   :  { %524 = vperm.xlu1 %13942, %v14699_v11  }
 0x11e   :  { %v467_v2 = vadd.f32 %v450_v57, %v361_v58 }
 0x11f   :  { %v289_v25 = vpop.permute.xlu0 %288 }
 0x120   :  { %v489_v26 = vpop.permute.xlu1 %488  ;;  %v363_v3 = vmul.f32 %v14814_v54, %v289_v25 }
 0x121   :  { %528 = vperm.xlu1 %13942, %v172_v20   ;;  %v556_v63 = vmul.f32 %v14817_v56, %v489_v26 }
 0x123   :  { %v14771_v27 = vpop.permute.xlu0 %303 }
 0x125   :  { %13943 = vset.pattern.permute.xlu1 %v14442_v1  ;;  %v14774_v28 = vpop.permute.xlu1 %283 }
 0x126   :  { %338 = vperm.xlu1 %13943, %v14706_v13   ;;  %v362_v14 = vmul.f32 %v14814_v54, %v14774_v28 }
 0x127   :  { %v14777_v29 = vpop.permute.xlu0 %318 }
 0x12a   :  { %13944 = vset.pattern.permute.xlu1 %v14441_v0  ;;  %v387_v30 = vpop.permute.xlu1 %386 }
 0x12b   :  { %426 = vperm.xlu1 %13944, %v14721_v15   ;;  %v451_v4 = vmul.f32 %v14812_v53, %v387_v30 }
 0x12c   :  { %v14781_v31 = vpop.permute.xlu0 %394 }
 0x12d   :  { %v468_v21 = vadd.f32 %v451_v4, %v362_v14  ;;  %v453_v44 = vmul.f32 %v14812_v53, %v14781_v31 }
 0x12e   :  { %v391_v32 = vpop.permute.xlu1 %390 }
 0x12f   :  { %13946 = vset.pattern.permute.xlu1 %v14444_v12  ;;  %v452_v6 = vmul.f32 %v14812_v53, %v391_v32 }
 0x130   :  { %630 = vperm.xlu1 %13946, %v14699_v11   ;;  %v14785_v33 = vpop.permute.xlu0 %406 }
 0x131   :  { %v469_v22 = vadd.f32 %v452_v6, %v363_v3 }
 0x133   :  { %v595_v34 = vpop.permute.xlu1 %594 }
 0x134   :  { %634 = vperm.xlu1 %13946, %v172_v20   ;;  %v14787_v35 = vpop.permute.xlu0 %418  ;;  %v662_v7 = vmul.f32 %v14824_v60, %v595_v34 }
 0x138   :  { %13947 = vset.pattern.permute.xlu1 %v14443_v5  ;;  %v493_v36 = vpop.permute.xlu1 %492  ;;  %v14790_v37 = vpop.permute.xlu0 %430 }
 0x139   :  { %536 = vperm.xlu1 %13947, %v14706_v13   ;;  %v557_v18 = vmul.f32 %v14817_v56, %v493_v36 }
 0x13b   :  { %v574_v34 = vadd.f32 %v557_v18, %v468_v21 }
 0x13d   :  { %13948 = vset.pattern.permute.xlu1 %v14442_v1  ;;  %v14797_v39 = vpop.permute.xlu1 %293  ;;  %v591_v40 = vpop.permute.xlu0 %590 }
 0x13e   :  { %343 = vperm.xlu1 %13948, %v175_v38   ;;  %v661_v10 = vmul.f32 %v14824_v60, %v591_v40 }
 0x141   :  { %v14799_v42 = vpop.permute.xlu1 %298  ;;  %v603_v43 = vpop.permute.xlu0 %602 }
 0x142   :  { %13949 = vset.pattern.permute.xlu1 %v14441_v0  ;;  %v664_v25 = vmul.f32 %v14824_v60, %v603_v43 }
 0x143   :  { %434 = vperm.xlu1 %13949, %v175_v38  }
 0x145   :  { %v14802_v45 = vpop.permute.xlu0 %614 }
 0x146   :  { %v14804_v46 = vpop.permute.xlu1 %398 }
 0x147   :  { %438 = vperm.xlu1 %13949, %v14737_v17   ;;  %v454_v47 = vmul.f32 %v14812_v53, %v14804_v46 }
 0x149   :  { %v14810_v51 = vpop.permute.xlu0 %626 }
 0x14a   :  { %v670_v18 = vmul.f32 %v14824_v60, %v14810_v51 }
 0x14b   :  { %13951 = vset.pattern.permute.xlu1 %v14444_v12  ;;  %v599_v55 = vpop.permute.xlu1 %598 }
 0x14c   :  { %642 = vperm.xlu1 %13951, %v14706_v13   ;;  %v573_v13 = vadd.f32 %v556_v63, %v467_v2  ;;  %v663_v26 = vmul.f32 %v14824_v60, %v599_v55  ;;  %v366_v2 = vmul.f32 %v14814_v54, %v14771_v27 }
 0x14d   :  { %v14822_v59 = vpop.permute.xlu0 %638 }
 0x14e   :  { %v679_v23 = vadd.f32 %v662_v7, %v573_v13  ;;  %v680_v36 = vadd.f32 %v663_v26, %v574_v34  ;;  %v369_v7 = vmul.f32 %v14814_v54, %v14777_v29  ;;  %v667_v29 = vmul.f32 %v14824_v60, %v14802_v45 }
 0x150   :  { %13952 = vset.pattern.permute.xlu1 %v14443_v5  ;;  %v501_v1 = vpop.permute.xlu1 %500 }
 0x151   :  { %540 = vperm.xlu1 %13952, %v175_v38   ;;  %v559_v49 = vmul.f32 %v14817_v56, %v501_v1 }
 0x152   :  { %v485_v8 = vpop.permute.xlu0 %484 }
 0x153   :  { %v555_v11 = vmul.f32 %v14817_v56, %v485_v8  ;;  %v456_v8 = vmul.f32 %v14812_v53, %v14785_v33 }
 0x154   :  { %v505_v15 = vpop.permute.xlu1 %504 }
 0x155   :  { %v572_v20 = vadd.f32 %v555_v11, %v466_v9  ;;  %13954 = vset.pattern.permute.xlu1 %v14444_v12  ;;  %v560_v50 = vmul.f32 %v14817_v56, %v505_v15 }
 0x156   :  { %646 = vperm.xlu1 %13954, %v175_v38   ;;  %v497_v24 = vpop.permute.xlu0 %496 }
 0x157   :  { %v558_v30 = vmul.f32 %v14817_v56, %v497_v24  ;;  %v678_v32 = vadd.f32 %v661_v10, %v572_v20 }
 0x159   :  { %v575_v28 = vadd.f32 %v558_v30, %v469_v22  ;;  %v309_v40 = vpop.permute.xlu1 %308  ;;  %v13188_v41 = vpack.c.bf16 %v679_v23, %v678_v32 }
 0x15a   :  { %650 = vperm.xlu1 %13954, %v14737_v17   ;;  %v364_v17 = vmul.f32 %v14814_v54, %v14797_v39  ;;  %v509_v1 = vpop.permute.xlu0 %508  ;;  %v367_v9 = vmul.f32 %v14814_v54, %v309_v40 }
 0x15b   :  { %v681_v12 = vadd.f32 %v664_v25, %v575_v28  ;;  %13189 = vmatpush1.bf16.msra.mxu0 %v13188_v41  ;;  %v561_v11 = vmul.f32 %v14817_v56, %v509_v1 }
 0x15c   :  { %13190 = vmatprep.subr.bf16.mxu0 %v20517_v16  ;;  %v470_v52 = vadd.f32 %v453_v44, %v364_v17  ;;  %v473_v33 = vadd.f32 %v456_v8, %v367_v9 }
 0x15d   :  { %v13191_v38 = vpack.c.bf16 %v681_v12, %v680_v36 }
 0x15e   :  { %13955 = vset.pattern.permute.xlu1 %v14441_v0  ;;  %v403_v43 = vpop.permute.xlu1 %402  ;;  %v365_v0 = vmul.f32 %v14814_v54, %v14799_v42  ;;  %v576_v57 = vadd.f32 %v559_v49, %v470_v52  ;;  %v521_v6 = vpop.permute.xlu0 %520 }
 0x15f   :  { %442 = vperm.xlu1 %13955, %v14752_v19   ;;  %13192 = vmatpush1.bf16.msra.mxu0 %v13191_v38  ;;  %v455_v3 = vmul.f32 %v14812_v53, %v403_v43  ;;  %v564_v27 = vmul.f32 %v14817_v56, %v521_v6 }
 0x160   :  { %13193 = vmatprep.subr.bf16.mxu0 %v20517_v16  ;;  %v471_v31 = vadd.f32 %v454_v47, %v365_v0 }
 0x161   :  { %v472_v10 = vadd.f32 %v455_v3, %v366_v2 }
 0x162   :  { %v577_v58 = vadd.f32 %v560_v50, %v471_v31  ;;  %v925_v31 = vld [vmem:[%s20449_s9] sm:$0xff]  ;;  %v533_v3 = vpop.permute.xlu0 %532 }
 0x163   :  { %13956 = vset.pattern.permute.xlu1 %v14443_v5  ;;  %v607_v48 = vpop.permute.xlu1 %606  ;;  %v14865_v5 = vld [vmem:[%s20643_s18 + $0x8] sm:$0xff]  ;;  %v578_v21 = vadd.f32 %v561_v11, %v472_v10 }
 0x164   :  { %548 = vperm.xlu1 %13956, %v14752_v19   ;;  %v665_v55 = vmul.f32 %v14824_v60, %v607_v48  ;;  %9502 = vmatprep.mubr.msk.f32.mxu0 %vm702_vm0, %v14865_v5 }
 0x165   :  { %v684_v30 = vadd.f32 %v667_v29, %v578_v21  ;;  %v567_v29 = vmul.f32 %v14817_v56, %v533_v3 }
 0x166   :  { %v682_v42 = vadd.f32 %v665_v55, %v576_v57  ;;  %v926_v55 = vld [vmem:[%s20449_s9 + $0x8] sm:$0xff]  ;;  %v459_v57 = vmul.f32 %v14812_v53, %v14787_v35 }
 0x167   :  { %v611_v39 = vpop.permute.xlu1 %610 }
 0x168   :  { %v666_v46 = vmul.f32 %v14824_v60, %v611_v39  ;;  %v13212_v39 = vpack.c.bf16 %v926_v55, %v925_v31 }
 0x16a   :  { %v683_v61 = vadd.f32 %v666_v46, %v577_v58  ;;  %13213 = vmatpush3.bf16.msra.mxu1 %v13212_v39 }
 0x16b   :  { %13214 = vmatprep.subr.bf16.mxu1 %v20517_v16 }
 0x16c   :  { %v513_v19 = vpop.permute.xlu1 %512  ;;  %v13194_v62 = vpack.c.bf16 %v683_v61, %v682_v42 }
 0x16d   :  { %v562_v15 = vmul.f32 %v14817_v56, %v513_v19 }
 0x16e   :  { %13195 = vmatpush1.bf16.msra.mxu0 %v13194_v62 }
 0x16f   :  { %13196 = vmatprep.subr.bf16.mxu0 %v20517_v16  ;;  %v579_v24 = vadd.f32 %v562_v15, %v473_v33 }
 0x171   :  { %v314_v63 = vpop.permute.xlu1 %313 }
 0x172   :  { %v368_v36 = vmul.f32 %v14814_v54, %v314_v63 }
 0x176   :  { %v411_v4 = vpop.permute.xlu1 %410 }
 0x177   :  { %v457_v41 = vmul.f32 %v14812_v53, %v411_v4 }
 0x179   :  { %v474_v38 = vadd.f32 %v457_v41, %v368_v36 }
 0x17a   :  { %v415_v13 = vpop.permute.xlu1 %414 }
 0x17b   :  { %v458_v14 = vmul.f32 %v14812_v53, %v415_v13  ;;  %v545_v13 = vpop.permute.xlu0 %544 }
 0x17d   :  { %v475_v20 = vadd.f32 %v458_v14, %v369_v7 }
 0x17f   :  { %v581_v22 = vadd.f32 %v564_v27, %v475_v20  ;;  %v619_v23 = vpop.permute.xlu1 %618  ;;  %v334_v27 = vpop.permute.xlu0 %333 }
 0x180   :  { %v668_v25 = vmul.f32 %v14824_v60, %v619_v23  ;;  %v462_v23 = vmul.f32 %v14812_v53, %v14790_v37 }
 0x181   :  { %v687_v26 = vadd.f32 %v670_v18, %v581_v22  ;;  %v372_v18 = vmul.f32 %v14814_v54, %v334_v27  ;;  %v15017_v27 = vld [vmem:[%s20643_s18 + $0x60] sm:$0xff] }
 0x182   :  { %v685_v32 = vadd.f32 %v668_v25, %v579_v24 }
 0x183   :  { %v349_v41 = vpop.permute.xlu0 %348 }
 0x184   :  { %v517_v34 = vpop.permute.xlu1 %516  ;;  %v13197_v28 = vpack.c.bf16 %v685_v32, %v684_v30  ;;  %v673_v32 = vmul.f32 %v14824_v60, %v14822_v59  ;;  %v375_v37 = vmul.f32 %v14814_v54, %v349_v41  ;;  %v15134_v41 = vld [vmem:[%s20643_s18 + $0xf0] sm:$0xff] }
 0x185   :  { %v563_v12 = vmul.f32 %v14817_v56, %v517_v34 }
 0x186   :  { %13198 = vmatpush1.bf16.msra.mxu0 %v13197_v28 }
 0x187   :  { %13199 = vmatprep.subr.bf16.mxu0 %v20517_v16  ;;  %v580_v44 = vadd.f32 %v563_v12, %v474_v38 }
 0x189   :  { %v324_v51 = vpop.permute.xlu1 %323 }
 0x18a   :  { %v370_v58 = vmul.f32 %v14814_v54, %v324_v51 }
 0x18c   :  { %v476_v63 = vadd.f32 %v459_v57, %v370_v58  ;;  %v354_v57 = vpop.permute.xlu0 %353 }
 0x18d   :  { %v329_v40 = vpop.permute.xlu1 %328 }
 0x18e   :  { %v371_v61 = vmul.f32 %v14814_v54, %v329_v40 }
 0x192   :  { %v423_v45 = vpop.permute.xlu1 %422 }
 0x193   :  { %v460_v46 = vmul.f32 %v14812_v53, %v423_v45 }
 0x195   :  { %v477_v1 = vadd.f32 %v460_v46, %v371_v61  ;;  %v655_v61 = vpop.permute.xlu0 %654 }
 0x196   :  { %v677_v3 = vmul.f32 %v14824_v60, %v655_v61 }
 0x197   :  { %v623_v43 = vpop.permute.xlu1 %622 }
 0x198   :  { %v669_v17 = vmul.f32 %v14824_v60, %v623_v43 }
 0x19a   :  { %v686_v47 = vadd.f32 %v669_v17, %v580_v44 }
 0x19c   :  { %v525_v48 = vpop.permute.xlu1 %524  ;;  %v13200_v0 = vpack.c.bf16 %v687_v26, %v686_v47  ;;  %v570_v47 = vmul.f32 %v14817_v56, %v545_v13  ;;  %v15004_v13 = vld [vmem:[%s20643_s18 + $0x50] sm:$0xff] }
 0x19d   :  { %v565_v19 = vmul.f32 %v14817_v56, %v525_v48 }
 0x19e   :  { %13201 = vmatpush1.bf16.msra.mxu0 %v13200_v0 }
 0x19f   :  { %13202 = vmatprep.subr.bf16.mxu0 %v20517_v16  ;;  %v582_v4 = vadd.f32 %v565_v19, %v476_v63  ;;  %v20488_v19 = vmov 0.0  }
 0x1a0   :  { %v529_v49 = vpop.permute.xlu1 %528  ;;  %11139 = vmatprep.mubr.msk.f32.mxu1 %vm14447_vm2, %v20488_v19 }
 0x1a1   :  { %v566_v62 = vmul.f32 %v14817_v56, %v529_v49 }
 0x1a3   :  { %v583_v6 = vadd.f32 %v566_v62, %v477_v1  ;;  %v376_v62 = vmul.f32 %v14814_v54, %v354_v57 }
 0x1a5   :  { %v339_v50 = vpop.permute.xlu1 %338 }
 0x1a6   :  { %v373_v33 = vmul.f32 %v14814_v54, %v339_v50 }
 0x1a8   :  { %v479_v25 = vadd.f32 %v462_v23, %v373_v33  ;;  %v15048_v33 = vld [vmem:[%s20643_s18 + $0x98] sm:$0xff]  ;;  %v15069_v23 = vld [vmem:[%s20643_s18 + $0xa0] sm:$0xff] }
 0x1aa   :  { %v427_v52 = vpop.permute.xlu1 %426 }
 0x1ab   :  { %v461_v15 = vmul.f32 %v14812_v53, %v427_v52 }
 0x1ad   :  { %v478_v21 = vadd.f32 %v461_v15, %v372_v18  ;;  %v15022_v15 = vld [vmem:[%s20643_s18 + $0x78] sm:$0xff]  ;;  %v15030_v18 = vld [vmem:[%s20643_s18 + $0x70] sm:$0xff] }
 0x1af   :  { %v631_v42 = vpop.permute.xlu1 %630  ;;  %v584_v26 = vadd.f32 %v567_v29, %v478_v21  ;;  %v15043_v29 = vld [vmem:[%s20643_s18 + $0x80] sm:$0xff]  ;;  %v15056_v21 = vld [vmem:[%s20643_s18 + $0x90] sm:$0xff] }
 0x1b0   :  { %v671_v2 = vmul.f32 %v14824_v60, %v631_v42 }
 0x1b1   :  { %v690_v40 = vadd.f32 %v673_v32, %v584_v26  ;;  %v15087_v26 = vld [vmem:[%s20643_s18 + $0xc8] sm:$0xff]  ;;  %v15100_v32 = vld [vmem:[%s20643_s18 + $0xd8] sm:$0xff] }
 0x1b2   :  { %v688_v8 = vadd.f32 %v671_v2, %v582_v4 }
 0x1b3   :  { %v635_v35 = vpop.permute.xlu1 %634 }
 0x1b4   :  { %v672_v7 = vmul.f32 %v14824_v60, %v635_v35 }
 0x1b6   :  { %v689_v9 = vadd.f32 %v672_v7, %v583_v6  ;;  %v14942_v6 = vld [vmem:[%s20643_s18 + $0x18] sm:$0xff] }
 0x1b7   :  { %v14970_v7 = vld [vmem:[%s20643_s18 + $0x38] sm:$0xff] }
 0x1b8   :  { %v537_v10 = vpop.permute.xlu1 %536  ;;  %v13203_v11 = vpack.c.bf16 %v689_v9, %v688_v8  ;;  %v14978_v8 = vld [vmem:[%s20643_s18 + $0x30] sm:$0xff]  ;;  %v14983_v9 = vld [vmem:[%s20643_s18 + $0x48] sm:$0xff] }
 0x1b9   :  { %v568_v24 = vmul.f32 %v14817_v56, %v537_v10  ;;  %v14991_v10 = vld [vmem:[%s20643_s18 + $0x40] sm:$0xff] }
 0x1ba   :  { %13204 = vmatpush1.bf16.msra.mxu0 %v13203_v11  ;;  %v14996_v11 = vld [vmem:[%s20643_s18 + $0x58] sm:$0xff] }
 0x1bb   :  { %13205 = vmatprep.subr.bf16.mxu0 %v20517_v16  ;;  %v585_v34 = vadd.f32 %v568_v24, %v479_v25  ;;  %v15074_v24 = vld [vmem:[%s20643_s18 + $0xb8] sm:$0xff]  ;;  %v15082_v25 = vld [vmem:[%s20643_s18 + $0xb0] sm:$0xff] }
 0x1bd   :  { %v344_v14 = vpop.permute.xlu1 %343 }
 0x1be   :  { %v374_v59 = vmul.f32 %v14814_v54, %v344_v14  ;;  %v14952_v54 = vld [vmem:[%s20643_s18 + $0x10] sm:$0xff]  ;;  %v15009_v14 = vld [vmem:[%s20643_s18 + $0x68] sm:$0xff] }
 0x1c2   :  { %v435_v20 = vpop.permute.xlu1 %434 }
 0x1c3   :  { %v463_v38 = vmul.f32 %v14812_v53, %v435_v20  ;;  %v15035_v20 = vld [vmem:[%s20643_s18 + $0x88] sm:$0xff] }
 0x1c5   :  { %v480_v48 = vadd.f32 %v463_v38, %v374_v59 }
 0x1c6   :  { %v439_v22 = vpop.permute.xlu1 %438 }
 0x1c7   :  { %v464_v12 = vmul.f32 %v14812_v53, %v439_v22  ;;  %v15061_v22 = vld [vmem:[%s20643_s18 + $0xa8] sm:$0xff] }
 0x1c9   :  { %v481_v44 = vadd.f32 %v464_v12, %v375_v37  ;;  %v927_v12 = vld [vmem:[%s20449_s9 + $0x10] sm:$0xff]  ;;  %v928_v37 = vld [vmem:[%s20449_s9 + $0x18] sm:$0xff] }
 0x1ca   :  { %v13215_v38 = vpack.c.bf16 %v928_v37, %v927_v12 }
 0x1cb   :  { %v643_v30 = vpop.permute.xlu1 %642  ;;  %v587_v52 = vadd.f32 %v570_v47, %v481_v44 }
 0x1cc   :  { %v674_v28 = vmul.f32 %v14824_v60, %v643_v30  ;;  %v15095_v30 = vld [vmem:[%s20643_s18 + $0xc0] sm:$0xff]  ;;  %13216 = vmatpush3.bf16.msra.mxu1 %v13215_v38 }
 0x1cd   :  { %13217 = vmatprep.subr.bf16.mxu1 %v20517_v16 }
 0x1ce   :  { %v691_v51 = vadd.f32 %v674_v28, %v585_v34  ;;  %v15108_v34 = vld [vmem:[%s20643_s18 + $0xd0] sm:$0xff]  ;;  %v15113_v28 = vld [vmem:[%s20643_s18 + $0xe8] sm:$0xff] }
 0x1d0   :  { %v541_v45 = vpop.permute.xlu1 %540  ;;  %v13206_v36 = vpack.c.bf16 %v691_v51, %v690_v40  ;;  %v15121_v51 = vld [vmem:[%s20643_s18 + $0xe0] sm:$0xff]  ;;  %v15126_v40 = vld [vmem:[%s20643_s18 + $0xf8] sm:$0xff] }
 0x1d1   :  { %v569_v17 = vmul.f32 %v14817_v56, %v541_v45  ;;  %v15139_v45 = vld [vmem:[%s20643_s18 + $0x108] sm:$0x1f] }
 0x1d2   :  { %13207 = vmatpush1.bf16.msra.mxu0 %v13206_v36  ;;  %v15147_v36 = vld [vmem:[%s20643_s18 + $0x100] sm:$0x1f] }
 0x1d3   :  { %13208 = vmatprep.subr.bf16.mxu0 %v20517_v16  ;;  %v586_v50 = vadd.f32 %v569_v17, %v480_v48 }
 0x1d5   :  { %v647_v43 = vpop.permute.xlu1 %646 }
 0x1d6   :  { %v675_v0 = vmul.f32 %v14824_v60, %v647_v43  ;;  %v15164_v43 = vld [vmem:[%s20448_s8] ss:$0 sm:$0xff] }
 0x1d8   :  { %v692_v55 = vadd.f32 %v675_v0, %v586_v50 }
 0x1d9   :  { %v651_v49 = vpop.permute.xlu1 %650 }
 0x1da   :  { %v676_v31 = vmul.f32 %v14824_v60, %v651_v49  ;;  %v14965_v60 = vld [vmem:[%s20643_s18 + $0x20] sm:$0xff] }
 0x1dc   :  { %v693_v39 = vadd.f32 %v676_v31, %v587_v52 }
 0x1de   :  { %v443_v58 = vpop.permute.xlu1 %442  ;;  %v13209_v46 = vpack.c.bf16 %v693_v39, %v692_v55 }
 0x1df   :  { %v465_v42 = vmul.f32 %v14812_v53, %v443_v58  ;;  %v14937_v53 = vld [vmem:[%s20643_s18] sm:$0xff] }
 0x1e0   :  { %13210 = vmatpush1.bf16.msra.mxu0 %v13209_v46 }
 0x1e1   :  { %790 = vmatprep.subr.mxu0 %v20488_v19  ;;  %v482_v1 = vadd.f32 %v465_v42, %v376_v62 }
 0x1e3   :  { %v549_v63 = vpop.permute.xlu1 %548 }
 0x1e4   :  { %v571_v2 = vmul.f32 %v14817_v56, %v549_v63  ;;  %v14957_v56 = vld [vmem:[%s20643_s18 + $0x28] sm:$0xff] }
 0x1e6   :  { %v588_v35 = vadd.f32 %v571_v2, %v482_v1 }
 0x1e8   :  { %v694_v4 = vadd.f32 %v677_v3, %v588_v35 }
 0x1ea   :  { %9501 = vmatpush1.msk.msra.mxu0 %vm754_vm1, %v694_v4 }
 0x1eb   :  { %823 = vmatmul.mubr.f32.vlgmr.msra.gmra.mrb[0].mxu0 %v14937_v53  ;;  %13241 = vmatprep.subr.bf16.mxu0 %v20517_v16 }
 0x1ec   :  { %9503 = vmatprep.mubr.msk.f32.mxu0 %vm702_vm0, %v14942_v6 }
 0x1ef   :  { %828 = vmatmul.mubr.f32.gmra.mrb[2].mxu0 %v14952_v54 }
 0x1f0   :  { %9504 = vmatprep.mubr.msk.f32.mxu0 %vm702_vm0, %v14957_v56 }
 0x1f3   :  { %833 = vmatmul.mubr.f32.gmra.mrb[4].mxu0 %v14965_v60 }
 0x1f4   :  { %9505 = vmatprep.mubr.msk.f32.mxu0 %vm702_vm0, %v14970_v7 }
 0x1f7   :  { %838 = vmatmul.mubr.f32.gmra.mrb[6].mxu0 %v14978_v8 }
 0x1f8   :  { %9506 = vmatprep.mubr.msk.f32.mxu0 %vm702_vm0, %v14983_v9 }
 0x1fb   :  { %843 = vmatmul.mubr.f32.gmra.mrb[8].mxu0 %v14991_v10 }
 0x1fc   :  { %9507 = vmatprep.mubr.msk.f32.mxu0 %vm702_vm0, %v14996_v11 }
 0x1ff   :  { %848 = vmatmul.mubr.f32.gmra.mrb[10].mxu0 %v15004_v13 }
 0x200   :  { %9508 = vmatprep.mubr.msk.f32.mxu0 %vm702_vm0, %v15009_v14 }
 0x203   :  { %853 = vmatmul.mubr.f32.gmra.mrb[12].mxu0 %v15017_v27 }
 0x204   :  { %9509 = vmatprep.mubr.msk.f32.mxu0 %vm702_vm0, %v15022_v15 }
 0x207   :  { %858 = vmatmul.mubr.f32.gmra.mrb[14].mxu0 %v15030_v18 }
 0x208   :  { %9510 = vmatprep.mubr.msk.f32.mxu0 %vm702_vm0, %v15035_v20 }
 0x20b   :  { %863 = vmatmul.mubr.f32.gmra.mrb[16].mxu0 %v15043_v29 }
 0x20c   :  { %9511 = vmatprep.mubr.msk.f32.mxu0 %vm702_vm0, %v15048_v33 }
 0x20f   :  { %868 = vmatmul.mubr.f32.gmra.mrb[18].mxu0 %v15056_v21 }
 0x210   :  { %9512 = vmatprep.mubr.msk.f32.mxu0 %vm702_vm0, %v15061_v22 }
 0x213   :  { %873 = vmatmul.mubr.f32.gmra.mrb[20].mxu0 %v15069_v23 }
 0x214   :  { %9513 = vmatprep.mubr.msk.f32.mxu0 %vm702_vm0, %v15074_v24 }
 0x217   :  { %878 = vmatmul.mubr.f32.gmra.mrb[22].mxu0 %v15082_v25 }
 0x218   :  { %9514 = vmatprep.mubr.msk.f32.mxu0 %vm702_vm0, %v15087_v26 }
 0x21b   :  { %883 = vmatmul.mubr.f32.gmra.mrb[24].mxu0 %v15095_v30 }
 0x21c   :  { %9515 = vmatprep.mubr.msk.f32.mxu0 %vm702_vm0, %v15100_v32 }
 0x21f   :  { %888 = vmatmul.mubr.f32.gmra.mrb[26].mxu0 %v15108_v34 }
 0x220   :  { %9516 = vmatprep.mubr.msk.f32.mxu0 %vm702_vm0, %v15113_v28 }
 0x223   :  { %893 = vmatmul.mubr.f32.gmra.mrb[28].mxu0 %v15121_v51 }
 0x224   :  { %9517 = vmatprep.mubr.msk.f32.mxu0 %vm702_vm0, %v15126_v40 }
 0x227   :  { %898 = vmatmul.mubr.f32.gmra.mrb[30].mxu0 %v15134_v41 }
 0x228   :  { %9518 = vmatprep.mubr.msk.f32.mxu0 %vm702_vm0, %v15139_v45 }
 0x22b   :  { %903 = vmatmul.mubr.f32.gmra.mrb[32].mxu0 %v15147_v36 }
 0x22c   :  { %11202 = vmatprep.mubr.msk.f32.mxu0 %vm14447_vm2, %v20488_v19 }
 0x2be   :  { %v824_v59 = vpop.f32.mrb[0].mxu0 }
 0x2bf   :  { %v15167_v44 = vadd.f32 %v15164_v43, %v824_v59  ;;  %v826_v17 = vpop.f32.mrb[1].mxu0 }
 0x2c1   :  { %v20487_v47 = vmax.f32 %v15167_v44, 0.0 }
 0x2c2   :  { %v829_v48 = vpop.f32.mrb[2].mxu0 }
 0x2c3   :  { %v15171_v0 = vadd.f32 %v15164_v43, %v829_v48  ;;  %v831_v49 = vpop.f32.mrb[3].mxu0  ;;  %11140 = vmatmul.mubr.msk.f32.vlgmr.msra.gmra.mrb[0].mxu1 %vm930_vm3, %v20487_v47 }
 0x2c4   :  { %11142 = vmatprep.mubr.msk.f32.mxu1 %vm14447_vm2, %v20488_v19 }
 0x2c5   :  { %v20486_v50 = vmax.f32 %v15171_v0, 0.0 }
 0x2c6   :  { %v834_v52 = vpop.f32.mrb[4].mxu0 }
 0x2c7   :  { %v15180_v31 = vadd.f32 %v15164_v43, %v834_v52  ;;  %v836_v55 = vpop.f32.mrb[5].mxu0  ;;  %11143 = vmatmul.mubr.msk.f32.gmra.mrb[2].mxu1 %vm930_vm3, %v20486_v50 }
 0x2c8   :  { %11145 = vmatprep.mubr.msk.f32.mxu1 %vm14447_vm2, %v20488_v19 }
 0x2c9   :  { %v20485_v39 = vmax.f32 %v15180_v31, 0.0 }
 0x2ca   :  { %v839_v57 = vpop.f32.mrb[6].mxu0 }
 0x2cb   :  { %v15189_v58 = vadd.f32 %v15164_v43, %v839_v57  ;;  %v841_v46 = vpop.f32.mrb[7].mxu0  ;;  %11146 = vmatmul.mubr.msk.f32.gmra.mrb[4].mxu1 %vm930_vm3, %v20485_v39 }
 0x2cc   :  { %11148 = vmatprep.mubr.msk.f32.mxu1 %vm14447_vm2, %v20488_v19 }
 0x2cd   :  { %v20483_v42 = vmax.f32 %v15189_v58, 0.0 }
 0x2ce   :  { %v844_v61 = vpop.f32.mrb[8].mxu0 }
 0x2cf   :  { %v15198_v62 = vadd.f32 %v15164_v43, %v844_v61  ;;  %v846_v63 = vpop.f32.mrb[9].mxu0  ;;  %11149 = vmatmul.mubr.msk.f32.gmra.mrb[6].mxu1 %vm930_vm3, %v20483_v42 }
 0x2d0   :  { %11151 = vmatprep.mubr.msk.f32.mxu1 %vm14447_vm2, %v20488_v19 }
 0x2d1   :  { %v20482_v1 = vmax.f32 %v15198_v62, 0.0 }
 0x2d2   :  { %v849_v2 = vpop.f32.mrb[10].mxu0 }
 0x2d3   :  { %v15207_v3 = vadd.f32 %v15164_v43, %v849_v2  ;;  %v851_v35 = vpop.f32.mrb[11].mxu0  ;;  %11152 = vmatmul.mubr.msk.f32.gmra.mrb[8].mxu1 %vm930_vm3, %v20482_v1  ;;  %v1310_v1 = vld [vmem:[%s20451_s11 + $0x10] sm:$0xff] }
 0x2d4   :  { %11154 = vmatprep.mubr.msk.f32.mxu1 %vm14447_vm2, %v20488_v19 }
 0x2d5   :  { %v20478_v4 = vmax.f32 %v15207_v3, 0.0 }
 0x2d6   :  { %v854_v12 = vpop.f32.mrb[12].mxu0 }
 0x2d7   :  { %v15216_v37 = vadd.f32 %v15164_v43, %v854_v12  ;;  %v856_v38 = vpop.f32.mrb[13].mxu0  ;;  %11155 = vmatmul.mubr.msk.f32.gmra.mrb[10].mxu1 %vm930_vm3, %v20478_v4 }
 0x2d8   :  { %11157 = vmatprep.mubr.msk.f32.mxu1 %vm14447_vm2, %v20488_v19 }
 0x2d9   :  { %v20476_v59 = vmax.f32 %v15216_v37, 0.0 }
 0x2da   :  { %v859_v17 = vpop.f32.mrb[14].mxu0 }
 0x2db   :  { %v15225_v48 = vadd.f32 %v15164_v43, %v859_v17  ;;  %v861_v49 = vpop.f32.mrb[15].mxu0  ;;  %11158 = vmatmul.mubr.msk.f32.gmra.mrb[12].mxu1 %vm930_vm3, %v20476_v59 }
 0x2dc   :  { %11160 = vmatprep.mubr.msk.f32.mxu1 %vm14447_vm2, %v20488_v19 }
 0x2dd   :  { %v20474_v52 = vmax.f32 %v15225_v48, 0.0 }
 0x2de   :  { %v864_v55 = vpop.f32.mrb[16].mxu0 }
 0x2df   :  { %v15234_v57 = vadd.f32 %v15164_v43, %v864_v55  ;;  %v866_v46 = vpop.f32.mrb[17].mxu0  ;;  %11161 = vmatmul.mubr.msk.f32.gmra.mrb[14].mxu1 %vm930_vm3, %v20474_v52 }
 0x2e0   :  { %11163 = vmatprep.mubr.msk.f32.mxu1 %vm14447_vm2, %v20488_v19 }
 0x2e1   :  { %v20472_v61 = vmax.f32 %v15234_v57, 0.0 }
 0x2e2   :  { %v869_v63 = vpop.f32.mrb[18].mxu0 }
 0x2e3   :  { %v15243_v2 = vadd.f32 %v15164_v43, %v869_v63  ;;  %v871_v35 = vpop.f32.mrb[19].mxu0  ;;  %11164 = vmatmul.mubr.msk.f32.gmra.mrb[16].mxu1 %vm930_vm3, %v20472_v61 }
 0x2e4   :  { %11166 = vmatprep.mubr.msk.f32.mxu1 %vm14447_vm2, %v20488_v19 }
 0x2e5   :  { %v20471_v12 = vmax.f32 %v15243_v2, 0.0 }
 0x2e6   :  { %v874_v38 = vpop.f32.mrb[20].mxu0 }
 0x2e7   :  { %v15252_v17 = vadd.f32 %v15164_v43, %v874_v38  ;;  %v876_v49 = vpop.f32.mrb[21].mxu0  ;;  %11167 = vmatmul.mubr.msk.f32.gmra.mrb[18].mxu1 %vm930_vm3, %v20471_v12 }
 0x2e8   :  { %11169 = vmatprep.mubr.msk.f32.mxu1 %vm14447_vm2, %v20488_v19 }
 0x2e9   :  { %v20473_v55 = vmax.f32 %v15252_v17, 0.0 }
 0x2ea   :  { %v879_v46 = vpop.f32.mrb[22].mxu0 }
 0x2eb   :  { %v15261_v63 = vadd.f32 %v15164_v43, %v879_v46  ;;  %v881_v35 = vpop.f32.mrb[23].mxu0  ;;  %11170 = vmatmul.mubr.msk.f32.gmra.mrb[20].mxu1 %vm930_vm3, %v20473_v55 }
 0x2ec   :  { %11172 = vmatprep.mubr.msk.f32.mxu1 %vm14447_vm2, %v20488_v19 }
 0x2ed   :  { %v20475_v38 = vmax.f32 %v15261_v63, 0.0 }
 0x2ee   :  { %v884_v49 = vpop.f32.mrb[24].mxu0 }
 0x2ef   :  { %v15270_v12 = vadd.f32 %v15164_v43, %v884_v49  ;;  %v886_v61 = vpop.f32.mrb[25].mxu0  ;;  %11173 = vmatmul.mubr.msk.f32.gmra.mrb[22].mxu1 %vm930_vm3, %v20475_v38 }
 0x2f0   :  { %11175 = vmatprep.mubr.msk.f32.mxu1 %vm14447_vm2, %v20488_v19 }
 0x2f1   :  { %v20477_v46 = vmax.f32 %v15270_v12, 0.0 }
 0x2f2   :  { %v889_v35 = vpop.f32.mrb[26].mxu0 }
 0x2f3   :  { %v15279_v55 = vadd.f32 %v15164_v43, %v889_v35  ;;  %v891_v52 = vpop.f32.mrb[27].mxu0  ;;  %11176 = vmatmul.mubr.msk.f32.gmra.mrb[24].mxu1 %vm930_vm3, %v20477_v46 }
 0x2f4   :  { %11178 = vmatprep.mubr.msk.f32.mxu1 %vm14447_vm2, %v20488_v19 }
 0x2f5   :  { %v20479_v61 = vmax.f32 %v15279_v55, 0.0 }
 0x2f6   :  { %v894_v49 = vpop.f32.mrb[28].mxu0 }
 0x2f7   :  { %v15288_v38 = vadd.f32 %v15164_v43, %v894_v49  ;;  %v896_v59 = vpop.f32.mrb[29].mxu0  ;;  %11179 = vmatmul.mubr.msk.f32.gmra.mrb[26].mxu1 %vm930_vm3, %v20479_v61 }
 0x2f8   :  { %11181 = vmatprep.mubr.msk.f32.mxu1 %vm14447_vm2, %v20488_v19 }
 0x2f9   :  { %v20480_v52 = vmax.f32 %v15288_v38, 0.0 }
 0x2fa   :  { %v899_v35 = vpop.f32.mrb[30].mxu0 }
 0x2fb   :  { %v15297_v46 = vadd.f32 %v15164_v43, %v899_v35  ;;  %v901_v4 = vpop.f32.mrb[31].mxu0  ;;  %11182 = vmatmul.mubr.msk.f32.gmra.mrb[28].mxu1 %vm930_vm3, %v20480_v52 }
 0x2fc   :  { %11184 = vmatprep.mubr.msk.f32.mxu1 %vm14447_vm2, %v20488_v19 }
 0x2fd   :  { %20644 = vst [vmem:[#allocation17_spill] sm:$0xff] %v15297_v46  ;;  %v20481_v59 = vmax.f32 %v15297_v46, 0.0 }
 0x2fe   :  { %v904_v49 = vpop.f32.mrb[32].mxu0 }
 0x2ff   :  { %v15306_v61 = vadd.f32 %v15164_v43, %v904_v49  ;;  %11185 = vmatmul.mubr.msk.f32.gmra.mrb[30].mxu1 %vm930_vm3, %v20481_v59  ;;  %v906_v35 = vpop.f32.mrb[33].mxu0  ;;  %v1308_v59 = vld [vmem:[%s20451_s11] sm:$0xff] }
 0x300   :  { %11187 = vmatprep.mubr.msk.f32.mxu1 %vm14447_vm2, %v20488_v19  ;;  %v1309_v35 = vld [vmem:[%s20451_s11 + $0x8] sm:$0xff] }
 0x301   :  { %20645 = vst [vmem:[#allocation18_spill] sm:$0xff] %v15306_v61  ;;  %v20484_v4 = vmax.f32 %v15306_v61, 0.0  ;;  %v13242_v39 = vpack.c.bf16 %v1309_v35, %v1308_v59 }
 0x303   :  { %11188 = vmatmul.mubr.msk.f32.gmra.mrb[32].mxu1 %vm930_vm3, %v20484_v4  ;;  %13243 = vmatpush3.bf16.msra.mxu0 %v13242_v39 }
 0x304   :  { %9538 = vmatprep.mubr.msk.f32.mxu1 %vm702_vm0, %v14865_v5  ;;  %v1311_v5 = vld [vmem:[%s20451_s11 + $0x18] sm:$0xff]  ;;  %13244 = vmatprep.subr.bf16.mxu0 %v20517_v16 }
 0x396   :  { %v1048_v52 = vpop.f32.mrb[0].mxu1 }
 0x397   :  { %v11141_v43 = vpop.f32.mrb[1].mxu1 }
 0x398   :  { %v13245_v43 = vpack.c.bf16 %v1311_v5, %v1310_v1 }
 0x39a   :  { %v1053_v49 = vpop.f32.mrb[2].mxu1  ;;  %13246 = vmatpush3.bf16.msra.mxu0 %v13245_v43 }
 0x39b   :  { %v13218_v42 = vpack.c.bf16 %v1053_v49, %v1048_v52  ;;  %v11144_v4 = vpop.f32.mrb[3].mxu1  ;;  %13247 = vmatprep.subr.bf16.mxu0 %v20517_v16 }
 0x39d   :  { %13219 = vmatpush1.bf16.msra.mxu1 %v13218_v42 }
 0x39e   :  { %v1058_v50 = vpop.f32.mrb[4].mxu1  ;;  %13220 = vmatprep.subr.bf16.mxu1 %v20517_v16 }
 0x39f   :  { %v11147_v47 = vpop.f32.mrb[5].mxu1 }
 0x3a2   :  { %v1063_v19 = vpop.f32.mrb[6].mxu1 }
 0x3a3   :  { %v13221_v52 = vpack.c.bf16 %v1063_v19, %v1058_v50  ;;  %v11150_v4 = vpop.f32.mrb[7].mxu1 }
 0x3a5   :  { %13222 = vmatpush1.bf16.msra.mxu1 %v13221_v52 }
 0x3a6   :  { %v1068_v59 = vpop.f32.mrb[8].mxu1  ;;  %13223 = vmatprep.subr.bf16.mxu1 %v20517_v16 }
 0x3a7   :  { %v11153_v49 = vpop.f32.mrb[9].mxu1 }
 0x3aa   :  { %v1073_v42 = vpop.f32.mrb[10].mxu1 }
 0x3ab   :  { %v13224_v39 = vpack.c.bf16 %v1073_v42, %v1068_v59  ;;  %v11156_v1 = vpop.f32.mrb[11].mxu1 }
 0x3ad   :  { %13225 = vmatpush1.bf16.msra.mxu1 %v13224_v39 }
 0x3ae   :  { %v1078_v35 = vpop.f32.mrb[12].mxu1  ;;  %13226 = vmatprep.subr.bf16.mxu1 %v20517_v16 }
 0x3af   :  { %v11159_v5 = vpop.f32.mrb[13].mxu1 }
 0x3b2   :  { %v1083_v47 = vpop.f32.mrb[14].mxu1 }
 0x3b3   :  { %v13227_v43 = vpack.c.bf16 %v1083_v47, %v1078_v35  ;;  %v11162_v61 = vpop.f32.mrb[15].mxu1 }
 0x3b5   :  { %13228 = vmatpush1.bf16.msra.mxu1 %v13227_v43 }
 0x3b6   :  { %v1088_v46 = vpop.f32.mrb[16].mxu1  ;;  %13229 = vmatprep.subr.bf16.mxu1 %v20517_v16 }
 0x3b7   :  { %v11165_v19 = vpop.f32.mrb[17].mxu1 }
 0x3ba   :  { %v1093_v50 = vpop.f32.mrb[18].mxu1 }
 0x3bb   :  { %v13230_v52 = vpack.c.bf16 %v1093_v50, %v1088_v46  ;;  %v11168_v4 = vpop.f32.mrb[19].mxu1 }
 0x3bd   :  { %13231 = vmatpush1.bf16.msra.mxu1 %v13230_v52 }
 0x3be   :  { %v1098_v49 = vpop.f32.mrb[20].mxu1  ;;  %13232 = vmatprep.subr.bf16.mxu1 %v20517_v16 }
 0x3bf   :  { %v11171_v59 = vpop.f32.mrb[21].mxu1 }
 0x3c2   :  { %v1103_v42 = vpop.f32.mrb[22].mxu1 }
 0x3c3   :  { %v13233_v39 = vpack.c.bf16 %v1103_v42, %v1098_v49  ;;  %v11174_v1 = vpop.f32.mrb[23].mxu1  ;;  %v20646_v49 = vmov 0.0  }
 0x3c5   :  { %13234 = vmatpush1.bf16.msra.mxu1 %v13233_v39 }
 0x3c6   :  { %v1108_v5 = vpop.f32.mrb[24].mxu1  ;;  %13235 = vmatprep.subr.bf16.mxu1 %v20517_v16 }
 0x3c7   :  { %v11177_v61 = vpop.f32.mrb[25].mxu1 }
 0x3ca   :  { %v1113_v35 = vpop.f32.mrb[26].mxu1 }
 0x3cb   :  { %v13236_v47 = vpack.c.bf16 %v1113_v35, %v1108_v5  ;;  %v11180_v43 = vpop.f32.mrb[27].mxu1 }
 0x3cd   :  { %13237 = vmatpush1.bf16.msra.mxu1 %v13236_v47 }
 0x3ce   :  { %v1118_v19 = vpop.f32.mrb[28].mxu1  ;;  %13238 = vmatprep.subr.bf16.mxu1 %v20517_v16 }
 0x3cf   :  { %v11183_v46 = vpop.f32.mrb[29].mxu1 }
 0x3d2   :  { %v1123_v50 = vpop.f32.mrb[30].mxu1 }
 0x3d3   :  { %v13239_v52 = vpack.c.bf16 %v1123_v50, %v1118_v19  ;;  %v11186_v4 = vpop.f32.mrb[31].mxu1 }
 0x3d5   :  { %13240 = vmatpush1.bf16.msra.mxu1 %v13239_v52 }
 0x3d6   :  { %v1128_v59 = vpop.f32.mrb[32].mxu1  ;;  %1173 = vmatprep.subr.mxu1 %v20646_v49 }
 0x3d7   :  { %v11189_v42 = vpop.f32.mrb[33].mxu1 }
 0x3d9   :  { %9537 = vmatpush1.msk.msra.mxu1 %vm754_vm1, %v1128_v59 }
 0x3da   :  { %1206 = vmatmul.mubr.f32.vlgmr.msra.gmra.mrb[34].mxu1 %v14937_v53  ;;  %13250 = vmatprep.subr.bf16.mxu1 %v20517_v16  ;;  %v1312_v53 = vld [vmem:[%s20451_s11 + $0x20] sm:$0xff] }
 0x3db   :  { %9539 = vmatprep.mubr.msk.f32.mxu1 %vm702_vm0, %v14942_v6  ;;  %v1313_v6 = vld [vmem:[%s20451_s11 + $0x28] sm:$0xff] }
 0x3de   :  { %1211 = vmatmul.mubr.f32.gmra.mrb[36].mxu1 %v14952_v54  ;;  %v13248_v54 = vpack.c.bf16 %v1313_v6, %v1312_v53 }
 0x3df   :  { %9540 = vmatprep.mubr.msk.f32.mxu1 %vm702_vm0, %v14957_v56  ;;  %v15402_v56 = vld [vmem:[%s20450_s10] ss:$0 sm:$0xff] }
 0x3e0   :  { %13249 = vmatpush3.bf16.msra.mxu0 %v13248_v54 }
 0x3e1   :  { %13274 = vmatprep.subr.bf16.mxu0 %v20517_v16 }
 0x3e2   :  { %1216 = vmatmul.mubr.f32.gmra.mrb[38].mxu1 %v14965_v60 }
 0x3e3   :  { %9541 = vmatprep.mubr.msk.f32.mxu1 %vm702_vm0, %v14970_v7 }
 0x3e6   :  { %1221 = vmatmul.mubr.f32.gmra.mrb[40].mxu1 %v14978_v8 }
 0x3e7   :  { %9542 = vmatprep.mubr.msk.f32.mxu1 %vm702_vm0, %v14983_v9 }
 0x3ea   :  { %1226 = vmatmul.mubr.f32.gmra.mrb[42].mxu1 %v14991_v10 }
 0x3eb   :  { %9543 = vmatprep.mubr.msk.f32.mxu1 %vm702_vm0, %v14996_v11 }
 0x3ee   :  { %1231 = vmatmul.mubr.f32.gmra.mrb[44].mxu1 %v15004_v13 }
 0x3ef   :  { %9544 = vmatprep.mubr.msk.f32.mxu1 %vm702_vm0, %v15009_v14 }
 0x3f2   :  { %1236 = vmatmul.mubr.f32.gmra.mrb[46].mxu1 %v15017_v27 }
 0x3f3   :  { %9545 = vmatprep.mubr.msk.f32.mxu1 %vm702_vm0, %v15022_v15 }
 0x3f6   :  { %1241 = vmatmul.mubr.f32.gmra.mrb[48].mxu1 %v15030_v18 }
 0x3f7   :  { %9546 = vmatprep.mubr.msk.f32.mxu1 %vm702_vm0, %v15035_v20 }
 0x3fa   :  { %1246 = vmatmul.mubr.f32.gmra.mrb[50].mxu1 %v15043_v29 }
 0x3fb   :  { %9547 = vmatprep.mubr.msk.f32.mxu1 %vm702_vm0, %v15048_v33 }
 0x3fe   :  { %1251 = vmatmul.mubr.f32.gmra.mrb[52].mxu1 %v15056_v21 }
 0x3ff   :  { %9548 = vmatprep.mubr.msk.f32.mxu1 %vm702_vm0, %v15061_v22 }
 0x402   :  { %1256 = vmatmul.mubr.f32.gmra.mrb[54].mxu1 %v15069_v23 }
 0x403   :  { %9549 = vmatprep.mubr.msk.f32.mxu1 %vm702_vm0, %v15074_v24 }
 0x406   :  { %1261 = vmatmul.mubr.f32.gmra.mrb[56].mxu1 %v15082_v25 }
 0x407   :  { %9550 = vmatprep.mubr.msk.f32.mxu1 %vm702_vm0, %v15087_v26 }
 0x40a   :  { %1266 = vmatmul.mubr.f32.gmra.mrb[58].mxu1 %v15095_v30 }
 0x40b   :  { %9551 = vmatprep.mubr.msk.f32.mxu1 %vm702_vm0, %v15100_v32 }
 0x40e   :  { %1271 = vmatmul.mubr.f32.gmra.mrb[60].mxu1 %v15108_v34 }
 0x40f   :  { %9552 = vmatprep.mubr.msk.f32.mxu1 %vm702_vm0, %v15113_v28 }
 0x412   :  { %1276 = vmatmul.mubr.f32.gmra.mrb[62].mxu1 %v15121_v51 }
 0x413   :  { %9553 = vmatprep.mubr.msk.f32.mxu1 %vm702_vm0, %v15126_v40 }
 0x416   :  { %1281 = vmatmul.mubr.f32.gmra.mrb[64].mxu1 %v15134_v41 }
 0x417   :  { %9554 = vmatprep.mubr.msk.f32.mxu1 %vm702_vm0, %v15139_v45 }
 0x41a   :  { %1286 = vmatmul.mubr.f32.gmra.mrb[66].mxu1 %v15147_v36 }
 0x4ad   :  { %v1207_v60 = vpop.f32.mrb[34].mxu1 }
 0x4ae   :  { %v15405_v7 = vadd.f32 %v15402_v56, %v1207_v60  ;;  %v1209_v8 = vpop.f32.mrb[35].mxu1 }
 0x4b0   :  { %v20508_v9 = vmax.f32 %v15405_v7, 0.0 }
 0x4b1   :  { %v1212_v10 = vpop.f32.mrb[36].mxu1 }
 0x4b2   :  { %v15409_v11 = vadd.f32 %v15402_v56, %v1212_v10  ;;  %v1214_v13 = vpop.f32.mrb[37].mxu1  ;;  %11203 = vmatmul.mubr.msk.f32.vlgmr.msra.gmra.mrb[34].mxu0 %vm1315_vm4, %v20508_v9 }
 0x4b3   :  { %11205 = vmatprep.mubr.msk.f32.mxu0 %vm14447_vm2, %v20646_v49 }
 0x4b4   :  { %v20507_v14 = vmax.f32 %v15409_v11, 0.0 }
 0x4b5   :  { %v1217_v27 = vpop.f32.mrb[38].mxu1 }
 0x4b6   :  { %v15418_v15 = vadd.f32 %v15402_v56, %v1217_v27  ;;  %v1219_v18 = vpop.f32.mrb[39].mxu1  ;;  %11206 = vmatmul.mubr.msk.f32.gmra.mrb[36].mxu0 %vm1315_vm4, %v20507_v14 }
 0x4b7   :  { %11208 = vmatprep.mubr.msk.f32.mxu0 %vm14447_vm2, %v20646_v49 }
 0x4b8   :  { %v20506_v20 = vmax.f32 %v15418_v15, 0.0 }
 0x4b9   :  { %v1222_v29 = vpop.f32.mrb[40].mxu1 }
 0x4ba   :  { %v15427_v33 = vadd.f32 %v15402_v56, %v1222_v29  ;;  %v1224_v21 = vpop.f32.mrb[41].mxu1  ;;  %11209 = vmatmul.mubr.msk.f32.gmra.mrb[38].mxu0 %vm1315_vm4, %v20506_v20 }
 0x4bb   :  { %11211 = vmatprep.mubr.msk.f32.mxu0 %vm14447_vm2, %v20646_v49 }
 0x4bc   :  { %v20505_v22 = vmax.f32 %v15427_v33, 0.0 }
 0x4bd   :  { %v1227_v23 = vpop.f32.mrb[42].mxu1 }
 0x4be   :  { %v15436_v24 = vadd.f32 %v15402_v56, %v1227_v23  ;;  %v1229_v25 = vpop.f32.mrb[43].mxu1  ;;  %11212 = vmatmul.mubr.msk.f32.gmra.mrb[40].mxu0 %vm1315_vm4, %v20505_v22 }
 0x4bf   :  { %11214 = vmatprep.mubr.msk.f32.mxu0 %vm14447_vm2, %v20646_v49 }
 0x4c0   :  { %v20504_v26 = vmax.f32 %v15436_v24, 0.0 }
 0x4c1   :  { %v1232_v30 = vpop.f32.mrb[44].mxu1 }
 0x4c2   :  { %v15445_v32 = vadd.f32 %v15402_v56, %v1232_v30  ;;  %v1234_v34 = vpop.f32.mrb[45].mxu1  ;;  %11215 = vmatmul.mubr.msk.f32.gmra.mrb[42].mxu0 %vm1315_vm4, %v20504_v26 }
 0x4c3   :  { %11217 = vmatprep.mubr.msk.f32.mxu0 %vm14447_vm2, %v20646_v49 }
 0x4c4   :  { %v20503_v28 = vmax.f32 %v15445_v32, 0.0 }
 0x4c5   :  { %v1237_v51 = vpop.f32.mrb[46].mxu1 }
 0x4c6   :  { %v15454_v40 = vadd.f32 %v15402_v56, %v1237_v51  ;;  %v1239_v41 = vpop.f32.mrb[47].mxu1  ;;  %11218 = vmatmul.mubr.msk.f32.gmra.mrb[44].mxu0 %vm1315_vm4, %v20503_v28 }
 0x4c7   :  { %11220 = vmatprep.mubr.msk.f32.mxu0 %vm14447_vm2, %v20646_v49 }
 0x4c8   :  { %v20502_v45 = vmax.f32 %v15454_v40, 0.0 }
 0x4c9   :  { %v1242_v36 = vpop.f32.mrb[48].mxu1 }
 0x4ca   :  { %v15463_v39 = vadd.f32 %v15402_v56, %v1242_v36  ;;  %v1244_v1 = vpop.f32.mrb[49].mxu1  ;;  %11221 = vmatmul.mubr.msk.f32.gmra.mrb[46].mxu0 %vm1315_vm4, %v20502_v45 }
 0x4cb   :  { %11223 = vmatprep.mubr.msk.f32.mxu0 %vm14447_vm2, %v20646_v49 }
 0x4cc   :  { %v20501_v5 = vmax.f32 %v15463_v39, 0.0 }
 0x4cd   :  { %v1247_v61 = vpop.f32.mrb[50].mxu1 }
 0x4ce   :  { %v15472_v35 = vadd.f32 %v15402_v56, %v1247_v61  ;;  %v1249_v47 = vpop.f32.mrb[51].mxu1  ;;  %11224 = vmatmul.mubr.msk.f32.gmra.mrb[48].mxu0 %vm1315_vm4, %v20501_v5 }
 0x4cf   :  { %11226 = vmatprep.mubr.msk.f32.mxu0 %vm14447_vm2, %v20646_v49 }
 0x4d0   :  { %v20500_v43 = vmax.f32 %v15472_v35, 0.0 }
 0x4d1   :  { %v1252_v19 = vpop.f32.mrb[52].mxu1 }
 0x4d2   :  { %v15481_v46 = vadd.f32 %v15402_v56, %v1252_v19  ;;  %v1254_v50 = vpop.f32.mrb[53].mxu1  ;;  %11227 = vmatmul.mubr.msk.f32.gmra.mrb[50].mxu0 %vm1315_vm4, %v20500_v43 }
 0x4d3   :  { %11229 = vmatprep.mubr.msk.f32.mxu0 %vm14447_vm2, %v20646_v49 }
 0x4d4   :  { %v20499_v52 = vmax.f32 %v15481_v46, 0.0 }
 0x4d5   :  { %v1257_v4 = vpop.f32.mrb[54].mxu1 }
 0x4d6   :  { %v15490_v59 = vadd.f32 %v15402_v56, %v1257_v4  ;;  %v1259_v42 = vpop.f32.mrb[55].mxu1  ;;  %11230 = vmatmul.mubr.msk.f32.gmra.mrb[52].mxu0 %vm1315_vm4, %v20499_v52 }
 0x4d7   :  { %11232 = vmatprep.mubr.msk.f32.mxu0 %vm14447_vm2, %v20646_v49 }
 0x4d8   :  { %v20498_v53 = vmax.f32 %v15490_v59, 0.0 }
 0x4d9   :  { %v1262_v6 = vpop.f32.mrb[56].mxu1 }
 0x4da   :  { %v15499_v54 = vadd.f32 %v15402_v56, %v1262_v6  ;;  %v1264_v60 = vpop.f32.mrb[57].mxu1  ;;  %11233 = vmatmul.mubr.msk.f32.gmra.mrb[54].mxu0 %vm1315_vm4, %v20498_v53  ;;  %v1672_v6 = vld [vmem:[%s20453_s13] sm:$0xff] }
 0x4db   :  { %11235 = vmatprep.mubr.msk.f32.mxu0 %vm14447_vm2, %v20646_v49  ;;  %v1673_v60 = vld [vmem:[%s20453_s13 + $0x8] sm:$0xff] }
 0x4dc   :  { %v20497_v8 = vmax.f32 %v15499_v54, 0.0 }
 0x4dd   :  { %v1267_v10 = vpop.f32.mrb[58].mxu1 }
 0x4de   :  { %v15508_v13 = vadd.f32 %v15402_v56, %v1267_v10  ;;  %v1269_v27 = vpop.f32.mrb[59].mxu1  ;;  %11236 = vmatmul.mubr.msk.f32.gmra.mrb[56].mxu0 %vm1315_vm4, %v20497_v8  ;;  %v1674_v10 = vld [vmem:[%s20453_s13 + $0x10] sm:$0xff] }
 0x4df   :  { %11238 = vmatprep.mubr.msk.f32.mxu0 %vm14447_vm2, %v20646_v49  ;;  %v13275_v27 = vpack.c.bf16 %v1673_v60, %v1672_v6 }
 0x4e0   :  { %v20496_v18 = vmax.f32 %v15508_v13, 0.0 }
 0x4e1   :  { %v1272_v29 = vpop.f32.mrb[60].mxu1  ;;  %13276 = vmatpush3.bf16.msra.mxu0 %v13275_v27 }
 0x4e2   :  { %v15517_v21 = vadd.f32 %v15402_v56, %v1272_v29  ;;  %v1274_v23 = vpop.f32.mrb[61].mxu1  ;;  %11239 = vmatmul.mubr.msk.f32.gmra.mrb[58].mxu0 %vm1315_vm4, %v20496_v18  ;;  %v1675_v29 = vld [vmem:[%s20453_s13 + $0x18] sm:$0xff]  ;;  %13277 = vmatprep.subr.bf16.mxu0 %v20517_v16 }
 0x4e3   :  { %11241 = vmatprep.mubr.msk.f32.mxu0 %vm14447_vm2, %v20646_v49  ;;  %v13278_v23 = vpack.c.bf16 %v1675_v29, %v1674_v10 }
 0x4e4   :  { %v20495_v25 = vmax.f32 %v15517_v21, 0.0 }
 0x4e5   :  { %v1277_v30 = vpop.f32.mrb[62].mxu1  ;;  %13279 = vmatpush3.bf16.msra.mxu0 %v13278_v23 }
 0x4e6   :  { %v15526_v34 = vadd.f32 %v15402_v56, %v1277_v30  ;;  %v1279_v51 = vpop.f32.mrb[63].mxu1  ;;  %11242 = vmatmul.mubr.msk.f32.gmra.mrb[60].mxu0 %vm1315_vm4, %v20495_v25  ;;  %v1676_v30 = vld [vmem:[%s20453_s13 + $0x20] sm:$0xff]  ;;  %13280 = vmatprep.subr.bf16.mxu0 %v20517_v16 }
 0x4e7   :  { %11244 = vmatprep.mubr.msk.f32.mxu0 %vm14447_vm2, %v20646_v49  ;;  %v1677_v51 = vld [vmem:[%s20453_s13 + $0x28] sm:$0xff] }
 0x4e8   :  { %v20494_v41 = vmax.f32 %v15526_v34, 0.0 }
 0x4e9   :  { %v1282_v36 = vpop.f32.mrb[64].mxu1 }
 0x4ea   :  { %v15535_v1 = vadd.f32 %v15402_v56, %v1282_v36  ;;  %v1284_v61 = vpop.f32.mrb[65].mxu1  ;;  %11245 = vmatmul.mubr.msk.f32.gmra.mrb[62].mxu0 %vm1315_vm4, %v20494_v41  ;;  %v13281_v36 = vpack.c.bf16 %v1677_v51, %v1676_v30 }
 0x4eb   :  { %11247 = vmatprep.mubr.msk.f32.mxu0 %vm14447_vm2, %v20646_v49 }
 0x4ec   :  { %v20493_v47 = vmax.f32 %v15535_v1, 0.0  ;;  %13282 = vmatpush3.bf16.msra.mxu0 %v13281_v36 }
 0x4ed   :  { %v1287_v19 = vpop.f32.mrb[66].mxu1  ;;  %13283 = vmatprep.subr.bf16.mxu0 %v20517_v16 }
 0x4ee   :  { %v15544_v50 = vadd.f32 %v15402_v56, %v1287_v19  ;;  %11248 = vmatmul.mubr.msk.f32.gmra.mrb[64].mxu0 %vm1315_vm4, %v20493_v47  ;;  %v1289_v4 = vpop.f32.mrb[67].mxu1  ;;  %v222_v56 = vld [vmem:[%s20647_s16 + $0x8] sm:$0xff] }
 0x4ef   :  { %11250 = vmatprep.mubr.msk.f32.mxu0 %vm14447_vm2, %v20646_v49  ;;  %9574 = vmatprep.mubr.msk.f32.mxu1 %vm702_vm0, %v222_v56 }
 0x4f0   :  { %v20492_v42 = vmax.f32 %v15544_v50, 0.0 }
 0x4f2   :  { %11251 = vmatmul.mubr.msk.f32.gmra.mrb[66].mxu0 %vm1315_vm4, %v20492_v42 }
 0x4f3   :  { %11269 = vmatprep.mubr.msk.f32.mxu0 %vm14447_vm2, %v20646_v49 }
 0x585   :  { %v1433_v61 = vpop.f32.mrb[34].mxu0 }
 0x586   :  { %v11204_v19 = vpop.f32.mrb[35].mxu0 }
 0x589   :  { %v1438_v4 = vpop.f32.mrb[36].mxu0 }
 0x58a   :  { %v13251_v56 = vpack.c.bf16 %v1438_v4, %v1433_v61  ;;  %v11207_v6 = vpop.f32.mrb[37].mxu0 }
 0x58c   :  { %13252 = vmatpush1.bf16.msra.mxu1 %v13251_v56 }
 0x58d   :  { %v1443_v60 = vpop.f32.mrb[38].mxu0  ;;  %13253 = vmatprep.subr.bf16.mxu1 %v20517_v16 }
 0x58e   :  { %v11210_v10 = vpop.f32.mrb[39].mxu0 }
 0x591   :  { %v1448_v27 = vpop.f32.mrb[40].mxu0 }
 0x592   :  { %v13254_v29 = vpack.c.bf16 %v1448_v27, %v1443_v60  ;;  %v11213_v42 = vpop.f32.mrb[41].mxu0 }
 0x594   :  { %13255 = vmatpush1.bf16.msra.mxu1 %v13254_v29 }
 0x595   :  { %v1453_v23 = vpop.f32.mrb[42].mxu0  ;;  %13256 = vmatprep.subr.bf16.mxu1 %v20517_v16 }
 0x596   :  { %v11216_v30 = vpop.f32.mrb[43].mxu0 }
 0x599   :  { %v1458_v51 = vpop.f32.mrb[44].mxu0 }
 0x59a   :  { %v13257_v36 = vpack.c.bf16 %v1458_v51, %v1453_v23  ;;  %v11219_v47 = vpop.f32.mrb[45].mxu0 }
 0x59c   :  { %13258 = vmatpush1.bf16.msra.mxu1 %v13257_v36 }
 0x59d   :  { %v1463_v19 = vpop.f32.mrb[46].mxu0  ;;  %13259 = vmatprep.subr.bf16.mxu1 %v20517_v16 }
 0x59e   :  { %v11222_v61 = vpop.f32.mrb[47].mxu0 }
 0x5a1   :  { %v1468_v4 = vpop.f32.mrb[48].mxu0 }
 0x5a2   :  { %v13260_v56 = vpack.c.bf16 %v1468_v4, %v1463_v19  ;;  %v11225_v6 = vpop.f32.mrb[49].mxu0 }
 0x5a4   :  { %13261 = vmatpush1.bf16.msra.mxu1 %v13260_v56 }
 0x5a5   :  { %v1473_v10 = vpop.f32.mrb[50].mxu0  ;;  %13262 = vmatprep.subr.bf16.mxu1 %v20517_v16 }
 0x5a6   :  { %v11228_v42 = vpop.f32.mrb[51].mxu0 }
 0x5a9   :  { %v1478_v60 = vpop.f32.mrb[52].mxu0 }
 0x5aa   :  { %v13263_v27 = vpack.c.bf16 %v1478_v60, %v1473_v10  ;;  %v11231_v29 = vpop.f32.mrb[53].mxu0 }
 0x5ac   :  { %13264 = vmatpush1.bf16.msra.mxu1 %v13263_v27 }
 0x5ad   :  { %v1483_v30 = vpop.f32.mrb[54].mxu0  ;;  %13265 = vmatprep.subr.bf16.mxu1 %v20517_v16 }
 0x5ae   :  { %v11234_v47 = vpop.f32.mrb[55].mxu0 }
 0x5b1   :  { %v1488_v23 = vpop.f32.mrb[56].mxu0 }
 0x5b2   :  { %v13266_v51 = vpack.c.bf16 %v1488_v23, %v1483_v30  ;;  %v11237_v36 = vpop.f32.mrb[57].mxu0  ;;  %v221_v23 = vld [vmem:[%s20647_s16] sm:$0xff] }
 0x5b3   :  { %v223_v36 = vld [vmem:[%s20647_s16 + $0x10] sm:$0xff] }
 0x5b4   :  { %13267 = vmatpush1.bf16.msra.mxu1 %v13266_v51  ;;  %v224_v51 = vld [vmem:[%s20647_s16 + $0x18] sm:$0xff] }
 0x5b5   :  { %v1493_v61 = vpop.f32.mrb[58].mxu0  ;;  %13268 = vmatprep.subr.bf16.mxu1 %v20517_v16 }
 0x5b6   :  { %v11240_v19 = vpop.f32.mrb[59].mxu0 }
 0x5b7   :  { %v225_v19 = vld [vmem:[%s20647_s16 + $0x20] sm:$0xff] }
 0x5b9   :  { %v1498_v4 = vpop.f32.mrb[60].mxu0 }
 0x5ba   :  { %v13269_v56 = vpack.c.bf16 %v1498_v4, %v1493_v61  ;;  %v11243_v6 = vpop.f32.mrb[61].mxu0  ;;  %v226_v61 = vld [vmem:[%s20647_s16 + $0x28] sm:$0xff]  ;;  %v228_v4 = vld [vmem:[%s20647_s16 + $0x38] sm:$0xff] }
 0x5bb   :  { %v230_v6 = vld [vmem:[%s20647_s16 + $0x48] sm:$0xff] }
 0x5bc   :  { %13270 = vmatpush1.bf16.msra.mxu1 %v13269_v56  ;;  %v227_v56 = vld [vmem:[%s20647_s16 + $0x30] sm:$0xff] }
 0x5bd   :  { %v1503_v42 = vpop.f32.mrb[62].mxu0  ;;  %13271 = vmatprep.subr.bf16.mxu1 %v20517_v16 }
 0x5be   :  { %v11246_v10 = vpop.f32.mrb[63].mxu0 }
 0x5bf   :  { %v232_v10 = vld [vmem:[%s20647_s16 + $0x58] sm:$0xff] }
 0x5c1   :  { %v1508_v60 = vpop.f32.mrb[64].mxu0 }
 0x5c2   :  { %v13272_v27 = vpack.c.bf16 %v1508_v60, %v1503_v42  ;;  %v11249_v29 = vpop.f32.mrb[65].mxu0  ;;  %v229_v42 = vld [vmem:[%s20647_s16 + $0x40] sm:$0xff]  ;;  %v231_v60 = vld [vmem:[%s20647_s16 + $0x50] sm:$0xff] }
 0x5c3   :  { %v233_v29 = vld [vmem:[%s20647_s16 + $0x60] sm:$0xff] }
 0x5c4   :  { %13273 = vmatpush1.bf16.msra.mxu1 %v13272_v27  ;;  %v234_v27 = vld [vmem:[%s20647_s16 + $0x68] sm:$0xff] }
 0x5c5   :  { %v1513_v47 = vpop.f32.mrb[66].mxu0  ;;  %1585 = vmatprep.subr.mxu1 %v20646_v49 }
 0x5c6   :  { %v11252_v30 = vpop.f32.mrb[67].mxu0 }
 0x5c7   :  { %v235_v30 = vld [vmem:[%s20647_s16 + $0x70] sm:$0xff] }
 0x5c8   :  { %9573 = vmatpush1.msk.msra.mxu1 %vm754_vm1, %v1513_v47  ;;  %v236_v47 = vld [vmem:[%s20647_s16 + $0x78] sm:$0xff] }
 0x5c9   :  { %1618 = vmatmul.mubr.f32.vlgmr.msra.gmra.mrb[68].mxu1 %v221_v23  ;;  %13286 = vmatprep.subr.bf16.mxu1 %v20517_v16  ;;  %v238_v23 = vld [vmem:[%s20647_s16 + $0x88] sm:$0xf] }
 0x5ca   :  { %9575 = vmatprep.mubr.msk.f32.mxu1 %vm702_vm0, %v224_v51  ;;  %v237_v51 = vld [vmem:[%s20647_s16 + $0x80] sm:$0xf] }
 0x5cd   :  { %1623 = vmatmul.mubr.f32.gmra.mrb[70].mxu1 %v223_v36  ;;  %v1678_v36 = vld [vmem:[%s20453_s13 + $0x30] sm:$0xff] }
 0x5ce   :  { %9576 = vmatprep.mubr.msk.f32.mxu1 %vm702_vm0, %v226_v61  ;;  %v1679_v61 = vld [vmem:[%s20453_s13 + $0x38] sm:$0xff] }
 0x5d1   :  { %1628 = vmatmul.mubr.f32.gmra.mrb[72].mxu1 %v225_v19  ;;  %v13284_v19 = vpack.c.bf16 %v1679_v61, %v1678_v36 }
 0x5d2   :  { %9577 = vmatprep.mubr.msk.f32.mxu1 %vm702_vm0, %v228_v4  ;;  %v9572_v4 = vld [vmem:[#allocation6] ss:$0 sm:$0xff] }
 0x5d3   :  { %13285 = vmatpush3.bf16.msra.mxu0 %v13284_v19 }
 0x5d4   :  { %13304 = vmatprep.subr.bf16.mxu0 %v20517_v16 }
 0x5d5   :  { %1633 = vmatmul.mubr.f32.gmra.mrb[74].mxu1 %v227_v56 }
 0x5d6   :  { %9578 = vmatprep.mubr.msk.f32.mxu1 %vm702_vm0, %v230_v6 }
 0x5d9   :  { %1638 = vmatmul.mubr.f32.gmra.mrb[76].mxu1 %v229_v42 }
 0x5da   :  { %9579 = vmatprep.mubr.msk.f32.mxu1 %vm702_vm0, %v232_v10 }
 0x5dd   :  { %1643 = vmatmul.mubr.f32.gmra.mrb[78].mxu1 %v231_v60 }
 0x5de   :  { %9580 = vmatprep.mubr.msk.f32.mxu1 %vm702_vm0, %v234_v27 }
 0x5e1   :  { %1648 = vmatmul.mubr.f32.gmra.mrb[80].mxu1 %v233_v29 }
 0x5e2   :  { %9581 = vmatprep.mubr.msk.f32.mxu1 %vm702_vm0, %v236_v47 }
 0x5e5   :  { %1653 = vmatmul.mubr.f32.gmra.mrb[82].mxu1 %v235_v30 }
 0x5e6   :  { %9582 = vmatprep.mubr.msk.f32.mxu1 %vm702_vm0, %v238_v23 }
 0x5e9   :  { %1658 = vmatmul.mubr.f32.gmra.mrb[84].mxu1 %v237_v51 }
 0x5ea   :  { %11314 = vmatprep.mubr.msk.f32.mxu1 %vm14447_vm2, %v20646_v49 }
 0x69c   :  { %v1619_v56 = vpop.f32.mrb[68].mxu1 }
 0x69d   :  { %v15660_v6 = vadd.f32 %v9572_v4, %v1619_v56  ;;  %v1621_v42 = vpop.f32.mrb[69].mxu1 }
 0x69f   :  { %v1663_v10 = vmax.f32 %v15660_v6, 0.0 }
 0x6a0   :  { %v1624_v60 = vpop.f32.mrb[70].mxu1 }
 0x6a1   :  { %v15663_v27 = vadd.f32 %v9572_v4, %v1624_v60  ;;  %v1626_v29 = vpop.f32.mrb[71].mxu1  ;;  %11270 = vmatmul.mubr.msk.f32.vlgmr.msra.gmra.mrb[68].mxu0 %vm1681_vm5, %v1663_v10 }
 0x6a2   :  { %11272 = vmatprep.mubr.msk.f32.mxu0 %vm14447_vm2, %v20646_v49 }
 0x6a3   :  { %v20516_v47 = vmax.f32 %v15663_v27, 0.0 }
 0x6a4   :  { %v1629_v30 = vpop.f32.mrb[72].mxu1 }
 0x6a5   :  { %v15671_v23 = vadd.f32 %v9572_v4, %v1629_v30  ;;  %v1631_v51 = vpop.f32.mrb[73].mxu1  ;;  %11273 = vmatmul.mubr.msk.f32.gmra.mrb[70].mxu0 %vm1681_vm5, %v20516_v47 }
 0x6a6   :  { %11275 = vmatprep.mubr.msk.f32.mxu0 %vm14447_vm2, %v20646_v49 }
 0x6a7   :  { %v20515_v36 = vmax.f32 %v15671_v23, 0.0  ;;  %v20650_v6 = vmax.f32 %v15671_v23, 0.0 }
 0x6a8   :  { %v1634_v61 = vpop.f32.mrb[74].mxu1 }
 0x6a9   :  { %v15679_v19 = vadd.f32 %v9572_v4, %v1634_v61  ;;  %v1636_v56 = vpop.f32.mrb[75].mxu1  ;;  %11276 = vmatmul.mubr.msk.f32.gmra.mrb[72].mxu0 %vm1681_vm5, %v20515_v36 }
 0x6aa   :  { %11278 = vmatprep.mubr.msk.f32.mxu0 %vm14447_vm2, %v20646_v49 }
 0x6ab   :  { %v20514_v42 = vmax.f32 %v15679_v19, 0.0 }
 0x6ac   :  { %v1639_v60 = vpop.f32.mrb[76].mxu1 }
 0x6ad   :  { %v15687_v29 = vadd.f32 %v9572_v4, %v1639_v60  ;;  %v1641_v30 = vpop.f32.mrb[77].mxu1  ;;  %11279 = vmatmul.mubr.msk.f32.gmra.mrb[74].mxu0 %vm1681_vm5, %v20514_v42 }
 0x6ae   :  { %11281 = vmatprep.mubr.msk.f32.mxu0 %vm14447_vm2, %v20646_v49 }
 0x6af   :  { %v20513_v51 = vmax.f32 %v15687_v29, 0.0  ;;  %v20652_v23 = vmax.f32 %v15687_v29, 0.0 }
 0x6b0   :  { %v1644_v61 = vpop.f32.mrb[78].mxu1 }
 0x6b1   :  { %v15695_v56 = vadd.f32 %v9572_v4, %v1644_v61  ;;  %v1646_v41 = vpop.f32.mrb[79].mxu1  ;;  %11282 = vmatmul.mubr.msk.f32.gmra.mrb[76].mxu0 %vm1681_vm5, %v20513_v51 }
 0x6b2   :  { %11284 = vmatprep.mubr.msk.f32.mxu0 %vm14447_vm2, %v20646_v49 }
 0x6b3   :  { %v20512_v60 = vmax.f32 %v15695_v56, 0.0 }
 0x6b4   :  { %v1649_v30 = vpop.f32.mrb[80].mxu1 }
 0x6b5   :  { %v15703_v25 = vadd.f32 %v9572_v4, %v1649_v30  ;;  %v1651_v18 = vpop.f32.mrb[81].mxu1  ;;  %11285 = vmatmul.mubr.msk.f32.gmra.mrb[78].mxu0 %vm1681_vm5, %v20512_v60 }
 0x6b6   :  { %11287 = vmatprep.mubr.msk.f32.mxu0 %vm14447_vm2, %v20646_v49 }
 0x6b7   :  { %v20511_v41 = vmax.f32 %v15703_v25, 0.0  ;;  %v20654_v29 = vmax.f32 %v15703_v25, 0.0 }
 0x6b8   :  { %v1654_v61 = vpop.f32.mrb[82].mxu1 }
 0x6b9   :  { %v15711_v8 = vadd.f32 %v9572_v4, %v1654_v61  ;;  %v1656_v53 = vpop.f32.mrb[83].mxu1  ;;  %11288 = vmatmul.mubr.msk.f32.gmra.mrb[80].mxu0 %vm1681_vm5, %v20511_v41 }
 0x6ba   :  { %11290 = vmatprep.mubr.msk.f32.mxu0 %vm14447_vm2, %v20646_v49 }
 0x6bb   :  { %v20510_v18 = vmax.f32 %v15711_v8, 0.0 }
 0x6bc   :  { %v1659_v30 = vpop.f32.mrb[84].mxu1 }
 0x6bd   :  { %v15719_v52 = vadd.f32 %v9572_v4, %v1659_v30  ;;  %11291 = vmatmul.mubr.msk.f32.gmra.mrb[82].mxu0 %vm1681_vm5, %v20510_v18  ;;  %v1661_v43 = vpop.f32.mrb[85].mxu1 }
 0x6be   :  { %11293 = vmatprep.mubr.msk.f32.mxu0 %vm14447_vm2, %v20646_v49 }
 0x6bf   :  { %v20509_v53 = vmax.f32 %v15719_v52, 0.0  ;;  %v20656_v25 = vmax.f32 %v15719_v52, 0.0 }
 0x6c1   :  { %11294 = vmatmul.mubr.msk.f32.gmra.mrb[84].mxu0 %vm1681_vm5, %v20509_v53 }
 0x6c2   :  { %11382 = vmatprep.mubr.msk.f32.mxu0 %vm14447_vm2, %v20646_v49 }
 0x774   :  { %v1775_v61 = vpop.f32.mrb[68].mxu0 }
 0x775   :  { %v11271_v4 = vpop.f32.mrb[69].mxu0 }
 0x778   :  { %v1780_v30 = vpop.f32.mrb[70].mxu0 }
 0x779   :  { %v13287_v5 = vpack.c.bf16 %v1780_v30, %v1775_v61  ;;  %v11274_v45 = vpop.f32.mrb[71].mxu0 }
 0x77b   :  { %13288 = vmatpush3.bf16.msra.mxu1 %v13287_v5 }
 0x77c   :  { %v1785_v28 = vpop.f32.mrb[72].mxu0  ;;  %13289 = vmatprep.subr.bf16.mxu1 %v20517_v16 }
 0x77d   :  { %v11277_v43 = vpop.f32.mrb[73].mxu0 }
 0x780   :  { %v1790_v26 = vpop.f32.mrb[74].mxu0 }
 0x781   :  { %v13290_v22 = vpack.c.bf16 %v1790_v26, %v1785_v28  ;;  %v11280_v20 = vpop.f32.mrb[75].mxu0  ;;  %v242_v26 = vld [vmem:[#allocation4 + $0x18] sm:$0xff]  ;;  %v243_v28 = vld [vmem:[#allocation4 + $0x20] sm:$0x3] }
 0x783   :  { %13291 = vmatpush3.bf16.msra.mxu1 %v13290_v22  ;;  %v239_v22 = vld [vmem:[#allocation4] sm:$0xff] }
 0x784   :  { %v1795_v14 = vpop.f32.mrb[76].mxu0  ;;  %13292 = vmatprep.subr.bf16.mxu1 %v20517_v16 }
 0x785   :  { %v11283_v9 = vpop.f32.mrb[77].mxu0 }
 0x786   :  { %v240_v9 = vld [vmem:[#allocation4 + $0x8] sm:$0xff] }
 0x788   :  { %v1800_v53 = vpop.f32.mrb[78].mxu0 }
 0x789   :  { %v13293_v18 = vpack.c.bf16 %v1800_v53, %v1795_v14  ;;  %v11286_v41 = vpop.f32.mrb[79].mxu0  ;;  %v241_v14 = vld [vmem:[#allocation4 + $0x10] sm:$0xff]  ;;  %v2084_v53 = vld [vmem:[%s20455_s15 + $0x10] sm:$0xff] }
 0x78a   :  { %v2082_v41 = vld [vmem:[%s20455_s15] sm:$0xff] }
 0x78b   :  { %13294 = vmatpush3.bf16.msra.mxu1 %v13293_v18  ;;  %v2083_v18 = vld [vmem:[%s20455_s15 + $0x8] sm:$0xff] }
 0x78c   :  { %v1805_v4 = vpop.f32.mrb[80].mxu0  ;;  %13295 = vmatprep.subr.bf16.mxu1 %v20517_v16 }
 0x78d   :  { %v11289_v45 = vpop.f32.mrb[81].mxu0 }
 0x78e   :  { %v2085_v45 = vld [vmem:[%s20455_s15 + $0x18] sm:$0xff] }
 0x790   :  { %v1810_v5 = vpop.f32.mrb[82].mxu0 }
 0x791   :  { %v13296_v61 = vpack.c.bf16 %v1810_v5, %v1805_v4  ;;  %v11292_v30 = vpop.f32.mrb[83].mxu0  ;;  %v13305_v4 = vpack.c.bf16 %v2083_v18, %v2082_v41  ;;  %v13308_v5 = vpack.c.bf16 %v2085_v45, %v2084_v53 }
 0x792   :  { %v2087_v30 = vld [vmem:[%s20455_s15 + $0x28] sm:$0xff] }
 0x793   :  { %13297 = vmatpush3.bf16.msra.mxu1 %v13296_v61  ;;  %13306 = vmatpush3.bf16.msra.mxu0 %v13305_v4  ;;  %v2086_v61 = vld [vmem:[%s20455_s15 + $0x20] sm:$0xff] }
 0x794   :  { %v1815_v43 = vpop.f32.mrb[84].mxu0  ;;  %11312 = vmatprep.subr.mxu1 %v20646_v49  ;;  %13307 = vmatprep.subr.bf16.mxu0 %v20517_v16 }
 0x795   :  { %v11295_v20 = vpop.f32.mrb[85].mxu0 }
 0x796   :  { %v9592_v20 = vld [vmem:[#allocation7] ss:$0 sm:$0xff] }
 0x797   :  { %11313 = vmatpush3.msk.msra.mxu1 %vm1841_vm6, %v1815_v43  ;;  %13309 = vmatpush3.bf16.msra.mxu0 %v13308_v5  ;;  %v13311_v43 = vpack.c.bf16 %v2087_v30, %v2086_v61 }
 0x798   :  { %11315 = vmatmul.mubr.msk.f32.vlgmr.msra.gmra.mrb[86].mxu1 %vm1825_vm7, %v239_v22  ;;  %13298 = vmatprep.subr.bf16.mxu1 %v20517_v16 }
 0x799   :  { %11317 = vmatprep.mubr.msk.f32.mxu1 %vm14447_vm2, %v20646_v49  ;;  %13310 = vmatprep.subr.bf16.mxu0 %v20517_v16 }
 0x79b   :  { %13312 = vmatpush3.bf16.msra.mxu0 %v13311_v43 }
 0x79c   :  { %11318 = vmatmul.mubr.msk.f32.gmra.mrb[88].mxu1 %vm1825_vm7, %v240_v9  ;;  %13313 = vmatprep.subr.bf16.mxu0 %v20517_v16 }
 0x79d   :  { %11320 = vmatprep.mubr.msk.f32.mxu1 %vm14447_vm2, %v20646_v49 }
 0x7a0   :  { %11321 = vmatmul.mubr.msk.f32.gmra.mrb[90].mxu1 %vm1825_vm7, %v241_v14 }
 0x7a1   :  { %11323 = vmatprep.mubr.msk.f32.mxu1 %vm14447_vm2, %v20646_v49 }
 0x7a4   :  { %11324 = vmatmul.mubr.msk.f32.gmra.mrb[92].mxu1 %vm1825_vm7, %v242_v26 }
 0x7a5   :  { %11326 = vmatprep.mubr.msk.f32.mxu1 %vm14447_vm2, %v20646_v49 }
 0x7a8   :  { %11327 = vmatmul.mubr.msk.f32.gmra.mrb[94].mxu1 %vm1825_vm7, %v243_v28 }
 0x7a9   :  { %11339 = vmatprep.mubr.msk.f32.mxu1 %vm14447_vm2, %v20646_v49 }
 0x86b   :  { %v1911_v22 = vpop.f32.mrb[86].mxu1 }
 0x86c   :  { %v11316_v9 = vpop.f32.mrb[87].mxu1  ;;  %v1912_v14 = vadd.f32 %v9592_v20, %v1911_v22 }
 0x86e   :  { %v1935_v18 = vmax.f32 %v1912_v14, 0.0  ;;  %v250_v14 = vld [vmem:[%s20648_s26 + $0x30] sm:$0xff] }
 0x86f   :  { %v1916_v26 = vpop.f32.mrb[88].mxu1 }
 0x870   :  { %v1917_v28 = vadd.f32 %v9592_v20, %v1916_v26  ;;  %v11319_v41 = vpop.f32.mrb[89].mxu1 }
 0x871   :  { %v252_v41 = vld [vmem:[%s20648_s26 + $0x40] sm:$0xf] }
 0x872   :  { %v1936_v53 = vmax.f32 %v1917_v28, 0.0  ;;  %v251_v28 = vld [vmem:[%s20648_s26 + $0x38] sm:$0xff] }
 0x873   :  { %v1921_v4 = vpop.f32.mrb[90].mxu1 }
 0x874   :  { %v13299_v45 = vpack.c.bf16 %v1936_v53, %v1935_v18  ;;  %v11322_v60 = vpop.f32.mrb[91].mxu1  ;;  %v1922_v51 = vadd.f32 %v9592_v20, %v1921_v4  ;;  %v2088_v18 = vld [vmem:[%s20455_s15 + $0x30] sm:$0xff]  ;;  %v2089_v53 = vld [vmem:[%s20455_s15 + $0x38] sm:$0xff] }
 0x875   :  { %v244_v60 = vld [vmem:[%s20648_s26] sm:$0xff]  ;;  %v13314_v4 = vpack.c.bf16 %v2089_v53, %v2088_v18 }
 0x876   :  { %13300 = vmatpush3.bf16.msra.mxu1 %v13299_v45  ;;  %v1937_v43 = vmax.f32 %v1922_v51, 0.0  ;;  %v248_v51 = vld [vmem:[%s20648_s26 + $0x20] sm:$0xff] }
 0x877   :  { %v1926_v5 = vpop.f32.mrb[92].mxu1  ;;  %13301 = vmatprep.subr.bf16.mxu1 %v20517_v16  ;;  %13315 = vmatpush3.bf16.msra.mxu0 %v13314_v4 }
 0x878   :  { %v1927_v61 = vadd.f32 %v9592_v20, %v1926_v5  ;;  %v11325_v30 = vpop.f32.mrb[93].mxu1  ;;  %13328 = vmatprep.subr.bf16.mxu0 %v20517_v16 }
 0x87a   :  { %v1938_v42 = vmax.f32 %v1927_v61, 0.0 }
 0x87b   :  { %v1931_v36 = vpop.f32.mrb[94].mxu1 }
 0x87c   :  { %v13302_v9 = vpack.c.bf16 %v1938_v42, %v1937_v43  ;;  %v1932_v22 = vadd.f32 %v9592_v20, %v1931_v36  ;;  %v11328_v47 = vpop.f32.mrb[95].mxu1  ;;  %v246_v36 = vld [vmem:[%s20648_s26 + $0x10] sm:$0xff]  ;;  %v247_v42 = vld [vmem:[%s20648_s26 + $0x18] sm:$0xff]  ;;  %v249_v20 = vld [vmem:[%s20648_s26 + $0x28] sm:$0xff]  ;;  %v20649_v43 = vmax.f32 %v15663_v27, 0.0  ;;  %v20651_v27 = vmax.f32 %v15679_v19, 0.0 }
 0x87d   :  { %v245_v47 = vld [vmem:[%s20648_s26 + $0x8] sm:$0xff]  ;;  %v20653_v19 = vmax.f32 %v15695_v56, 0.0  ;;  %v20655_v56 = vmax.f32 %v15711_v8, 0.0 }
 0x87e   :  { %v1939_v26 = vmax.f32 %v1932_v22, 0.0  ;;  %13303 = vmatpush3.bf16.msra.mxu1 %v13302_v9 }
 0x87f   :  { %11337 = vmatprep.subr.mxu1 %v20646_v49 }
 0x882   :  { %11338 = vmatpush3.msk.msra.mxu1 %vm1968_vm8, %v1939_v26 }
 0x883   :  { %11340 = vmatmul.mubr.msk.f32.vlgmr.msra.gmra.mrb[96].mxu1 %vm1940_vm9, %v244_v60  ;;  %13316 = vmatprep.subr.bf16.mxu1 %v20517_v16 }
 0x884   :  { %11342 = vmatprep.mubr.msk.f32.mxu1 %vm14447_vm2, %v20646_v49 }
 0x887   :  { %11343 = vmatmul.mubr.msk.f32.gmra.mrb[98].mxu1 %vm1940_vm9, %v245_v47 }
 0x888   :  { %11345 = vmatprep.mubr.msk.f32.mxu1 %vm14447_vm2, %v20646_v49 }
 0x88b   :  { %11346 = vmatmul.mubr.msk.f32.gmra.mrb[100].mxu1 %vm1940_vm9, %v246_v36 }
 0x88c   :  { %11348 = vmatprep.mubr.msk.f32.mxu1 %vm14447_vm2, %v20646_v49 }
 0x88f   :  { %11349 = vmatmul.mubr.msk.f32.gmra.mrb[102].mxu1 %vm1940_vm9, %v247_v42 }
 0x890   :  { %11351 = vmatprep.mubr.msk.f32.mxu1 %vm14447_vm2, %v20646_v49 }
 0x893   :  { %11352 = vmatmul.mubr.msk.f32.gmra.mrb[104].mxu1 %vm1940_vm9, %v248_v51 }
 0x894   :  { %11354 = vmatprep.mubr.msk.f32.mxu1 %vm14447_vm2, %v20646_v49 }
 0x897   :  { %11355 = vmatmul.mubr.msk.f32.gmra.mrb[106].mxu1 %vm1940_vm9, %v249_v20 }
 0x898   :  { %11357 = vmatprep.mubr.msk.f32.mxu1 %vm14447_vm2, %v20646_v49 }
 0x89b   :  { %11358 = vmatmul.mubr.msk.f32.gmra.mrb[108].mxu1 %vm1940_vm9, %v250_v14 }
 0x89c   :  { %11360 = vmatprep.mubr.msk.f32.mxu1 %vm14447_vm2, %v20646_v49 }
 0x89f   :  { %11361 = vmatmul.mubr.msk.f32.gmra.mrb[110].mxu1 %vm1940_vm9, %v251_v28 }
 0x8a0   :  { %11363 = vmatprep.mubr.msk.f32.mxu1 %vm14447_vm2, %v20646_v49 }
 0x8a3   :  { %11364 = vmatmul.mubr.msk.f32.gmra.mrb[112].mxu1 %vm1940_vm9, %v252_v41 }
 0x8a4   :  { %11427 = vmatprep.mubr.msk.f32.mxu1 %vm14447_vm2, %v20646_v49 }
 0x956   :  { %v2038_v45 = vpop.f32.mrb[96].mxu1 }
 0x957   :  { %v2039_v5 = vadd.f32 %v2038_v45, %v1663_v10  ;;  %v11341_v61 = vpop.f32.mrb[97].mxu1 }
 0x959   :  { %11383 = vmatmul.mubr.msk.f32.vlgmr.msra.gmra.mrb[86].mxu0 %vm1681_vm5, %v2039_v5 }
 0x95a   :  { %v2043_v30 = vpop.f32.mrb[98].mxu1  ;;  %11385 = vmatprep.mubr.msk.f32.mxu0 %vm14447_vm2, %v20646_v49 }
 0x95b   :  { %v2044_v9 = vadd.f32 %v2043_v30, %v20649_v43  ;;  %v11344_v22 = vpop.f32.mrb[99].mxu1 }
 0x95d   :  { %11386 = vmatmul.mubr.msk.f32.gmra.mrb[88].mxu0 %vm1681_vm5, %v2044_v9 }
 0x95e   :  { %v2048_v26 = vpop.f32.mrb[100].mxu1  ;;  %11388 = vmatprep.mubr.msk.f32.mxu0 %vm14447_vm2, %v20646_v49 }
 0x95f   :  { %v2049_v10 = vadd.f32 %v2048_v26, %v20650_v6  ;;  %v11347_v60 = vpop.f32.mrb[101].mxu1 }
 0x961   :  { %11389 = vmatmul.mubr.msk.f32.gmra.mrb[90].mxu0 %vm1681_vm5, %v2049_v10 }
 0x962   :  { %v2053_v47 = vpop.f32.mrb[102].mxu1  ;;  %11391 = vmatprep.mubr.msk.f32.mxu0 %vm14447_vm2, %v20646_v49 }
 0x963   :  { %v2054_v36 = vadd.f32 %v2053_v47, %v20651_v27  ;;  %v11350_v42 = vpop.f32.mrb[103].mxu1 }
 0x965   :  { %11392 = vmatmul.mubr.msk.f32.gmra.mrb[92].mxu0 %vm1681_vm5, %v2054_v36 }
 0x966   :  { %v2058_v51 = vpop.f32.mrb[104].mxu1  ;;  %11394 = vmatprep.mubr.msk.f32.mxu0 %vm14447_vm2, %v20646_v49 }
 0x967   :  { %v2059_v20 = vadd.f32 %v2058_v51, %v20652_v23  ;;  %v11353_v14 = vpop.f32.mrb[105].mxu1 }
 0x969   :  { %11395 = vmatmul.mubr.msk.f32.gmra.mrb[94].mxu0 %vm1681_vm5, %v2059_v20 }
 0x96a   :  { %v2063_v28 = vpop.f32.mrb[106].mxu1  ;;  %11397 = vmatprep.mubr.msk.f32.mxu0 %vm14447_vm2, %v20646_v49 }
 0x96b   :  { %v2064_v41 = vadd.f32 %v2063_v28, %v20653_v19  ;;  %v11356_v18 = vpop.f32.mrb[107].mxu1 }
 0x96d   :  { %11398 = vmatmul.mubr.msk.f32.gmra.mrb[96].mxu0 %vm1681_vm5, %v2064_v41 }
 0x96e   :  { %v2068_v53 = vpop.f32.mrb[108].mxu1  ;;  %11400 = vmatprep.mubr.msk.f32.mxu0 %vm14447_vm2, %v20646_v49 }
 0x96f   :  { %v2069_v4 = vadd.f32 %v2068_v53, %v20654_v29  ;;  %v11359_v45 = vpop.f32.mrb[109].mxu1 }
 0x971   :  { %11401 = vmatmul.mubr.msk.f32.gmra.mrb[98].mxu0 %vm1681_vm5, %v2069_v4 }
 0x972   :  { %v2073_v5 = vpop.f32.mrb[110].mxu1  ;;  %11403 = vmatprep.mubr.msk.f32.mxu0 %vm14447_vm2, %v20646_v49 }
 0x973   :  { %v2074_v61 = vadd.f32 %v2073_v5, %v20655_v56  ;;  %v11362_v30 = vpop.f32.mrb[111].mxu1  ;;  %v212_v5 = vld [vmem:[#allocation2] sm:$0xff]  ;;  %v213_v56 = vld [vmem:[#allocation2 + $0x8] sm:$0xff] }
 0x974   :  { %v215_v30 = vld [vmem:[#allocation2 + $0x18] sm:$0xff] }
 0x975   :  { %11404 = vmatmul.mubr.msk.f32.gmra.mrb[100].mxu0 %vm1681_vm5, %v2074_v61  ;;  %v214_v61 = vld [vmem:[#allocation2 + $0x10] sm:$0xff] }
 0x976   :  { %v2078_v43 = vpop.f32.mrb[112].mxu1  ;;  %11406 = vmatprep.mubr.msk.f32.mxu0 %vm14447_vm2, %v20646_v49 }
 0x977   :  { %v2079_v9 = vadd.f32 %v2078_v43, %v20656_v25  ;;  %v11365_v22 = vpop.f32.mrb[113].mxu1  ;;  %v216_v43 = vld [vmem:[#allocation2 + $0x20] sm:$0xff]  ;;  %v217_v25 = vld [vmem:[#allocation2 + $0x28] sm:$0xff] }
 0x978   :  { %v219_v22 = vld [vmem:[#allocation2 + $0x38] sm:$0xff] }
 0x979   :  { %11407 = vmatmul.mubr.msk.f32.gmra.mrb[102].mxu0 %vm1681_vm5, %v2079_v9  ;;  %v218_v9 = vld [vmem:[#allocation2 + $0x30] sm:$0xff] }
 0x97a   :  { %11472 = vmatprep.mubr.msk.f32.mxu0 %vm14447_vm2, %v20646_v49 }
 0xa2c   :  { %v2184_v26 = vpop.f32.mrb[86].mxu0 }
 0xa2d   :  { %v11384_v6 = vpop.f32.mrb[87].mxu0 }
 0xa2e   :  { %v2587_v6 = vld [vmem:[%s20457_s17] sm:$0xff] }
 0xa30   :  { %v2189_v8 = vpop.f32.mrb[88].mxu0 }
 0xa31   :  { %v13317_v10 = vpack.c.bf16 %v2189_v8, %v2184_v26  ;;  %v11387_v60 = vpop.f32.mrb[89].mxu0  ;;  %v220_v26 = vld [vmem:[#allocation2 + $0x40] sm:$0xf]  ;;  %v2588_v8 = vld [vmem:[%s20457_s17 + $0x8] sm:$0xff] }
 0xa32   :  { %v13341_v60 = vpack.c.bf16 %v2588_v8, %v2587_v6 }
 0xa33   :  { %13318 = vmatpush3.bf16.msra.mxu1 %v13317_v10  ;;  %v2589_v10 = vld [vmem:[%s20457_s17 + $0x10] sm:$0xff] }
 0xa34   :  { %v2194_v47 = vpop.f32.mrb[90].mxu0  ;;  %13319 = vmatprep.subr.bf16.mxu1 %v20517_v16 }
 0xa35   :  { %v11390_v27 = vpop.f32.mrb[91].mxu0 }
 0xa38   :  { %v2199_v36 = vpop.f32.mrb[92].mxu0 }
 0xa39   :  { %v13320_v42 = vpack.c.bf16 %v2199_v36, %v2194_v47  ;;  %v11393_v52 = vpop.f32.mrb[93].mxu0  ;;  %v2590_v47 = vld [vmem:[%s20457_s17 + $0x18] sm:$0xff] }
 0xa3a   :  { %v13344_v27 = vpack.c.bf16 %v2590_v47, %v2589_v10  ;;  %v9618_v36 = vld [vmem:[#allocation9] ss:$0 sm:$0xff] }
 0xa3b   :  { %13321 = vmatpush3.bf16.msra.mxu1 %v13320_v42 }
 0xa3c   :  { %v2204_v51 = vpop.f32.mrb[94].mxu0  ;;  %13322 = vmatprep.subr.bf16.mxu1 %v20517_v16 }
 0xa3d   :  { %v11396_v23 = vpop.f32.mrb[95].mxu0 }
 0xa40   :  { %v2209_v20 = vpop.f32.mrb[96].mxu0 }
 0xa41   :  { %v13323_v14 = vpack.c.bf16 %v2209_v20, %v2204_v51  ;;  %v11399_v28 = vpop.f32.mrb[97].mxu0 }
 0xa43   :  { %13324 = vmatpush3.bf16.msra.mxu1 %v13323_v14 }
 0xa44   :  { %v2214_v19 = vpop.f32.mrb[98].mxu0  ;;  %13325 = vmatprep.subr.bf16.mxu1 %v20517_v16 }
 0xa45   :  { %v11402_v41 = vpop.f32.mrb[99].mxu0 }
 0xa48   :  { %v2219_v18 = vpop.f32.mrb[100].mxu0 }
 0xa49   :  { %v13326_v53 = vpack.c.bf16 %v2219_v18, %v2214_v19  ;;  %v11405_v29 = vpop.f32.mrb[101].mxu0 }
 0xa4b   :  { %13327 = vmatpush3.bf16.msra.mxu1 %v13326_v53 }
 0xa4c   :  { %v2224_v4 = vpop.f32.mrb[102].mxu0  ;;  %11425 = vmatprep.subr.mxu1 %v20646_v49 }
 0xa4d   :  { %v11408_v45 = vpop.f32.mrb[103].mxu0 }
 0xa4f   :  { %11426 = vmatpush3.msk.msra.mxu1 %vm1841_vm6, %v2224_v4 }
 0xa50   :  { %11428 = vmatmul.mubr.msk.f32.vlgmr.msra.gmra.mrb[114].mxu1 %vm1825_vm7, %v212_v5  ;;  %13340 = vmatprep.subr.bf16.mxu1 %v20517_v16 }
 0xa51   :  { %11430 = vmatprep.mubr.msk.f32.mxu1 %vm14447_vm2, %v20646_v49  ;;  %13342 = vmatpush3.bf16.msra.mxu1 %v13341_v60 }
 0xa52   :  { %13343 = vmatprep.subr.bf16.mxu1 %v20517_v16 }
 0xa54   :  { %11431 = vmatmul.mubr.msk.f32.gmra.mrb[116].mxu1 %vm1825_vm7, %v213_v56 }
 0xa55   :  { %11433 = vmatprep.mubr.msk.f32.mxu1 %vm14447_vm2, %v20646_v49  ;;  %13345 = vmatpush3.bf16.msra.mxu1 %v13344_v27 }
 0xa56   :  { %13346 = vmatprep.subr.bf16.mxu1 %v20517_v16 }
 0xa58   :  { %11434 = vmatmul.mubr.msk.f32.gmra.mrb[118].mxu1 %vm1825_vm7, %v214_v61 }
 0xa59   :  { %11436 = vmatprep.mubr.msk.f32.mxu1 %vm14447_vm2, %v20646_v49 }
 0xa5c   :  { %11437 = vmatmul.mubr.msk.f32.gmra.mrb[120].mxu1 %vm1825_vm7, %v215_v30 }
 0xa5d   :  { %11439 = vmatprep.mubr.msk.f32.mxu1 %vm14447_vm2, %v20646_v49 }
 0xa60   :  { %11440 = vmatmul.mubr.msk.f32.gmra.mrb[122].mxu1 %vm1825_vm7, %v216_v43 }
 0xa61   :  { %11442 = vmatprep.mubr.msk.f32.mxu1 %vm14447_vm2, %v20646_v49 }
 0xa64   :  { %11443 = vmatmul.mubr.msk.f32.gmra.mrb[124].mxu1 %vm1825_vm7, %v217_v25 }
 0xa65   :  { %11445 = vmatprep.mubr.msk.f32.mxu1 %vm14447_vm2, %v20646_v49 }
 0xa68   :  { %11446 = vmatmul.mubr.msk.f32.gmra.mrb[126].mxu1 %vm1825_vm7, %v218_v9 }
 0xa69   :  { %11448 = vmatprep.mubr.msk.f32.mxu1 %vm14447_vm2, %v20646_v49 }
 0xa6c   :  { %11449 = vmatmul.mubr.msk.f32.gmra.mrb[128].mxu1 %vm1825_vm7, %v219_v22 }
 0xa6d   :  { %11451 = vmatprep.mubr.msk.f32.mxu1 %vm14447_vm2, %v20646_v49 }
 0xa70   :  { %11452 = vmatmul.mubr.msk.f32.gmra.mrb[130].mxu1 %vm1825_vm7, %v220_v26 }
 0xa71   :  { %11535 = vmatprep.mubr.msk.f32.mxu1 %vm14447_vm2, %v20646_v49 }
 0xb23   :  { %v2330_v42 = vpop.f32.mrb[114].mxu1 }
 0xb24   :  { %v11429_v52 = vpop.f32.mrb[115].mxu1  ;;  %v2331_v51 = vadd.f32 %v9618_v36, %v2330_v42 }
 0xb26   :  { %v2374_v28 = vmax.f32 %v2331_v51, 0.0 }
 0xb27   :  { %v2335_v23 = vpop.f32.mrb[116].mxu1 }
 0xb28   :  { %v2336_v20 = vadd.f32 %v9618_v36, %v2335_v23  ;;  %v11432_v14 = vpop.f32.mrb[117].mxu1 }
 0xb2a   :  { %v2375_v19 = vmax.f32 %v2336_v20, 0.0 }
 0xb2b   :  { %v2340_v41 = vpop.f32.mrb[118].mxu1 }
 0xb2c   :  { %v13329_v18 = vpack.c.bf16 %v2375_v19, %v2374_v28  ;;  %v11435_v53 = vpop.f32.mrb[119].mxu1  ;;  %v2341_v29 = vadd.f32 %v9618_v36, %v2340_v41 }
 0xb2e   :  { %13330 = vmatpush3.bf16.msra.mxu0 %v13329_v18  ;;  %v2376_v56 = vmax.f32 %v2341_v29, 0.0  ;;  %v253_v29 = vld [vmem:[%s20446_s6] sm:$0xff] }
 0xb2f   :  { %v2345_v4 = vpop.f32.mrb[120].mxu1  ;;  %13331 = vmatprep.subr.bf16.mxu0 %v20517_v16 }
 0xb30   :  { %v2346_v45 = vadd.f32 %v9618_v36, %v2345_v4  ;;  %v11438_v5 = vpop.f32.mrb[121].mxu1  ;;  %v255_v4 = vld [vmem:[%s20446_s6 + $0x10] sm:$0xff] }
 0xb31   :  { %v257_v5 = vld [vmem:[%s20446_s6 + $0x20] sm:$0xff] }
 0xb32   :  { %v2377_v61 = vmax.f32 %v2346_v45, 0.0  ;;  %v256_v45 = vld [vmem:[%s20446_s6 + $0x18] sm:$0xff] }
 0xb33   :  { %v2350_v30 = vpop.f32.mrb[122].mxu1 }
 0xb34   :  { %v13332_v43 = vpack.c.bf16 %v2377_v61, %v2376_v56  ;;  %v11441_v25 = vpop.f32.mrb[123].mxu1  ;;  %v2351_v9 = vadd.f32 %v9618_v36, %v2350_v30  ;;  %v258_v56 = vld [vmem:[%s20446_s6 + $0x28] sm:$0xff]  ;;  %v259_v61 = vld [vmem:[%s20446_s6 + $0x30] sm:$0xff]  ;;  %v260_v30 = vld [vmem:[%s20446_s6 + $0x38] sm:$0xff] }
 0xb35   :  { %v262_v25 = vld [vmem:[%s20446_s6 + $0x48] sm:$0xff] }
 0xb36   :  { %13333 = vmatpush3.bf16.msra.mxu0 %v13332_v43  ;;  %v2378_v8 = vmax.f32 %v2351_v9, 0.0  ;;  %v261_v43 = vld [vmem:[%s20446_s6 + $0x40] sm:$0xff]  ;;  %v263_v9 = vld [vmem:[%s20446_s6 + $0x50] sm:$0xff] }
 0xb37   :  { %v2355_v22 = vpop.f32.mrb[124].mxu1  ;;  %13334 = vmatprep.subr.bf16.mxu0 %v20517_v16 }
 0xb38   :  { %v2356_v26 = vadd.f32 %v9618_v36, %v2355_v22  ;;  %v11444_v6 = vpop.f32.mrb[125].mxu1  ;;  %v264_v22 = vld [vmem:[%s20446_s6 + $0x58] sm:$0xff] }
 0xb39   :  { %v266_v6 = vld [vmem:[%s20446_s6 + $0x68] sm:$0xff] }
 0xb3a   :  { %v2379_v10 = vmax.f32 %v2356_v26, 0.0  ;;  %v265_v26 = vld [vmem:[%s20446_s6 + $0x60] sm:$0xff] }
 0xb3b   :  { %v2360_v60 = vpop.f32.mrb[126].mxu1 }
 0xb3c   :  { %v13335_v47 = vpack.c.bf16 %v2379_v10, %v2378_v8  ;;  %v11447_v27 = vpop.f32.mrb[127].mxu1  ;;  %v2361_v42 = vadd.f32 %v9618_v36, %v2360_v60  ;;  %v267_v8 = vld [vmem:[%s20446_s6 + $0x70] sm:$0xff]  ;;  %v268_v10 = vld [vmem:[%s20446_s6 + $0x78] sm:$0xff]  ;;  %v269_v60 = vld [vmem:[%s20446_s6 + $0x80] sm:$0x1f] }
 0xb3d   :  { %v2591_v27 = vld [vmem:[%s20457_s17 + $0x20] sm:$0xff] }
 0xb3e   :  { %13336 = vmatpush3.bf16.msra.mxu0 %v13335_v47  ;;  %v2380_v20 = vmax.f32 %v2361_v42, 0.0  ;;  %v16040_v47 = vld [vmem:[%s20643_s18 + $0x8] sm:$0xff] }
 0xb3f   :  { %v2365_v52 = vpop.f32.mrb[128].mxu1  ;;  %13337 = vmatprep.subr.bf16.mxu0 %v20517_v16  ;;  %v2592_v42 = vld [vmem:[%s20457_s17 + $0x28] sm:$0xff] }
 0xb40   :  { %v2366_v51 = vadd.f32 %v9618_v36, %v2365_v52  ;;  %v11450_v23 = vpop.f32.mrb[129].mxu1  ;;  %v13347_v52 = vpack.c.bf16 %v2592_v42, %v2591_v27 }
 0xb41   :  { %v20657_v23 = vmax.f32 %v15405_v7, 0.0  ;;  %v20659_v7 = vmax.f32 %v15418_v15, 0.0  ;;  %v20661_v15 = vmax.f32 %v15436_v24, 0.0  ;;  %v20663_v24 = vmax.f32 %v15454_v40, 0.0 }
 0xb42   :  { %v2381_v14 = vmax.f32 %v2366_v51, 0.0  ;;  %13348 = vmatpush3.bf16.msra.mxu1 %v13347_v52  ;;  %v20665_v40 = vmax.f32 %v15472_v35, 0.0  ;;  %v20667_v35 = vmax.f32 %v15490_v59, 0.0  ;;  %v20669_v59 = vmax.f32 %v15508_v13, 0.0 }
 0xb43   :  { %v2370_v28 = vpop.f32.mrb[130].mxu1  ;;  %13883 = vmatprep.subr.bf16.mxu1 %v20517_v16  ;;  %v20671_v13 = vmax.f32 %v15526_v34, 0.0  ;;  %v20673_v34 = vmax.f32 %v15544_v50, 0.0 }
 0xb44   :  { %v13338_v19 = vpack.c.bf16 %v2381_v14, %v2380_v20  ;;  %v2371_v41 = vadd.f32 %v9618_v36, %v2370_v28  ;;  %v11453_v18 = vpop.f32.mrb[131].mxu1  ;;  %v254_v36 = vld [vmem:[%s20446_s6 + $0x8] sm:$0xff] }
 0xb46   :  { %v2382_v53 = vmax.f32 %v2371_v41, 0.0  ;;  %13339 = vmatpush3.bf16.msra.mxu0 %v13338_v19  ;;  %v20658_v19 = vmax.f32 %v15409_v11, 0.0  ;;  %v20660_v11 = vmax.f32 %v15427_v33, 0.0  ;;  %v20662_v33 = vmax.f32 %v15445_v32, 0.0 }
 0xb47   :  { %11470 = vmatprep.subr.mxu0 %v20646_v49  ;;  %v20664_v32 = vmax.f32 %v15463_v39, 0.0  ;;  %v20666_v39 = vmax.f32 %v15481_v46, 0.0  ;;  %v20668_v46 = vmax.f32 %v15499_v54, 0.0  ;;  %v20670_v54 = vmax.f32 %v15517_v21, 0.0 }
 0xb48   :  { %v20672_v21 = vmax.f32 %v15535_v1, 0.0 }
 0xb4a   :  { %11471 = vmatpush3.msk.msra.mxu0 %vm1841_vm6, %v2382_v53 }
 0xb4b   :  { %11473 = vmatmul.mubr.msk.f32.vlgmr.msra.gmra.mrb[104].mxu0 %vm1825_vm7, %v253_v29  ;;  %13349 = vmatprep.subr.bf16.mxu0 %v20517_v16 }
 0xb4c   :  { %11475 = vmatprep.mubr.msk.f32.mxu0 %vm14447_vm2, %v20646_v49 }
 0xb4f   :  { %11476 = vmatmul.mubr.msk.f32.gmra.mrb[106].mxu0 %vm1825_vm7, %v254_v36 }
 0xb50   :  { %11478 = vmatprep.mubr.msk.f32.mxu0 %vm14447_vm2, %v20646_v49 }
 0xb53   :  { %11479 = vmatmul.mubr.msk.f32.gmra.mrb[108].mxu0 %vm1825_vm7, %v255_v4 }
 0xb54   :  { %11481 = vmatprep.mubr.msk.f32.mxu0 %vm14447_vm2, %v20646_v49 }
 0xb57   :  { %11482 = vmatmul.mubr.msk.f32.gmra.mrb[110].mxu0 %vm1825_vm7, %v256_v45 }
 0xb58   :  { %11484 = vmatprep.mubr.msk.f32.mxu0 %vm14447_vm2, %v20646_v49 }
 0xb5b   :  { %11485 = vmatmul.mubr.msk.f32.gmra.mrb[112].mxu0 %vm1825_vm7, %v257_v5 }
 0xb5c   :  { %11487 = vmatprep.mubr.msk.f32.mxu0 %vm14447_vm2, %v20646_v49 }
 0xb5f   :  { %11488 = vmatmul.mubr.msk.f32.gmra.mrb[114].mxu0 %vm1825_vm7, %v258_v56 }
 0xb60   :  { %11490 = vmatprep.mubr.msk.f32.mxu0 %vm14447_vm2, %v20646_v49 }
 0xb63   :  { %11491 = vmatmul.mubr.msk.f32.gmra.mrb[116].mxu0 %vm1825_vm7, %v259_v61 }
 0xb64   :  { %11493 = vmatprep.mubr.msk.f32.mxu0 %vm14447_vm2, %v20646_v49 }
 0xb67   :  { %11494 = vmatmul.mubr.msk.f32.gmra.mrb[118].mxu0 %vm1825_vm7, %v260_v30 }
 0xb68   :  { %11496 = vmatprep.mubr.msk.f32.mxu0 %vm14447_vm2, %v20646_v49 }
 0xb6b   :  { %11497 = vmatmul.mubr.msk.f32.gmra.mrb[120].mxu0 %vm1825_vm7, %v261_v43 }
 0xb6c   :  { %11499 = vmatprep.mubr.msk.f32.mxu0 %vm14447_vm2, %v20646_v49 }
 0xb6f   :  { %11500 = vmatmul.mubr.msk.f32.gmra.mrb[122].mxu0 %vm1825_vm7, %v262_v25 }
 0xb70   :  { %11502 = vmatprep.mubr.msk.f32.mxu0 %vm14447_vm2, %v20646_v49 }
 0xb73   :  { %11503 = vmatmul.mubr.msk.f32.gmra.mrb[124].mxu0 %vm1825_vm7, %v263_v9 }
 0xb74   :  { %11505 = vmatprep.mubr.msk.f32.mxu0 %vm14447_vm2, %v20646_v49 }
 0xb77   :  { %11506 = vmatmul.mubr.msk.f32.gmra.mrb[126].mxu0 %vm1825_vm7, %v264_v22 }
 0xb78   :  { %11508 = vmatprep.mubr.msk.f32.mxu0 %vm14447_vm2, %v20646_v49 }
 0xb7b   :  { %11509 = vmatmul.mubr.msk.f32.gmra.mrb[128].mxu0 %vm1825_vm7, %v265_v26 }
 0xb7c   :  { %11511 = vmatprep.mubr.msk.f32.mxu0 %vm14447_vm2, %v20646_v49 }
 0xb7f   :  { %11512 = vmatmul.mubr.msk.f32.gmra.mrb[130].mxu0 %vm1825_vm7, %v266_v6 }
 0xb80   :  { %11514 = vmatprep.mubr.msk.f32.mxu0 %vm14447_vm2, %v20646_v49 }
 0xb83   :  { %11515 = vmatmul.mubr.msk.f32.gmra.mrb[132].mxu0 %vm1825_vm7, %v267_v8 }
 0xb84   :  { %11517 = vmatprep.mubr.msk.f32.mxu0 %vm14447_vm2, %v20646_v49 }
 0xb87   :  { %11518 = vmatmul.mubr.msk.f32.gmra.mrb[134].mxu0 %vm1825_vm7, %v268_v10 }
 0xb88   :  { %11520 = vmatprep.mubr.msk.f32.mxu0 %vm14447_vm2, %v20646_v49 }
 0xb8b   :  { %11521 = vmatmul.mubr.msk.f32.gmra.mrb[136].mxu0 %vm1825_vm7, %v269_v60 }
 0xb8c   :  { %9666 = vmatprep.mubr.msk.f32.mxu0 %vm702_vm0, %v16040_v47 }
 0xc1e   :  { %v2503_v51 = vpop.f32.mrb[104].mxu0 }
 0xc1f   :  { %v2504_v20 = vadd.f32 %v2503_v51, %v20657_v23  ;;  %v11474_v14 = vpop.f32.mrb[105].mxu0 }
 0xc21   :  { %11536 = vmatmul.mubr.msk.f32.vlgmr.msra.gmra.mrb[132].mxu1 %vm1315_vm4, %v2504_v20 }
 0xc22   :  { %v2508_v28 = vpop.f32.mrb[106].mxu0  ;;  %11538 = vmatprep.mubr.msk.f32.mxu1 %vm14447_vm2, %v20646_v49 }
 0xc23   :  { %v2509_v41 = vadd.f32 %v2508_v28, %v20658_v19  ;;  %v11477_v18 = vpop.f32.mrb[107].mxu0 }
 0xc25   :  { %11539 = vmatmul.mubr.msk.f32.gmra.mrb[134].mxu1 %vm1315_vm4, %v2509_v41 }
 0xc26   :  { %v2513_v53 = vpop.f32.mrb[108].mxu0  ;;  %11541 = vmatprep.mubr.msk.f32.mxu1 %vm14447_vm2, %v20646_v49 }
 0xc27   :  { %v2514_v29 = vadd.f32 %v2513_v53, %v20659_v7  ;;  %v11480_v36 = vpop.f32.mrb[109].mxu0 }
 0xc29   :  { %11542 = vmatmul.mubr.msk.f32.gmra.mrb[136].mxu1 %vm1315_vm4, %v2514_v29 }
 0xc2a   :  { %v2518_v4 = vpop.f32.mrb[110].mxu0  ;;  %11544 = vmatprep.mubr.msk.f32.mxu1 %vm14447_vm2, %v20646_v49 }
 0xc2b   :  { %v2519_v45 = vadd.f32 %v2518_v4, %v20660_v11  ;;  %v11483_v5 = vpop.f32.mrb[111].mxu0 }
 0xc2d   :  { %11545 = vmatmul.mubr.msk.f32.gmra.mrb[138].mxu1 %vm1315_vm4, %v2519_v45 }
 0xc2e   :  { %v2523_v56 = vpop.f32.mrb[112].mxu0  ;;  %11547 = vmatprep.mubr.msk.f32.mxu1 %vm14447_vm2, %v20646_v49 }
 0xc2f   :  { %v2524_v61 = vadd.f32 %v2523_v56, %v20661_v15  ;;  %v11486_v30 = vpop.f32.mrb[113].mxu0 }
 0xc31   :  { %11548 = vmatmul.mubr.msk.f32.gmra.mrb[140].mxu1 %vm1315_vm4, %v2524_v61 }
 0xc32   :  { %v2528_v43 = vpop.f32.mrb[114].mxu0  ;;  %11550 = vmatprep.mubr.msk.f32.mxu1 %vm14447_vm2, %v20646_v49 }
 0xc33   :  { %v2529_v25 = vadd.f32 %v2528_v43, %v20662_v33  ;;  %v11489_v9 = vpop.f32.mrb[115].mxu0 }
 0xc35   :  { %11551 = vmatmul.mubr.msk.f32.gmra.mrb[142].mxu1 %vm1315_vm4, %v2529_v25 }
 0xc36   :  { %v2533_v22 = vpop.f32.mrb[116].mxu0  ;;  %11553 = vmatprep.mubr.msk.f32.mxu1 %vm14447_vm2, %v20646_v49 }
 0xc37   :  { %v2534_v26 = vadd.f32 %v2533_v22, %v20663_v24  ;;  %v11492_v6 = vpop.f32.mrb[117].mxu0  ;;  %v16137_v22 = vld [vmem:[%s20643_s18 + $0xf8] sm:$0xff] }
 0xc39   :  { %11554 = vmatmul.mubr.msk.f32.gmra.mrb[144].mxu1 %vm1315_vm4, %v2534_v26 }
 0xc3a   :  { %v2538_v8 = vpop.f32.mrb[118].mxu0  ;;  %11556 = vmatprep.mubr.msk.f32.mxu1 %vm14447_vm2, %v20646_v49 }
 0xc3b   :  { %v2539_v10 = vadd.f32 %v2538_v8, %v20664_v32  ;;  %v11495_v60 = vpop.f32.mrb[119].mxu0 }
 0xc3d   :  { %11557 = vmatmul.mubr.msk.f32.gmra.mrb[146].mxu1 %vm1315_vm4, %v2539_v10 }
 0xc3e   :  { %v2543_v27 = vpop.f32.mrb[120].mxu0  ;;  %11559 = vmatprep.mubr.msk.f32.mxu1 %vm14447_vm2, %v20646_v49 }
 0xc3f   :  { %v2544_v42 = vadd.f32 %v2543_v27, %v20665_v40  ;;  %v11498_v52 = vpop.f32.mrb[121].mxu0 }
 0xc41   :  { %11560 = vmatmul.mubr.msk.f32.gmra.mrb[148].mxu1 %vm1315_vm4, %v2544_v42 }
 0xc42   :  { %v2548_v51 = vpop.f32.mrb[122].mxu0  ;;  %11562 = vmatprep.mubr.msk.f32.mxu1 %vm14447_vm2, %v20646_v49 }
 0xc43   :  { %v2549_v23 = vadd.f32 %v2548_v51, %v20666_v39  ;;  %v11501_v20 = vpop.f32.mrb[123].mxu0 }
 0xc45   :  { %11563 = vmatmul.mubr.msk.f32.gmra.mrb[150].mxu1 %vm1315_vm4, %v2549_v23 }
 0xc46   :  { %v2553_v14 = vpop.f32.mrb[124].mxu0  ;;  %11565 = vmatprep.mubr.msk.f32.mxu1 %vm14447_vm2, %v20646_v49 }
 0xc47   :  { %v2554_v28 = vadd.f32 %v2553_v14, %v20667_v35  ;;  %v11504_v19 = vpop.f32.mrb[125].mxu0 }
 0xc49   :  { %11566 = vmatmul.mubr.msk.f32.gmra.mrb[152].mxu1 %vm1315_vm4, %v2554_v28 }
 0xc4a   :  { %v2558_v41 = vpop.f32.mrb[126].mxu0  ;;  %11568 = vmatprep.mubr.msk.f32.mxu1 %vm14447_vm2, %v20646_v49 }
 0xc4b   :  { %v2559_v18 = vadd.f32 %v2558_v41, %v20668_v46  ;;  %v11507_v53 = vpop.f32.mrb[127].mxu0 }
 0xc4d   :  { %11569 = vmatmul.mubr.msk.f32.gmra.mrb[154].mxu1 %vm1315_vm4, %v2559_v18 }
 0xc4e   :  { %v2563_v7 = vpop.f32.mrb[128].mxu0  ;;  %11571 = vmatprep.mubr.msk.f32.mxu1 %vm14447_vm2, %v20646_v49 }
 0xc4f   :  { %v2564_v29 = vadd.f32 %v2563_v7, %v20669_v59  ;;  %v11510_v36 = vpop.f32.mrb[129].mxu0 }
 0xc51   :  { %11572 = vmatmul.mubr.msk.f32.gmra.mrb[156].mxu1 %vm1315_vm4, %v2564_v29 }
 0xc52   :  { %v2568_v4 = vpop.f32.mrb[130].mxu0  ;;  %11574 = vmatprep.mubr.msk.f32.mxu1 %vm14447_vm2, %v20646_v49 }
 0xc53   :  { %v2569_v11 = vadd.f32 %v2568_v4, %v20670_v54  ;;  %v11513_v45 = vpop.f32.mrb[131].mxu0 }
 0xc55   :  { %11575 = vmatmul.mubr.msk.f32.gmra.mrb[158].mxu1 %vm1315_vm4, %v2569_v11 }
 0xc56   :  { %v2573_v5 = vpop.f32.mrb[132].mxu0  ;;  %11577 = vmatprep.mubr.msk.f32.mxu1 %vm14447_vm2, %v20646_v49 }
 0xc57   :  { %v2574_v56 = vadd.f32 %v2573_v5, %v20671_v13  ;;  %v11516_v15 = vpop.f32.mrb[133].mxu0 }
 0xc59   :  { %11578 = vmatmul.mubr.msk.f32.gmra.mrb[160].mxu1 %vm1315_vm4, %v2574_v56 }
 0xc5a   :  { %v2578_v61 = vpop.f32.mrb[134].mxu0  ;;  %11580 = vmatprep.mubr.msk.f32.mxu1 %vm14447_vm2, %v20646_v49 }
 0xc5b   :  { %v2579_v30 = vadd.f32 %v2578_v61, %v20672_v21  ;;  %v11519_v43 = vpop.f32.mrb[135].mxu0 }
 0xc5d   :  { %11581 = vmatmul.mubr.msk.f32.gmra.mrb[162].mxu1 %vm1315_vm4, %v2579_v30 }
 0xc5e   :  { %v2583_v33 = vpop.f32.mrb[136].mxu0  ;;  %11583 = vmatprep.mubr.msk.f32.mxu1 %vm14447_vm2, %v20646_v49 }
 0xc5f   :  { %v2584_v25 = vadd.f32 %v2583_v33, %v20673_v34  ;;  %v11522_v9 = vpop.f32.mrb[137].mxu0  ;;  %v16162_v34 = vld [vmem:[%s20643_s18] sm:$0xff] }
 0xc60   :  { %v16174_v9 = vld [vmem:[%s20643_s18 + $0x18] sm:$0xff] }
 0xc61   :  { %11584 = vmatmul.mubr.msk.f32.gmra.mrb[164].mxu1 %vm1315_vm4, %v2584_v25  ;;  %v16168_v25 = vld [vmem:[%s20643_s18 + $0xf0] sm:$0xff] }
 0xc62   :  { %9681 = vmatprep.mubr.msk.f32.mxu1 %vm702_vm0, %v16137_v22 }
 0xcf4   :  { %v2711_v1 = vpop.f32.mrb[132].mxu1 }
 0xcf5   :  { %v11537_v24 = vpop.f32.mrb[133].mxu1 }
 0xcf6   :  { %v16190_v24 = vld [vmem:[%s20643_s18 + $0x10] sm:$0xff] }
 0xcf8   :  { %v2716_v26 = vpop.f32.mrb[134].mxu1 }
 0xcf9   :  { %v13350_v6 = vpack.c.bf16 %v2716_v26, %v2711_v1  ;;  %v11540_v8 = vpop.f32.mrb[135].mxu1  ;;  %v16181_v1 = vld [vmem:[%s20643_s18 + $0x108] sm:$0x1f]  ;;  %v16196_v26 = vld [vmem:[%s20643_s18 + $0x100] sm:$0x1f] }
 0xcfa   :  { %20674 = vst [vmem:[#allocation19_spill] sm:$0xff] %v16196_v26  ;;  %v16211_v8 = vld [vmem:[%s20643_s18 + $0x20] sm:$0xff] }
 0xcfb   :  { %13351 = vmatpush1.bf16.msra.mxu0 %v13350_v6  ;;  %13892 = vmatpush1.bf16.msra.mxu1 %v13350_v6  ;;  %v16202_v6 = vld [vmem:[%s20643_s18 + $0x28] sm:$0xff] }
 0xcfc   :  { %v2721_v50 = vpop.f32.mrb[136].mxu1  ;;  %13352 = vmatprep.subr.bf16.mxu0 %v20517_v16  ;;  %13884 = vmatprep.subr.bf16.mxu1 %v20517_v16 }
 0xcfd   :  { %v11543_v32 = vpop.f32.mrb[137].mxu1 }
 0xcfe   :  { %v16224_v32 = vld [vmem:[%s20643_s18 + $0x30] sm:$0xff] }
 0xd00   :  { %v2726_v10 = vpop.f32.mrb[138].mxu1 }
 0xd01   :  { %v13353_v60 = vpack.c.bf16 %v2726_v10, %v2721_v50  ;;  %v11546_v27 = vpop.f32.mrb[139].mxu1  ;;  %v16217_v50 = vld [vmem:[%s20643_s18 + $0x38] sm:$0xff]  ;;  %v16230_v10 = vld [vmem:[%s20643_s18 + $0x48] sm:$0xff] }
 0xd02   :  { %v16243_v27 = vld [vmem:[%s20643_s18 + $0x58] sm:$0xff] }
 0xd03   :  { %13354 = vmatpush1.bf16.msra.mxu0 %v13353_v60  ;;  %13893 = vmatpush1.bf16.msra.mxu1 %v13353_v60  ;;  %v16237_v60 = vld [vmem:[%s20643_s18 + $0x40] sm:$0xff] }
 0xd04   :  { %v2731_v40 = vpop.f32.mrb[140].mxu1  ;;  %13355 = vmatprep.subr.bf16.mxu0 %v20517_v16  ;;  %13885 = vmatprep.subr.bf16.mxu1 %v20517_v16 }
 0xd05   :  { %v11549_v42 = vpop.f32.mrb[141].mxu1 }
 0xd06   :  { %v16256_v42 = vld [vmem:[%s20643_s18 + $0x68] sm:$0xff] }
 0xd08   :  { %v2736_v52 = vpop.f32.mrb[142].mxu1 }
 0xd09   :  { %v13356_v51 = vpack.c.bf16 %v2736_v52, %v2731_v40  ;;  %v11552_v39 = vpop.f32.mrb[143].mxu1  ;;  %v16250_v40 = vld [vmem:[%s20643_s18 + $0x50] sm:$0xff]  ;;  %v16263_v52 = vld [vmem:[%s20643_s18 + $0x60] sm:$0xff] }
 0xd0a   :  { %v16276_v39 = vld [vmem:[%s20643_s18 + $0x70] sm:$0xff] }
 0xd0b   :  { %13357 = vmatpush1.bf16.msra.mxu0 %v13356_v51  ;;  %13894 = vmatpush1.bf16.msra.mxu1 %v13356_v51  ;;  %v16269_v51 = vld [vmem:[%s20643_s18 + $0x78] sm:$0xff] }
 0xd0c   :  { %v2741_v23 = vpop.f32.mrb[144].mxu1  ;;  %13358 = vmatprep.subr.bf16.mxu0 %v20517_v16  ;;  %13886 = vmatprep.subr.bf16.mxu1 %v20517_v16 }
 0xd0d   :  { %v11555_v20 = vpop.f32.mrb[145].mxu1 }
 0xd0e   :  { %v16289_v20 = vld [vmem:[%s20643_s18 + $0x80] sm:$0xff] }
 0xd10   :  { %v2746_v14 = vpop.f32.mrb[146].mxu1 }
 0xd11   :  { %v13359_v35 = vpack.c.bf16 %v2746_v14, %v2741_v23  ;;  %v11558_v28 = vpop.f32.mrb[147].mxu1  ;;  %v16282_v23 = vld [vmem:[%s20643_s18 + $0x88] sm:$0xff]  ;;  %v16295_v14 = vld [vmem:[%s20643_s18 + $0x98] sm:$0xff] }
 0xd12   :  { %v16308_v28 = vld [vmem:[%s20643_s18 + $0xa8] sm:$0xff] }
 0xd13   :  { %13360 = vmatpush1.bf16.msra.mxu0 %v13359_v35  ;;  %13895 = vmatpush1.bf16.msra.mxu1 %v13359_v35  ;;  %v16302_v35 = vld [vmem:[%s20643_s18 + $0x90] sm:$0xff] }
 0xd14   :  { %v2751_v19 = vpop.f32.mrb[148].mxu1  ;;  %13361 = vmatprep.subr.bf16.mxu0 %v20517_v16  ;;  %13887 = vmatprep.subr.bf16.mxu1 %v20517_v16 }
 0xd15   :  { %v11561_v41 = vpop.f32.mrb[149].mxu1 }
 0xd16   :  { %v16321_v41 = vld [vmem:[%s20643_s18 + $0xb8] sm:$0xff] }
 0xd18   :  { %v2756_v46 = vpop.f32.mrb[150].mxu1 }
 0xd19   :  { %v13362_v18 = vpack.c.bf16 %v2756_v46, %v2751_v19  ;;  %v11564_v53 = vpop.f32.mrb[151].mxu1  ;;  %v16315_v19 = vld [vmem:[%s20643_s18 + $0xa0] sm:$0xff]  ;;  %v16328_v46 = vld [vmem:[%s20643_s18 + $0xb0] sm:$0xff] }
 0xd1a   :  { %v16341_v53 = vld [vmem:[%s20643_s18 + $0xc0] sm:$0xff] }
 0xd1b   :  { %13363 = vmatpush1.bf16.msra.mxu0 %v13362_v18  ;;  %13896 = vmatpush1.bf16.msra.mxu1 %v13362_v18  ;;  %v16334_v18 = vld [vmem:[%s20643_s18 + $0xc8] sm:$0xff] }
 0xd1c   :  { %v2761_v7 = vpop.f32.mrb[152].mxu1  ;;  %13364 = vmatprep.subr.bf16.mxu0 %v20517_v16  ;;  %13888 = vmatprep.subr.bf16.mxu1 %v20517_v16 }
 0xd1d   :  { %v11567_v59 = vpop.f32.mrb[153].mxu1 }
 0xd1e   :  { %v16354_v59 = vld [vmem:[%s20643_s18 + $0xd0] sm:$0xff] }
 0xd20   :  { %v2766_v29 = vpop.f32.mrb[154].mxu1 }
 0xd21   :  { %v13365_v36 = vpack.c.bf16 %v2766_v29, %v2761_v7  ;;  %v11570_v4 = vpop.f32.mrb[155].mxu1  ;;  %v16347_v7 = vld [vmem:[%s20643_s18 + $0xd8] sm:$0xff]  ;;  %v16360_v29 = vld [vmem:[%s20643_s18 + $0xe8] sm:$0xff] }
 0xd22   :  { %v9683_v4 = vld [vmem:[%s20449_s9 + $0x20] sm:$0xff] }
 0xd23   :  { %13366 = vmatpush1.bf16.msra.mxu0 %v13365_v36  ;;  %13897 = vmatpush1.bf16.msra.mxu1 %v13365_v36  ;;  %v16367_v36 = vld [vmem:[%s20643_s18 + $0xe0] sm:$0xff] }
 0xd24   :  { %v2771_v54 = vpop.f32.mrb[156].mxu1  ;;  %13367 = vmatprep.subr.bf16.mxu0 %v20517_v16  ;;  %13889 = vmatprep.subr.bf16.mxu1 %v20517_v16 }
 0xd25   :  { %v11573_v11 = vpop.f32.mrb[157].mxu1 }
 0xd28   :  { %v2776_v45 = vpop.f32.mrb[158].mxu1 }
 0xd29   :  { %v13368_v5 = vpack.c.bf16 %v2776_v45, %v2771_v54  ;;  %v11576_v13 = vpop.f32.mrb[159].mxu1  ;;  %v9684_v54 = vld [vmem:[%s20449_s9 + $0x28] sm:$0xff]  ;;  %v9685_v45 = vld [vmem:[%s20449_s9 + $0x30] sm:$0xff] }
 0xd2a   :  { %v13374_v11 = vpack.c.bf16 %v9684_v54, %v9683_v4  ;;  %v16386_v13 = vld [vmem:[#allocation10] ss:$0 sm:$0xff]  ;;  %v20675_v54 = vmax.f32 %v15167_v44, 0.0 }
 0xd2b   :  { %13369 = vmatpush1.bf16.msra.mxu0 %v13368_v5  ;;  %13898 = vmatpush1.bf16.msra.mxu1 %v13368_v5 }
 0xd2c   :  { %v2781_v56 = vpop.f32.mrb[160].mxu1  ;;  %13370 = vmatprep.subr.bf16.mxu0 %v20517_v16  ;;  %13890 = vmatprep.subr.bf16.mxu1 %v20517_v16 }
 0xd2d   :  { %v11579_v15 = vpop.f32.mrb[161].mxu1 }
 0xd30   :  { %v2786_v61 = vpop.f32.mrb[162].mxu1 }
 0xd31   :  { %v13371_v21 = vpack.c.bf16 %v2786_v61, %v2781_v56  ;;  %v11582_v30 = vpop.f32.mrb[163].mxu1 }
 0xd33   :  { %13372 = vmatpush1.bf16.msra.mxu0 %v13371_v21  ;;  %13899 = vmatpush1.bf16.msra.mxu1 %v13371_v21 }
 0xd34   :  { %v2791_v43 = vpop.f32.mrb[164].mxu1  ;;  %2836 = vmatprep.subr.mxu0 %v20646_v49  ;;  %13891 = vmatprep.subr.mxu1 %v20646_v49 }
 0xd35   :  { %v11585_v33 = vpop.f32.mrb[165].mxu1 }
 0xd37   :  { %9665 = vmatpush1.msk.msra.mxu0 %vm754_vm1, %v2791_v43  ;;  %13900 = vmatpush1.msk.msra.mxu1 %vm754_vm1, %v2791_v43 }
 0xd38   :  { %2869 = vmatmul.mubr.f32.vlgmr.msra.gmra.mrb[138].mxu0 %v16162_v34  ;;  %2944 = vmatmul.mubr.f32.vlgmr.msra.gmra.mrb[166].mxu1 %v16168_v25 }
 0xd39   :  { %9667 = vmatprep.mubr.msk.f32.mxu0 %vm702_vm0, %v16174_v9  ;;  %9682 = vmatprep.mubr.msk.f32.mxu1 %vm702_vm0, %v16181_v1 }
 0xd3a   :  { %13373 = vmatprep.subr.bf16.mxu1 %v20517_v16  ;;  %13379 = vmatprep.subr.bf16.mxu0 %v20517_v16 }
 0xd3b   :  { %13375 = vmatpush3.bf16.msra.mxu1 %v13374_v11 }
 0xd3c   :  { %2874 = vmatmul.mubr.f32.gmra.mrb[140].mxu0 %v16190_v24  ;;  %2949 = vmatmul.mubr.f32.gmra.mrb[168].mxu1 %v16196_v26 }
 0xd3d   :  { %9668 = vmatprep.mubr.msk.f32.mxu0 %vm702_vm0, %v16202_v6  ;;  %11594 = vmatprep.mubr.msk.f32.mxu1 %vm14447_vm2, %v20646_v49 }
 0xd3e   :  { %13376 = vmatprep.subr.bf16.mxu1 %v20517_v16 }
 0xd40   :  { %2879 = vmatmul.mubr.f32.gmra.mrb[142].mxu0 %v16211_v8 }
 0xd41   :  { %9669 = vmatprep.mubr.msk.f32.mxu0 %vm702_vm0, %v16217_v50 }
 0xd44   :  { %2884 = vmatmul.mubr.f32.gmra.mrb[144].mxu0 %v16224_v32 }
 0xd45   :  { %9670 = vmatprep.mubr.msk.f32.mxu0 %vm702_vm0, %v16230_v10 }
 0xd48   :  { %2889 = vmatmul.mubr.f32.gmra.mrb[146].mxu0 %v16237_v60 }
 0xd49   :  { %9671 = vmatprep.mubr.msk.f32.mxu0 %vm702_vm0, %v16243_v27 }
 0xd4c   :  { %2894 = vmatmul.mubr.f32.gmra.mrb[148].mxu0 %v16250_v40 }
 0xd4d   :  { %9672 = vmatprep.mubr.msk.f32.mxu0 %vm702_vm0, %v16256_v42 }
 0xd50   :  { %2899 = vmatmul.mubr.f32.gmra.mrb[150].mxu0 %v16263_v52 }
 0xd51   :  { %9673 = vmatprep.mubr.msk.f32.mxu0 %vm702_vm0, %v16269_v51 }
 0xd54   :  { %2904 = vmatmul.mubr.f32.gmra.mrb[152].mxu0 %v16276_v39 }
 0xd55   :  { %9674 = vmatprep.mubr.msk.f32.mxu0 %vm702_vm0, %v16282_v23 }
 0xd58   :  { %2909 = vmatmul.mubr.f32.gmra.mrb[154].mxu0 %v16289_v20 }
 0xd59   :  { %9675 = vmatprep.mubr.msk.f32.mxu0 %vm702_vm0, %v16295_v14 }
 0xd5c   :  { %2914 = vmatmul.mubr.f32.gmra.mrb[156].mxu0 %v16302_v35 }
 0xd5d   :  { %9676 = vmatprep.mubr.msk.f32.mxu0 %vm702_vm0, %v16308_v28 }
 0xd60   :  { %2919 = vmatmul.mubr.f32.gmra.mrb[158].mxu0 %v16315_v19 }
 0xd61   :  { %9677 = vmatprep.mubr.msk.f32.mxu0 %vm702_vm0, %v16321_v41 }
 0xd64   :  { %2924 = vmatmul.mubr.f32.gmra.mrb[160].mxu0 %v16328_v46 }
 0xd65   :  { %9678 = vmatprep.mubr.msk.f32.mxu0 %vm702_vm0, %v16334_v18 }
 0xd68   :  { %2929 = vmatmul.mubr.f32.gmra.mrb[162].mxu0 %v16341_v53 }
 0xd69   :  { %9679 = vmatprep.mubr.msk.f32.mxu0 %vm702_vm0, %v16347_v7 }
 0xd6c   :  { %2934 = vmatmul.mubr.f32.gmra.mrb[164].mxu0 %v16354_v59 }
 0xd6d   :  { %9680 = vmatprep.mubr.msk.f32.mxu0 %vm702_vm0, %v16360_v29 }
 0xd70   :  { %2939 = vmatmul.mubr.f32.gmra.mrb[166].mxu0 %v16367_v36 }
 0xd71   :  { %9707 = vmatprep.mubr.msk.f32.mxu0 %vm702_vm0, %v16040_v47  ;;  %v9686_v47 = vld [vmem:[%s20449_s9 + $0x38] sm:$0xff] }
 0xd72   :  { %v13377_v5 = vpack.c.bf16 %v9686_v47, %v9685_v45 }
 0xd74   :  { %13378 = vmatpush3.bf16.msra.mxu1 %v13377_v5 }
 0xd75   :  { %13403 = vmatprep.subr.bf16.mxu1 %v20517_v16 }
 0xe0b   :  { %v2870_v56 = vpop.f32.mrb[138].mxu0  ;;  %v16388_v15 = vpop.f32.mrb[166].mxu1 }
 0xe0c   :  { %v2871_v61 = vadd.f32 %v16386_v13, %v2870_v56  ;;  %v2872_v21 = vpop.f32.mrb[139].mxu0  ;;  %v2947_v30 = vpop.f32.mrb[167].mxu1 }
 0xe0e   :  { %v2954_v43 = vmax.f32 %v2871_v61, 0.0  ;;  %v20676_v61 = vmax.f32 %v15171_v0, 0.0 }
 0xe0f   :  { %v2875_v33 = vpop.f32.mrb[140].mxu0  ;;  %v2950_v4 = vpop.f32.mrb[168].mxu1 }
 0xe10   :  { %v16393_v11 = vadd.f32 %v2954_v43, %v20675_v54  ;;  %v2876_v45 = vadd.f32 %v16386_v13, %v2875_v33  ;;  %v16397_v47 = vadd.f32 %v16386_v13, %v2950_v4  ;;  %v2877_v5 = vpop.f32.mrb[141].mxu0  ;;  %v2952_v16 = vpop.f32.mrb[169].mxu1  ;;  %v20677_v33 = vmax.f32 %v15180_v31, 0.0 }
 0xe11   :  { %v20678_v5 = vmax.f32 %v15189_v58, 0.0 }
 0xe12   :  { %v2955_v26 = vmax.f32 %v2876_v45, 0.0  ;;  %11595 = vmatmul.mubr.msk.f32.vlgmr.msra.gmra.mrb[170].mxu1 %vm930_vm3, %v16393_v11 }
 0xe13   :  { %v2880_v56 = vpop.f32.mrb[142].mxu0  ;;  %11597 = vmatprep.mubr.msk.f32.mxu1 %vm14447_vm2, %v20646_v49 }
 0xe14   :  { %v16405_v44 = vadd.f32 %v2955_v26, %v20676_v61  ;;  %v2881_v21 = vadd.f32 %v16386_v13, %v2880_v56  ;;  %v2882_v30 = vpop.f32.mrb[143].mxu0 }
 0xe16   :  { %v2956_v43 = vmax.f32 %v2881_v21, 0.0  ;;  %11598 = vmatmul.mubr.msk.f32.gmra.mrb[172].mxu1 %vm930_vm3, %v16405_v44 }
 0xe17   :  { %v2885_v16 = vpop.f32.mrb[144].mxu0  ;;  %11600 = vmatprep.mubr.msk.f32.mxu1 %vm14447_vm2, %v20646_v49 }
 0xe18   :  { %v16414_v4 = vadd.f32 %v2956_v43, %v20677_v33  ;;  %v2886_v54 = vadd.f32 %v16386_v13, %v2885_v16  ;;  %v2887_v0 = vpop.f32.mrb[145].mxu0  ;;  %v20679_v43 = vmax.f32 %v15198_v62, 0.0 }
 0xe1a   :  { %v2957_v26 = vmax.f32 %v2886_v54, 0.0  ;;  %11601 = vmatmul.mubr.msk.f32.gmra.mrb[174].mxu1 %vm930_vm3, %v16414_v4 }
 0xe1b   :  { %v2890_v45 = vpop.f32.mrb[146].mxu0  ;;  %11603 = vmatprep.mubr.msk.f32.mxu1 %vm14447_vm2, %v20646_v49 }
 0xe1c   :  { %v16423_v56 = vadd.f32 %v2957_v26, %v20678_v5  ;;  %v2891_v61 = vadd.f32 %v16386_v13, %v2890_v45  ;;  %v2892_v31 = vpop.f32.mrb[147].mxu0  ;;  %v20680_v26 = vmax.f32 %v15207_v3, 0.0 }
 0xe1e   :  { %v2958_v21 = vmax.f32 %v2891_v61, 0.0  ;;  %11604 = vmatmul.mubr.msk.f32.gmra.mrb[176].mxu1 %vm930_vm3, %v16423_v56 }
 0xe1f   :  { %v2895_v30 = vpop.f32.mrb[148].mxu0  ;;  %11606 = vmatprep.mubr.msk.f32.mxu1 %vm14447_vm2, %v20646_v49 }
 0xe20   :  { %v16432_v16 = vadd.f32 %v2958_v21, %v20679_v43  ;;  %v2896_v33 = vadd.f32 %v16386_v13, %v2895_v30  ;;  %v2897_v58 = vpop.f32.mrb[149].mxu0  ;;  %v20681_v21 = vmax.f32 %v15216_v37, 0.0 }
 0xe22   :  { %v2959_v54 = vmax.f32 %v2896_v33, 0.0  ;;  %11607 = vmatmul.mubr.msk.f32.gmra.mrb[178].mxu1 %vm930_vm3, %v16432_v16 }
 0xe23   :  { %v2900_v0 = vpop.f32.mrb[150].mxu0  ;;  %11609 = vmatprep.mubr.msk.f32.mxu1 %vm14447_vm2, %v20646_v49 }
 0xe24   :  { %v16441_v45 = vadd.f32 %v2959_v54, %v20680_v26  ;;  %v2901_v5 = vadd.f32 %v16386_v13, %v2900_v0  ;;  %v2902_v62 = vpop.f32.mrb[151].mxu0  ;;  %v20682_v54 = vmax.f32 %v15225_v48, 0.0 }
 0xe26   :  { %v2960_v61 = vmax.f32 %v2901_v5, 0.0  ;;  %11610 = vmatmul.mubr.msk.f32.gmra.mrb[180].mxu1 %vm930_vm3, %v16441_v45 }
 0xe27   :  { %v2905_v31 = vpop.f32.mrb[152].mxu0  ;;  %11612 = vmatprep.mubr.msk.f32.mxu1 %vm14447_vm2, %v20646_v49 }
 0xe28   :  { %v16450_v30 = vadd.f32 %v2960_v61, %v20681_v21  ;;  %v2906_v43 = vadd.f32 %v16386_v13, %v2905_v31  ;;  %v2907_v3 = vpop.f32.mrb[153].mxu0  ;;  %v20683_v61 = vmax.f32 %v15234_v57, 0.0 }
 0xe2a   :  { %v2961_v33 = vmax.f32 %v2906_v43, 0.0  ;;  %11613 = vmatmul.mubr.msk.f32.gmra.mrb[182].mxu1 %vm930_vm3, %v16450_v30 }
 0xe2b   :  { %v2910_v58 = vpop.f32.mrb[154].mxu0  ;;  %11615 = vmatprep.mubr.msk.f32.mxu1 %vm14447_vm2, %v20646_v49 }
 0xe2c   :  { %v16459_v0 = vadd.f32 %v2961_v33, %v20682_v54  ;;  %v2911_v26 = vadd.f32 %v16386_v13, %v2910_v58  ;;  %v2912_v37 = vpop.f32.mrb[155].mxu0  ;;  %v20684_v33 = vmax.f32 %v15243_v2, 0.0 }
 0xe2e   :  { %v2962_v5 = vmax.f32 %v2911_v26, 0.0  ;;  %11616 = vmatmul.mubr.msk.f32.gmra.mrb[184].mxu1 %vm930_vm3, %v16459_v0 }
 0xe2f   :  { %v2915_v62 = vpop.f32.mrb[156].mxu0  ;;  %11618 = vmatprep.mubr.msk.f32.mxu1 %vm14447_vm2, %v20646_v49 }
 0xe30   :  { %v16468_v31 = vadd.f32 %v2962_v5, %v20683_v61  ;;  %v2916_v21 = vadd.f32 %v16386_v13, %v2915_v62  ;;  %v2917_v48 = vpop.f32.mrb[157].mxu0  ;;  %v20685_v5 = vmax.f32 %v15252_v17, 0.0 }
 0xe32   :  { %v2963_v43 = vmax.f32 %v2916_v21, 0.0  ;;  %11619 = vmatmul.mubr.msk.f32.gmra.mrb[186].mxu1 %vm930_vm3, %v16468_v31 }
 0xe33   :  { %v2920_v3 = vpop.f32.mrb[158].mxu0  ;;  %11621 = vmatprep.mubr.msk.f32.mxu1 %vm14447_vm2, %v20646_v49 }
 0xe34   :  { %v16477_v58 = vadd.f32 %v2963_v43, %v20684_v33  ;;  %v2921_v54 = vadd.f32 %v16386_v13, %v2920_v3  ;;  %v2922_v57 = vpop.f32.mrb[159].mxu0  ;;  %v20686_v43 = vmax.f32 %v15261_v63, 0.0 }
 0xe36   :  { %v2964_v26 = vmax.f32 %v2921_v54, 0.0  ;;  %11622 = vmatmul.mubr.msk.f32.gmra.mrb[188].mxu1 %vm930_vm3, %v16477_v58 }
 0xe37   :  { %v2925_v37 = vpop.f32.mrb[160].mxu0  ;;  %11624 = vmatprep.mubr.msk.f32.mxu1 %vm14447_vm2, %v20646_v49 }
 0xe38   :  { %v16486_v62 = vadd.f32 %v2964_v26, %v20685_v5  ;;  %v2926_v61 = vadd.f32 %v16386_v13, %v2925_v37  ;;  %v2927_v2 = vpop.f32.mrb[161].mxu0  ;;  %v20687_v26 = vmax.f32 %v15270_v12, 0.0 }
 0xe3a   :  { %v2965_v21 = vmax.f32 %v2926_v61, 0.0  ;;  %11625 = vmatmul.mubr.msk.f32.gmra.mrb[190].mxu1 %vm930_vm3, %v16486_v62 }
 0xe3b   :  { %v2930_v48 = vpop.f32.mrb[162].mxu0  ;;  %11627 = vmatprep.mubr.msk.f32.mxu1 %vm14447_vm2, %v20646_v49 }
 0xe3c   :  { %v16495_v3 = vadd.f32 %v2965_v21, %v20686_v43  ;;  %v2931_v33 = vadd.f32 %v16386_v13, %v2930_v48  ;;  %v2932_v17 = vpop.f32.mrb[163].mxu0  ;;  %v2946_v21 = vadd.f32 %v16386_v13, %v16388_v15  ;;  %v20688_v48 = vmax.f32 %v15279_v55, 0.0  ;;  %v20690_v55 = vld [vmem:[#allocation17_spill] sm:$0xff] }
 0xe3e   :  { %v2966_v54 = vmax.f32 %v2931_v33, 0.0  ;;  %11628 = vmatmul.mubr.msk.f32.gmra.mrb[192].mxu1 %vm930_vm3, %v16495_v3 }
 0xe3f   :  { %v2935_v57 = vpop.f32.mrb[164].mxu0  ;;  %11630 = vmatprep.mubr.msk.f32.mxu1 %vm14447_vm2, %v20646_v49 }
 0xe40   :  { %v16504_v37 = vadd.f32 %v2966_v54, %v20687_v26  ;;  %v2936_v5 = vadd.f32 %v16386_v13, %v2935_v57  ;;  %v2937_v63 = vpop.f32.mrb[165].mxu0  ;;  %v2969_v54 = vmax.f32 %v2946_v21, 0.0  ;;  %v20689_v57 = vmax.f32 %v15288_v38, 0.0  ;;  %v20693_v38 = vld [vmem:[#allocation18_spill] sm:$0xff] }
 0xe41   :  { %v20694_v63 = vmax.f32 %v20693_v38, 0.0  ;;  %v20696_v38 = vmov 0.0|0.0  }
 0xe42   :  { %v2967_v61 = vmax.f32 %v2936_v5, 0.0  ;;  %11631 = vmatmul.mubr.msk.f32.gmra.mrb[194].mxu1 %vm930_vm3, %v16504_v37  ;;  %v2970_v5 = vmax.f32 %v16397_v47, 0.0  ;;  %v9724_v47 = vld [vmem:[%s20451_s11 + $0x30] sm:$0xff] }
 0xe43   :  { %v2940_v2 = vpop.f32.mrb[166].mxu0  ;;  %11633 = vmatprep.mubr.msk.f32.mxu1 %vm14447_vm2, %v20646_v49 }
 0xe44   :  { %v16515_v43 = vadd.f32 %v2967_v61, %v20688_v48  ;;  %v2941_v12 = vadd.f32 %v16386_v13, %v2940_v2  ;;  %v2942_v33 = vpop.f32.mrb[167].mxu0  ;;  %v20691_v13 = vmax.f32 %v20690_v55, 0.0  ;;  %v16541_v61 = vadd.f32 %v2970_v5, %v20694_v63  ;;  %v9727_v55 = vld [vmem:[%s20451_s11 + $0x48] sm:$0xff] }
 0xe45   :  { %v9726_v33 = vld [vmem:[%s20451_s11 + $0x40] sm:$0xff] }
 0xe46   :  { %v2968_v17 = vmax.f32 %v2941_v12, 0.0  ;;  %11634 = vmatmul.mubr.msk.f32.gmra.mrb[196].mxu1 %vm930_vm3, %v16515_v43  ;;  %v16532_v15 = vadd.f32 %v2969_v54, %v20691_v13  ;;  %20695 = vst [vmem:[#allocation18_spill] sm:$0xff] %v16541_v61  ;;  %v9725_v12 = vld [vmem:[%s20451_s11 + $0x38] sm:$0xff]  ;;  %v13407_v13 = vpack.c.bf16 %v9727_v55, %v9726_v33 }
 0xe47   :  { %11636 = vmatprep.mubr.msk.f32.mxu1 %vm14447_vm2, %v20646_v49 }
 0xe48   :  { %v16524_v26 = vadd.f32 %v2968_v17, %v20689_v57  ;;  %20692 = vst [vmem:[#allocation17_spill] sm:$0xff] %v16532_v15  ;;  %v13404_v57 = vpack.c.bf16 %v9725_v12, %v9724_v47 }
 0xe4a   :  { %11637 = vmatmul.mubr.msk.f32.gmra.mrb[198].mxu1 %vm930_vm3, %v16524_v26 }
 0xe4b   :  { %11639 = vmatprep.mubr.msk.f32.mxu1 %vm14447_vm2, %v20646_v49  ;;  %13405 = vmatpush3.bf16.msra.mxu1 %v13404_v57 }
 0xe4c   :  { %13406 = vmatprep.subr.bf16.mxu1 %v20696_v38 }
 0xe4e   :  { %11640 = vmatmul.mubr.msk.f32.gmra.mrb[200].mxu1 %vm930_vm3, %v16532_v15 }
 0xe4f   :  { %11642 = vmatprep.mubr.msk.f32.mxu1 %vm14447_vm2, %v20646_v49  ;;  %13408 = vmatpush3.bf16.msra.mxu1 %v13407_v13 }
 0xe50   :  { %13409 = vmatprep.subr.bf16.mxu1 %v20696_v38 }
 0xe52   :  { %11643 = vmatmul.mubr.msk.f32.gmra.mrb[202].mxu1 %vm930_vm3, %v16541_v61 }
 0xe53   :  { %11657 = vmatprep.mubr.msk.f32.mxu1 %vm14447_vm2, %v20646_v49 }
 0xee5   :  { %v3116_v2 = vpop.f32.mrb[170].mxu1 }
 0xee6   :  { %v11596_v21 = vpop.f32.mrb[171].mxu1 }
 0xee9   :  { %v3121_v48 = vpop.f32.mrb[172].mxu1 }
 0xeea   :  { %v13380_v17 = vpack.c.bf16 %v3121_v48, %v3116_v2  ;;  %v11599_v54 = vpop.f32.mrb[173].mxu1 }
 0xeec   :  { %13381 = vmatpush1.bf16.msra.mxu0 %v13380_v17 }
 0xeed   :  { %v3126_v5 = vpop.f32.mrb[174].mxu1  ;;  %13382 = vmatprep.subr.bf16.mxu0 %v20696_v38 }
 0xeee   :  { %v11602_v63 = vpop.f32.mrb[175].mxu1 }
 0xef1   :  { %v3131_v21 = vpop.f32.mrb[176].mxu1 }
 0xef2   :  { %v13383_v2 = vpack.c.bf16 %v3131_v21, %v3126_v5  ;;  %v11605_v48 = vpop.f32.mrb[177].mxu1 }
 0xef4   :  { %13384 = vmatpush1.bf16.msra.mxu0 %v13383_v2 }
 0xef5   :  { %v3136_v47 = vpop.f32.mrb[178].mxu1  ;;  %13385 = vmatprep.subr.bf16.mxu0 %v20696_v38 }
 0xef6   :  { %v11608_v12 = vpop.f32.mrb[179].mxu1 }
 0xef9   :  { %v3141_v17 = vpop.f32.mrb[180].mxu1 }
 0xefa   :  { %v13386_v54 = vpack.c.bf16 %v3141_v17, %v3136_v47  ;;  %v11611_v33 = vpop.f32.mrb[181].mxu1 }
 0xefc   :  { %13387 = vmatpush1.bf16.msra.mxu0 %v13386_v54 }
 0xefd   :  { %v3146_v57 = vpop.f32.mrb[182].mxu1  ;;  %13388 = vmatprep.subr.bf16.mxu0 %v20696_v38 }
 0xefe   :  { %v11614_v55 = vpop.f32.mrb[183].mxu1 }
 0xf01   :  { %v3151_v63 = vpop.f32.mrb[184].mxu1 }
 0xf02   :  { %v13389_v13 = vpack.c.bf16 %v3151_v63, %v3146_v57  ;;  %v11617_v61 = vpop.f32.mrb[185].mxu1 }
 0xf04   :  { %13390 = vmatpush1.bf16.msra.mxu0 %v13389_v13 }
 0xf05   :  { %v3156_v15 = vpop.f32.mrb[186].mxu1  ;;  %13391 = vmatprep.subr.bf16.mxu0 %v20696_v38 }
 0xf06   :  { %v11620_v5 = vpop.f32.mrb[187].mxu1 }
 0xf09   :  { %v3161_v21 = vpop.f32.mrb[188].mxu1 }
 0xf0a   :  { %v13392_v2 = vpack.c.bf16 %v3161_v21, %v3156_v15  ;;  %v11623_v48 = vpop.f32.mrb[189].mxu1 }
 0xf0c   :  { %13393 = vmatpush1.bf16.msra.mxu0 %v13392_v2 }
 0xf0d   :  { %v3166_v12 = vpop.f32.mrb[190].mxu1  ;;  %13394 = vmatprep.subr.bf16.mxu0 %v20696_v38 }
 0xf0e   :  { %v11626_v47 = vpop.f32.mrb[191].mxu1 }
 0xf11   :  { %v3171_v17 = vpop.f32.mrb[192].mxu1 }
 0xf12   :  { %v13395_v54 = vpack.c.bf16 %v3171_v17, %v3166_v12  ;;  %v11629_v33 = vpop.f32.mrb[193].mxu1 }
 0xf14   :  { %13396 = vmatpush1.bf16.msra.mxu0 %v13395_v54 }
 0xf15   :  { %v3176_v55 = vpop.f32.mrb[194].mxu1  ;;  %13397 = vmatprep.subr.bf16.mxu0 %v20696_v38 }
 0xf16   :  { %v11632_v61 = vpop.f32.mrb[195].mxu1 }
 0xf19   :  { %v3181_v57 = vpop.f32.mrb[196].mxu1 }
 0xf1a   :  { %v13398_v63 = vpack.c.bf16 %v3181_v57, %v3176_v55  ;;  %v11635_v13 = vpop.f32.mrb[197].mxu1 }
 0xf1c   :  { %13399 = vmatpush1.bf16.msra.mxu0 %v13398_v63 }
 0xf1d   :  { %v3186_v5 = vpop.f32.mrb[198].mxu1  ;;  %13400 = vmatprep.subr.bf16.mxu0 %v20696_v38 }
 0xf1e   :  { %v11638_v15 = vpop.f32.mrb[199].mxu1 }
 0xf21   :  { %v3191_v21 = vpop.f32.mrb[200].mxu1 }
 0xf22   :  { %v13401_v2 = vpack.c.bf16 %v3191_v21, %v3186_v5  ;;  %v11641_v48 = vpop.f32.mrb[201].mxu1 }
 0xf24   :  { %13402 = vmatpush1.bf16.msra.mxu0 %v13401_v2 }
 0xf25   :  { %v3196_v47 = vpop.f32.mrb[202].mxu1  ;;  %3241 = vmatprep.subr.mxu0 %v20646_v49 }
 0xf26   :  { %v11644_v12 = vpop.f32.mrb[203].mxu1 }
 0xf28   :  { %9706 = vmatpush1.msk.msra.mxu0 %vm754_vm1, %v3196_v47 }
 0xf29   :  { %3274 = vmatmul.mubr.f32.vlgmr.msra.gmra.mrb[168].mxu0 %v16162_v34  ;;  %13412 = vmatprep.subr.bf16.mxu0 %v20696_v38  ;;  %v20697_v34 = vld [vmem:[#allocation19_spill] sm:$0xff] }
 0xf2a   :  { %9708 = vmatprep.mubr.msk.f32.mxu0 %vm702_vm0, %v16174_v9  ;;  %v13992_v9 = vld [vmem:[%s20647_s16 + $0x8] sm:$0xff] }
 0xf2d   :  { %3279 = vmatmul.mubr.f32.gmra.mrb[170].mxu0 %v16190_v24  ;;  %v9728_v24 = vld [vmem:[%s20451_s11 + $0x50] sm:$0xff] }
 0xf2e   :  { %9709 = vmatprep.mubr.msk.f32.mxu0 %vm702_vm0, %v16202_v6 }
 0xf31   :  { %3284 = vmatmul.mubr.f32.gmra.mrb[172].mxu0 %v16211_v8 }
 0xf32   :  { %9710 = vmatprep.mubr.msk.f32.mxu0 %vm702_vm0, %v16217_v50 }
 0xf35   :  { %3289 = vmatmul.mubr.f32.gmra.mrb[174].mxu0 %v16224_v32 }
 0xf36   :  { %9711 = vmatprep.mubr.msk.f32.mxu0 %vm702_vm0, %v16230_v10 }
 0xf39   :  { %3294 = vmatmul.mubr.f32.gmra.mrb[176].mxu0 %v16237_v60 }
 0xf3a   :  { %9712 = vmatprep.mubr.msk.f32.mxu0 %vm702_vm0, %v16243_v27 }
 0xf3d   :  { %3299 = vmatmul.mubr.f32.gmra.mrb[178].mxu0 %v16250_v40 }
 0xf3e   :  { %9713 = vmatprep.mubr.msk.f32.mxu0 %vm702_vm0, %v16256_v42 }
 0xf41   :  { %3304 = vmatmul.mubr.f32.gmra.mrb[180].mxu0 %v16263_v52 }
 0xf42   :  { %9714 = vmatprep.mubr.msk.f32.mxu0 %vm702_vm0, %v16269_v51 }
 0xf45   :  { %3309 = vmatmul.mubr.f32.gmra.mrb[182].mxu0 %v16276_v39 }
 0xf46   :  { %9715 = vmatprep.mubr.msk.f32.mxu0 %vm702_vm0, %v16282_v23 }
 0xf49   :  { %3314 = vmatmul.mubr.f32.gmra.mrb[184].mxu0 %v16289_v20 }
 0xf4a   :  { %9716 = vmatprep.mubr.msk.f32.mxu0 %vm702_vm0, %v16295_v14 }
 0xf4d   :  { %3319 = vmatmul.mubr.f32.gmra.mrb[186].mxu0 %v16302_v35 }
 0xf4e   :  { %9717 = vmatprep.mubr.msk.f32.mxu0 %vm702_vm0, %v16308_v28 }
 0xf51   :  { %3324 = vmatmul.mubr.f32.gmra.mrb[188].mxu0 %v16315_v19 }
 0xf52   :  { %9718 = vmatprep.mubr.msk.f32.mxu0 %vm702_vm0, %v16321_v41 }
 0xf55   :  { %3329 = vmatmul.mubr.f32.gmra.mrb[190].mxu0 %v16328_v46 }
 0xf56   :  { %9719 = vmatprep.mubr.msk.f32.mxu0 %vm702_vm0, %v16334_v18 }
 0xf59   :  { %3334 = vmatmul.mubr.f32.gmra.mrb[192].mxu0 %v16341_v53 }
 0xf5a   :  { %9720 = vmatprep.mubr.msk.f32.mxu0 %vm702_vm0, %v16347_v7 }
 0xf5d   :  { %3339 = vmatmul.mubr.f32.gmra.mrb[194].mxu0 %v16354_v59 }
 0xf5e   :  { %9721 = vmatprep.mubr.msk.f32.mxu0 %vm702_vm0, %v16360_v29 }
 0xf61   :  { %3344 = vmatmul.mubr.f32.gmra.mrb[196].mxu0 %v16367_v36 }
 0xf62   :  { %9722 = vmatprep.mubr.msk.f32.mxu0 %vm702_vm0, %v16137_v22  ;;  %v9729_v22 = vld [vmem:[%s20451_s11 + $0x58] sm:$0xff] }
 0xf65   :  { %3349 = vmatmul.mubr.f32.gmra.mrb[198].mxu0 %v16168_v25  ;;  %v13410_v25 = vpack.c.bf16 %v9729_v22, %v9728_v24 }
 0xf66   :  { %9723 = vmatprep.mubr.msk.f32.mxu0 %vm702_vm0, %v16181_v1  ;;  %v16634_v1 = vld [vmem:[%s20450_s10 + $0x1] ss:$0 sm:$0xff] }
 0xf67   :  { %13411 = vmatpush3.bf16.msra.mxu1 %v13410_v25 }
 0xf68   :  { %13436 = vmatprep.subr.bf16.mxu1 %v20696_v38 }
 0xf69   :  { %3354 = vmatmul.mubr.f32.gmra.mrb[200].mxu0 %v20697_v34 }
 0xf6a   :  { %9749 = vmatprep.mubr.msk.f32.mxu0 %vm702_vm0, %v13992_v9 }
 0xffc   :  { %v3275_v6 = vpop.f32.mrb[168].mxu0 }
 0xffd   :  { %v16637_v8 = vadd.f32 %v16634_v1, %v3275_v6  ;;  %v3277_v50 = vpop.f32.mrb[169].mxu0 }
 0xfff   :  { %v20540_v32 = vmax.f32 %v16637_v8, 0.0 }
0x1000   :  { %v3280_v10 = vpop.f32.mrb[170].mxu0 }
0x1001   :  { %v16641_v60 = vadd.f32 %v16634_v1, %v3280_v10  ;;  %v3282_v27 = vpop.f32.mrb[171].mxu0  ;;  %11658 = vmatmul.mubr.msk.f32.vlgmr.msra.gmra.mrb[204].mxu1 %vm1315_vm4, %v20540_v32 }
0x1002   :  { %11660 = vmatprep.mubr.msk.f32.mxu1 %vm14447_vm2, %v20646_v49 }
0x1003   :  { %v20539_v40 = vmax.f32 %v16641_v60, 0.0 }
0x1004   :  { %v3285_v42 = vpop.f32.mrb[172].mxu0 }
0x1005   :  { %v16650_v52 = vadd.f32 %v16634_v1, %v3285_v42  ;;  %v3287_v51 = vpop.f32.mrb[173].mxu0  ;;  %11661 = vmatmul.mubr.msk.f32.gmra.mrb[206].mxu1 %vm1315_vm4, %v20539_v40 }
0x1006   :  { %11663 = vmatprep.mubr.msk.f32.mxu1 %vm14447_vm2, %v20646_v49 }
0x1007   :  { %v20538_v39 = vmax.f32 %v16650_v52, 0.0 }
0x1008   :  { %v3290_v23 = vpop.f32.mrb[174].mxu0 }
0x1009   :  { %v16659_v20 = vadd.f32 %v16634_v1, %v3290_v23  ;;  %v3292_v14 = vpop.f32.mrb[175].mxu0  ;;  %11664 = vmatmul.mubr.msk.f32.gmra.mrb[208].mxu1 %vm1315_vm4, %v20538_v39 }
0x100a   :  { %11666 = vmatprep.mubr.msk.f32.mxu1 %vm14447_vm2, %v20646_v49 }
0x100b   :  { %v20537_v35 = vmax.f32 %v16659_v20, 0.0 }
0x100c   :  { %v3295_v28 = vpop.f32.mrb[176].mxu0 }
0x100d   :  { %v16668_v19 = vadd.f32 %v16634_v1, %v3295_v28  ;;  %v3297_v41 = vpop.f32.mrb[177].mxu0  ;;  %11667 = vmatmul.mubr.msk.f32.gmra.mrb[210].mxu1 %vm1315_vm4, %v20537_v35 }
0x100e   :  { %11669 = vmatprep.mubr.msk.f32.mxu1 %vm14447_vm2, %v20646_v49 }
0x100f   :  { %v20536_v46 = vmax.f32 %v16668_v19, 0.0 }
0x1010   :  { %v3300_v18 = vpop.f32.mrb[178].mxu0 }
0x1011   :  { %v16677_v53 = vadd.f32 %v16634_v1, %v3300_v18  ;;  %v3302_v7 = vpop.f32.mrb[179].mxu0  ;;  %11670 = vmatmul.mubr.msk.f32.gmra.mrb[212].mxu1 %vm1315_vm4, %v20536_v46 }
0x1012   :  { %11672 = vmatprep.mubr.msk.f32.mxu1 %vm14447_vm2, %v20646_v49 }
0x1013   :  { %v20535_v59 = vmax.f32 %v16677_v53, 0.0 }
0x1014   :  { %v3305_v29 = vpop.f32.mrb[180].mxu0 }
0x1015   :  { %v16686_v36 = vadd.f32 %v16634_v1, %v3305_v29  ;;  %v3307_v17 = vpop.f32.mrb[181].mxu0  ;;  %11673 = vmatmul.mubr.msk.f32.gmra.mrb[214].mxu1 %vm1315_vm4, %v20535_v59 }
0x1016   :  { %11675 = vmatprep.mubr.msk.f32.mxu1 %vm14447_vm2, %v20646_v49 }
0x1017   :  { %v20534_v54 = vmax.f32 %v16686_v36, 0.0 }
0x1018   :  { %v3310_v33 = vpop.f32.mrb[182].mxu0 }
0x1019   :  { %v16695_v55 = vadd.f32 %v16634_v1, %v3310_v33  ;;  %v3312_v61 = vpop.f32.mrb[183].mxu0  ;;  %11676 = vmatmul.mubr.msk.f32.gmra.mrb[216].mxu1 %vm1315_vm4, %v20534_v54 }
0x101a   :  { %11678 = vmatprep.mubr.msk.f32.mxu1 %vm14447_vm2, %v20646_v49 }
0x101b   :  { %v20533_v57 = vmax.f32 %v16695_v55, 0.0 }
0x101c   :  { %v3315_v63 = vpop.f32.mrb[184].mxu0 }
0x101d   :  { %v16704_v13 = vadd.f32 %v16634_v1, %v3315_v63  ;;  %v3317_v5 = vpop.f32.mrb[185].mxu0  ;;  %11679 = vmatmul.mubr.msk.f32.gmra.mrb[218].mxu1 %vm1315_vm4, %v20533_v57 }
0x101e   :  { %11681 = vmatprep.mubr.msk.f32.mxu1 %vm14447_vm2, %v20646_v49 }
0x101f   :  { %v20532_v15 = vmax.f32 %v16704_v13, 0.0 }
0x1020   :  { %v3320_v21 = vpop.f32.mrb[186].mxu0 }
0x1021   :  { %v16713_v2 = vadd.f32 %v16634_v1, %v3320_v21  ;;  %v3322_v48 = vpop.f32.mrb[187].mxu0  ;;  %11682 = vmatmul.mubr.msk.f32.gmra.mrb[220].mxu1 %vm1315_vm4, %v20532_v15 }
0x1022   :  { %11684 = vmatprep.mubr.msk.f32.mxu1 %vm14447_vm2, %v20646_v49 }
0x1023   :  { %v20531_v47 = vmax.f32 %v16713_v2, 0.0 }
0x1024   :  { %v3325_v12 = vpop.f32.mrb[188].mxu0 }
0x1025   :  { %v16722_v34 = vadd.f32 %v16634_v1, %v3325_v12  ;;  %v3327_v9 = vpop.f32.mrb[189].mxu0  ;;  %11685 = vmatmul.mubr.msk.f32.gmra.mrb[222].mxu1 %vm1315_vm4, %v20531_v47 }
0x1026   :  { %11687 = vmatprep.mubr.msk.f32.mxu1 %vm14447_vm2, %v20646_v49 }
0x1027   :  { %v20530_v24 = vmax.f32 %v16722_v34, 0.0 }
0x1028   :  { %v3330_v22 = vpop.f32.mrb[190].mxu0 }
0x1029   :  { %v16731_v25 = vadd.f32 %v16634_v1, %v3330_v22  ;;  %v3332_v6 = vpop.f32.mrb[191].mxu0  ;;  %11688 = vmatmul.mubr.msk.f32.gmra.mrb[224].mxu1 %vm1315_vm4, %v20530_v24  ;;  %v9759_v22 = vld [vmem:[%s20453_s13 + $0x48] sm:$0xff] }
0x102a   :  { %11690 = vmatprep.mubr.msk.f32.mxu1 %vm14447_vm2, %v20646_v49  ;;  %v9760_v6 = vld [vmem:[%s20453_s13 + $0x50] sm:$0xff] }
0x102b   :  { %v20529_v50 = vmax.f32 %v16731_v25, 0.0 }
0x102c   :  { %v3335_v10 = vpop.f32.mrb[192].mxu0 }
0x102d   :  { %v16740_v27 = vadd.f32 %v16634_v1, %v3335_v10  ;;  %v3337_v42 = vpop.f32.mrb[193].mxu0  ;;  %11691 = vmatmul.mubr.msk.f32.gmra.mrb[226].mxu1 %vm1315_vm4, %v20529_v50 }
0x102e   :  { %11693 = vmatprep.mubr.msk.f32.mxu1 %vm14447_vm2, %v20646_v49  ;;  %v9761_v42 = vld [vmem:[%s20453_s13 + $0x58] sm:$0xff] }
0x102f   :  { %v20528_v51 = vmax.f32 %v16740_v27, 0.0 }
0x1030   :  { %v3340_v23 = vpop.f32.mrb[194].mxu0 }
0x1031   :  { %v16749_v14 = vadd.f32 %v16634_v1, %v3340_v23  ;;  %v3342_v28 = vpop.f32.mrb[195].mxu0  ;;  %11694 = vmatmul.mubr.msk.f32.gmra.mrb[228].mxu1 %vm1315_vm4, %v20528_v51  ;;  %v13440_v23 = vpack.c.bf16 %v9761_v42, %v9760_v6 }
0x1032   :  { %11696 = vmatprep.mubr.msk.f32.mxu1 %vm14447_vm2, %v20646_v49  ;;  %v9762_v28 = vld [vmem:[%s20453_s13 + $0x60] sm:$0xff] }
0x1033   :  { %v20527_v41 = vmax.f32 %v16749_v14, 0.0 }
0x1034   :  { %v3345_v18 = vpop.f32.mrb[196].mxu0 }
0x1035   :  { %v16758_v7 = vadd.f32 %v16634_v1, %v3345_v18  ;;  %v3347_v29 = vpop.f32.mrb[197].mxu0  ;;  %11697 = vmatmul.mubr.msk.f32.gmra.mrb[230].mxu1 %vm1315_vm4, %v20527_v41  ;;  %v9763_v18 = vld [vmem:[%s20453_s13 + $0x68] sm:$0xff] }
0x1036   :  { %11699 = vmatprep.mubr.msk.f32.mxu1 %vm14447_vm2, %v20646_v49  ;;  %v13443_v29 = vpack.c.bf16 %v9763_v18, %v9762_v28 }
0x1037   :  { %v20526_v17 = vmax.f32 %v16758_v7, 0.0 }
0x1038   :  { %v3350_v33 = vpop.f32.mrb[198].mxu0 }
0x1039   :  { %v16767_v61 = vadd.f32 %v16634_v1, %v3350_v33  ;;  %v3352_v63 = vpop.f32.mrb[199].mxu0  ;;  %11700 = vmatmul.mubr.msk.f32.gmra.mrb[232].mxu1 %vm1315_vm4, %v20526_v17 }
0x103a   :  { %11702 = vmatprep.mubr.msk.f32.mxu1 %vm14447_vm2, %v20646_v49 }
0x103b   :  { %v20525_v5 = vmax.f32 %v16767_v61, 0.0 }
0x103c   :  { %v3355_v21 = vpop.f32.mrb[200].mxu0 }
0x103d   :  { %v16776_v48 = vadd.f32 %v16634_v1, %v3355_v21  ;;  %11703 = vmatmul.mubr.msk.f32.gmra.mrb[234].mxu1 %vm1315_vm4, %v20525_v5  ;;  %v3357_v12 = vpop.f32.mrb[201].mxu0  ;;  %v9758_v1 = vld [vmem:[%s20453_s13 + $0x40] sm:$0xff] }
0x103e   :  { %11705 = vmatprep.mubr.msk.f32.mxu1 %vm14447_vm2, %v20646_v49  ;;  %v13437_v10 = vpack.c.bf16 %v9759_v22, %v9758_v1 }
0x103f   :  { %v20524_v9 = vmax.f32 %v16776_v48, 0.0 }
0x1040   :  { %13438 = vmatpush3.bf16.msra.mxu1 %v13437_v10 }
0x1041   :  { %11706 = vmatmul.mubr.msk.f32.gmra.mrb[236].mxu1 %vm1315_vm4, %v20524_v9  ;;  %13439 = vmatprep.subr.bf16.mxu1 %v20696_v38 }
0x1042   :  { %11724 = vmatprep.mubr.msk.f32.mxu1 %vm14447_vm2, %v20646_v49 }
0x1044   :  { %13441 = vmatpush3.bf16.msra.mxu1 %v13440_v23 }
0x1045   :  { %13442 = vmatprep.subr.bf16.mxu1 %v20696_v38 }
0x1048   :  { %13444 = vmatpush3.bf16.msra.mxu1 %v13443_v29 }
0x1049   :  { %13445 = vmatprep.subr.bf16.mxu1 %v20696_v38 }
0x10d4   :  { %v3502_v33 = vpop.f32.mrb[204].mxu1 }
0x10d5   :  { %v11659_v63 = vpop.f32.mrb[205].mxu1 }
0x10d8   :  { %v3507_v21 = vpop.f32.mrb[206].mxu1 }
0x10d9   :  { %v13413_v12 = vpack.c.bf16 %v3507_v21, %v3502_v33  ;;  %v11662_v1 = vpop.f32.mrb[207].mxu1 }
0x10db   :  { %13414 = vmatpush1.bf16.msra.mxu0 %v13413_v12 }
0x10dc   :  { %v3512_v22 = vpop.f32.mrb[208].mxu1  ;;  %13415 = vmatprep.subr.bf16.mxu0 %v20696_v38 }
0x10dd   :  { %v11665_v6 = vpop.f32.mrb[209].mxu1 }
0x10e0   :  { %v3517_v10 = vpop.f32.mrb[210].mxu1 }
0x10e1   :  { %v13416_v42 = vpack.c.bf16 %v3517_v10, %v3512_v22  ;;  %v11668_v9 = vpop.f32.mrb[211].mxu1 }
0x10e3   :  { %13417 = vmatpush1.bf16.msra.mxu0 %v13416_v42 }
0x10e4   :  { %v3522_v23 = vpop.f32.mrb[212].mxu1  ;;  %13418 = vmatprep.subr.bf16.mxu0 %v20696_v38 }
0x10e5   :  { %v11671_v28 = vpop.f32.mrb[213].mxu1 }
0x10e8   :  { %v3527_v18 = vpop.f32.mrb[214].mxu1 }
0x10e9   :  { %v13419_v29 = vpack.c.bf16 %v3527_v18, %v3522_v23  ;;  %v11674_v5 = vpop.f32.mrb[215].mxu1 }
0x10eb   :  { %13420 = vmatpush1.bf16.msra.mxu0 %v13419_v29 }
0x10ec   :  { %v3532_v63 = vpop.f32.mrb[216].mxu1  ;;  %13421 = vmatprep.subr.bf16.mxu0 %v20696_v38 }
0x10ed   :  { %v11677_v33 = vpop.f32.mrb[217].mxu1 }
0x10f0   :  { %v3537_v21 = vpop.f32.mrb[218].mxu1 }
0x10f1   :  { %v13422_v12 = vpack.c.bf16 %v3537_v21, %v3532_v63  ;;  %v11680_v1 = vpop.f32.mrb[219].mxu1 }
0x10f3   :  { %13423 = vmatpush1.bf16.msra.mxu0 %v13422_v12 }
0x10f4   :  { %v3542_v6 = vpop.f32.mrb[220].mxu1  ;;  %13424 = vmatprep.subr.bf16.mxu0 %v20696_v38 }
0x10f5   :  { %v11683_v9 = vpop.f32.mrb[221].mxu1 }
0x10f8   :  { %v3547_v22 = vpop.f32.mrb[222].mxu1 }
0x10f9   :  { %v13425_v10 = vpack.c.bf16 %v3547_v22, %v3542_v6  ;;  %v11686_v42 = vpop.f32.mrb[223].mxu1 }
0x10fb   :  { %13426 = vmatpush1.bf16.msra.mxu0 %v13425_v10 }
0x10fc   :  { %v3552_v28 = vpop.f32.mrb[224].mxu1  ;;  %13427 = vmatprep.subr.bf16.mxu0 %v20696_v38 }
0x10fd   :  { %v11689_v5 = vpop.f32.mrb[225].mxu1 }
0x1100   :  { %v3557_v23 = vpop.f32.mrb[226].mxu1 }
0x1101   :  { %v13428_v18 = vpack.c.bf16 %v3557_v23, %v3552_v28  ;;  %v11692_v29 = vpop.f32.mrb[227].mxu1  ;;  %v13993_v23 = vld [vmem:[%s20647_s16] sm:$0xff] }
0x1102   :  { %v13995_v29 = vld [vmem:[%s20647_s16 + $0x10] sm:$0xff] }
0x1103   :  { %13429 = vmatpush1.bf16.msra.mxu0 %v13428_v18  ;;  %v13994_v18 = vld [vmem:[%s20647_s16 + $0x18] sm:$0xff] }
0x1104   :  { %v3562_v33 = vpop.f32.mrb[228].mxu1  ;;  %13430 = vmatprep.subr.bf16.mxu0 %v20696_v38 }
0x1105   :  { %v11695_v63 = vpop.f32.mrb[229].mxu1 }
0x1106   :  { %v13997_v63 = vld [vmem:[%s20647_s16 + $0x20] sm:$0xff] }
0x1108   :  { %v3567_v21 = vpop.f32.mrb[230].mxu1 }
0x1109   :  { %v13431_v12 = vpack.c.bf16 %v3567_v21, %v3562_v33  ;;  %v11698_v1 = vpop.f32.mrb[231].mxu1  ;;  %v13996_v33 = vld [vmem:[%s20647_s16 + $0x28] sm:$0xff]  ;;  %v13998_v21 = vld [vmem:[%s20647_s16 + $0x38] sm:$0xff] }
0x110a   :  { %v14000_v1 = vld [vmem:[%s20647_s16 + $0x48] sm:$0xff] }
0x110b   :  { %13432 = vmatpush1.bf16.msra.mxu0 %v13431_v12  ;;  %v13999_v12 = vld [vmem:[%s20647_s16 + $0x30] sm:$0xff] }
0x110c   :  { %v3572_v9 = vpop.f32.mrb[232].mxu1  ;;  %13433 = vmatprep.subr.bf16.mxu0 %v20696_v38 }
0x110d   :  { %v11701_v6 = vpop.f32.mrb[233].mxu1 }
0x110e   :  { %v14002_v6 = vld [vmem:[%s20647_s16 + $0x58] sm:$0xff] }
0x1110   :  { %v3577_v22 = vpop.f32.mrb[234].mxu1 }
0x1111   :  { %v13434_v10 = vpack.c.bf16 %v3577_v22, %v3572_v9  ;;  %v11704_v42 = vpop.f32.mrb[235].mxu1  ;;  %v14001_v9 = vld [vmem:[%s20647_s16 + $0x40] sm:$0xff]  ;;  %v14003_v22 = vld [vmem:[%s20647_s16 + $0x50] sm:$0xff] }
0x1112   :  { %v14005_v42 = vld [vmem:[%s20647_s16 + $0x60] sm:$0xff] }
0x1113   :  { %13435 = vmatpush1.bf16.msra.mxu0 %v13434_v10  ;;  %v14004_v10 = vld [vmem:[%s20647_s16 + $0x68] sm:$0xff] }
0x1114   :  { %v3582_v5 = vpop.f32.mrb[236].mxu1  ;;  %3627 = vmatprep.subr.mxu0 %v20646_v49 }
0x1115   :  { %v11707_v28 = vpop.f32.mrb[237].mxu1 }
0x1116   :  { %v14007_v28 = vld [vmem:[%s20647_s16 + $0x70] sm:$0xff] }
0x1117   :  { %9748 = vmatpush1.msk.msra.mxu0 %vm754_vm1, %v3582_v5  ;;  %v14006_v5 = vld [vmem:[%s20647_s16 + $0x78] sm:$0xff] }
0x1118   :  { %3660 = vmatmul.mubr.f32.vlgmr.msra.gmra.mrb[202].mxu0 %v13993_v23  ;;  %13448 = vmatprep.subr.bf16.mxu0 %v20696_v38  ;;  %v14008_v23 = vld [vmem:[%s20647_s16 + $0x88] sm:$0xf] }
0x1119   :  { %9750 = vmatprep.mubr.msk.f32.mxu0 %vm702_vm0, %v13994_v18  ;;  %v14009_v18 = vld [vmem:[%s20647_s16 + $0x80] sm:$0xf] }
0x111c   :  { %3665 = vmatmul.mubr.f32.gmra.mrb[204].mxu0 %v13995_v29  ;;  %v9764_v29 = vld [vmem:[%s20453_s13 + $0x70] sm:$0xff] }
0x111d   :  { %9751 = vmatprep.mubr.msk.f32.mxu0 %vm702_vm0, %v13996_v33  ;;  %v9765_v33 = vld [vmem:[%s20453_s13 + $0x78] sm:$0xff] }
0x1120   :  { %3670 = vmatmul.mubr.f32.gmra.mrb[206].mxu0 %v13997_v63  ;;  %v13446_v63 = vpack.c.bf16 %v9765_v33, %v9764_v29 }
0x1121   :  { %9752 = vmatprep.mubr.msk.f32.mxu0 %vm702_vm0, %v13998_v21  ;;  %v9747_v21 = vld [vmem:[#allocation6 + $0x1] ss:$0 sm:$0xff] }
0x1122   :  { %13447 = vmatpush3.bf16.msra.mxu1 %v13446_v63 }
0x1123   :  { %13466 = vmatprep.subr.bf16.mxu1 %v20696_v38 }
0x1124   :  { %3675 = vmatmul.mubr.f32.gmra.mrb[208].mxu0 %v13999_v12 }
0x1125   :  { %9753 = vmatprep.mubr.msk.f32.mxu0 %vm702_vm0, %v14000_v1 }
0x1128   :  { %3680 = vmatmul.mubr.f32.gmra.mrb[210].mxu0 %v14001_v9 }
0x1129   :  { %9754 = vmatprep.mubr.msk.f32.mxu0 %vm702_vm0, %v14002_v6 }
0x112c   :  { %3685 = vmatmul.mubr.f32.gmra.mrb[212].mxu0 %v14003_v22 }
0x112d   :  { %9755 = vmatprep.mubr.msk.f32.mxu0 %vm702_vm0, %v14004_v10 }
0x1130   :  { %3690 = vmatmul.mubr.f32.gmra.mrb[214].mxu0 %v14005_v42 }
0x1131   :  { %9756 = vmatprep.mubr.msk.f32.mxu0 %vm702_vm0, %v14006_v5 }
0x1134   :  { %3695 = vmatmul.mubr.f32.gmra.mrb[216].mxu0 %v14007_v28 }
0x1135   :  { %9757 = vmatprep.mubr.msk.f32.mxu0 %vm702_vm0, %v14008_v23 }
0x1138   :  { %3700 = vmatmul.mubr.f32.gmra.mrb[218].mxu0 %v14009_v18 }
0x1139   :  { %11769 = vmatprep.mubr.msk.f32.mxu0 %vm14447_vm2, %v20646_v49 }
0x11eb   :  { %v3661_v12 = vpop.f32.mrb[202].mxu0 }
0x11ec   :  { %v16888_v1 = vadd.f32 %v9747_v21, %v3661_v12  ;;  %v3663_v9 = vpop.f32.mrb[203].mxu0 }
0x11ee   :  { %v3705_v6 = vmax.f32 %v16888_v1, 0.0 }
0x11ef   :  { %v3666_v22 = vpop.f32.mrb[204].mxu0 }
0x11f0   :  { %v16891_v10 = vadd.f32 %v9747_v21, %v3666_v22  ;;  %v3668_v42 = vpop.f32.mrb[205].mxu0  ;;  %11725 = vmatmul.mubr.msk.f32.vlgmr.msra.gmra.mrb[238].mxu1 %vm1681_vm5, %v3705_v6 }
0x11f1   :  { %11727 = vmatprep.mubr.msk.f32.mxu1 %vm14447_vm2, %v20646_v49 }
0x11f2   :  { %v20548_v5 = vmax.f32 %v16891_v10, 0.0 }
0x11f3   :  { %v3671_v28 = vpop.f32.mrb[206].mxu0 }
0x11f4   :  { %v16899_v23 = vadd.f32 %v9747_v21, %v3671_v28  ;;  %v3673_v18 = vpop.f32.mrb[207].mxu0  ;;  %11728 = vmatmul.mubr.msk.f32.gmra.mrb[240].mxu1 %vm1681_vm5, %v20548_v5 }
0x11f5   :  { %11730 = vmatprep.mubr.msk.f32.mxu1 %vm14447_vm2, %v20646_v49 }
0x11f6   :  { %v20547_v29 = vmax.f32 %v16899_v23, 0.0  ;;  %v20699_v1 = vmax.f32 %v16899_v23, 0.0 }
0x11f7   :  { %v3676_v33 = vpop.f32.mrb[208].mxu0 }
0x11f8   :  { %v16907_v63 = vadd.f32 %v9747_v21, %v3676_v33  ;;  %v3678_v12 = vpop.f32.mrb[209].mxu0  ;;  %11731 = vmatmul.mubr.msk.f32.gmra.mrb[242].mxu1 %vm1681_vm5, %v20547_v29 }
0x11f9   :  { %11733 = vmatprep.mubr.msk.f32.mxu1 %vm14447_vm2, %v20646_v49 }
0x11fa   :  { %v20546_v9 = vmax.f32 %v16907_v63, 0.0 }
0x11fb   :  { %v3681_v22 = vpop.f32.mrb[210].mxu0 }
0x11fc   :  { %v16915_v42 = vadd.f32 %v9747_v21, %v3681_v22  ;;  %v3683_v28 = vpop.f32.mrb[211].mxu0  ;;  %11734 = vmatmul.mubr.msk.f32.gmra.mrb[244].mxu1 %vm1681_vm5, %v20546_v9 }
0x11fd   :  { %11736 = vmatprep.mubr.msk.f32.mxu1 %vm14447_vm2, %v20646_v49 }
0x11fe   :  { %v20545_v18 = vmax.f32 %v16915_v42, 0.0  ;;  %v20701_v23 = vmax.f32 %v16915_v42, 0.0 }
0x11ff   :  { %v3686_v33 = vpop.f32.mrb[212].mxu0 }
0x1200   :  { %v16923_v12 = vadd.f32 %v9747_v21, %v3686_v33  ;;  %v3688_v17 = vpop.f32.mrb[213].mxu0  ;;  %11737 = vmatmul.mubr.msk.f32.gmra.mrb[246].mxu1 %vm1681_vm5, %v20545_v18 }
0x1201   :  { %11739 = vmatprep.mubr.msk.f32.mxu1 %vm14447_vm2, %v20646_v49 }
0x1202   :  { %v20544_v22 = vmax.f32 %v16923_v12, 0.0 }
0x1203   :  { %v3691_v28 = vpop.f32.mrb[214].mxu0 }
0x1204   :  { %v16931_v41 = vadd.f32 %v9747_v21, %v3691_v28  ;;  %v3693_v51 = vpop.f32.mrb[215].mxu0  ;;  %11740 = vmatmul.mubr.msk.f32.gmra.mrb[248].mxu1 %vm1681_vm5, %v20544_v22 }
0x1205   :  { %11742 = vmatprep.mubr.msk.f32.mxu1 %vm14447_vm2, %v20646_v49 }
0x1206   :  { %v20543_v17 = vmax.f32 %v16931_v41, 0.0  ;;  %v20703_v42 = vmax.f32 %v16931_v41, 0.0 }
0x1207   :  { %v3696_v33 = vpop.f32.mrb[216].mxu0 }
0x1208   :  { %v16939_v50 = vadd.f32 %v9747_v21, %v3696_v33  ;;  %v3698_v24 = vpop.f32.mrb[217].mxu0  ;;  %11743 = vmatmul.mubr.msk.f32.gmra.mrb[250].mxu1 %vm1681_vm5, %v20543_v17 }
0x1209   :  { %11745 = vmatprep.mubr.msk.f32.mxu1 %vm14447_vm2, %v20646_v49 }
0x120a   :  { %v20542_v51 = vmax.f32 %v16939_v50, 0.0 }
0x120b   :  { %v3701_v28 = vpop.f32.mrb[218].mxu0 }
0x120c   :  { %v16947_v47 = vadd.f32 %v9747_v21, %v3701_v28  ;;  %11746 = vmatmul.mubr.msk.f32.gmra.mrb[252].mxu1 %vm1681_vm5, %v20542_v51  ;;  %v3703_v15 = vpop.f32.mrb[219].mxu0 }
0x120d   :  { %11748 = vmatprep.mubr.msk.f32.mxu1 %vm14447_vm2, %v20646_v49 }
0x120e   :  { %v20541_v24 = vmax.f32 %v16947_v47, 0.0  ;;  %v20705_v41 = vmax.f32 %v16947_v47, 0.0 }
0x1210   :  { %11749 = vmatmul.mubr.msk.f32.gmra.mrb[254].mxu1 %vm1681_vm5, %v20541_v24 }
0x1211   :  { %11837 = vmatprep.mubr.msk.f32.mxu1 %vm14447_vm2, %v20646_v49 }
0x12c3   :  { %v3818_v33 = vpop.f32.mrb[238].mxu1 }
0x12c4   :  { %v11726_v21 = vpop.f32.mrb[239].mxu1 }
0x12c7   :  { %v3823_v28 = vpop.f32.mrb[240].mxu1 }
0x12c8   :  { %v13449_v57 = vpack.c.bf16 %v3823_v28, %v3818_v33  ;;  %v11729_v54 = vpop.f32.mrb[241].mxu1 }
0x12ca   :  { %13450 = vmatpush3.bf16.msra.mxu0 %v13449_v57 }
0x12cb   :  { %v3828_v59 = vpop.f32.mrb[242].mxu1  ;;  %13451 = vmatprep.subr.bf16.mxu0 %v20696_v38 }
0x12cc   :  { %v11732_v15 = vpop.f32.mrb[243].mxu1 }
0x12cf   :  { %v3833_v46 = vpop.f32.mrb[244].mxu1 }
0x12d0   :  { %v13452_v35 = vpack.c.bf16 %v3833_v46, %v3828_v59  ;;  %v11735_v39 = vpop.f32.mrb[245].mxu1  ;;  %v14013_v46 = vld [vmem:[#allocation4 + $0x18] sm:$0xff]  ;;  %v14014_v59 = vld [vmem:[#allocation4 + $0x20] sm:$0x3] }
0x12d2   :  { %13453 = vmatpush3.bf16.msra.mxu0 %v13452_v35  ;;  %v14010_v35 = vld [vmem:[#allocation4] sm:$0xff] }
0x12d3   :  { %v3838_v40 = vpop.f32.mrb[246].mxu1  ;;  %13454 = vmatprep.subr.bf16.mxu0 %v20696_v38 }
0x12d4   :  { %v11738_v32 = vpop.f32.mrb[247].mxu1 }
0x12d5   :  { %v14011_v32 = vld [vmem:[#allocation4 + $0x8] sm:$0xff] }
0x12d7   :  { %v3843_v24 = vpop.f32.mrb[248].mxu1 }
0x12d8   :  { %v13455_v51 = vpack.c.bf16 %v3843_v24, %v3838_v40  ;;  %v11741_v17 = vpop.f32.mrb[249].mxu1  ;;  %v14012_v40 = vld [vmem:[#allocation4 + $0x10] sm:$0xff]  ;;  %v9794_v24 = vld [vmem:[%s20455_s15 + $0x50] sm:$0xff] }
0x12d9   :  { %v9792_v17 = vld [vmem:[%s20455_s15 + $0x40] sm:$0xff] }
0x12da   :  { %13456 = vmatpush3.bf16.msra.mxu0 %v13455_v51  ;;  %v9793_v51 = vld [vmem:[%s20455_s15 + $0x48] sm:$0xff] }
0x12db   :  { %v3848_v21 = vpop.f32.mrb[250].mxu1  ;;  %13457 = vmatprep.subr.bf16.mxu0 %v20696_v38 }
0x12dc   :  { %v11744_v54 = vpop.f32.mrb[251].mxu1 }
0x12dd   :  { %v9795_v54 = vld [vmem:[%s20455_s15 + $0x58] sm:$0xff] }
0x12df   :  { %v3853_v57 = vpop.f32.mrb[252].mxu1 }
0x12e0   :  { %v13458_v33 = vpack.c.bf16 %v3853_v57, %v3848_v21  ;;  %v11747_v28 = vpop.f32.mrb[253].mxu1  ;;  %v13467_v21 = vpack.c.bf16 %v9793_v51, %v9792_v17  ;;  %v13470_v57 = vpack.c.bf16 %v9795_v54, %v9794_v24 }
0x12e1   :  { %v9797_v28 = vld [vmem:[%s20455_s15 + $0x68] sm:$0xff] }
0x12e2   :  { %13459 = vmatpush3.bf16.msra.mxu0 %v13458_v33  ;;  %13468 = vmatpush3.bf16.msra.mxu1 %v13467_v21  ;;  %v9796_v33 = vld [vmem:[%s20455_s15 + $0x60] sm:$0xff] }
0x12e3   :  { %v3858_v15 = vpop.f32.mrb[254].mxu1  ;;  %11767 = vmatprep.subr.mxu0 %v20646_v49  ;;  %13469 = vmatprep.subr.bf16.mxu1 %v20696_v38 }
0x12e4   :  { %v11750_v39 = vpop.f32.mrb[255].mxu1 }
0x12e5   :  { %v9775_v39 = vld [vmem:[#allocation7 + $0x1] ss:$0 sm:$0xff] }
0x12e6   :  { %11768 = vmatpush3.msk.msra.mxu0 %vm1841_vm6, %v3858_v15  ;;  %13471 = vmatpush3.bf16.msra.mxu1 %v13470_v57  ;;  %v13473_v15 = vpack.c.bf16 %v9797_v28, %v9796_v33 }
0x12e7   :  { %11770 = vmatmul.mubr.msk.f32.vlgmr.msra.gmra.mrb[220].mxu0 %vm1825_vm7, %v14010_v35  ;;  %13460 = vmatprep.subr.bf16.mxu0 %v20696_v38 }
0x12e8   :  { %11772 = vmatprep.mubr.msk.f32.mxu0 %vm14447_vm2, %v20646_v49  ;;  %13472 = vmatprep.subr.bf16.mxu1 %v20696_v38 }
0x12ea   :  { %13474 = vmatpush3.bf16.msra.mxu1 %v13473_v15 }
0x12eb   :  { %11773 = vmatmul.mubr.msk.f32.gmra.mrb[222].mxu0 %vm1825_vm7, %v14011_v32  ;;  %13475 = vmatprep.subr.bf16.mxu1 %v20696_v38 }
0x12ec   :  { %11775 = vmatprep.mubr.msk.f32.mxu0 %vm14447_vm2, %v20646_v49 }
0x12ef   :  { %11776 = vmatmul.mubr.msk.f32.gmra.mrb[224].mxu0 %vm1825_vm7, %v14012_v40 }
0x12f0   :  { %11778 = vmatprep.mubr.msk.f32.mxu0 %vm14447_vm2, %v20646_v49 }
0x12f3   :  { %11779 = vmatmul.mubr.msk.f32.gmra.mrb[226].mxu0 %vm1825_vm7, %v14013_v46 }
0x12f4   :  { %11781 = vmatprep.mubr.msk.f32.mxu0 %vm14447_vm2, %v20646_v49 }
0x12f7   :  { %11782 = vmatmul.mubr.msk.f32.gmra.mrb[228].mxu0 %vm1825_vm7, %v14014_v59 }
0x12f8   :  { %11794 = vmatprep.mubr.msk.f32.mxu0 %vm14447_vm2, %v20646_v49 }
0x13ba   :  { %v3937_v35 = vpop.f32.mrb[220].mxu0 }
0x13bb   :  { %v11771_v32 = vpop.f32.mrb[221].mxu0  ;;  %v3938_v40 = vadd.f32 %v9775_v39, %v3937_v35 }
0x13bd   :  { %v3961_v51 = vmax.f32 %v3938_v40, 0.0  ;;  %v14021_v40 = vld [vmem:[%s20648_s26 + $0x30] sm:$0xff] }
0x13be   :  { %v3942_v46 = vpop.f32.mrb[222].mxu0 }
0x13bf   :  { %v3943_v59 = vadd.f32 %v9775_v39, %v3942_v46  ;;  %v11774_v17 = vpop.f32.mrb[223].mxu0 }
0x13c0   :  { %v14023_v17 = vld [vmem:[%s20648_s26 + $0x40] sm:$0xf] }
0x13c1   :  { %v3962_v24 = vmax.f32 %v3943_v59, 0.0  ;;  %v14022_v59 = vld [vmem:[%s20648_s26 + $0x38] sm:$0xff] }
0x13c2   :  { %v3947_v21 = vpop.f32.mrb[224].mxu0 }
0x13c3   :  { %v13461_v54 = vpack.c.bf16 %v3962_v24, %v3961_v51  ;;  %v11777_v22 = vpop.f32.mrb[225].mxu0  ;;  %v3948_v18 = vadd.f32 %v9775_v39, %v3947_v21  ;;  %v9798_v51 = vld [vmem:[%s20455_s15 + $0x70] sm:$0xff]  ;;  %v9799_v24 = vld [vmem:[%s20455_s15 + $0x78] sm:$0xff] }
0x13c4   :  { %v14015_v22 = vld [vmem:[%s20648_s26] sm:$0xff]  ;;  %v13476_v21 = vpack.c.bf16 %v9799_v24, %v9798_v51 }
0x13c5   :  { %13462 = vmatpush3.bf16.msra.mxu0 %v13461_v54  ;;  %v3963_v15 = vmax.f32 %v3948_v18, 0.0  ;;  %v14019_v18 = vld [vmem:[%s20648_s26 + $0x20] sm:$0xff] }
0x13c6   :  { %v3952_v57 = vpop.f32.mrb[226].mxu0  ;;  %13463 = vmatprep.subr.bf16.mxu0 %v20696_v38  ;;  %13477 = vmatpush3.bf16.msra.mxu1 %v13476_v21 }
0x13c7   :  { %v3953_v33 = vadd.f32 %v9775_v39, %v3952_v57  ;;  %v11780_v28 = vpop.f32.mrb[227].mxu0  ;;  %13490 = vmatprep.subr.bf16.mxu1 %v20696_v38 }
0x13c9   :  { %v3964_v9 = vmax.f32 %v3953_v33, 0.0 }
0x13ca   :  { %v3957_v29 = vpop.f32.mrb[228].mxu0 }
0x13cb   :  { %v13464_v32 = vpack.c.bf16 %v3964_v9, %v3963_v15  ;;  %v3958_v35 = vadd.f32 %v9775_v39, %v3957_v29  ;;  %v11783_v5 = vpop.f32.mrb[229].mxu0  ;;  %v14017_v29 = vld [vmem:[%s20648_s26 + $0x10] sm:$0xff]  ;;  %v14018_v9 = vld [vmem:[%s20648_s26 + $0x18] sm:$0xff]  ;;  %v14020_v39 = vld [vmem:[%s20648_s26 + $0x28] sm:$0xff]  ;;  %v20698_v15 = vmax.f32 %v16891_v10, 0.0  ;;  %v20700_v10 = vmax.f32 %v16907_v63, 0.0 }
0x13cc   :  { %v14016_v5 = vld [vmem:[%s20648_s26 + $0x8] sm:$0xff]  ;;  %v20702_v63 = vmax.f32 %v16923_v12, 0.0  ;;  %v20704_v12 = vmax.f32 %v16939_v50, 0.0 }
0x13cd   :  { %v3965_v46 = vmax.f32 %v3958_v35, 0.0  ;;  %13465 = vmatpush3.bf16.msra.mxu0 %v13464_v32 }
0x13ce   :  { %11792 = vmatprep.subr.mxu0 %v20646_v49 }
0x13d1   :  { %11793 = vmatpush3.msk.msra.mxu0 %vm1968_vm8, %v3965_v46 }
0x13d2   :  { %11795 = vmatmul.mubr.msk.f32.vlgmr.msra.gmra.mrb[230].mxu0 %vm1940_vm9, %v14015_v22  ;;  %13478 = vmatprep.subr.bf16.mxu0 %v20696_v38 }
0x13d3   :  { %11797 = vmatprep.mubr.msk.f32.mxu0 %vm14447_vm2, %v20646_v49 }
0x13d6   :  { %11798 = vmatmul.mubr.msk.f32.gmra.mrb[232].mxu0 %vm1940_vm9, %v14016_v5 }
0x13d7   :  { %11800 = vmatprep.mubr.msk.f32.mxu0 %vm14447_vm2, %v20646_v49 }
0x13da   :  { %11801 = vmatmul.mubr.msk.f32.gmra.mrb[234].mxu0 %vm1940_vm9, %v14017_v29 }
0x13db   :  { %11803 = vmatprep.mubr.msk.f32.mxu0 %vm14447_vm2, %v20646_v49 }
0x13de   :  { %11804 = vmatmul.mubr.msk.f32.gmra.mrb[236].mxu0 %vm1940_vm9, %v14018_v9 }
0x13df   :  { %11806 = vmatprep.mubr.msk.f32.mxu0 %vm14447_vm2, %v20646_v49 }
0x13e2   :  { %11807 = vmatmul.mubr.msk.f32.gmra.mrb[238].mxu0 %vm1940_vm9, %v14019_v18 }
0x13e3   :  { %11809 = vmatprep.mubr.msk.f32.mxu0 %vm14447_vm2, %v20646_v49 }
0x13e6   :  { %11810 = vmatmul.mubr.msk.f32.gmra.mrb[240].mxu0 %vm1940_vm9, %v14020_v39 }
0x13e7   :  { %11812 = vmatprep.mubr.msk.f32.mxu0 %vm14447_vm2, %v20646_v49 }
0x13ea   :  { %11813 = vmatmul.mubr.msk.f32.gmra.mrb[242].mxu0 %vm1940_vm9, %v14021_v40 }
0x13eb   :  { %11815 = vmatprep.mubr.msk.f32.mxu0 %vm14447_vm2, %v20646_v49 }
0x13ee   :  { %11816 = vmatmul.mubr.msk.f32.gmra.mrb[244].mxu0 %vm1940_vm9, %v14022_v59 }
0x13ef   :  { %11818 = vmatprep.mubr.msk.f32.mxu0 %vm14447_vm2, %v20646_v49 }
0x13f2   :  { %11819 = vmatmul.mubr.msk.f32.gmra.mrb[246].mxu0 %vm1940_vm9, %v14023_v17 }
0x13f3   :  { %11882 = vmatprep.mubr.msk.f32.mxu0 %vm14447_vm2, %v20646_v49 }
0x14a5   :  { %v4035_v54 = vpop.f32.mrb[230].mxu0 }
0x14a6   :  { %v4036_v57 = vadd.f32 %v4035_v54, %v3705_v6  ;;  %v11796_v33 = vpop.f32.mrb[231].mxu0 }
0x14a8   :  { %11838 = vmatmul.mubr.msk.f32.vlgmr.msra.gmra.mrb[0].mxu1 %vm1681_vm5, %v4036_v57 }
0x14a9   :  { %v4040_v28 = vpop.f32.mrb[232].mxu0  ;;  %11840 = vmatprep.mubr.msk.f32.mxu1 %vm14447_vm2, %v20646_v49 }
0x14aa   :  { %v4041_v32 = vadd.f32 %v4040_v28, %v20698_v15  ;;  %v11799_v35 = vpop.f32.mrb[233].mxu0 }
0x14ac   :  { %11841 = vmatmul.mubr.msk.f32.gmra.mrb[2].mxu1 %vm1681_vm5, %v4041_v32 }
0x14ad   :  { %v4045_v46 = vpop.f32.mrb[234].mxu0  ;;  %11843 = vmatprep.mubr.msk.f32.mxu1 %vm14447_vm2, %v20646_v49 }
0x14ae   :  { %v4046_v6 = vadd.f32 %v4045_v46, %v20699_v1  ;;  %v11802_v22 = vpop.f32.mrb[235].mxu0 }
0x14b0   :  { %11844 = vmatmul.mubr.msk.f32.gmra.mrb[4].mxu1 %vm1681_vm5, %v4046_v6 }
0x14b1   :  { %v4050_v5 = vpop.f32.mrb[236].mxu0  ;;  %11846 = vmatprep.mubr.msk.f32.mxu1 %vm14447_vm2, %v20646_v49 }
0x14b2   :  { %v4051_v29 = vadd.f32 %v4050_v5, %v20700_v10  ;;  %v11805_v9 = vpop.f32.mrb[237].mxu0 }
0x14b4   :  { %11847 = vmatmul.mubr.msk.f32.gmra.mrb[6].mxu1 %vm1681_vm5, %v4051_v29 }
0x14b5   :  { %v4055_v18 = vpop.f32.mrb[238].mxu0  ;;  %11849 = vmatprep.mubr.msk.f32.mxu1 %vm14447_vm2, %v20646_v49 }
0x14b6   :  { %v4056_v39 = vadd.f32 %v4055_v18, %v20701_v23  ;;  %v11808_v40 = vpop.f32.mrb[239].mxu0 }
0x14b8   :  { %11850 = vmatmul.mubr.msk.f32.gmra.mrb[8].mxu1 %vm1681_vm5, %v4056_v39 }
0x14b9   :  { %v4060_v59 = vpop.f32.mrb[240].mxu0  ;;  %11852 = vmatprep.mubr.msk.f32.mxu1 %vm14447_vm2, %v20646_v49 }
0x14ba   :  { %v4061_v17 = vadd.f32 %v4060_v59, %v20702_v63  ;;  %v11811_v51 = vpop.f32.mrb[241].mxu0 }
0x14bc   :  { %11853 = vmatmul.mubr.msk.f32.gmra.mrb[10].mxu1 %vm1681_vm5, %v4061_v17 }
0x14bd   :  { %v4065_v24 = vpop.f32.mrb[242].mxu0  ;;  %11855 = vmatprep.mubr.msk.f32.mxu1 %vm14447_vm2, %v20646_v49 }
0x14be   :  { %v4066_v21 = vadd.f32 %v4065_v24, %v20703_v42  ;;  %v11814_v54 = vpop.f32.mrb[243].mxu0 }
0x14c0   :  { %11856 = vmatmul.mubr.msk.f32.gmra.mrb[12].mxu1 %vm1681_vm5, %v4066_v21 }
0x14c1   :  { %v4070_v57 = vpop.f32.mrb[244].mxu0  ;;  %11858 = vmatprep.mubr.msk.f32.mxu1 %vm14447_vm2, %v20646_v49 }
0x14c2   :  { %v4071_v33 = vadd.f32 %v4070_v57, %v20704_v12  ;;  %v11817_v28 = vpop.f32.mrb[245].mxu0  ;;  %v14024_v57 = vld [vmem:[#allocation2] sm:$0xff]  ;;  %v14025_v12 = vld [vmem:[#allocation2 + $0x8] sm:$0xff] }
0x14c3   :  { %v14027_v28 = vld [vmem:[#allocation2 + $0x18] sm:$0xff] }
0x14c4   :  { %11859 = vmatmul.mubr.msk.f32.gmra.mrb[14].mxu1 %vm1681_vm5, %v4071_v33  ;;  %v14026_v33 = vld [vmem:[#allocation2 + $0x10] sm:$0xff] }
0x14c5   :  { %v4075_v15 = vpop.f32.mrb[246].mxu0  ;;  %11861 = vmatprep.mubr.msk.f32.mxu1 %vm14447_vm2, %v20646_v49 }
0x14c6   :  { %v4076_v32 = vadd.f32 %v4075_v15, %v20705_v41  ;;  %v11820_v35 = vpop.f32.mrb[247].mxu0  ;;  %v14028_v15 = vld [vmem:[#allocation2 + $0x20] sm:$0xff]  ;;  %v14029_v41 = vld [vmem:[#allocation2 + $0x28] sm:$0xff] }
0x14c7   :  { %v14031_v35 = vld [vmem:[#allocation2 + $0x38] sm:$0xff] }
0x14c8   :  { %11862 = vmatmul.mubr.msk.f32.gmra.mrb[16].mxu1 %vm1681_vm5, %v4076_v32  ;;  %v14030_v32 = vld [vmem:[#allocation2 + $0x30] sm:$0xff] }
0x14c9   :  { %11927 = vmatprep.mubr.msk.f32.mxu1 %vm14447_vm2, %v20646_v49 }
0x157b   :  { %v4183_v46 = vpop.f32.mrb[0].mxu1 }
0x157c   :  { %v11839_v1 = vpop.f32.mrb[1].mxu1 }
0x157d   :  { %v9838_v1 = vld [vmem:[%s20457_s17 + $0x30] sm:$0xff] }
0x157f   :  { %v4188_v50 = vpop.f32.mrb[2].mxu1 }
0x1580   :  { %v13479_v6 = vpack.c.bf16 %v4188_v50, %v4183_v46  ;;  %v11842_v22 = vpop.f32.mrb[3].mxu1  ;;  %v14032_v46 = vld [vmem:[#allocation2 + $0x40] sm:$0xf]  ;;  %v9839_v50 = vld [vmem:[%s20457_s17 + $0x38] sm:$0xff] }
0x1581   :  { %v13503_v22 = vpack.c.bf16 %v9839_v50, %v9838_v1 }
0x1582   :  { %13480 = vmatpush3.bf16.msra.mxu0 %v13479_v6  ;;  %v9840_v6 = vld [vmem:[%s20457_s17 + $0x40] sm:$0xff] }
0x1583   :  { %v4193_v5 = vpop.f32.mrb[4].mxu1  ;;  %13481 = vmatprep.subr.bf16.mxu0 %v20696_v38 }
0x1584   :  { %v11845_v10 = vpop.f32.mrb[5].mxu1 }
0x1587   :  { %v4198_v29 = vpop.f32.mrb[6].mxu1 }
0x1588   :  { %v13482_v9 = vpack.c.bf16 %v4198_v29, %v4193_v5  ;;  %v11848_v47 = vpop.f32.mrb[7].mxu1  ;;  %v9841_v5 = vld [vmem:[%s20457_s17 + $0x48] sm:$0xff]  ;;  %v9809_v29 = vld [vmem:[#allocation9 + $0x1] ss:$0 sm:$0xff] }
0x1589   :  { %v13506_v10 = vpack.c.bf16 %v9841_v5, %v9840_v6 }
0x158a   :  { %13483 = vmatpush3.bf16.msra.mxu0 %v13482_v9 }
0x158b   :  { %v4203_v18 = vpop.f32.mrb[8].mxu1  ;;  %13484 = vmatprep.subr.bf16.mxu0 %v20696_v38 }
0x158c   :  { %v11851_v23 = vpop.f32.mrb[9].mxu1 }
0x158f   :  { %v4208_v39 = vpop.f32.mrb[10].mxu1 }
0x1590   :  { %v13485_v40 = vpack.c.bf16 %v4208_v39, %v4203_v18  ;;  %v11854_v59 = vpop.f32.mrb[11].mxu1 }
0x1592   :  { %13486 = vmatpush3.bf16.msra.mxu0 %v13485_v40 }
0x1593   :  { %v4213_v63 = vpop.f32.mrb[12].mxu1  ;;  %13487 = vmatprep.subr.bf16.mxu0 %v20696_v38 }
0x1594   :  { %v11857_v17 = vpop.f32.mrb[13].mxu1 }
0x1597   :  { %v4218_v51 = vpop.f32.mrb[14].mxu1 }
0x1598   :  { %v13488_v24 = vpack.c.bf16 %v4218_v51, %v4213_v63  ;;  %v11860_v42 = vpop.f32.mrb[15].mxu1 }
0x159a   :  { %13489 = vmatpush3.bf16.msra.mxu0 %v13488_v24 }
0x159b   :  { %v4223_v21 = vpop.f32.mrb[16].mxu1  ;;  %11880 = vmatprep.subr.mxu0 %v20646_v49 }
0x159c   :  { %v11863_v54 = vpop.f32.mrb[17].mxu1 }
0x159e   :  { %11881 = vmatpush3.msk.msra.mxu0 %vm1841_vm6, %v4223_v21 }
0x159f   :  { %11883 = vmatmul.mubr.msk.f32.vlgmr.msra.gmra.mrb[248].mxu0 %vm1825_vm7, %v14024_v57  ;;  %13502 = vmatprep.subr.bf16.mxu0 %v20696_v38 }
0x15a0   :  { %11885 = vmatprep.mubr.msk.f32.mxu0 %vm14447_vm2, %v20646_v49  ;;  %13504 = vmatpush3.bf16.msra.mxu0 %v13503_v22 }
0x15a1   :  { %13505 = vmatprep.subr.bf16.mxu0 %v20696_v38 }
0x15a3   :  { %11886 = vmatmul.mubr.msk.f32.gmra.mrb[250].mxu0 %vm1825_vm7, %v14025_v12 }
0x15a4   :  { %11888 = vmatprep.mubr.msk.f32.mxu0 %vm14447_vm2, %v20646_v49  ;;  %13507 = vmatpush3.bf16.msra.mxu0 %v13506_v10 }
0x15a5   :  { %13508 = vmatprep.subr.bf16.mxu0 %v20696_v38 }
0x15a7   :  { %11889 = vmatmul.mubr.msk.f32.gmra.mrb[252].mxu0 %vm1825_vm7, %v14026_v33 }
0x15a8   :  { %11891 = vmatprep.mubr.msk.f32.mxu0 %vm14447_vm2, %v20646_v49 }
0x15ab   :  { %11892 = vmatmul.mubr.msk.f32.gmra.mrb[254].mxu0 %vm1825_vm7, %v14027_v28 }
0x15ac   :  { %11894 = vmatprep.mubr.msk.f32.mxu0 %vm14447_vm2, %v20646_v49 }
0x15af   :  { %11895 = vmatmul.mubr.msk.f32.gmra.mrb[0].mxu0 %vm1825_vm7, %v14028_v15 }
0x15b0   :  { %11897 = vmatprep.mubr.msk.f32.mxu0 %vm14447_vm2, %v20646_v49 }
0x15b3   :  { %11898 = vmatmul.mubr.msk.f32.gmra.mrb[2].mxu0 %vm1825_vm7, %v14029_v41 }
0x15b4   :  { %11900 = vmatprep.mubr.msk.f32.mxu0 %vm14447_vm2, %v20646_v49 }
0x15b7   :  { %11901 = vmatmul.mubr.msk.f32.gmra.mrb[4].mxu0 %vm1825_vm7, %v14030_v32 }
0x15b8   :  { %11903 = vmatprep.mubr.msk.f32.mxu0 %vm14447_vm2, %v20646_v49 }
0x15bb   :  { %11904 = vmatmul.mubr.msk.f32.gmra.mrb[6].mxu0 %vm1825_vm7, %v14031_v35 }
0x15bc   :  { %11906 = vmatprep.mubr.msk.f32.mxu0 %vm14447_vm2, %v20646_v49 }
0x15bf   :  { %11907 = vmatmul.mubr.msk.f32.gmra.mrb[8].mxu0 %vm1825_vm7, %v14032_v46 }
0x15c0   :  { %11990 = vmatprep.mubr.msk.f32.mxu0 %vm14447_vm2, %v20646_v49 }
0x1672   :  { %v4302_v9 = vpop.f32.mrb[248].mxu0 }
0x1673   :  { %v11884_v47 = vpop.f32.mrb[249].mxu0  ;;  %v4303_v18 = vadd.f32 %v9809_v29, %v4302_v9 }
0x1675   :  { %v4346_v59 = vmax.f32 %v4303_v18, 0.0 }
0x1676   :  { %v4307_v23 = vpop.f32.mrb[250].mxu0 }
0x1677   :  { %v4308_v39 = vadd.f32 %v9809_v29, %v4307_v23  ;;  %v11887_v40 = vpop.f32.mrb[251].mxu0 }
0x1679   :  { %v4347_v63 = vmax.f32 %v4308_v39, 0.0 }
0x167a   :  { %v4312_v17 = vpop.f32.mrb[252].mxu0 }
0x167b   :  { %v13491_v51 = vpack.c.bf16 %v4347_v63, %v4346_v59  ;;  %v11890_v24 = vpop.f32.mrb[253].mxu0  ;;  %v4313_v42 = vadd.f32 %v9809_v29, %v4312_v17 }
0x167d   :  { %13492 = vmatpush3.bf16.msra.mxu1 %v13491_v51  ;;  %v4348_v12 = vmax.f32 %v4313_v42, 0.0  ;;  %v14033_v42 = vld [vmem:[%s20446_s6] sm:$0xff] }
0x167e   :  { %v4317_v21 = vpop.f32.mrb[254].mxu0  ;;  %13493 = vmatprep.subr.bf16.mxu1 %v20696_v38 }
0x167f   :  { %v4318_v54 = vadd.f32 %v9809_v29, %v4317_v21  ;;  %v11893_v57 = vpop.f32.mrb[255].mxu0  ;;  %v14035_v21 = vld [vmem:[%s20446_s6 + $0x10] sm:$0xff] }
0x1680   :  { %v14037_v57 = vld [vmem:[%s20446_s6 + $0x20] sm:$0xff] }
0x1681   :  { %v4349_v33 = vmax.f32 %v4318_v54, 0.0  ;;  %v14036_v54 = vld [vmem:[%s20446_s6 + $0x18] sm:$0xff] }
0x1682   :  { %v4322_v28 = vpop.f32.mrb[0].mxu0 }
0x1683   :  { %v13494_v15 = vpack.c.bf16 %v4349_v33, %v4348_v12  ;;  %v11896_v41 = vpop.f32.mrb[1].mxu0  ;;  %v4323_v32 = vadd.f32 %v9809_v29, %v4322_v28  ;;  %v14038_v12 = vld [vmem:[%s20446_s6 + $0x28] sm:$0xff]  ;;  %v14039_v33 = vld [vmem:[%s20446_s6 + $0x30] sm:$0xff]  ;;  %v14040_v28 = vld [vmem:[%s20446_s6 + $0x38] sm:$0xff] }
0x1684   :  { %v14042_v41 = vld [vmem:[%s20446_s6 + $0x48] sm:$0xff] }
0x1685   :  { %13495 = vmatpush3.bf16.msra.mxu1 %v13494_v15  ;;  %v4350_v50 = vmax.f32 %v4323_v32, 0.0  ;;  %v14041_v15 = vld [vmem:[%s20446_s6 + $0x40] sm:$0xff]  ;;  %v14043_v32 = vld [vmem:[%s20446_s6 + $0x50] sm:$0xff] }
0x1686   :  { %v4327_v35 = vpop.f32.mrb[2].mxu0  ;;  %13496 = vmatprep.subr.bf16.mxu1 %v20696_v38 }
0x1687   :  { %v4328_v46 = vadd.f32 %v9809_v29, %v4327_v35  ;;  %v11899_v1 = vpop.f32.mrb[3].mxu0  ;;  %v14044_v35 = vld [vmem:[%s20446_s6 + $0x58] sm:$0xff] }
0x1688   :  { %v14046_v1 = vld [vmem:[%s20446_s6 + $0x68] sm:$0xff] }
0x1689   :  { %v4351_v6 = vmax.f32 %v4328_v46, 0.0  ;;  %v14045_v46 = vld [vmem:[%s20446_s6 + $0x60] sm:$0xff] }
0x168a   :  { %v4332_v22 = vpop.f32.mrb[4].mxu0 }
0x168b   :  { %v13497_v5 = vpack.c.bf16 %v4351_v6, %v4350_v50  ;;  %v11902_v10 = vpop.f32.mrb[5].mxu0  ;;  %v4333_v9 = vadd.f32 %v9809_v29, %v4332_v22  ;;  %v14047_v50 = vld [vmem:[%s20446_s6 + $0x70] sm:$0xff]  ;;  %v14048_v6 = vld [vmem:[%s20446_s6 + $0x78] sm:$0xff]  ;;  %v14049_v22 = vld [vmem:[%s20446_s6 + $0x80] sm:$0x1f] }
0x168c   :  { %v9842_v10 = vld [vmem:[%s20457_s17 + $0x50] sm:$0xff] }
0x168d   :  { %13498 = vmatpush3.bf16.msra.mxu1 %v13497_v5  ;;  %v4352_v39 = vmax.f32 %v4333_v9, 0.0  ;;  %v17268_v5 = vld [vmem:[%s20643_s18 + $0x8] sm:$0xff]  ;;  %v9843_v9 = vld [vmem:[%s20457_s17 + $0x58] sm:$0xff] }
0x168e   :  { %v4337_v47 = vpop.f32.mrb[6].mxu0  ;;  %13499 = vmatprep.subr.bf16.mxu1 %v20696_v38 }
0x168f   :  { %v4338_v18 = vadd.f32 %v9809_v29, %v4337_v47  ;;  %v11905_v23 = vpop.f32.mrb[7].mxu0  ;;  %v13509_v47 = vpack.c.bf16 %v9843_v9, %v9842_v10 }
0x1690   :  { %v20706_v23 = vmax.f32 %v16637_v8, 0.0  ;;  %v20708_v8 = vmax.f32 %v16650_v52, 0.0  ;;  %v20710_v52 = vmax.f32 %v16668_v19, 0.0  ;;  %v20712_v19 = vmax.f32 %v16686_v36, 0.0 }
0x1691   :  { %v4353_v40 = vmax.f32 %v4338_v18, 0.0  ;;  %13510 = vmatpush3.bf16.msra.mxu0 %v13509_v47  ;;  %v20714_v36 = vmax.f32 %v16704_v13, 0.0  ;;  %v20716_v13 = vmax.f32 %v16722_v34, 0.0  ;;  %v20718_v34 = vmax.f32 %v16740_v27, 0.0 }
0x1692   :  { %v4342_v59 = vpop.f32.mrb[8].mxu0  ;;  %13535 = vmatprep.subr.bf16.mxu0 %v20696_v38  ;;  %v20720_v27 = vmax.f32 %v16758_v7, 0.0  ;;  %v20722_v7 = vmax.f32 %v16776_v48, 0.0 }
0x1693   :  { %v13500_v63 = vpack.c.bf16 %v4353_v40, %v4352_v39  ;;  %v4343_v17 = vadd.f32 %v9809_v29, %v4342_v59  ;;  %v11908_v51 = vpop.f32.mrb[9].mxu0  ;;  %v14034_v29 = vld [vmem:[%s20446_s6 + $0x8] sm:$0xff] }
0x1695   :  { %v4354_v24 = vmax.f32 %v4343_v17, 0.0  ;;  %13501 = vmatpush3.bf16.msra.mxu1 %v13500_v63  ;;  %v20707_v63 = vmax.f32 %v16641_v60, 0.0  ;;  %v20709_v60 = vmax.f32 %v16659_v20, 0.0  ;;  %v20711_v20 = vmax.f32 %v16677_v53, 0.0 }
0x1696   :  { %11925 = vmatprep.subr.mxu1 %v20646_v49  ;;  %v20713_v53 = vmax.f32 %v16695_v55, 0.0  ;;  %v20715_v55 = vmax.f32 %v16713_v2, 0.0  ;;  %v20717_v2 = vmax.f32 %v16731_v25, 0.0  ;;  %v20719_v25 = vmax.f32 %v16749_v14, 0.0 }
0x1697   :  { %v20721_v14 = vmax.f32 %v16767_v61, 0.0 }
0x1699   :  { %11926 = vmatpush3.msk.msra.mxu1 %vm1841_vm6, %v4354_v24 }
0x169a   :  { %11928 = vmatmul.mubr.msk.f32.vlgmr.msra.gmra.mrb[18].mxu1 %vm1825_vm7, %v14033_v42  ;;  %13511 = vmatprep.subr.bf16.mxu1 %v20696_v38 }
0x169b   :  { %11930 = vmatprep.mubr.msk.f32.mxu1 %vm14447_vm2, %v20646_v49 }
0x169e   :  { %11931 = vmatmul.mubr.msk.f32.gmra.mrb[20].mxu1 %vm1825_vm7, %v14034_v29 }
0x169f   :  { %11933 = vmatprep.mubr.msk.f32.mxu1 %vm14447_vm2, %v20646_v49 }
0x16a2   :  { %11934 = vmatmul.mubr.msk.f32.gmra.mrb[22].mxu1 %vm1825_vm7, %v14035_v21 }
0x16a3   :  { %11936 = vmatprep.mubr.msk.f32.mxu1 %vm14447_vm2, %v20646_v49 }
0x16a6   :  { %11937 = vmatmul.mubr.msk.f32.gmra.mrb[24].mxu1 %vm1825_vm7, %v14036_v54 }
0x16a7   :  { %11939 = vmatprep.mubr.msk.f32.mxu1 %vm14447_vm2, %v20646_v49 }
0x16aa   :  { %11940 = vmatmul.mubr.msk.f32.gmra.mrb[26].mxu1 %vm1825_vm7, %v14037_v57 }
0x16ab   :  { %11942 = vmatprep.mubr.msk.f32.mxu1 %vm14447_vm2, %v20646_v49 }
0x16ae   :  { %11943 = vmatmul.mubr.msk.f32.gmra.mrb[28].mxu1 %vm1825_vm7, %v14038_v12 }
0x16af   :  { %11945 = vmatprep.mubr.msk.f32.mxu1 %vm14447_vm2, %v20646_v49 }
0x16b2   :  { %11946 = vmatmul.mubr.msk.f32.gmra.mrb[30].mxu1 %vm1825_vm7, %v14039_v33 }
0x16b3   :  { %11948 = vmatprep.mubr.msk.f32.mxu1 %vm14447_vm2, %v20646_v49 }
0x16b6   :  { %11949 = vmatmul.mubr.msk.f32.gmra.mrb[32].mxu1 %vm1825_vm7, %v14040_v28 }
0x16b7   :  { %11951 = vmatprep.mubr.msk.f32.mxu1 %vm14447_vm2, %v20646_v49 }
0x16ba   :  { %11952 = vmatmul.mubr.msk.f32.gmra.mrb[34].mxu1 %vm1825_vm7, %v14041_v15 }
0x16bb   :  { %11954 = vmatprep.mubr.msk.f32.mxu1 %vm14447_vm2, %v20646_v49 }
0x16be   :  { %11955 = vmatmul.mubr.msk.f32.gmra.mrb[36].mxu1 %vm1825_vm7, %v14042_v41 }
0x16bf   :  { %11957 = vmatprep.mubr.msk.f32.mxu1 %vm14447_vm2, %v20646_v49 }
0x16c2   :  { %11958 = vmatmul.mubr.msk.f32.gmra.mrb[38].mxu1 %vm1825_vm7, %v14043_v32 }
0x16c3   :  { %11960 = vmatprep.mubr.msk.f32.mxu1 %vm14447_vm2, %v20646_v49 }
0x16c6   :  { %11961 = vmatmul.mubr.msk.f32.gmra.mrb[40].mxu1 %vm1825_vm7, %v14044_v35 }
0x16c7   :  { %11963 = vmatprep.mubr.msk.f32.mxu1 %vm14447_vm2, %v20646_v49 }
0x16ca   :  { %11964 = vmatmul.mubr.msk.f32.gmra.mrb[42].mxu1 %vm1825_vm7, %v14045_v46 }
0x16cb   :  { %11966 = vmatprep.mubr.msk.f32.mxu1 %vm14447_vm2, %v20646_v49 }
0x16ce   :  { %11967 = vmatmul.mubr.msk.f32.gmra.mrb[44].mxu1 %vm1825_vm7, %v14046_v1 }
0x16cf   :  { %11969 = vmatprep.mubr.msk.f32.mxu1 %vm14447_vm2, %v20646_v49 }
0x16d2   :  { %11970 = vmatmul.mubr.msk.f32.gmra.mrb[46].mxu1 %vm1825_vm7, %v14047_v50 }
0x16d3   :  { %11972 = vmatprep.mubr.msk.f32.mxu1 %vm14447_vm2, %v20646_v49 }
0x16d6   :  { %11973 = vmatmul.mubr.msk.f32.gmra.mrb[48].mxu1 %vm1825_vm7, %v14048_v6 }
0x16d7   :  { %11975 = vmatprep.mubr.msk.f32.mxu1 %vm14447_vm2, %v20646_v49 }
0x16da   :  { %11976 = vmatmul.mubr.msk.f32.gmra.mrb[50].mxu1 %vm1825_vm7, %v14049_v22 }
0x16db   :  { %9863 = vmatprep.mubr.msk.f32.mxu1 %vm702_vm0, %v17268_v5 }
0x176d   :  { %v4424_v18 = vpop.f32.mrb[18].mxu1 }
0x176e   :  { %v4425_v39 = vadd.f32 %v4424_v18, %v20706_v23  ;;  %v11929_v40 = vpop.f32.mrb[19].mxu1 }
0x1770   :  { %11991 = vmatmul.mubr.msk.f32.vlgmr.msra.gmra.mrb[10].mxu0 %vm1315_vm4, %v4425_v39 }
0x1771   :  { %v4429_v59 = vpop.f32.mrb[20].mxu1  ;;  %11993 = vmatprep.mubr.msk.f32.mxu0 %vm14447_vm2, %v20646_v49 }
0x1772   :  { %v4430_v17 = vadd.f32 %v4429_v59, %v20707_v63  ;;  %v11932_v51 = vpop.f32.mrb[21].mxu1 }
0x1774   :  { %11994 = vmatmul.mubr.msk.f32.gmra.mrb[12].mxu0 %vm1315_vm4, %v4430_v17 }
0x1775   :  { %v4434_v24 = vpop.f32.mrb[22].mxu1  ;;  %11996 = vmatprep.mubr.msk.f32.mxu0 %vm14447_vm2, %v20646_v49 }
0x1776   :  { %v4435_v42 = vadd.f32 %v4434_v24, %v20708_v8  ;;  %v11935_v29 = vpop.f32.mrb[23].mxu1 }
0x1778   :  { %11997 = vmatmul.mubr.msk.f32.gmra.mrb[14].mxu0 %vm1315_vm4, %v4435_v42 }
0x1779   :  { %v4439_v21 = vpop.f32.mrb[24].mxu1  ;;  %11999 = vmatprep.mubr.msk.f32.mxu0 %vm14447_vm2, %v20646_v49 }
0x177a   :  { %v4440_v54 = vadd.f32 %v4439_v21, %v20709_v60  ;;  %v11938_v57 = vpop.f32.mrb[25].mxu1 }
0x177c   :  { %12000 = vmatmul.mubr.msk.f32.gmra.mrb[16].mxu0 %vm1315_vm4, %v4440_v54 }
0x177d   :  { %v4444_v12 = vpop.f32.mrb[26].mxu1  ;;  %12002 = vmatprep.mubr.msk.f32.mxu0 %vm14447_vm2, %v20646_v49 }
0x177e   :  { %v4445_v33 = vadd.f32 %v4444_v12, %v20710_v52  ;;  %v11941_v28 = vpop.f32.mrb[27].mxu1 }
0x1780   :  { %12003 = vmatmul.mubr.msk.f32.gmra.mrb[18].mxu0 %vm1315_vm4, %v4445_v33 }
0x1781   :  { %v4449_v15 = vpop.f32.mrb[28].mxu1  ;;  %12005 = vmatprep.mubr.msk.f32.mxu0 %vm14447_vm2, %v20646_v49 }
0x1782   :  { %v4450_v41 = vadd.f32 %v4449_v15, %v20711_v20  ;;  %v11944_v32 = vpop.f32.mrb[29].mxu1 }
0x1784   :  { %12006 = vmatmul.mubr.msk.f32.gmra.mrb[20].mxu0 %vm1315_vm4, %v4450_v41 }
0x1785   :  { %v4454_v35 = vpop.f32.mrb[30].mxu1  ;;  %12008 = vmatprep.mubr.msk.f32.mxu0 %vm14447_vm2, %v20646_v49 }
0x1786   :  { %v4455_v46 = vadd.f32 %v4454_v35, %v20712_v19  ;;  %v11947_v1 = vpop.f32.mrb[31].mxu1 }
0x1788   :  { %12009 = vmatmul.mubr.msk.f32.gmra.mrb[22].mxu0 %vm1315_vm4, %v4455_v46 }
0x1789   :  { %v4459_v50 = vpop.f32.mrb[32].mxu1  ;;  %12011 = vmatprep.mubr.msk.f32.mxu0 %vm14447_vm2, %v20646_v49 }
0x178a   :  { %v4460_v6 = vadd.f32 %v4459_v50, %v20713_v53  ;;  %v11950_v22 = vpop.f32.mrb[33].mxu1 }
0x178c   :  { %12012 = vmatmul.mubr.msk.f32.gmra.mrb[24].mxu0 %vm1315_vm4, %v4460_v6 }
0x178d   :  { %v4464_v10 = vpop.f32.mrb[34].mxu1  ;;  %12014 = vmatprep.mubr.msk.f32.mxu0 %vm14447_vm2, %v20646_v49 }
0x178e   :  { %v4465_v9 = vadd.f32 %v4464_v10, %v20714_v36  ;;  %v11953_v47 = vpop.f32.mrb[35].mxu1 }
0x1790   :  { %12015 = vmatmul.mubr.msk.f32.gmra.mrb[26].mxu0 %vm1315_vm4, %v4465_v9 }
0x1791   :  { %v4469_v18 = vpop.f32.mrb[36].mxu1  ;;  %12017 = vmatprep.mubr.msk.f32.mxu0 %vm14447_vm2, %v20646_v49 }
0x1792   :  { %v4470_v23 = vadd.f32 %v4469_v18, %v20715_v55  ;;  %v11956_v39 = vpop.f32.mrb[37].mxu1 }
0x1794   :  { %12018 = vmatmul.mubr.msk.f32.gmra.mrb[28].mxu0 %vm1315_vm4, %v4470_v23 }
0x1795   :  { %v4474_v40 = vpop.f32.mrb[38].mxu1  ;;  %12020 = vmatprep.mubr.msk.f32.mxu0 %vm14447_vm2, %v20646_v49 }
0x1796   :  { %v4475_v59 = vadd.f32 %v4474_v40, %v20716_v13  ;;  %v11959_v63 = vpop.f32.mrb[39].mxu1 }
0x1798   :  { %12021 = vmatmul.mubr.msk.f32.gmra.mrb[30].mxu0 %vm1315_vm4, %v4475_v59 }
0x1799   :  { %v4479_v17 = vpop.f32.mrb[40].mxu1  ;;  %12023 = vmatprep.mubr.msk.f32.mxu0 %vm14447_vm2, %v20646_v49 }
0x179a   :  { %v4480_v51 = vadd.f32 %v4479_v17, %v20717_v2  ;;  %v11962_v24 = vpop.f32.mrb[41].mxu1 }
0x179c   :  { %12024 = vmatmul.mubr.msk.f32.gmra.mrb[32].mxu0 %vm1315_vm4, %v4480_v51 }
0x179d   :  { %v4484_v8 = vpop.f32.mrb[42].mxu1  ;;  %12026 = vmatprep.mubr.msk.f32.mxu0 %vm14447_vm2, %v20646_v49 }
0x179e   :  { %v4485_v42 = vadd.f32 %v4484_v8, %v20718_v34  ;;  %v11965_v29 = vpop.f32.mrb[43].mxu1 }
0x17a0   :  { %12027 = vmatmul.mubr.msk.f32.gmra.mrb[34].mxu0 %vm1315_vm4, %v4485_v42 }
0x17a1   :  { %v4489_v21 = vpop.f32.mrb[44].mxu1  ;;  %12029 = vmatprep.mubr.msk.f32.mxu0 %vm14447_vm2, %v20646_v49 }
0x17a2   :  { %v4490_v60 = vadd.f32 %v4489_v21, %v20719_v25  ;;  %v11968_v54 = vpop.f32.mrb[45].mxu1 }
0x17a4   :  { %12030 = vmatmul.mubr.msk.f32.gmra.mrb[36].mxu0 %vm1315_vm4, %v4490_v60 }
0x17a5   :  { %v4494_v57 = vpop.f32.mrb[46].mxu1  ;;  %12032 = vmatprep.mubr.msk.f32.mxu0 %vm14447_vm2, %v20646_v49 }
0x17a6   :  { %v4495_v12 = vadd.f32 %v4494_v57, %v20720_v27  ;;  %v11971_v52 = vpop.f32.mrb[47].mxu1 }
0x17a8   :  { %12033 = vmatmul.mubr.msk.f32.gmra.mrb[38].mxu0 %vm1315_vm4, %v4495_v12 }
0x17a9   :  { %v4499_v33 = vpop.f32.mrb[48].mxu1  ;;  %12035 = vmatprep.mubr.msk.f32.mxu0 %vm14447_vm2, %v20646_v49 }
0x17aa   :  { %v4500_v28 = vadd.f32 %v4499_v33, %v20721_v14  ;;  %v11974_v15 = vpop.f32.mrb[49].mxu1 }
0x17ab   :  { %v2989_v15 = vld [vmem:[%s20723_s29 + $0x8] sm:$0xff] }
0x17ac   :  { %12036 = vmatmul.mubr.msk.f32.gmra.mrb[40].mxu0 %vm1315_vm4, %v4500_v28  ;;  %v2988_v28 = vld [vmem:[%s20723_s29] sm:$0xff] }
0x17ad   :  { %v4504_v20 = vpop.f32.mrb[50].mxu1  ;;  %12038 = vmatprep.mubr.msk.f32.mxu0 %vm14447_vm2, %v20646_v49 }
0x17ae   :  { %v4505_v41 = vadd.f32 %v4504_v20, %v20722_v7  ;;  %v11977_v32 = vpop.f32.mrb[51].mxu1 }
0x17af   :  { %v2990_v32 = vld [vmem:[%s20723_s29 + $0x10] sm:$0xff] }
0x17b0   :  { %12039 = vmatmul.mubr.msk.f32.gmra.mrb[42].mxu0 %vm1315_vm4, %v4505_v41  ;;  %v13542_v41 = vpack.c.bf16 %v2989_v15, %v2988_v28  ;;  %v20725_v15 = vld [vmem:[#allocation17_spill] sm:$0xff] }
0x17b1   :  { %12049 = vmatprep.mubr.msk.f32.mxu0 %vm14447_vm2, %v20646_v49 }
0x1843   :  { %v4634_v35 = vpop.f32.mrb[10].mxu0 }
0x1844   :  { %v11992_v19 = vpop.f32.mrb[11].mxu0 }
0x1845   :  { %v17388_v19 = vld [vmem:[%s20643_s18] sm:$0xff] }
0x1847   :  { %v4639_v61 = vpop.f32.mrb[12].mxu0 }
0x1848   :  { %v13512_v46 = vpack.c.bf16 %v4639_v61, %v4634_v35  ;;  %v11995_v1 = vpop.f32.mrb[13].mxu0  ;;  %v2991_v35 = vld [vmem:[%s20723_s29 + $0x18] sm:$0xff] }
0x1849   :  { %v17395_v61 = vld [vmem:[%s20643_s18 + $0x18] sm:$0xff]  ;;  %v17403_v1 = vld [vmem:[%s20643_s18 + $0x10] sm:$0xff] }
0x184a   :  { %13513 = vmatpush1.bf16.msra.mxu1 %v13512_v46  ;;  %v13545_v46 = vpack.c.bf16 %v2991_v35, %v2990_v32 }
0x184b   :  { %v4644_v50 = vpop.f32.mrb[14].mxu0  ;;  %13514 = vmatprep.subr.bf16.mxu1 %v20696_v38 }
0x184c   :  { %v11998_v53 = vpop.f32.mrb[15].mxu0 }
0x184d   :  { %v9881_v53 = vld [vmem:[%s20723_s29 + $0x28] sm:$0xff] }
0x184f   :  { %v4649_v6 = vpop.f32.mrb[16].mxu0 }
0x1850   :  { %v13515_v22 = vpack.c.bf16 %v4649_v6, %v4644_v50  ;;  %v12001_v48 = vpop.f32.mrb[17].mxu0  ;;  %v9880_v50 = vld [vmem:[%s20723_s29 + $0x20] sm:$0xff]  ;;  %v17415_v6 = vld [vmem:[%s20643_s18 + $0x28] sm:$0xff] }
0x1851   :  { %v17423_v48 = vld [vmem:[%s20643_s18 + $0x20] sm:$0xff] }
0x1852   :  { %13516 = vmatpush1.bf16.msra.mxu1 %v13515_v22  ;;  %v13536_v22 = vpack.c.bf16 %v9881_v53, %v9880_v50  ;;  %v9919_v50 = vld [vmem:[%s20449_s9 + $0x48] sm:$0xff] }
0x1853   :  { %v4654_v10 = vpop.f32.mrb[18].mxu0  ;;  %13517 = vmatprep.subr.bf16.mxu1 %v20696_v38 }
0x1854   :  { %v12004_v36 = vpop.f32.mrb[19].mxu0  ;;  %13537 = vmatpush3.bf16.msra.mxu0 %v13536_v22 }
0x1855   :  { %13538 = vmatprep.subr.bf16.mxu0 %v20696_v38  ;;  %v17437_v36 = vld [vmem:[%s20643_s18 + $0x30] sm:$0xff] }
0x1857   :  { %v4659_v9 = vpop.f32.mrb[20].mxu0 }
0x1858   :  { %v13518_v47 = vpack.c.bf16 %v4659_v9, %v4654_v10  ;;  %v12007_v18 = vpop.f32.mrb[21].mxu0  ;;  %v17430_v10 = vld [vmem:[%s20643_s18 + $0x38] sm:$0xff]  ;;  %v17443_v9 = vld [vmem:[%s20643_s18 + $0x48] sm:$0xff] }
0x1859   :  { %v17456_v18 = vld [vmem:[%s20643_s18 + $0x58] sm:$0xff] }
0x185a   :  { %13519 = vmatpush1.bf16.msra.mxu1 %v13518_v47  ;;  %v17450_v47 = vld [vmem:[%s20643_s18 + $0x40] sm:$0xff] }
0x185b   :  { %v4664_v55 = vpop.f32.mrb[22].mxu0  ;;  %13520 = vmatprep.subr.bf16.mxu1 %v20696_v38 }
0x185c   :  { %v12010_v23 = vpop.f32.mrb[23].mxu0 }
0x185d   :  { %v17469_v23 = vld [vmem:[%s20643_s18 + $0x68] sm:$0xff] }
0x185f   :  { %v4669_v39 = vpop.f32.mrb[24].mxu0 }
0x1860   :  { %v13521_v40 = vpack.c.bf16 %v4669_v39, %v4664_v55  ;;  %v12013_v13 = vpop.f32.mrb[25].mxu0  ;;  %v17463_v55 = vld [vmem:[%s20643_s18 + $0x50] sm:$0xff]  ;;  %v17476_v39 = vld [vmem:[%s20643_s18 + $0x60] sm:$0xff] }
0x1861   :  { %v17489_v13 = vld [vmem:[%s20643_s18 + $0x70] sm:$0xff] }
0x1862   :  { %13522 = vmatpush1.bf16.msra.mxu1 %v13521_v40  ;;  %v17482_v40 = vld [vmem:[%s20643_s18 + $0x78] sm:$0xff] }
0x1863   :  { %v4674_v59 = vpop.f32.mrb[26].mxu0  ;;  %13523 = vmatprep.subr.bf16.mxu1 %v20696_v38 }
0x1864   :  { %v12016_v63 = vpop.f32.mrb[27].mxu0 }
0x1865   :  { %v17502_v63 = vld [vmem:[%s20643_s18 + $0x80] sm:$0xff] }
0x1867   :  { %v4679_v17 = vpop.f32.mrb[28].mxu0 }
0x1868   :  { %v13524_v2 = vpack.c.bf16 %v4679_v17, %v4674_v59  ;;  %v12019_v51 = vpop.f32.mrb[29].mxu0  ;;  %v17495_v59 = vld [vmem:[%s20643_s18 + $0x88] sm:$0xff]  ;;  %v17508_v17 = vld [vmem:[%s20643_s18 + $0x98] sm:$0xff] }
0x1869   :  { %v17521_v51 = vld [vmem:[%s20643_s18 + $0xa8] sm:$0xff] }
0x186a   :  { %13525 = vmatpush1.bf16.msra.mxu1 %v13524_v2  ;;  %v17515_v2 = vld [vmem:[%s20643_s18 + $0x90] sm:$0xff] }
0x186b   :  { %v4684_v24 = vpop.f32.mrb[30].mxu0  ;;  %13526 = vmatprep.subr.bf16.mxu1 %v20696_v38 }
0x186c   :  { %v12022_v8 = vpop.f32.mrb[31].mxu0 }
0x186d   :  { %v17534_v8 = vld [vmem:[%s20643_s18 + $0xb8] sm:$0xff] }
0x186f   :  { %v4689_v34 = vpop.f32.mrb[32].mxu0 }
0x1870   :  { %v13527_v42 = vpack.c.bf16 %v4689_v34, %v4684_v24  ;;  %v12025_v29 = vpop.f32.mrb[33].mxu0  ;;  %v17528_v24 = vld [vmem:[%s20643_s18 + $0xa0] sm:$0xff]  ;;  %v17541_v34 = vld [vmem:[%s20643_s18 + $0xb0] sm:$0xff] }
0x1871   :  { %v17554_v29 = vld [vmem:[%s20643_s18 + $0xc0] sm:$0xff] }
0x1872   :  { %13528 = vmatpush1.bf16.msra.mxu1 %v13527_v42  ;;  %v17547_v42 = vld [vmem:[%s20643_s18 + $0xc8] sm:$0xff] }
0x1873   :  { %v4694_v21 = vpop.f32.mrb[34].mxu0  ;;  %13529 = vmatprep.subr.bf16.mxu1 %v20696_v38 }
0x1874   :  { %v12028_v25 = vpop.f32.mrb[35].mxu0 }
0x1875   :  { %v17567_v25 = vld [vmem:[%s20643_s18 + $0xd0] sm:$0xff] }
0x1877   :  { %v4699_v60 = vpop.f32.mrb[36].mxu0 }
0x1878   :  { %v13530_v54 = vpack.c.bf16 %v4699_v60, %v4694_v21  ;;  %v12031_v57 = vpop.f32.mrb[37].mxu0  ;;  %v17560_v21 = vld [vmem:[%s20643_s18 + $0xd8] sm:$0xff]  ;;  %v17573_v60 = vld [vmem:[%s20643_s18 + $0xe8] sm:$0xff] }
0x1879   :  { %v17586_v57 = vld [vmem:[%s20643_s18 + $0xf8] sm:$0xff] }
0x187a   :  { %13531 = vmatpush1.bf16.msra.mxu1 %v13530_v54  ;;  %v17580_v54 = vld [vmem:[%s20643_s18 + $0xe0] sm:$0xff] }
0x187b   :  { %v4704_v27 = vpop.f32.mrb[38].mxu0  ;;  %13532 = vmatprep.subr.bf16.mxu1 %v20696_v38 }
0x187c   :  { %v12034_v12 = vpop.f32.mrb[39].mxu0 }
0x187d   :  { %v17599_v12 = vld [vmem:[%s20643_s18 + $0x108] sm:$0x1f] }
0x187f   :  { %v4709_v52 = vpop.f32.mrb[40].mxu0 }
0x1880   :  { %v13533_v33 = vpack.c.bf16 %v4709_v52, %v4704_v27  ;;  %v12037_v14 = vpop.f32.mrb[41].mxu0  ;;  %v17593_v27 = vld [vmem:[%s20643_s18 + $0xf0] sm:$0xff]  ;;  %v17606_v52 = vld [vmem:[%s20643_s18 + $0x100] sm:$0x1f] }
0x1881   :  { %20724 = vst [vmem:[#allocation19_spill] sm:$0xff] %v17606_v52  ;;  %v9883_v14 = vld [vmem:[%s20723_s29 + $0x38] sm:$0xff] }
0x1882   :  { %13534 = vmatpush1.bf16.msra.mxu1 %v13533_v33  ;;  %v9882_v33 = vld [vmem:[%s20723_s29 + $0x30] sm:$0xff] }
0x1883   :  { %v4714_v20 = vpop.f32.mrb[42].mxu0  ;;  %4759 = vmatprep.subr.mxu1 %v20646_v49  ;;  %v13539_v28 = vpack.c.bf16 %v9883_v14, %v9882_v33 }
0x1884   :  { %v12040_v7 = vpop.f32.mrb[43].mxu0 }
0x1885   :  { %13540 = vmatpush3.bf16.msra.mxu0 %v13539_v28  ;;  %v17686_v7 = vld [vmem:[#allocation10 + $0x1] ss:$0 sm:$0xff] }
0x1886   :  { %9862 = vmatpush1.msk.msra.mxu1 %vm754_vm1, %v4714_v20  ;;  %13547 = vmatprep.subr.bf16.mxu0 %v20696_v38  ;;  %v20726_v20 = vld [vmem:[#allocation18_spill] sm:$0xff] }
0x1887   :  { %4792 = vmatmul.mubr.f32.vlgmr.msra.gmra.mrb[52].mxu1 %v17388_v19  ;;  %13541 = vmatprep.subr.bf16.mxu1 %v20696_v38 }
0x1888   :  { %9864 = vmatprep.mubr.msk.f32.mxu1 %vm702_vm0, %v17395_v61  ;;  %13543 = vmatpush3.bf16.msra.mxu1 %v13542_v41 }
0x1889   :  { %13544 = vmatprep.subr.bf16.mxu1 %v20696_v38 }
0x188b   :  { %4797 = vmatmul.mubr.f32.gmra.mrb[54].mxu1 %v17403_v1 }
0x188c   :  { %9865 = vmatprep.mubr.msk.f32.mxu1 %vm702_vm0, %v17415_v6  ;;  %13546 = vmatpush3.bf16.msra.mxu1 %v13545_v46  ;;  %v9918_v46 = vld [vmem:[%s20449_s9 + $0x40] sm:$0xff] }
0x188d   :  { %13553 = vmatprep.subr.bf16.mxu1 %v20696_v38  ;;  %v13548_v33 = vpack.c.bf16 %v9919_v50, %v9918_v46 }
0x188f   :  { %4802 = vmatmul.mubr.f32.gmra.mrb[56].mxu1 %v17423_v48 }
0x1890   :  { %9866 = vmatprep.mubr.msk.f32.mxu1 %vm702_vm0, %v17430_v10 }
0x1893   :  { %4807 = vmatmul.mubr.f32.gmra.mrb[58].mxu1 %v17437_v36 }
0x1894   :  { %9867 = vmatprep.mubr.msk.f32.mxu1 %vm702_vm0, %v17443_v9 }
0x1897   :  { %4812 = vmatmul.mubr.f32.gmra.mrb[60].mxu1 %v17450_v47 }
0x1898   :  { %9868 = vmatprep.mubr.msk.f32.mxu1 %vm702_vm0, %v17456_v18 }
0x189b   :  { %4817 = vmatmul.mubr.f32.gmra.mrb[62].mxu1 %v17463_v55 }
0x189c   :  { %9869 = vmatprep.mubr.msk.f32.mxu1 %vm702_vm0, %v17469_v23 }
0x189f   :  { %4822 = vmatmul.mubr.f32.gmra.mrb[64].mxu1 %v17476_v39 }
0x18a0   :  { %9870 = vmatprep.mubr.msk.f32.mxu1 %vm702_vm0, %v17482_v40 }
0x18a3   :  { %4827 = vmatmul.mubr.f32.gmra.mrb[66].mxu1 %v17489_v13 }
0x18a4   :  { %9871 = vmatprep.mubr.msk.f32.mxu1 %vm702_vm0, %v17495_v59 }
0x18a7   :  { %4832 = vmatmul.mubr.f32.gmra.mrb[68].mxu1 %v17502_v63 }
0x18a8   :  { %9872 = vmatprep.mubr.msk.f32.mxu1 %vm702_vm0, %v17508_v17 }
0x18ab   :  { %4837 = vmatmul.mubr.f32.gmra.mrb[70].mxu1 %v17515_v2 }
0x18ac   :  { %9873 = vmatprep.mubr.msk.f32.mxu1 %vm702_vm0, %v17521_v51 }
0x18af   :  { %4842 = vmatmul.mubr.f32.gmra.mrb[72].mxu1 %v17528_v24 }
0x18b0   :  { %9874 = vmatprep.mubr.msk.f32.mxu1 %vm702_vm0, %v17534_v8 }
0x18b3   :  { %4847 = vmatmul.mubr.f32.gmra.mrb[74].mxu1 %v17541_v34 }
0x18b4   :  { %9875 = vmatprep.mubr.msk.f32.mxu1 %vm702_vm0, %v17547_v42 }
0x18b7   :  { %4852 = vmatmul.mubr.f32.gmra.mrb[76].mxu1 %v17554_v29 }
0x18b8   :  { %9876 = vmatprep.mubr.msk.f32.mxu1 %vm702_vm0, %v17560_v21 }
0x18bb   :  { %4857 = vmatmul.mubr.f32.gmra.mrb[78].mxu1 %v17567_v25 }
0x18bc   :  { %9877 = vmatprep.mubr.msk.f32.mxu1 %vm702_vm0, %v17573_v60 }
0x18bf   :  { %4862 = vmatmul.mubr.f32.gmra.mrb[80].mxu1 %v17580_v54 }
0x18c0   :  { %9878 = vmatprep.mubr.msk.f32.mxu1 %vm702_vm0, %v17586_v57 }
0x18c3   :  { %4867 = vmatmul.mubr.f32.gmra.mrb[82].mxu1 %v17593_v27 }
0x18c4   :  { %9879 = vmatprep.mubr.msk.f32.mxu1 %vm702_vm0, %v17599_v12 }
0x18c7   :  { %4872 = vmatmul.mubr.f32.gmra.mrb[84].mxu1 %v17606_v52 }
0x18c8   :  { %12108 = vmatprep.mubr.msk.f32.mxu1 %vm14447_vm2, %v20646_v49 }
0x18cb   :  { %12109 = vmatmul.mubr.msk.f32.vlgmr.msra.gmra.mrb[86].mxu1 %vm930_vm3, %v16393_v11 }
0x18cc   :  { %12111 = vmatprep.mubr.msk.f32.mxu1 %vm14447_vm2, %v20646_v49 }
0x18cf   :  { %12112 = vmatmul.mubr.msk.f32.gmra.mrb[88].mxu1 %vm930_vm3, %v16405_v44 }
0x18d0   :  { %12114 = vmatprep.mubr.msk.f32.mxu1 %vm14447_vm2, %v20646_v49 }
0x18d3   :  { %12115 = vmatmul.mubr.msk.f32.gmra.mrb[90].mxu1 %vm930_vm3, %v16414_v4 }
0x18d4   :  { %12117 = vmatprep.mubr.msk.f32.mxu1 %vm14447_vm2, %v20646_v49 }
0x18d7   :  { %12118 = vmatmul.mubr.msk.f32.gmra.mrb[92].mxu1 %vm930_vm3, %v16423_v56 }
0x18d8   :  { %12120 = vmatprep.mubr.msk.f32.mxu1 %vm14447_vm2, %v20646_v49 }
0x18db   :  { %12121 = vmatmul.mubr.msk.f32.gmra.mrb[94].mxu1 %vm930_vm3, %v16432_v16 }
0x18dc   :  { %12123 = vmatprep.mubr.msk.f32.mxu1 %vm14447_vm2, %v20646_v49 }
0x18df   :  { %12124 = vmatmul.mubr.msk.f32.gmra.mrb[96].mxu1 %vm930_vm3, %v16441_v45 }
0x18e0   :  { %12126 = vmatprep.mubr.msk.f32.mxu1 %vm14447_vm2, %v20646_v49 }
0x18e3   :  { %12127 = vmatmul.mubr.msk.f32.gmra.mrb[98].mxu1 %vm930_vm3, %v16450_v30 }
0x18e4   :  { %12129 = vmatprep.mubr.msk.f32.mxu1 %vm14447_vm2, %v20646_v49 }
0x18e7   :  { %12130 = vmatmul.mubr.msk.f32.gmra.mrb[100].mxu1 %vm930_vm3, %v16459_v0 }
0x18e8   :  { %12132 = vmatprep.mubr.msk.f32.mxu1 %vm14447_vm2, %v20646_v49 }
0x18eb   :  { %12133 = vmatmul.mubr.msk.f32.gmra.mrb[102].mxu1 %vm930_vm3, %v16468_v31 }
0x18ec   :  { %12135 = vmatprep.mubr.msk.f32.mxu1 %vm14447_vm2, %v20646_v49 }
0x18ef   :  { %12136 = vmatmul.mubr.msk.f32.gmra.mrb[104].mxu1 %vm930_vm3, %v16477_v58 }
0x18f0   :  { %12138 = vmatprep.mubr.msk.f32.mxu1 %vm14447_vm2, %v20646_v49 }
0x18f3   :  { %12139 = vmatmul.mubr.msk.f32.gmra.mrb[106].mxu1 %vm930_vm3, %v16486_v62 }
0x18f4   :  { %12141 = vmatprep.mubr.msk.f32.mxu1 %vm14447_vm2, %v20646_v49 }
0x18f7   :  { %12142 = vmatmul.mubr.msk.f32.gmra.mrb[108].mxu1 %vm930_vm3, %v16495_v3 }
0x18f8   :  { %12144 = vmatprep.mubr.msk.f32.mxu1 %vm14447_vm2, %v20646_v49 }
0x18fb   :  { %12145 = vmatmul.mubr.msk.f32.gmra.mrb[110].mxu1 %vm930_vm3, %v16504_v37 }
0x18fc   :  { %12147 = vmatprep.mubr.msk.f32.mxu1 %vm14447_vm2, %v20646_v49 }
0x18ff   :  { %12148 = vmatmul.mubr.msk.f32.gmra.mrb[112].mxu1 %vm930_vm3, %v16515_v43 }
0x1900   :  { %12150 = vmatprep.mubr.msk.f32.mxu1 %vm14447_vm2, %v20646_v49 }
0x1903   :  { %12151 = vmatmul.mubr.msk.f32.gmra.mrb[114].mxu1 %vm930_vm3, %v16524_v26 }
0x1904   :  { %12153 = vmatprep.mubr.msk.f32.mxu1 %vm14447_vm2, %v20646_v49 }
0x1907   :  { %12154 = vmatmul.mubr.msk.f32.gmra.mrb[116].mxu1 %vm930_vm3, %v20725_v15 }
0x1908   :  { %12156 = vmatprep.mubr.msk.f32.mxu1 %vm14447_vm2, %v20646_v49 }
0x190b   :  { %12157 = vmatmul.mubr.msk.f32.gmra.mrb[118].mxu1 %vm930_vm3, %v20726_v20 }
0x190c   :  { %9942 = vmatprep.mubr.msk.f32.mxu1 %vm702_vm0, %v17268_v5 }
0x195a   :  { %v4793_v41 = vpop.f32.mrb[52].mxu1 }
0x195b   :  { %v4794_v32 = vadd.f32 %v17686_v7, %v4793_v41  ;;  %v4795_v35 = vpop.f32.mrb[53].mxu1  ;;  %v9920_v41 = vld [vmem:[%s20449_s9 + $0x50] sm:$0xff] }
0x195c   :  { %v9921_v35 = vld [vmem:[%s20449_s9 + $0x58] sm:$0xff] }
0x195d   :  { %v4877_v53 = vmax.f32 %v4794_v32, 0.0 }
0x195e   :  { %v4798_v22 = vpop.f32.mrb[54].mxu1 }
0x195f   :  { %v17696_v14 = vadd.f32 %v4877_v53, %v16393_v11  ;;  %v4799_v5 = vadd.f32 %v17686_v7, %v4798_v22  ;;  %v4800_v28 = vpop.f32.mrb[55].mxu1  ;;  %v13551_v11 = vpack.c.bf16 %v9921_v35, %v9920_v41 }
0x1961   :  { %20727 = vst [vmem:[#allocation17_spill] sm:$0xff] %v17696_v14  ;;  %v4878_v52 = vmax.f32 %v4799_v5, 0.0  ;;  %12050 = vmatmul.mubr.msk.f32.vlgmr.msra.gmra.mrb[44].mxu0 %vm930_vm3, %v17696_v14 }
0x1962   :  { %v4803_v32 = vpop.f32.mrb[56].mxu1  ;;  %12052 = vmatprep.mubr.msk.f32.mxu0 %vm14447_vm2, %v20646_v49  ;;  %13549 = vmatpush3.bf16.msra.mxu0 %v13548_v33 }
0x1963   :  { %v17710_v46 = vadd.f32 %v4878_v52, %v16405_v44  ;;  %v4804_v50 = vadd.f32 %v17686_v7, %v4803_v32  ;;  %v4805_v53 = vpop.f32.mrb[57].mxu1  ;;  %13550 = vmatprep.subr.bf16.mxu0 %v20696_v38 }
0x1965   :  { %20728 = vst [vmem:[#allocation18_spill] sm:$0xff] %v17710_v46  ;;  %v4879_v22 = vmax.f32 %v4804_v50, 0.0  ;;  %12053 = vmatmul.mubr.msk.f32.gmra.mrb[46].mxu0 %vm930_vm3, %v17710_v46 }
0x1966   :  { %v4808_v5 = vpop.f32.mrb[58].mxu1  ;;  %12055 = vmatprep.mubr.msk.f32.mxu0 %vm14447_vm2, %v20646_v49  ;;  %13552 = vmatpush3.bf16.msra.mxu0 %v13551_v11 }
0x1967   :  { %v17719_v33 = vadd.f32 %v4879_v22, %v16414_v4  ;;  %v4809_v44 = vadd.f32 %v17686_v7, %v4808_v5  ;;  %v4810_v52 = vpop.f32.mrb[59].mxu1  ;;  %13577 = vmatprep.subr.bf16.mxu0 %v20696_v38 }
0x1969   :  { %20729 = vst [vmem:[#allocation20_spill] sm:$0xff] %v17719_v33  ;;  %v4880_v28 = vmax.f32 %v4809_v44, 0.0  ;;  %12056 = vmatmul.mubr.msk.f32.gmra.mrb[48].mxu0 %vm930_vm3, %v17719_v33 }
0x196a   :  { %v4813_v41 = vpop.f32.mrb[60].mxu1  ;;  %12058 = vmatprep.mubr.msk.f32.mxu0 %vm14447_vm2, %v20646_v49 }
0x196b   :  { %v17728_v35 = vadd.f32 %v4880_v28, %v16423_v56  ;;  %v4814_v32 = vadd.f32 %v17686_v7, %v4813_v41  ;;  %v4815_v4 = vpop.f32.mrb[61].mxu1 }
0x196d   :  { %20730 = vst [vmem:[#allocation21_spill] sm:$0xff] %v17728_v35  ;;  %v4881_v11 = vmax.f32 %v4814_v32, 0.0  ;;  %12059 = vmatmul.mubr.msk.f32.gmra.mrb[50].mxu0 %vm930_vm3, %v17728_v35 }
0x196e   :  { %v4818_v50 = vpop.f32.mrb[62].mxu1  ;;  %12061 = vmatprep.mubr.msk.f32.mxu0 %vm14447_vm2, %v20646_v49 }
0x196f   :  { %v17736_v53 = vadd.f32 %v4881_v11, %v16432_v16  ;;  %v4819_v22 = vadd.f32 %v17686_v7, %v4818_v50  ;;  %v4820_v5 = vpop.f32.mrb[63].mxu1 }
0x1971   :  { %20731 = vst [vmem:[#allocation22_spill] sm:$0xff] %v17736_v53  ;;  %v4882_v44 = vmax.f32 %v4819_v22, 0.0  ;;  %12062 = vmatmul.mubr.msk.f32.gmra.mrb[52].mxu0 %vm930_vm3, %v17736_v53 }
0x1972   :  { %v4823_v56 = vpop.f32.mrb[64].mxu1  ;;  %12064 = vmatprep.mubr.msk.f32.mxu0 %vm14447_vm2, %v20646_v49 }
0x1973   :  { %v17744_v52 = vadd.f32 %v4882_v44, %v16441_v45  ;;  %v4824_v28 = vadd.f32 %v17686_v7, %v4823_v56  ;;  %v4825_v41 = vpop.f32.mrb[65].mxu1 }
0x1975   :  { %20732 = vst [vmem:[#allocation23_spill] sm:$0xff] %v17744_v52  ;;  %v4883_v32 = vmax.f32 %v4824_v28, 0.0  ;;  %12065 = vmatmul.mubr.msk.f32.gmra.mrb[54].mxu0 %vm930_vm3, %v17744_v52 }
0x1976   :  { %v4828_v16 = vpop.f32.mrb[66].mxu1  ;;  %12067 = vmatprep.mubr.msk.f32.mxu0 %vm14447_vm2, %v20646_v49 }
0x1977   :  { %v17752_v4 = vadd.f32 %v4883_v32, %v16450_v30  ;;  %v4829_v11 = vadd.f32 %v17686_v7, %v4828_v16  ;;  %v4830_v50 = vpop.f32.mrb[67].mxu1 }
0x1979   :  { %20733 = vst [vmem:[#allocation24_spill] sm:$0xff] %v17752_v4  ;;  %v4884_v22 = vmax.f32 %v4829_v11, 0.0  ;;  %12068 = vmatmul.mubr.msk.f32.gmra.mrb[56].mxu0 %vm930_vm3, %v17752_v4 }
0x197a   :  { %v4833_v45 = vpop.f32.mrb[68].mxu1  ;;  %12070 = vmatprep.mubr.msk.f32.mxu0 %vm14447_vm2, %v20646_v49 }
0x197b   :  { %v17760_v5 = vadd.f32 %v4884_v22, %v16459_v0  ;;  %v4834_v44 = vadd.f32 %v17686_v7, %v4833_v45  ;;  %v4835_v56 = vpop.f32.mrb[69].mxu1 }
0x197d   :  { %20734 = vst [vmem:[#allocation25_spill] sm:$0xff] %v17760_v5  ;;  %v4885_v28 = vmax.f32 %v4834_v44, 0.0  ;;  %12071 = vmatmul.mubr.msk.f32.gmra.mrb[58].mxu0 %vm930_vm3, %v17760_v5 }
0x197e   :  { %v4838_v30 = vpop.f32.mrb[70].mxu1  ;;  %12073 = vmatprep.mubr.msk.f32.mxu0 %vm14447_vm2, %v20646_v49 }
0x197f   :  { %v17768_v41 = vadd.f32 %v4885_v28, %v16468_v31  ;;  %v4839_v32 = vadd.f32 %v17686_v7, %v4838_v30  ;;  %v4840_v16 = vpop.f32.mrb[71].mxu1 }
0x1981   :  { %20735 = vst [vmem:[#allocation26_spill] sm:$0xff] %v17768_v41  ;;  %v4886_v11 = vmax.f32 %v4839_v32, 0.0  ;;  %12074 = vmatmul.mubr.msk.f32.gmra.mrb[60].mxu0 %vm930_vm3, %v17768_v41 }
0x1982   :  { %v4843_v0 = vpop.f32.mrb[72].mxu1  ;;  %12076 = vmatprep.mubr.msk.f32.mxu0 %vm14447_vm2, %v20646_v49 }
0x1983   :  { %v17776_v50 = vadd.f32 %v4886_v11, %v16477_v58  ;;  %v4844_v22 = vadd.f32 %v17686_v7, %v4843_v0  ;;  %v4845_v45 = vpop.f32.mrb[73].mxu1 }
0x1985   :  { %20736 = vst [vmem:[#allocation27_spill] sm:$0xff] %v17776_v50  ;;  %v4887_v44 = vmax.f32 %v4844_v22, 0.0  ;;  %12077 = vmatmul.mubr.msk.f32.gmra.mrb[62].mxu0 %vm930_vm3, %v17776_v50 }
0x1986   :  { %v4848_v31 = vpop.f32.mrb[74].mxu1  ;;  %12079 = vmatprep.mubr.msk.f32.mxu0 %vm14447_vm2, %v20646_v49 }
0x1987   :  { %v17784_v56 = vadd.f32 %v4887_v44, %v16486_v62  ;;  %v4849_v28 = vadd.f32 %v17686_v7, %v4848_v31  ;;  %v4850_v30 = vpop.f32.mrb[75].mxu1 }
0x1989   :  { %20737 = vst [vmem:[#allocation28_spill] sm:$0xff] %v17784_v56  ;;  %v4888_v32 = vmax.f32 %v4849_v28, 0.0  ;;  %12080 = vmatmul.mubr.msk.f32.gmra.mrb[64].mxu0 %vm930_vm3, %v17784_v56 }
0x198a   :  { %v4853_v58 = vpop.f32.mrb[76].mxu1  ;;  %12082 = vmatprep.mubr.msk.f32.mxu0 %vm14447_vm2, %v20646_v49 }
0x198b   :  { %v17792_v16 = vadd.f32 %v4888_v32, %v16495_v3  ;;  %v4854_v11 = vadd.f32 %v17686_v7, %v4853_v58  ;;  %v4855_v0 = vpop.f32.mrb[77].mxu1 }
0x198d   :  { %20738 = vst [vmem:[#allocation29_spill] sm:$0xff] %v17792_v16  ;;  %v4889_v22 = vmax.f32 %v4854_v11, 0.0  ;;  %12083 = vmatmul.mubr.msk.f32.gmra.mrb[66].mxu0 %vm930_vm3, %v17792_v16 }
0x198e   :  { %v4858_v62 = vpop.f32.mrb[78].mxu1  ;;  %12085 = vmatprep.mubr.msk.f32.mxu0 %vm14447_vm2, %v20646_v49 }
0x198f   :  { %v17800_v45 = vadd.f32 %v4889_v22, %v16504_v37  ;;  %v4859_v44 = vadd.f32 %v17686_v7, %v4858_v62  ;;  %v4860_v31 = vpop.f32.mrb[79].mxu1 }
0x1991   :  { %20739 = vst [vmem:[#allocation30_spill] sm:$0xff] %v17800_v45  ;;  %v4890_v28 = vmax.f32 %v4859_v44, 0.0  ;;  %12086 = vmatmul.mubr.msk.f32.gmra.mrb[68].mxu0 %vm930_vm3, %v17800_v45 }
0x1992   :  { %v4863_v3 = vpop.f32.mrb[80].mxu1  ;;  %12088 = vmatprep.mubr.msk.f32.mxu0 %vm14447_vm2, %v20646_v49 }
0x1993   :  { %v17808_v30 = vadd.f32 %v4890_v28, %v16515_v43  ;;  %v4864_v32 = vadd.f32 %v17686_v7, %v4863_v3  ;;  %v4865_v58 = vpop.f32.mrb[81].mxu1 }
0x1995   :  { %20740 = vst [vmem:[#allocation31_spill] sm:$0xff] %v17808_v30  ;;  %v4891_v11 = vmax.f32 %v4864_v32, 0.0  ;;  %12089 = vmatmul.mubr.msk.f32.gmra.mrb[70].mxu0 %vm930_vm3, %v17808_v30 }
0x1996   :  { %v4868_v37 = vpop.f32.mrb[82].mxu1  ;;  %12091 = vmatprep.mubr.msk.f32.mxu0 %vm14447_vm2, %v20646_v49 }
0x1997   :  { %v17816_v0 = vadd.f32 %v4891_v11, %v16524_v26  ;;  %v4869_v22 = vadd.f32 %v17686_v7, %v4868_v37  ;;  %v4870_v62 = vpop.f32.mrb[83].mxu1 }
0x1999   :  { %20741 = vst [vmem:[#allocation32_spill] sm:$0xff] %v17816_v0  ;;  %v4892_v44 = vmax.f32 %v4869_v22, 0.0  ;;  %12092 = vmatmul.mubr.msk.f32.gmra.mrb[72].mxu0 %vm930_vm3, %v17816_v0 }
0x199a   :  { %v4873_v43 = vpop.f32.mrb[84].mxu1  ;;  %12094 = vmatprep.mubr.msk.f32.mxu0 %vm14447_vm2, %v20646_v49 }
0x199b   :  { %v17824_v31 = vadd.f32 %v4892_v44, %v20725_v15  ;;  %v4874_v28 = vadd.f32 %v17686_v7, %v4873_v43  ;;  %v4875_v3 = vpop.f32.mrb[85].mxu1 }
0x199d   :  { %20742 = vst [vmem:[#allocation33_spill] sm:$0xff] %v17824_v31  ;;  %v4893_v32 = vmax.f32 %v4874_v28, 0.0  ;;  %12095 = vmatmul.mubr.msk.f32.gmra.mrb[74].mxu0 %vm930_vm3, %v17824_v31 }
0x199e   :  { %v17829_v26 = vpop.f32.mrb[86].mxu1  ;;  %12097 = vmatprep.mubr.msk.f32.mxu0 %vm14447_vm2, %v20646_v49 }
0x199f   :  { %v17834_v58 = vadd.f32 %v4893_v32, %v20726_v20  ;;  %v12110_v11 = vpop.f32.mrb[87].mxu1 }
0x19a1   :  { %20743 = vst [vmem:[#allocation34_spill] sm:$0xff] %v17834_v58  ;;  %12098 = vmatmul.mubr.msk.f32.gmra.mrb[76].mxu0 %vm930_vm3, %v17834_v58 }
0x19a2   :  { %v17838_v15 = vpop.f32.mrb[88].mxu1  ;;  %12167 = vmatprep.mubr.msk.f32.mxu0 %vm14447_vm2, %v20646_v49 }
0x19a3   :  { %v12113_v7 = vpop.f32.mrb[89].mxu1 }
0x19a5   :  { %12168 = vmatmul.mubr.msk.f32.vlgmr.msra.gmra.mrb[78].mxu0 %vm930_vm3, %v17696_v14 }
0x19a6   :  { %v17844_v37 = vpop.f32.mrb[90].mxu1  ;;  %12170 = vmatprep.mubr.msk.f32.mxu0 %vm14447_vm2, %v20646_v49 }
0x19a7   :  { %v12116_v20 = vpop.f32.mrb[91].mxu1 }
0x19a9   :  { %12171 = vmatmul.mubr.msk.f32.gmra.mrb[80].mxu0 %vm930_vm3, %v17710_v46 }
0x19aa   :  { %v17850_v22 = vpop.f32.mrb[92].mxu1  ;;  %12173 = vmatprep.mubr.msk.f32.mxu0 %vm14447_vm2, %v20646_v49 }
0x19ab   :  { %v12119_v62 = vpop.f32.mrb[93].mxu1 }
0x19ad   :  { %12174 = vmatmul.mubr.msk.f32.gmra.mrb[82].mxu0 %vm930_vm3, %v17719_v33 }
0x19ae   :  { %v17856_v44 = vpop.f32.mrb[94].mxu1  ;;  %12176 = vmatprep.mubr.msk.f32.mxu0 %vm14447_vm2, %v20646_v49 }
0x19af   :  { %v12122_v43 = vpop.f32.mrb[95].mxu1 }
0x19b1   :  { %12177 = vmatmul.mubr.msk.f32.gmra.mrb[84].mxu0 %vm930_vm3, %v17728_v35 }
0x19b2   :  { %v17862_v28 = vpop.f32.mrb[96].mxu1  ;;  %12179 = vmatprep.mubr.msk.f32.mxu0 %vm14447_vm2, %v20646_v49 }
0x19b3   :  { %v12125_v3 = vpop.f32.mrb[97].mxu1 }
0x19b5   :  { %12180 = vmatmul.mubr.msk.f32.gmra.mrb[86].mxu0 %vm930_vm3, %v17736_v53 }
0x19b6   :  { %v17868_v32 = vpop.f32.mrb[98].mxu1  ;;  %12182 = vmatprep.mubr.msk.f32.mxu0 %vm14447_vm2, %v20646_v49 }
0x19b7   :  { %v12128_v11 = vpop.f32.mrb[99].mxu1 }
0x19b9   :  { %12183 = vmatmul.mubr.msk.f32.gmra.mrb[88].mxu0 %vm930_vm3, %v17744_v52 }
0x19ba   :  { %v17874_v7 = vpop.f32.mrb[100].mxu1  ;;  %12185 = vmatprep.mubr.msk.f32.mxu0 %vm14447_vm2, %v20646_v49 }
0x19bb   :  { %v12131_v20 = vpop.f32.mrb[101].mxu1 }
0x19bd   :  { %12186 = vmatmul.mubr.msk.f32.gmra.mrb[90].mxu0 %vm930_vm3, %v17752_v4 }
0x19be   :  { %v17880_v62 = vpop.f32.mrb[102].mxu1  ;;  %12188 = vmatprep.mubr.msk.f32.mxu0 %vm14447_vm2, %v20646_v49 }
0x19bf   :  { %v12134_v43 = vpop.f32.mrb[103].mxu1 }
0x19c1   :  { %12189 = vmatmul.mubr.msk.f32.gmra.mrb[92].mxu0 %vm930_vm3, %v17760_v5 }
0x19c2   :  { %v17886_v3 = vpop.f32.mrb[104].mxu1  ;;  %12191 = vmatprep.mubr.msk.f32.mxu0 %vm14447_vm2, %v20646_v49 }
0x19c3   :  { %v12137_v11 = vpop.f32.mrb[105].mxu1 }
0x19c5   :  { %12192 = vmatmul.mubr.msk.f32.gmra.mrb[94].mxu0 %vm930_vm3, %v17768_v41 }
0x19c6   :  { %v17892_v20 = vpop.f32.mrb[106].mxu1  ;;  %12194 = vmatprep.mubr.msk.f32.mxu0 %vm14447_vm2, %v20646_v49 }
0x19c7   :  { %v12140_v4 = vpop.f32.mrb[107].mxu1 }
0x19c9   :  { %12195 = vmatmul.mubr.msk.f32.gmra.mrb[96].mxu0 %vm930_vm3, %v17776_v50 }
0x19ca   :  { %v5238_v43 = vpop.f32.mrb[108].mxu1  ;;  %12197 = vmatprep.mubr.msk.f32.mxu0 %vm14447_vm2, %v20646_v49 }
0x19cb   :  { %v12143_v5 = vpop.f32.mrb[109].mxu1 }
0x19cd   :  { %12198 = vmatmul.mubr.msk.f32.gmra.mrb[98].mxu0 %vm930_vm3, %v17784_v56 }
0x19ce   :  { %v5243_v11 = vpop.f32.mrb[110].mxu1  ;;  %12200 = vmatprep.mubr.msk.f32.mxu0 %vm14447_vm2, %v20646_v49 }
0x19cf   :  { %v12146_v41 = vpop.f32.mrb[111].mxu1 }
0x19d1   :  { %12201 = vmatmul.mubr.msk.f32.gmra.mrb[100].mxu0 %vm930_vm3, %v17792_v16 }
0x19d2   :  { %v5248_v4 = vpop.f32.mrb[112].mxu1  ;;  %12203 = vmatprep.mubr.msk.f32.mxu0 %vm14447_vm2, %v20646_v49 }
0x19d3   :  { %v12149_v50 = vpop.f32.mrb[113].mxu1 }
0x19d5   :  { %12204 = vmatmul.mubr.msk.f32.gmra.mrb[102].mxu0 %vm930_vm3, %v17800_v45 }
0x19d6   :  { %v5253_v5 = vpop.f32.mrb[114].mxu1  ;;  %12206 = vmatprep.mubr.msk.f32.mxu0 %vm14447_vm2, %v20646_v49 }
0x19d7   :  { %v12152_v56 = vpop.f32.mrb[115].mxu1 }
0x19d9   :  { %12207 = vmatmul.mubr.msk.f32.gmra.mrb[104].mxu0 %vm930_vm3, %v17808_v30 }
0x19da   :  { %v5258_v41 = vpop.f32.mrb[116].mxu1  ;;  %12209 = vmatprep.mubr.msk.f32.mxu0 %vm14447_vm2, %v20646_v49 }
0x19db   :  { %v12155_v16 = vpop.f32.mrb[117].mxu1 }
0x19dd   :  { %12210 = vmatmul.mubr.msk.f32.gmra.mrb[106].mxu0 %vm930_vm3, %v17816_v0 }
0x19de   :  { %v5263_v50 = vpop.f32.mrb[118].mxu1  ;;  %12212 = vmatprep.mubr.msk.f32.mxu0 %vm14447_vm2, %v20646_v49 }
0x19df   :  { %v12158_v45 = vpop.f32.mrb[119].mxu1 }
0x19e1   :  { %12213 = vmatmul.mubr.msk.f32.gmra.mrb[108].mxu0 %vm930_vm3, %v17824_v31 }
0x19e2   :  { %12215 = vmatprep.mubr.msk.f32.mxu0 %vm14447_vm2, %v20646_v49 }
0x19e5   :  { %12216 = vmatmul.mubr.msk.f32.gmra.mrb[110].mxu0 %vm930_vm3, %v17834_v58 }
0x19e6   :  { %12230 = vmatprep.mubr.msk.f32.mxu0 %vm14447_vm2, %v20646_v49 }
0x1a34   :  { %v5033_v56 = vpop.f32.mrb[44].mxu0 }
0x1a35   :  { %v12051_v16 = vpop.f32.mrb[45].mxu0  ;;  %v17929_v0 = vadd.f32 %v17829_v26, %v5033_v56 }
0x1a38   :  { %v5038_v30 = vpop.f32.mrb[46].mxu0 }
0x1a39   :  { %v12054_v52 = vpop.f32.mrb[47].mxu0  ;;  %v17932_v45 = vadd.f32 %v17838_v15, %v5038_v30 }
0x1a3c   :  { %v5043_v31 = vpop.f32.mrb[48].mxu0 }
0x1a3d   :  { %v12057_v53 = vpop.f32.mrb[49].mxu0  ;;  %v17935_v35 = vadd.f32 %v17844_v37, %v5043_v31 }
0x1a40   :  { %v5048_v33 = vpop.f32.mrb[50].mxu0 }
0x1a41   :  { %v12060_v58 = vpop.f32.mrb[51].mxu0  ;;  %v17938_v46 = vadd.f32 %v17850_v22, %v5048_v33 }
0x1a44   :  { %v5053_v14 = vpop.f32.mrb[52].mxu0 }
0x1a45   :  { %v12063_v16 = vpop.f32.mrb[53].mxu0  ;;  %v17941_v26 = vadd.f32 %v17856_v44, %v5053_v14 }
0x1a48   :  { %v5058_v56 = vpop.f32.mrb[54].mxu0 }
0x1a49   :  { %v12066_v52 = vpop.f32.mrb[55].mxu0  ;;  %v17944_v30 = vadd.f32 %v17862_v28, %v5058_v56 }
0x1a4c   :  { %v5063_v15 = vpop.f32.mrb[56].mxu0 }
0x1a4d   :  { %v12069_v53 = vpop.f32.mrb[57].mxu0  ;;  %v17947_v31 = vadd.f32 %v17868_v32, %v5063_v15 }
0x1a4f   :  { %20744 = vst [vmem:[#allocation35_spill] sm:$0xff] %v17947_v31 }
0x1a50   :  { %v5068_v37 = vpop.f32.mrb[58].mxu0 }
0x1a51   :  { %v12072_v58 = vpop.f32.mrb[59].mxu0  ;;  %v17950_v33 = vadd.f32 %v17874_v7, %v5068_v37 }
0x1a54   :  { %v5073_v22 = vpop.f32.mrb[60].mxu0 }
0x1a55   :  { %v12075_v16 = vpop.f32.mrb[61].mxu0  ;;  %v17953_v14 = vadd.f32 %v17880_v62, %v5073_v22 }
0x1a57   :  { %20745 = vst [vmem:[#allocation36_spill] sm:$0xff] %v17953_v14 }
0x1a58   :  { %v5078_v44 = vpop.f32.mrb[62].mxu0 }
0x1a59   :  { %v12078_v52 = vpop.f32.mrb[63].mxu0  ;;  %v17956_v28 = vadd.f32 %v17886_v3, %v5078_v44 }
0x1a5b   :  { %20746 = vst [vmem:[#allocation37_spill] sm:$0xff] %v17956_v28 }
0x1a5c   :  { %v5083_v56 = vpop.f32.mrb[64].mxu0 }
0x1a5d   :  { %v12081_v53 = vpop.f32.mrb[65].mxu0  ;;  %v17959_v32 = vadd.f32 %v17892_v20, %v5083_v56 }
0x1a60   :  { %v5088_v15 = vpop.f32.mrb[66].mxu0 }
0x1a61   :  { %v12084_v58 = vpop.f32.mrb[67].mxu0  ;;  %v17961_v31 = vadd.f32 %v5238_v43, %v5088_v15 }
0x1a64   :  { %v5093_v7 = vpop.f32.mrb[68].mxu0 }
0x1a65   :  { %v12087_v37 = vpop.f32.mrb[69].mxu0  ;;  %v17963_v16 = vadd.f32 %v5243_v11, %v5093_v7 }
0x1a68   :  { %v5098_v62 = vpop.f32.mrb[70].mxu0 }
0x1a69   :  { %v12090_v22 = vpop.f32.mrb[71].mxu0  ;;  %v17965_v14 = vadd.f32 %v5248_v4, %v5098_v62  ;;  %v9959_v4 = vld [vmem:[%s20451_s11 + $0x60] sm:$0xff] }
0x1a6c   :  { %v5103_v52 = vpop.f32.mrb[72].mxu0 }
0x1a6d   :  { %v12093_v3 = vpop.f32.mrb[73].mxu0  ;;  %v17967_v44 = vadd.f32 %v5253_v5, %v5103_v52  ;;  %v9960_v5 = vld [vmem:[%s20451_s11 + $0x68] sm:$0xff] }
0x1a6e   :  { %v13578_v62 = vpack.c.bf16 %v9960_v5, %v9959_v4 }
0x1a70   :  { %v5108_v53 = vpop.f32.mrb[74].mxu0  ;;  %13579 = vmatpush3.bf16.msra.mxu0 %v13578_v62 }
0x1a71   :  { %v12096_v28 = vpop.f32.mrb[75].mxu0  ;;  %v17969_v20 = vadd.f32 %v5258_v41, %v5108_v53  ;;  %v9961_v41 = vld [vmem:[%s20451_s11 + $0x70] sm:$0xff]  ;;  %13580 = vmatprep.subr.bf16.mxu0 %v20696_v38 }
0x1a74   :  { %v5113_v56 = vpop.f32.mrb[76].mxu0 }
0x1a75   :  { %v12099_v58 = vpop.f32.mrb[77].mxu0  ;;  %v17971_v43 = vadd.f32 %v5263_v50, %v5113_v56  ;;  %v9962_v50 = vld [vmem:[%s20451_s11 + $0x78] sm:$0xff] }
0x1a76   :  { %v13581_v22 = vpack.c.bf16 %v9962_v50, %v9961_v41 }
0x1a78   :  { %v5340_v15 = vpop.f32.mrb[78].mxu0  ;;  %13582 = vmatpush3.bf16.msra.mxu0 %v13581_v22 }
0x1a79   :  { %v12169_v37 = vpop.f32.mrb[79].mxu0  ;;  %13583 = vmatprep.subr.bf16.mxu0 %v20696_v38 }
0x1a7c   :  { %v5345_v11 = vpop.f32.mrb[80].mxu0 }
0x1a7d   :  { %v13554_v28 = vpack.c.bf16 %v5345_v11, %v5340_v15  ;;  %v12172_v7 = vpop.f32.mrb[81].mxu0 }
0x1a7f   :  { %13555 = vmatpush1.bf16.msra.mxu1 %v13554_v28 }
0x1a80   :  { %v5350_v52 = vpop.f32.mrb[82].mxu0  ;;  %13556 = vmatprep.subr.bf16.mxu1 %v20696_v38 }
0x1a81   :  { %v12175_v3 = vpop.f32.mrb[83].mxu0 }
0x1a84   :  { %v5355_v53 = vpop.f32.mrb[84].mxu0 }
0x1a85   :  { %v13557_v56 = vpack.c.bf16 %v5355_v53, %v5350_v52  ;;  %v12178_v58 = vpop.f32.mrb[85].mxu0 }
0x1a87   :  { %13558 = vmatpush1.bf16.msra.mxu1 %v13557_v56 }
0x1a88   :  { %v5360_v15 = vpop.f32.mrb[86].mxu0  ;;  %13559 = vmatprep.subr.bf16.mxu1 %v20696_v38 }
0x1a89   :  { %v12181_v37 = vpop.f32.mrb[87].mxu0 }
0x1a8c   :  { %v5365_v11 = vpop.f32.mrb[88].mxu0 }
0x1a8d   :  { %v13560_v4 = vpack.c.bf16 %v5365_v11, %v5360_v15  ;;  %v12184_v5 = vpop.f32.mrb[89].mxu0 }
0x1a8f   :  { %13561 = vmatpush1.bf16.msra.mxu1 %v13560_v4 }
0x1a90   :  { %v5370_v41 = vpop.f32.mrb[90].mxu0  ;;  %13562 = vmatprep.subr.bf16.mxu1 %v20696_v38 }
0x1a91   :  { %v12187_v28 = vpop.f32.mrb[91].mxu0 }
0x1a94   :  { %v5375_v7 = vpop.f32.mrb[92].mxu0 }
0x1a95   :  { %v13563_v62 = vpack.c.bf16 %v5375_v7, %v5370_v41  ;;  %v12190_v50 = vpop.f32.mrb[93].mxu0 }
0x1a97   :  { %13564 = vmatpush1.bf16.msra.mxu1 %v13563_v62 }
0x1a98   :  { %v5380_v22 = vpop.f32.mrb[94].mxu0  ;;  %13565 = vmatprep.subr.bf16.mxu1 %v20696_v38 }
0x1a99   :  { %v12193_v52 = vpop.f32.mrb[95].mxu0 }
0x1a9c   :  { %v5385_v3 = vpop.f32.mrb[96].mxu0 }
0x1a9d   :  { %v13566_v53 = vpack.c.bf16 %v5385_v3, %v5380_v22  ;;  %v12196_v56 = vpop.f32.mrb[97].mxu0 }
0x1a9f   :  { %13567 = vmatpush1.bf16.msra.mxu1 %v13566_v53 }
0x1aa0   :  { %v5390_v58 = vpop.f32.mrb[98].mxu0  ;;  %13568 = vmatprep.subr.bf16.mxu1 %v20696_v38 }
0x1aa1   :  { %v12199_v15 = vpop.f32.mrb[99].mxu0 }
0x1aa4   :  { %v5395_v37 = vpop.f32.mrb[100].mxu0 }
0x1aa5   :  { %v13569_v11 = vpack.c.bf16 %v5395_v37, %v5390_v58  ;;  %v12202_v4 = vpop.f32.mrb[101].mxu0 }
0x1aa7   :  { %13570 = vmatpush1.bf16.msra.mxu1 %v13569_v11 }
0x1aa8   :  { %v5400_v5 = vpop.f32.mrb[102].mxu0  ;;  %13571 = vmatprep.subr.bf16.mxu1 %v20696_v38 }
0x1aa9   :  { %v12205_v41 = vpop.f32.mrb[103].mxu0 }
0x1aac   :  { %v5405_v28 = vpop.f32.mrb[104].mxu0 }
0x1aad   :  { %v13572_v7 = vpack.c.bf16 %v5405_v28, %v5400_v5  ;;  %v12208_v62 = vpop.f32.mrb[105].mxu0 }
0x1aaf   :  { %13573 = vmatpush1.bf16.msra.mxu1 %v13572_v7 }
0x1ab0   :  { %v5410_v50 = vpop.f32.mrb[106].mxu0  ;;  %13574 = vmatprep.subr.bf16.mxu1 %v20696_v38 }
0x1ab1   :  { %v12211_v22 = vpop.f32.mrb[107].mxu0 }
0x1ab4   :  { %v5415_v52 = vpop.f32.mrb[108].mxu0 }
0x1ab5   :  { %v13575_v3 = vpack.c.bf16 %v5415_v52, %v5410_v50  ;;  %v12214_v53 = vpop.f32.mrb[109].mxu0 }
0x1ab7   :  { %13576 = vmatpush1.bf16.msra.mxu1 %v13575_v3 }
0x1ab8   :  { %v5420_v56 = vpop.f32.mrb[110].mxu0  ;;  %5465 = vmatprep.subr.mxu1 %v20646_v49 }
0x1ab9   :  { %v12217_v58 = vpop.f32.mrb[111].mxu0 }
0x1abb   :  { %9941 = vmatpush1.msk.msra.mxu1 %vm754_vm1, %v5420_v56 }
0x1abc   :  { %5498 = vmatmul.mubr.f32.vlgmr.msra.gmra.mrb[120].mxu1 %v17388_v19  ;;  %13586 = vmatprep.subr.bf16.mxu1 %v20696_v38  ;;  %v20747_v19 = vld [vmem:[#allocation19_spill] sm:$0xff] }
0x1abd   :  { %9943 = vmatprep.mubr.msk.f32.mxu1 %vm702_vm0, %v17395_v61  ;;  %v14084_v61 = vld [vmem:[%s20647_s16 + $0x8] sm:$0xff] }
0x1ac0   :  { %5503 = vmatmul.mubr.f32.gmra.mrb[122].mxu1 %v17403_v1  ;;  %v9963_v1 = vld [vmem:[%s20451_s11 + $0x80] sm:$0xff] }
0x1ac1   :  { %9944 = vmatprep.mubr.msk.f32.mxu1 %vm702_vm0, %v17415_v6  ;;  %v9964_v6 = vld [vmem:[%s20451_s11 + $0x88] sm:$0xff] }
0x1ac4   :  { %5508 = vmatmul.mubr.f32.gmra.mrb[124].mxu1 %v17423_v48  ;;  %v13584_v48 = vpack.c.bf16 %v9964_v6, %v9963_v1 }
0x1ac5   :  { %9945 = vmatprep.mubr.msk.f32.mxu1 %vm702_vm0, %v17430_v10  ;;  %v18060_v10 = vld [vmem:[%s20450_s10 + $0x2] ss:$0 sm:$0xff] }
0x1ac6   :  { %13585 = vmatpush3.bf16.msra.mxu0 %v13584_v48 }
0x1ac7   :  { %13610 = vmatprep.subr.bf16.mxu0 %v20696_v38 }
0x1ac8   :  { %5513 = vmatmul.mubr.f32.gmra.mrb[126].mxu1 %v17437_v36 }
0x1ac9   :  { %9946 = vmatprep.mubr.msk.f32.mxu1 %vm702_vm0, %v17443_v9 }
0x1acc   :  { %5518 = vmatmul.mubr.f32.gmra.mrb[128].mxu1 %v17450_v47 }
0x1acd   :  { %9947 = vmatprep.mubr.msk.f32.mxu1 %vm702_vm0, %v17456_v18 }
0x1ad0   :  { %5523 = vmatmul.mubr.f32.gmra.mrb[130].mxu1 %v17463_v55 }
0x1ad1   :  { %9948 = vmatprep.mubr.msk.f32.mxu1 %vm702_vm0, %v17469_v23 }
0x1ad4   :  { %5528 = vmatmul.mubr.f32.gmra.mrb[132].mxu1 %v17476_v39 }
0x1ad5   :  { %9949 = vmatprep.mubr.msk.f32.mxu1 %vm702_vm0, %v17482_v40 }
0x1ad8   :  { %5533 = vmatmul.mubr.f32.gmra.mrb[134].mxu1 %v17489_v13 }
0x1ad9   :  { %9950 = vmatprep.mubr.msk.f32.mxu1 %vm702_vm0, %v17495_v59 }
0x1adc   :  { %5538 = vmatmul.mubr.f32.gmra.mrb[136].mxu1 %v17502_v63 }
0x1add   :  { %9951 = vmatprep.mubr.msk.f32.mxu1 %vm702_vm0, %v17508_v17 }
0x1ae0   :  { %5543 = vmatmul.mubr.f32.gmra.mrb[138].mxu1 %v17515_v2 }
0x1ae1   :  { %9952 = vmatprep.mubr.msk.f32.mxu1 %vm702_vm0, %v17521_v51 }
0x1ae4   :  { %5548 = vmatmul.mubr.f32.gmra.mrb[140].mxu1 %v17528_v24 }
0x1ae5   :  { %9953 = vmatprep.mubr.msk.f32.mxu1 %vm702_vm0, %v17534_v8 }
0x1ae8   :  { %5553 = vmatmul.mubr.f32.gmra.mrb[142].mxu1 %v17541_v34 }
0x1ae9   :  { %9954 = vmatprep.mubr.msk.f32.mxu1 %vm702_vm0, %v17547_v42 }
0x1aec   :  { %5558 = vmatmul.mubr.f32.gmra.mrb[144].mxu1 %v17554_v29 }
0x1aed   :  { %9955 = vmatprep.mubr.msk.f32.mxu1 %vm702_vm0, %v17560_v21 }
0x1af0   :  { %5563 = vmatmul.mubr.f32.gmra.mrb[146].mxu1 %v17567_v25 }
0x1af1   :  { %9956 = vmatprep.mubr.msk.f32.mxu1 %vm702_vm0, %v17573_v60 }
0x1af4   :  { %5568 = vmatmul.mubr.f32.gmra.mrb[148].mxu1 %v17580_v54 }
0x1af5   :  { %9957 = vmatprep.mubr.msk.f32.mxu1 %vm702_vm0, %v17586_v57 }
0x1af8   :  { %5573 = vmatmul.mubr.f32.gmra.mrb[150].mxu1 %v17593_v27 }
0x1af9   :  { %9958 = vmatprep.mubr.msk.f32.mxu1 %vm702_vm0, %v17599_v12 }
0x1afc   :  { %5578 = vmatmul.mubr.f32.gmra.mrb[152].mxu1 %v20747_v19 }
0x1afd   :  { %9984 = vmatprep.mubr.msk.f32.mxu1 %vm702_vm0, %v14084_v61 }
0x1b8f   :  { %v5499_v36 = vpop.f32.mrb[120].mxu1 }
0x1b90   :  { %v18063_v9 = vadd.f32 %v18060_v10, %v5499_v36  ;;  %v5501_v47 = vpop.f32.mrb[121].mxu1 }
0x1b92   :  { %v20583_v18 = vmax.f32 %v18063_v9, 0.0 }
0x1b93   :  { %v5504_v55 = vpop.f32.mrb[122].mxu1 }
0x1b94   :  { %v18067_v23 = vadd.f32 %v18060_v10, %v5504_v55  ;;  %v5506_v39 = vpop.f32.mrb[123].mxu1  ;;  %12231 = vmatmul.mubr.msk.f32.vlgmr.msra.gmra.mrb[112].mxu0 %vm1315_vm4, %v20583_v18 }
0x1b95   :  { %12233 = vmatprep.mubr.msk.f32.mxu0 %vm14447_vm2, %v20646_v49 }
0x1b96   :  { %v20582_v40 = vmax.f32 %v18067_v23, 0.0 }
0x1b97   :  { %v5509_v13 = vpop.f32.mrb[124].mxu1 }
0x1b98   :  { %v18076_v59 = vadd.f32 %v18060_v10, %v5509_v13  ;;  %v5511_v63 = vpop.f32.mrb[125].mxu1  ;;  %12234 = vmatmul.mubr.msk.f32.gmra.mrb[114].mxu0 %vm1315_vm4, %v20582_v40 }
0x1b99   :  { %12236 = vmatprep.mubr.msk.f32.mxu0 %vm14447_vm2, %v20646_v49 }
0x1b9a   :  { %v20581_v17 = vmax.f32 %v18076_v59, 0.0 }
0x1b9b   :  { %v5514_v2 = vpop.f32.mrb[126].mxu1 }
0x1b9c   :  { %v18085_v51 = vadd.f32 %v18060_v10, %v5514_v2  ;;  %v5516_v24 = vpop.f32.mrb[127].mxu1  ;;  %12237 = vmatmul.mubr.msk.f32.gmra.mrb[116].mxu0 %vm1315_vm4, %v20581_v17 }
0x1b9d   :  { %12239 = vmatprep.mubr.msk.f32.mxu0 %vm14447_vm2, %v20646_v49 }
0x1b9e   :  { %v20580_v8 = vmax.f32 %v18085_v51, 0.0 }
0x1b9f   :  { %v5519_v34 = vpop.f32.mrb[128].mxu1 }
0x1ba0   :  { %v18094_v42 = vadd.f32 %v18060_v10, %v5519_v34  ;;  %v5521_v29 = vpop.f32.mrb[129].mxu1  ;;  %12240 = vmatmul.mubr.msk.f32.gmra.mrb[118].mxu0 %vm1315_vm4, %v20580_v8 }
0x1ba1   :  { %12242 = vmatprep.mubr.msk.f32.mxu0 %vm14447_vm2, %v20646_v49 }
0x1ba2   :  { %v20579_v21 = vmax.f32 %v18094_v42, 0.0 }
0x1ba3   :  { %v5524_v25 = vpop.f32.mrb[130].mxu1 }
0x1ba4   :  { %v18103_v60 = vadd.f32 %v18060_v10, %v5524_v25  ;;  %v5526_v54 = vpop.f32.mrb[131].mxu1  ;;  %12243 = vmatmul.mubr.msk.f32.gmra.mrb[120].mxu0 %vm1315_vm4, %v20579_v21 }
0x1ba5   :  { %12245 = vmatprep.mubr.msk.f32.mxu0 %vm14447_vm2, %v20646_v49 }
0x1ba6   :  { %v20578_v57 = vmax.f32 %v18103_v60, 0.0 }
0x1ba7   :  { %v5529_v27 = vpop.f32.mrb[132].mxu1 }
0x1ba8   :  { %v18112_v12 = vadd.f32 %v18060_v10, %v5529_v27  ;;  %v5531_v15 = vpop.f32.mrb[133].mxu1  ;;  %12246 = vmatmul.mubr.msk.f32.gmra.mrb[122].mxu0 %vm1315_vm4, %v20578_v57 }
0x1ba9   :  { %12248 = vmatprep.mubr.msk.f32.mxu0 %vm14447_vm2, %v20646_v49 }
0x1baa   :  { %v20577_v37 = vmax.f32 %v18112_v12, 0.0 }
0x1bab   :  { %v5534_v11 = vpop.f32.mrb[134].mxu1 }
0x1bac   :  { %v18121_v4 = vadd.f32 %v18060_v10, %v5534_v11  ;;  %v5536_v5 = vpop.f32.mrb[135].mxu1  ;;  %12249 = vmatmul.mubr.msk.f32.gmra.mrb[124].mxu0 %vm1315_vm4, %v20577_v37 }
0x1bad   :  { %12251 = vmatprep.mubr.msk.f32.mxu0 %vm14447_vm2, %v20646_v49 }
0x1bae   :  { %v20576_v41 = vmax.f32 %v18121_v4, 0.0 }
0x1baf   :  { %v5539_v28 = vpop.f32.mrb[136].mxu1 }
0x1bb0   :  { %v18130_v7 = vadd.f32 %v18060_v10, %v5539_v28  ;;  %v5541_v62 = vpop.f32.mrb[137].mxu1  ;;  %12252 = vmatmul.mubr.msk.f32.gmra.mrb[126].mxu0 %vm1315_vm4, %v20576_v41 }
0x1bb1   :  { %12254 = vmatprep.mubr.msk.f32.mxu0 %vm14447_vm2, %v20646_v49 }
0x1bb2   :  { %v20575_v50 = vmax.f32 %v18130_v7, 0.0 }
0x1bb3   :  { %v5544_v22 = vpop.f32.mrb[138].mxu1 }
0x1bb4   :  { %v18139_v52 = vadd.f32 %v18060_v10, %v5544_v22  ;;  %v5546_v3 = vpop.f32.mrb[139].mxu1  ;;  %12255 = vmatmul.mubr.msk.f32.gmra.mrb[128].mxu0 %vm1315_vm4, %v20575_v50 }
0x1bb5   :  { %12257 = vmatprep.mubr.msk.f32.mxu0 %vm14447_vm2, %v20646_v49 }
0x1bb6   :  { %v20574_v53 = vmax.f32 %v18139_v52, 0.0 }
0x1bb7   :  { %v5549_v56 = vpop.f32.mrb[140].mxu1 }
0x1bb8   :  { %v18148_v58 = vadd.f32 %v18060_v10, %v5549_v56  ;;  %v5551_v19 = vpop.f32.mrb[141].mxu1  ;;  %12258 = vmatmul.mubr.msk.f32.gmra.mrb[130].mxu0 %vm1315_vm4, %v20574_v53 }
0x1bb9   :  { %12260 = vmatprep.mubr.msk.f32.mxu0 %vm14447_vm2, %v20646_v49  ;;  %v9994_v19 = vld [vmem:[%s20453_s13 + $0x88] sm:$0xff] }
0x1bba   :  { %v20573_v61 = vmax.f32 %v18148_v58, 0.0 }
0x1bbb   :  { %v5554_v1 = vpop.f32.mrb[142].mxu1 }
0x1bbc   :  { %v18157_v6 = vadd.f32 %v18060_v10, %v5554_v1  ;;  %v5556_v48 = vpop.f32.mrb[143].mxu1  ;;  %12261 = vmatmul.mubr.msk.f32.gmra.mrb[132].mxu0 %vm1315_vm4, %v20573_v61  ;;  %v9995_v1 = vld [vmem:[%s20453_s13 + $0x90] sm:$0xff] }
0x1bbd   :  { %12263 = vmatprep.mubr.msk.f32.mxu0 %vm14447_vm2, %v20646_v49 }
0x1bbe   :  { %v20572_v36 = vmax.f32 %v18157_v6, 0.0 }
0x1bbf   :  { %v5559_v47 = vpop.f32.mrb[144].mxu1 }
0x1bc0   :  { %v18166_v55 = vadd.f32 %v18060_v10, %v5559_v47  ;;  %v5561_v39 = vpop.f32.mrb[145].mxu1  ;;  %12264 = vmatmul.mubr.msk.f32.gmra.mrb[134].mxu0 %vm1315_vm4, %v20572_v36  ;;  %v9996_v47 = vld [vmem:[%s20453_s13 + $0x98] sm:$0xff] }
0x1bc1   :  { %12266 = vmatprep.mubr.msk.f32.mxu0 %vm14447_vm2, %v20646_v49  ;;  %v13614_v39 = vpack.c.bf16 %v9996_v47, %v9995_v1 }
0x1bc2   :  { %v20571_v13 = vmax.f32 %v18166_v55, 0.0 }
0x1bc3   :  { %v5564_v63 = vpop.f32.mrb[146].mxu1 }
0x1bc4   :  { %v18175_v2 = vadd.f32 %v18060_v10, %v5564_v63  ;;  %v5566_v24 = vpop.f32.mrb[147].mxu1  ;;  %12267 = vmatmul.mubr.msk.f32.gmra.mrb[136].mxu0 %vm1315_vm4, %v20571_v13  ;;  %v9997_v63 = vld [vmem:[%s20453_s13 + $0xa0] sm:$0xff] }
0x1bc5   :  { %12269 = vmatprep.mubr.msk.f32.mxu0 %vm14447_vm2, %v20646_v49  ;;  %v9998_v24 = vld [vmem:[%s20453_s13 + $0xa8] sm:$0xff] }
0x1bc6   :  { %v20570_v34 = vmax.f32 %v18175_v2, 0.0 }
0x1bc7   :  { %v5569_v29 = vpop.f32.mrb[148].mxu1 }
0x1bc8   :  { %v18184_v25 = vadd.f32 %v18060_v10, %v5569_v29  ;;  %v5571_v54 = vpop.f32.mrb[149].mxu1  ;;  %12270 = vmatmul.mubr.msk.f32.gmra.mrb[138].mxu0 %vm1315_vm4, %v20570_v34  ;;  %v13617_v29 = vpack.c.bf16 %v9998_v24, %v9997_v63 }
0x1bc9   :  { %12272 = vmatprep.mubr.msk.f32.mxu0 %vm14447_vm2, %v20646_v49 }
0x1bca   :  { %v20569_v27 = vmax.f32 %v18184_v25, 0.0 }
0x1bcb   :  { %v5574_v15 = vpop.f32.mrb[150].mxu1 }
0x1bcc   :  { %v18193_v11 = vadd.f32 %v18060_v10, %v5574_v15  ;;  %v5576_v5 = vpop.f32.mrb[151].mxu1  ;;  %12273 = vmatmul.mubr.msk.f32.gmra.mrb[140].mxu0 %vm1315_vm4, %v20569_v27 }
0x1bcd   :  { %12275 = vmatprep.mubr.msk.f32.mxu0 %vm14447_vm2, %v20646_v49 }
0x1bce   :  { %v20568_v28 = vmax.f32 %v18193_v11, 0.0 }
0x1bcf   :  { %v5579_v62 = vpop.f32.mrb[152].mxu1 }
0x1bd0   :  { %v18202_v22 = vadd.f32 %v18060_v10, %v5579_v62  ;;  %12276 = vmatmul.mubr.msk.f32.gmra.mrb[142].mxu0 %vm1315_vm4, %v20568_v28  ;;  %v5581_v3 = vpop.f32.mrb[153].mxu1  ;;  %v9993_v10 = vld [vmem:[%s20453_s13 + $0x80] sm:$0xff] }
0x1bd1   :  { %12278 = vmatprep.mubr.msk.f32.mxu0 %vm14447_vm2, %v20646_v49  ;;  %v13611_v48 = vpack.c.bf16 %v9994_v19, %v9993_v10 }
0x1bd2   :  { %v20567_v56 = vmax.f32 %v18202_v22, 0.0 }
0x1bd3   :  { %13612 = vmatpush3.bf16.msra.mxu0 %v13611_v48 }
0x1bd4   :  { %12279 = vmatmul.mubr.msk.f32.gmra.mrb[144].mxu0 %vm1315_vm4, %v20567_v56  ;;  %13613 = vmatprep.subr.bf16.mxu0 %v20696_v38 }
0x1bd5   :  { %12297 = vmatprep.mubr.msk.f32.mxu0 %vm14447_vm2, %v20646_v49 }
0x1bd7   :  { %13615 = vmatpush3.bf16.msra.mxu0 %v13614_v39 }
0x1bd8   :  { %13616 = vmatprep.subr.bf16.mxu0 %v20696_v38 }
0x1bdb   :  { %13618 = vmatpush3.bf16.msra.mxu0 %v13617_v29 }
0x1bdc   :  { %13619 = vmatprep.subr.bf16.mxu0 %v20696_v38 }
0x1c67   :  { %v5726_v54 = vpop.f32.mrb[112].mxu0 }
0x1c68   :  { %v12232_v15 = vpop.f32.mrb[113].mxu0 }
0x1c6b   :  { %v5731_v5 = vpop.f32.mrb[114].mxu0 }
0x1c6c   :  { %v13587_v62 = vpack.c.bf16 %v5731_v5, %v5726_v54  ;;  %v12235_v3 = vpop.f32.mrb[115].mxu0 }
0x1c6e   :  { %13588 = vmatpush1.bf16.msra.mxu1 %v13587_v62 }
0x1c6f   :  { %v5736_v10 = vpop.f32.mrb[116].mxu0  ;;  %13589 = vmatprep.subr.bf16.mxu1 %v20696_v38 }
0x1c70   :  { %v12238_v19 = vpop.f32.mrb[117].mxu0 }
0x1c73   :  { %v5741_v1 = vpop.f32.mrb[118].mxu0 }
0x1c74   :  { %v13590_v48 = vpack.c.bf16 %v5741_v1, %v5736_v10  ;;  %v12241_v47 = vpop.f32.mrb[119].mxu0 }
0x1c76   :  { %13591 = vmatpush1.bf16.msra.mxu1 %v13590_v48 }
0x1c77   :  { %v5746_v39 = vpop.f32.mrb[120].mxu0  ;;  %13592 = vmatprep.subr.bf16.mxu1 %v20696_v38 }
0x1c78   :  { %v12244_v63 = vpop.f32.mrb[121].mxu0 }
0x1c7b   :  { %v5751_v24 = vpop.f32.mrb[122].mxu0 }
0x1c7c   :  { %v13593_v29 = vpack.c.bf16 %v5751_v24, %v5746_v39  ;;  %v12247_v56 = vpop.f32.mrb[123].mxu0 }
0x1c7e   :  { %13594 = vmatpush1.bf16.msra.mxu1 %v13593_v29 }
0x1c7f   :  { %v5756_v15 = vpop.f32.mrb[124].mxu0  ;;  %13595 = vmatprep.subr.bf16.mxu1 %v20696_v38 }
0x1c80   :  { %v12250_v54 = vpop.f32.mrb[125].mxu0 }
0x1c83   :  { %v5761_v5 = vpop.f32.mrb[126].mxu0 }
0x1c84   :  { %v13596_v62 = vpack.c.bf16 %v5761_v5, %v5756_v15  ;;  %v12253_v3 = vpop.f32.mrb[127].mxu0 }
0x1c86   :  { %13597 = vmatpush1.bf16.msra.mxu1 %v13596_v62 }
0x1c87   :  { %v5766_v19 = vpop.f32.mrb[128].mxu0  ;;  %13598 = vmatprep.subr.bf16.mxu1 %v20696_v38 }
0x1c88   :  { %v12256_v10 = vpop.f32.mrb[129].mxu0 }
0x1c8b   :  { %v5771_v1 = vpop.f32.mrb[130].mxu0 }
0x1c8c   :  { %v13599_v48 = vpack.c.bf16 %v5771_v1, %v5766_v19  ;;  %v12259_v47 = vpop.f32.mrb[131].mxu0 }
0x1c8e   :  { %13600 = vmatpush1.bf16.msra.mxu1 %v13599_v48 }
0x1c8f   :  { %v5776_v63 = vpop.f32.mrb[132].mxu0  ;;  %13601 = vmatprep.subr.bf16.mxu1 %v20696_v38 }
0x1c90   :  { %v12262_v56 = vpop.f32.mrb[133].mxu0 }
0x1c93   :  { %v5781_v39 = vpop.f32.mrb[134].mxu0 }
0x1c94   :  { %v13602_v24 = vpack.c.bf16 %v5781_v39, %v5776_v63  ;;  %v12265_v29 = vpop.f32.mrb[135].mxu0  ;;  %v14085_v39 = vld [vmem:[%s20647_s16] sm:$0xff] }
0x1c95   :  { %v14087_v29 = vld [vmem:[%s20647_s16 + $0x10] sm:$0xff] }
0x1c96   :  { %13603 = vmatpush1.bf16.msra.mxu1 %v13602_v24  ;;  %v14086_v24 = vld [vmem:[%s20647_s16 + $0x18] sm:$0xff] }
0x1c97   :  { %v5786_v54 = vpop.f32.mrb[136].mxu0  ;;  %13604 = vmatprep.subr.bf16.mxu1 %v20696_v38 }
0x1c98   :  { %v12268_v15 = vpop.f32.mrb[137].mxu0 }
0x1c99   :  { %v14089_v15 = vld [vmem:[%s20647_s16 + $0x20] sm:$0xff] }
0x1c9b   :  { %v5791_v5 = vpop.f32.mrb[138].mxu0 }
0x1c9c   :  { %v13605_v62 = vpack.c.bf16 %v5791_v5, %v5786_v54  ;;  %v12271_v3 = vpop.f32.mrb[139].mxu0  ;;  %v14088_v54 = vld [vmem:[%s20647_s16 + $0x28] sm:$0xff]  ;;  %v14090_v5 = vld [vmem:[%s20647_s16 + $0x38] sm:$0xff] }
0x1c9d   :  { %v14092_v3 = vld [vmem:[%s20647_s16 + $0x48] sm:$0xff] }
0x1c9e   :  { %13606 = vmatpush1.bf16.msra.mxu1 %v13605_v62  ;;  %v14091_v62 = vld [vmem:[%s20647_s16 + $0x30] sm:$0xff] }
0x1c9f   :  { %v5796_v10 = vpop.f32.mrb[140].mxu0  ;;  %13607 = vmatprep.subr.bf16.mxu1 %v20696_v38 }
0x1ca0   :  { %v12274_v19 = vpop.f32.mrb[141].mxu0 }
0x1ca1   :  { %v14094_v19 = vld [vmem:[%s20647_s16 + $0x58] sm:$0xff] }
0x1ca3   :  { %v5801_v1 = vpop.f32.mrb[142].mxu0 }
0x1ca4   :  { %v13608_v48 = vpack.c.bf16 %v5801_v1, %v5796_v10  ;;  %v12277_v47 = vpop.f32.mrb[143].mxu0  ;;  %v14093_v10 = vld [vmem:[%s20647_s16 + $0x40] sm:$0xff]  ;;  %v14095_v1 = vld [vmem:[%s20647_s16 + $0x50] sm:$0xff] }
0x1ca5   :  { %v14097_v47 = vld [vmem:[%s20647_s16 + $0x60] sm:$0xff] }
0x1ca6   :  { %13609 = vmatpush1.bf16.msra.mxu1 %v13608_v48  ;;  %v14096_v48 = vld [vmem:[%s20647_s16 + $0x68] sm:$0xff] }
0x1ca7   :  { %v5806_v56 = vpop.f32.mrb[144].mxu0  ;;  %5851 = vmatprep.subr.mxu1 %v20646_v49 }
0x1ca8   :  { %v12280_v63 = vpop.f32.mrb[145].mxu0 }
0x1ca9   :  { %v14099_v63 = vld [vmem:[%s20647_s16 + $0x70] sm:$0xff] }
0x1caa   :  { %9983 = vmatpush1.msk.msra.mxu1 %vm754_vm1, %v5806_v56  ;;  %v14098_v56 = vld [vmem:[%s20647_s16 + $0x78] sm:$0xff] }
0x1cab   :  { %5884 = vmatmul.mubr.f32.vlgmr.msra.gmra.mrb[154].mxu1 %v14085_v39  ;;  %13622 = vmatprep.subr.bf16.mxu1 %v20696_v38  ;;  %v14100_v39 = vld [vmem:[%s20647_s16 + $0x88] sm:$0xf] }
0x1cac   :  { %9985 = vmatprep.mubr.msk.f32.mxu1 %vm702_vm0, %v14086_v24  ;;  %v14101_v24 = vld [vmem:[%s20647_s16 + $0x80] sm:$0xf] }
0x1caf   :  { %5889 = vmatmul.mubr.f32.gmra.mrb[156].mxu1 %v14087_v29  ;;  %v9999_v29 = vld [vmem:[%s20453_s13 + $0xb0] sm:$0xff] }
0x1cb0   :  { %9986 = vmatprep.mubr.msk.f32.mxu1 %vm702_vm0, %v14088_v54  ;;  %v10000_v54 = vld [vmem:[%s20453_s13 + $0xb8] sm:$0xff] }
0x1cb3   :  { %5894 = vmatmul.mubr.f32.gmra.mrb[158].mxu1 %v14089_v15  ;;  %v13620_v15 = vpack.c.bf16 %v10000_v54, %v9999_v29 }
0x1cb4   :  { %9987 = vmatprep.mubr.msk.f32.mxu1 %vm702_vm0, %v14090_v5  ;;  %v9982_v5 = vld [vmem:[#allocation6 + $0x2] ss:$0 sm:$0xff] }
0x1cb5   :  { %13621 = vmatpush3.bf16.msra.mxu0 %v13620_v15 }
0x1cb6   :  { %13640 = vmatprep.subr.bf16.mxu0 %v20696_v38 }
0x1cb7   :  { %5899 = vmatmul.mubr.f32.gmra.mrb[160].mxu1 %v14091_v62 }
0x1cb8   :  { %9988 = vmatprep.mubr.msk.f32.mxu1 %vm702_vm0, %v14092_v3 }
0x1cbb   :  { %5904 = vmatmul.mubr.f32.gmra.mrb[162].mxu1 %v14093_v10 }
0x1cbc   :  { %9989 = vmatprep.mubr.msk.f32.mxu1 %vm702_vm0, %v14094_v19 }
0x1cbf   :  { %5909 = vmatmul.mubr.f32.gmra.mrb[164].mxu1 %v14095_v1 }
0x1cc0   :  { %9990 = vmatprep.mubr.msk.f32.mxu1 %vm702_vm0, %v14096_v48 }
0x1cc3   :  { %5914 = vmatmul.mubr.f32.gmra.mrb[166].mxu1 %v14097_v47 }
0x1cc4   :  { %9991 = vmatprep.mubr.msk.f32.mxu1 %vm702_vm0, %v14098_v56 }
0x1cc7   :  { %5919 = vmatmul.mubr.f32.gmra.mrb[168].mxu1 %v14099_v63 }
0x1cc8   :  { %9992 = vmatprep.mubr.msk.f32.mxu1 %vm702_vm0, %v14100_v39 }
0x1ccb   :  { %5924 = vmatmul.mubr.f32.gmra.mrb[170].mxu1 %v14101_v24 }
0x1ccc   :  { %12342 = vmatprep.mubr.msk.f32.mxu1 %vm14447_vm2, %v20646_v49 }
0x1d7e   :  { %v5885_v62 = vpop.f32.mrb[154].mxu1 }
0x1d7f   :  { %v18314_v3 = vadd.f32 %v9982_v5, %v5885_v62  ;;  %v5887_v10 = vpop.f32.mrb[155].mxu1 }
0x1d81   :  { %v5929_v19 = vmax.f32 %v18314_v3, 0.0 }
0x1d82   :  { %v5890_v1 = vpop.f32.mrb[156].mxu1 }
0x1d83   :  { %v18317_v48 = vadd.f32 %v9982_v5, %v5890_v1  ;;  %v5892_v47 = vpop.f32.mrb[157].mxu1  ;;  %12298 = vmatmul.mubr.msk.f32.vlgmr.msra.gmra.mrb[146].mxu0 %vm1681_vm5, %v5929_v19 }
0x1d84   :  { %12300 = vmatprep.mubr.msk.f32.mxu0 %vm14447_vm2, %v20646_v49 }
0x1d85   :  { %v5930_v56 = vmax.f32 %v18317_v48, 0.0 }
0x1d86   :  { %v5895_v63 = vpop.f32.mrb[158].mxu1 }
0x1d87   :  { %v18325_v39 = vadd.f32 %v9982_v5, %v5895_v63  ;;  %v5897_v24 = vpop.f32.mrb[159].mxu1  ;;  %12301 = vmatmul.mubr.msk.f32.gmra.mrb[148].mxu0 %vm1681_vm5, %v5930_v56 }
0x1d88   :  { %12303 = vmatprep.mubr.msk.f32.mxu0 %vm14447_vm2, %v20646_v49 }
0x1d89   :  { %v20590_v29 = vmax.f32 %v18325_v39, 0.0  ;;  %v20748_v3 = vmax.f32 %v18325_v39, 0.0 }
0x1d8a   :  { %v5900_v54 = vpop.f32.mrb[160].mxu1 }
0x1d8b   :  { %v18333_v15 = vadd.f32 %v9982_v5, %v5900_v54  ;;  %v5902_v62 = vpop.f32.mrb[161].mxu1  ;;  %12304 = vmatmul.mubr.msk.f32.gmra.mrb[150].mxu0 %vm1681_vm5, %v20590_v29 }
0x1d8c   :  { %12306 = vmatprep.mubr.msk.f32.mxu0 %vm14447_vm2, %v20646_v49 }
0x1d8d   :  { %v20589_v10 = vmax.f32 %v18333_v15, 0.0  ;;  %v20749_v48 = vmax.f32 %v18333_v15, 0.0 }
0x1d8e   :  { %v5905_v1 = vpop.f32.mrb[162].mxu1 }
0x1d8f   :  { %v18341_v47 = vadd.f32 %v9982_v5, %v5905_v1  ;;  %v5907_v63 = vpop.f32.mrb[163].mxu1  ;;  %12307 = vmatmul.mubr.msk.f32.gmra.mrb[152].mxu0 %vm1681_vm5, %v20589_v10 }
0x1d90   :  { %12309 = vmatprep.mubr.msk.f32.mxu0 %vm14447_vm2, %v20646_v49 }
0x1d91   :  { %v20588_v24 = vmax.f32 %v18341_v47, 0.0  ;;  %v20750_v39 = vmax.f32 %v18341_v47, 0.0 }
0x1d92   :  { %v5910_v54 = vpop.f32.mrb[164].mxu1 }
0x1d93   :  { %v18349_v62 = vadd.f32 %v9982_v5, %v5910_v54  ;;  %v5912_v28 = vpop.f32.mrb[165].mxu1  ;;  %12310 = vmatmul.mubr.msk.f32.gmra.mrb[154].mxu0 %vm1681_vm5, %v20588_v24 }
0x1d94   :  { %12312 = vmatprep.mubr.msk.f32.mxu0 %vm14447_vm2, %v20646_v49 }
0x1d95   :  { %v20587_v1 = vmax.f32 %v18349_v62, 0.0  ;;  %v20751_v15 = vmax.f32 %v18349_v62, 0.0 }
0x1d96   :  { %v5915_v63 = vpop.f32.mrb[166].mxu1 }
0x1d97   :  { %v18357_v27 = vadd.f32 %v9982_v5, %v5915_v63  ;;  %v5917_v34 = vpop.f32.mrb[167].mxu1  ;;  %12313 = vmatmul.mubr.msk.f32.gmra.mrb[156].mxu0 %vm1681_vm5, %v20587_v1 }
0x1d98   :  { %12315 = vmatprep.mubr.msk.f32.mxu0 %vm14447_vm2, %v20646_v49 }
0x1d99   :  { %v20586_v28 = vmax.f32 %v18357_v27, 0.0  ;;  %v20752_v47 = vmax.f32 %v18357_v27, 0.0 }
0x1d9a   :  { %v5920_v54 = vpop.f32.mrb[168].mxu1 }
0x1d9b   :  { %v18365_v13 = vadd.f32 %v9982_v5, %v5920_v54  ;;  %v5922_v36 = vpop.f32.mrb[169].mxu1  ;;  %12316 = vmatmul.mubr.msk.f32.gmra.mrb[158].mxu0 %vm1681_vm5, %v20586_v28 }
0x1d9c   :  { %12318 = vmatprep.mubr.msk.f32.mxu0 %vm14447_vm2, %v20646_v49 }
0x1d9d   :  { %v20585_v34 = vmax.f32 %v18365_v13, 0.0  ;;  %v20753_v62 = vmax.f32 %v18365_v13, 0.0 }
0x1d9e   :  { %v5925_v63 = vpop.f32.mrb[170].mxu1 }
0x1d9f   :  { %v18373_v61 = vadd.f32 %v9982_v5, %v5925_v63  ;;  %12319 = vmatmul.mubr.msk.f32.gmra.mrb[160].mxu0 %vm1681_vm5, %v20585_v34  ;;  %v5927_v53 = vpop.f32.mrb[171].mxu1 }
0x1da0   :  { %12321 = vmatprep.mubr.msk.f32.mxu0 %vm14447_vm2, %v20646_v49 }
0x1da1   :  { %v20584_v36 = vmax.f32 %v18373_v61, 0.0  ;;  %v20754_v27 = vmax.f32 %v18373_v61, 0.0 }
0x1da3   :  { %12322 = vmatmul.mubr.msk.f32.gmra.mrb[162].mxu0 %vm1681_vm5, %v20584_v36 }
0x1da4   :  { %12410 = vmatprep.mubr.msk.f32.mxu0 %vm14447_vm2, %v20646_v49 }
0x1e56   :  { %v6042_v54 = vpop.f32.mrb[146].mxu0 }
0x1e57   :  { %v12299_v5 = vpop.f32.mrb[147].mxu0 }
0x1e5a   :  { %v6047_v63 = vpop.f32.mrb[148].mxu0 }
0x1e5b   :  { %v13623_v50 = vpack.c.bf16 %v6047_v63, %v6042_v54  ;;  %v12302_v41 = vpop.f32.mrb[149].mxu0 }
0x1e5d   :  { %13624 = vmatpush3.bf16.msra.mxu1 %v13623_v50 }
0x1e5e   :  { %v6052_v37 = vpop.f32.mrb[150].mxu0  ;;  %13625 = vmatprep.subr.bf16.mxu1 %v20696_v38 }
0x1e5f   :  { %v12305_v53 = vpop.f32.mrb[151].mxu0 }
0x1e62   :  { %v6057_v57 = vpop.f32.mrb[152].mxu0 }
0x1e63   :  { %v13626_v21 = vpack.c.bf16 %v6057_v57, %v6052_v37  ;;  %v12308_v8 = vpop.f32.mrb[153].mxu0  ;;  %v14106_v57 = vld [vmem:[#allocation4 + $0x20] sm:$0x3]  ;;  %v10027_v37 = vld [vmem:[%s20455_s15 + $0x80] sm:$0xff] }
0x1e65   :  { %13627 = vmatpush3.bf16.msra.mxu1 %v13626_v21  ;;  %v14102_v21 = vld [vmem:[#allocation4] sm:$0xff] }
0x1e66   :  { %v6062_v17 = vpop.f32.mrb[154].mxu0  ;;  %13628 = vmatprep.subr.bf16.mxu1 %v20696_v38 }
0x1e67   :  { %v12311_v40 = vpop.f32.mrb[155].mxu0 }
0x1e68   :  { %v14104_v40 = vld [vmem:[#allocation4 + $0x10] sm:$0xff] }
0x1e6a   :  { %v6067_v18 = vpop.f32.mrb[156].mxu0 }
0x1e6b   :  { %v13629_v36 = vpack.c.bf16 %v6067_v18, %v6062_v17  ;;  %v12314_v34 = vpop.f32.mrb[157].mxu0  ;;  %v14103_v18 = vld [vmem:[#allocation4 + $0x8] sm:$0xff]  ;;  %v14105_v17 = vld [vmem:[#allocation4 + $0x18] sm:$0xff] }
0x1e6c   :  { %v10028_v34 = vld [vmem:[%s20455_s15 + $0x88] sm:$0xff] }
0x1e6d   :  { %13630 = vmatpush3.bf16.msra.mxu1 %v13629_v36  ;;  %v10029_v36 = vld [vmem:[%s20455_s15 + $0x90] sm:$0xff] }
0x1e6e   :  { %v6072_v5 = vpop.f32.mrb[158].mxu0  ;;  %13631 = vmatprep.subr.bf16.mxu1 %v20696_v38 }
0x1e6f   :  { %v12317_v41 = vpop.f32.mrb[159].mxu0 }
0x1e70   :  { %v10030_v41 = vld [vmem:[%s20455_s15 + $0x98] sm:$0xff] }
0x1e72   :  { %v6077_v50 = vpop.f32.mrb[160].mxu0 }
0x1e73   :  { %v13632_v54 = vpack.c.bf16 %v6077_v50, %v6072_v5  ;;  %v12320_v63 = vpop.f32.mrb[161].mxu0  ;;  %v13641_v5 = vpack.c.bf16 %v10028_v34, %v10027_v37  ;;  %v13644_v50 = vpack.c.bf16 %v10030_v41, %v10029_v36 }
0x1e74   :  { %v10032_v63 = vld [vmem:[%s20455_s15 + $0xa8] sm:$0xff] }
0x1e75   :  { %13633 = vmatpush3.bf16.msra.mxu1 %v13632_v54  ;;  %13642 = vmatpush3.bf16.msra.mxu0 %v13641_v5  ;;  %v10031_v54 = vld [vmem:[%s20455_s15 + $0xa0] sm:$0xff] }
0x1e76   :  { %v6082_v53 = vpop.f32.mrb[162].mxu0  ;;  %12340 = vmatprep.subr.mxu1 %v20646_v49  ;;  %13643 = vmatprep.subr.bf16.mxu0 %v20696_v38 }
0x1e77   :  { %v12323_v8 = vpop.f32.mrb[163].mxu0 }
0x1e78   :  { %v10010_v8 = vld [vmem:[#allocation7 + $0x2] ss:$0 sm:$0xff] }
0x1e79   :  { %12341 = vmatpush3.msk.msra.mxu1 %vm1841_vm6, %v6082_v53  ;;  %13645 = vmatpush3.bf16.msra.mxu0 %v13644_v50  ;;  %v13647_v53 = vpack.c.bf16 %v10032_v63, %v10031_v54 }
0x1e7a   :  { %12343 = vmatmul.mubr.msk.f32.vlgmr.msra.gmra.mrb[172].mxu1 %vm1825_vm7, %v14102_v21  ;;  %13634 = vmatprep.subr.bf16.mxu1 %v20696_v38 }
0x1e7b   :  { %12345 = vmatprep.mubr.msk.f32.mxu1 %vm14447_vm2, %v20646_v49  ;;  %13646 = vmatprep.subr.bf16.mxu0 %v20696_v38 }
0x1e7d   :  { %13648 = vmatpush3.bf16.msra.mxu0 %v13647_v53 }
0x1e7e   :  { %12346 = vmatmul.mubr.msk.f32.gmra.mrb[174].mxu1 %vm1825_vm7, %v14103_v18  ;;  %13649 = vmatprep.subr.bf16.mxu0 %v20696_v38 }
0x1e7f   :  { %12348 = vmatprep.mubr.msk.f32.mxu1 %vm14447_vm2, %v20646_v49 }
0x1e82   :  { %12349 = vmatmul.mubr.msk.f32.gmra.mrb[176].mxu1 %vm1825_vm7, %v14104_v40 }
0x1e83   :  { %12351 = vmatprep.mubr.msk.f32.mxu1 %vm14447_vm2, %v20646_v49 }
0x1e86   :  { %12352 = vmatmul.mubr.msk.f32.gmra.mrb[178].mxu1 %vm1825_vm7, %v14105_v17 }
0x1e87   :  { %12354 = vmatprep.mubr.msk.f32.mxu1 %vm14447_vm2, %v20646_v49 }
0x1e8a   :  { %12355 = vmatmul.mubr.msk.f32.gmra.mrb[180].mxu1 %vm1825_vm7, %v14106_v57 }
0x1e8b   :  { %12367 = vmatprep.mubr.msk.f32.mxu1 %vm14447_vm2, %v20646_v49 }
0x1f4d   :  { %v6161_v21 = vpop.f32.mrb[172].mxu1 }
0x1f4e   :  { %v12344_v18 = vpop.f32.mrb[173].mxu1  ;;  %v6162_v40 = vadd.f32 %v10010_v8, %v6161_v21 }
0x1f50   :  { %v6185_v34 = vmax.f32 %v6162_v40, 0.0  ;;  %v14113_v40 = vld [vmem:[%s20648_s26 + $0x30] sm:$0xff] }
0x1f51   :  { %v6166_v17 = vpop.f32.mrb[174].mxu1 }
0x1f52   :  { %v6167_v57 = vadd.f32 %v10010_v8, %v6166_v17  ;;  %v12347_v37 = vpop.f32.mrb[175].mxu1 }
0x1f53   :  { %v14115_v37 = vld [vmem:[%s20648_s26 + $0x40] sm:$0xf] }
0x1f54   :  { %v6186_v36 = vmax.f32 %v6167_v57, 0.0  ;;  %v14114_v57 = vld [vmem:[%s20648_s26 + $0x38] sm:$0xff] }
0x1f55   :  { %v6171_v5 = vpop.f32.mrb[176].mxu1 }
0x1f56   :  { %v13635_v41 = vpack.c.bf16 %v6186_v36, %v6185_v34  ;;  %v12350_v28 = vpop.f32.mrb[177].mxu1  ;;  %v6172_v1 = vadd.f32 %v10010_v8, %v6171_v5  ;;  %v10033_v34 = vld [vmem:[%s20455_s15 + $0xb0] sm:$0xff]  ;;  %v10034_v36 = vld [vmem:[%s20455_s15 + $0xb8] sm:$0xff] }
0x1f57   :  { %v14107_v28 = vld [vmem:[%s20648_s26] sm:$0xff]  ;;  %v13650_v5 = vpack.c.bf16 %v10034_v36, %v10033_v34 }
0x1f58   :  { %13636 = vmatpush3.bf16.msra.mxu1 %v13635_v41  ;;  %v6187_v53 = vmax.f32 %v6172_v1, 0.0  ;;  %v14111_v1 = vld [vmem:[%s20648_s26 + $0x20] sm:$0xff] }
0x1f59   :  { %v6176_v50 = vpop.f32.mrb[178].mxu1  ;;  %13637 = vmatprep.subr.bf16.mxu1 %v20696_v38  ;;  %13651 = vmatpush3.bf16.msra.mxu0 %v13650_v5 }
0x1f5a   :  { %v6177_v54 = vadd.f32 %v10010_v8, %v6176_v50  ;;  %v12353_v63 = vpop.f32.mrb[179].mxu1  ;;  %13664 = vmatprep.subr.bf16.mxu0 %v20696_v38 }
0x1f5c   :  { %v6188_v24 = vmax.f32 %v6177_v54, 0.0 }
0x1f5d   :  { %v6181_v10 = vpop.f32.mrb[180].mxu1 }
0x1f5e   :  { %v13638_v18 = vpack.c.bf16 %v6188_v24, %v6187_v53  ;;  %v6182_v21 = vadd.f32 %v10010_v8, %v6181_v10  ;;  %v12356_v29 = vpop.f32.mrb[181].mxu1  ;;  %v14109_v10 = vld [vmem:[%s20648_s26 + $0x10] sm:$0xff]  ;;  %v14110_v24 = vld [vmem:[%s20648_s26 + $0x18] sm:$0xff]  ;;  %v14112_v8 = vld [vmem:[%s20648_s26 + $0x28] sm:$0xff] }
0x1f5f   :  { %v14108_v29 = vld [vmem:[%s20648_s26 + $0x8] sm:$0xff] }
0x1f60   :  { %v6189_v17 = vmax.f32 %v6182_v21, 0.0  ;;  %13639 = vmatpush3.bf16.msra.mxu1 %v13638_v18 }
0x1f61   :  { %12365 = vmatprep.subr.mxu1 %v20646_v49 }
0x1f64   :  { %12366 = vmatpush3.msk.msra.mxu1 %vm1968_vm8, %v6189_v17 }
0x1f65   :  { %12368 = vmatmul.mubr.msk.f32.vlgmr.msra.gmra.mrb[182].mxu1 %vm1940_vm9, %v14107_v28  ;;  %13652 = vmatprep.subr.bf16.mxu1 %v20696_v38 }
0x1f66   :  { %12370 = vmatprep.mubr.msk.f32.mxu1 %vm14447_vm2, %v20646_v49 }
0x1f69   :  { %12371 = vmatmul.mubr.msk.f32.gmra.mrb[184].mxu1 %vm1940_vm9, %v14108_v29 }
0x1f6a   :  { %12373 = vmatprep.mubr.msk.f32.mxu1 %vm14447_vm2, %v20646_v49 }
0x1f6d   :  { %12374 = vmatmul.mubr.msk.f32.gmra.mrb[186].mxu1 %vm1940_vm9, %v14109_v10 }
0x1f6e   :  { %12376 = vmatprep.mubr.msk.f32.mxu1 %vm14447_vm2, %v20646_v49 }
0x1f71   :  { %12377 = vmatmul.mubr.msk.f32.gmra.mrb[188].mxu1 %vm1940_vm9, %v14110_v24 }
0x1f72   :  { %12379 = vmatprep.mubr.msk.f32.mxu1 %vm14447_vm2, %v20646_v49 }
0x1f75   :  { %12380 = vmatmul.mubr.msk.f32.gmra.mrb[190].mxu1 %vm1940_vm9, %v14111_v1 }
0x1f76   :  { %12382 = vmatprep.mubr.msk.f32.mxu1 %vm14447_vm2, %v20646_v49 }
0x1f79   :  { %12383 = vmatmul.mubr.msk.f32.gmra.mrb[192].mxu1 %vm1940_vm9, %v14112_v8 }
0x1f7a   :  { %12385 = vmatprep.mubr.msk.f32.mxu1 %vm14447_vm2, %v20646_v49 }
0x1f7d   :  { %12386 = vmatmul.mubr.msk.f32.gmra.mrb[194].mxu1 %vm1940_vm9, %v14113_v40 }
0x1f7e   :  { %12388 = vmatprep.mubr.msk.f32.mxu1 %vm14447_vm2, %v20646_v49 }
0x1f81   :  { %12389 = vmatmul.mubr.msk.f32.gmra.mrb[196].mxu1 %vm1940_vm9, %v14114_v57 }
0x1f82   :  { %12391 = vmatprep.mubr.msk.f32.mxu1 %vm14447_vm2, %v20646_v49 }
0x1f85   :  { %12392 = vmatmul.mubr.msk.f32.gmra.mrb[198].mxu1 %vm1940_vm9, %v14115_v37 }
0x1f86   :  { %12455 = vmatprep.mubr.msk.f32.mxu1 %vm14447_vm2, %v20646_v49 }
0x2038   :  { %v6259_v41 = vpop.f32.mrb[182].mxu1 }
0x2039   :  { %v6260_v50 = vadd.f32 %v6259_v41, %v5929_v19  ;;  %v12369_v54 = vpop.f32.mrb[183].mxu1 }
0x203b   :  { %12411 = vmatmul.mubr.msk.f32.vlgmr.msra.gmra.mrb[164].mxu0 %vm1681_vm5, %v6260_v50 }
0x203c   :  { %v6264_v63 = vpop.f32.mrb[184].mxu1  ;;  %12413 = vmatprep.mubr.msk.f32.mxu0 %vm14447_vm2, %v20646_v49 }
0x203d   :  { %v6265_v53 = vadd.f32 %v6264_v63, %v5930_v56  ;;  %v12372_v18 = vpop.f32.mrb[185].mxu1 }
0x203f   :  { %12414 = vmatmul.mubr.msk.f32.gmra.mrb[166].mxu0 %vm1681_vm5, %v6265_v53 }
0x2040   :  { %v6269_v21 = vpop.f32.mrb[186].mxu1  ;;  %12416 = vmatprep.mubr.msk.f32.mxu0 %vm14447_vm2, %v20646_v49 }
0x2041   :  { %v6270_v19 = vadd.f32 %v6269_v21, %v20748_v3  ;;  %v12375_v17 = vpop.f32.mrb[187].mxu1 }
0x2043   :  { %12417 = vmatmul.mubr.msk.f32.gmra.mrb[168].mxu0 %vm1681_vm5, %v6270_v19 }
0x2044   :  { %v6274_v28 = vpop.f32.mrb[188].mxu1  ;;  %12419 = vmatprep.mubr.msk.f32.mxu0 %vm14447_vm2, %v20646_v49 }
0x2045   :  { %v6275_v56 = vadd.f32 %v6274_v28, %v20749_v48  ;;  %v12378_v29 = vpop.f32.mrb[189].mxu1 }
0x2047   :  { %12420 = vmatmul.mubr.msk.f32.gmra.mrb[170].mxu0 %vm1681_vm5, %v6275_v56 }
0x2048   :  { %v6279_v10 = vpop.f32.mrb[190].mxu1  ;;  %12422 = vmatprep.mubr.msk.f32.mxu0 %vm14447_vm2, %v20646_v49 }
0x2049   :  { %v6280_v24 = vadd.f32 %v6279_v10, %v20750_v39  ;;  %v12381_v1 = vpop.f32.mrb[191].mxu1 }
0x204b   :  { %12423 = vmatmul.mubr.msk.f32.gmra.mrb[172].mxu0 %vm1681_vm5, %v6280_v24 }
0x204c   :  { %v6284_v8 = vpop.f32.mrb[192].mxu1  ;;  %12425 = vmatprep.mubr.msk.f32.mxu0 %vm14447_vm2, %v20646_v49 }
0x204d   :  { %v6285_v40 = vadd.f32 %v6284_v8, %v20751_v15  ;;  %v12384_v57 = vpop.f32.mrb[193].mxu1 }
0x204f   :  { %12426 = vmatmul.mubr.msk.f32.gmra.mrb[174].mxu0 %vm1681_vm5, %v6285_v40 }
0x2050   :  { %v6289_v37 = vpop.f32.mrb[194].mxu1  ;;  %12428 = vmatprep.mubr.msk.f32.mxu0 %vm14447_vm2, %v20646_v49 }
0x2051   :  { %v6290_v34 = vadd.f32 %v6289_v37, %v20752_v47  ;;  %v12387_v36 = vpop.f32.mrb[195].mxu1 }
0x2052   :  { %v14116_v36 = vld [vmem:[#allocation2] sm:$0xff] }
0x2053   :  { %12429 = vmatmul.mubr.msk.f32.gmra.mrb[176].mxu0 %vm1681_vm5, %v6290_v34 }
0x2054   :  { %v6294_v5 = vpop.f32.mrb[196].mxu1  ;;  %12431 = vmatprep.mubr.msk.f32.mxu0 %vm14447_vm2, %v20646_v49 }
0x2055   :  { %v6295_v41 = vadd.f32 %v6294_v5, %v20753_v62  ;;  %v12390_v50 = vpop.f32.mrb[197].mxu1  ;;  %v14117_v5 = vld [vmem:[#allocation2 + $0x8] sm:$0xff]  ;;  %v14118_v62 = vld [vmem:[#allocation2 + $0x10] sm:$0xff] }
0x2056   :  { %v14120_v50 = vld [vmem:[#allocation2 + $0x20] sm:$0xff] }
0x2057   :  { %12432 = vmatmul.mubr.msk.f32.gmra.mrb[178].mxu0 %vm1681_vm5, %v6295_v41  ;;  %v14119_v41 = vld [vmem:[#allocation2 + $0x18] sm:$0xff] }
0x2058   :  { %v6299_v54 = vpop.f32.mrb[198].mxu1  ;;  %12434 = vmatprep.mubr.msk.f32.mxu0 %vm14447_vm2, %v20646_v49 }
0x2059   :  { %v6300_v63 = vadd.f32 %v6299_v54, %v20754_v27  ;;  %v12393_v53 = vpop.f32.mrb[199].mxu1  ;;  %v14121_v54 = vld [vmem:[#allocation2 + $0x28] sm:$0xff]  ;;  %v14122_v27 = vld [vmem:[#allocation2 + $0x30] sm:$0xff] }
0x205a   :  { %v14124_v53 = vld [vmem:[#allocation2 + $0x40] sm:$0xf] }
0x205b   :  { %12435 = vmatmul.mubr.msk.f32.gmra.mrb[180].mxu0 %vm1681_vm5, %v6300_v63  ;;  %v14123_v63 = vld [vmem:[#allocation2 + $0x38] sm:$0xff] }
0x205c   :  { %12500 = vmatprep.mubr.msk.f32.mxu0 %vm14447_vm2, %v20646_v49 }
0x210e   :  { %v6407_v18 = vpop.f32.mrb[164].mxu0 }
0x210f   :  { %v12412_v21 = vpop.f32.mrb[165].mxu0 }
0x2110   :  { %v10074_v21 = vld [vmem:[%s20457_s17 + $0x68] sm:$0xff] }
0x2112   :  { %v6412_v13 = vpop.f32.mrb[166].mxu0 }
0x2113   :  { %v13653_v3 = vpack.c.bf16 %v6412_v13, %v6407_v18  ;;  %v12415_v19 = vpop.f32.mrb[167].mxu0  ;;  %v10073_v18 = vld [vmem:[%s20457_s17 + $0x60] sm:$0xff]  ;;  %v10075_v13 = vld [vmem:[%s20457_s17 + $0x70] sm:$0xff] }
0x2114   :  { %v10076_v19 = vld [vmem:[%s20457_s17 + $0x78] sm:$0xff] }
0x2115   :  { %13654 = vmatpush3.bf16.msra.mxu1 %v13653_v3  ;;  %v13677_v3 = vpack.c.bf16 %v10074_v21, %v10073_v18 }
0x2116   :  { %v6417_v17 = vpop.f32.mrb[168].mxu0  ;;  %13655 = vmatprep.subr.bf16.mxu1 %v20696_v38 }
0x2117   :  { %v12418_v28 = vpop.f32.mrb[169].mxu0 }
0x2118   :  { %v10044_v28 = vld [vmem:[#allocation9 + $0x2] ss:$0 sm:$0xff] }
0x211a   :  { %v6422_v48 = vpop.f32.mrb[170].mxu0 }
0x211b   :  { %v13656_v56 = vpack.c.bf16 %v6422_v48, %v6417_v17  ;;  %v12421_v61 = vpop.f32.mrb[171].mxu0  ;;  %v13680_v17 = vpack.c.bf16 %v10076_v19, %v10075_v13 }
0x211d   :  { %13657 = vmatpush3.bf16.msra.mxu1 %v13656_v56 }
0x211e   :  { %v6427_v29 = vpop.f32.mrb[172].mxu0  ;;  %13658 = vmatprep.subr.bf16.mxu1 %v20696_v38 }
0x211f   :  { %v12424_v10 = vpop.f32.mrb[173].mxu0 }
0x2122   :  { %v6432_v39 = vpop.f32.mrb[174].mxu0 }
0x2123   :  { %v13659_v24 = vpack.c.bf16 %v6432_v39, %v6427_v29  ;;  %v12427_v1 = vpop.f32.mrb[175].mxu0 }
0x2125   :  { %13660 = vmatpush3.bf16.msra.mxu1 %v13659_v24 }
0x2126   :  { %v6437_v8 = vpop.f32.mrb[176].mxu0  ;;  %13661 = vmatprep.subr.bf16.mxu1 %v20696_v38 }
0x2127   :  { %v12430_v15 = vpop.f32.mrb[177].mxu0 }
0x212a   :  { %v6442_v40 = vpop.f32.mrb[178].mxu0 }
0x212b   :  { %v13662_v57 = vpack.c.bf16 %v6442_v40, %v6437_v8  ;;  %v12433_v37 = vpop.f32.mrb[179].mxu0 }
0x212d   :  { %13663 = vmatpush3.bf16.msra.mxu1 %v13662_v57 }
0x212e   :  { %v6447_v47 = vpop.f32.mrb[180].mxu0  ;;  %12453 = vmatprep.subr.mxu1 %v20646_v49 }
0x212f   :  { %v12436_v34 = vpop.f32.mrb[181].mxu0 }
0x2131   :  { %12454 = vmatpush3.msk.msra.mxu1 %vm1841_vm6, %v6447_v47 }
0x2132   :  { %12456 = vmatmul.mubr.msk.f32.vlgmr.msra.gmra.mrb[200].mxu1 %vm1825_vm7, %v14116_v36  ;;  %13676 = vmatprep.subr.bf16.mxu1 %v20696_v38 }
0x2133   :  { %12458 = vmatprep.mubr.msk.f32.mxu1 %vm14447_vm2, %v20646_v49  ;;  %13678 = vmatpush3.bf16.msra.mxu1 %v13677_v3 }
0x2134   :  { %13679 = vmatprep.subr.bf16.mxu1 %v20696_v38 }
0x2136   :  { %12459 = vmatmul.mubr.msk.f32.gmra.mrb[202].mxu1 %vm1825_vm7, %v14117_v5 }
0x2137   :  { %12461 = vmatprep.mubr.msk.f32.mxu1 %vm14447_vm2, %v20646_v49  ;;  %13681 = vmatpush3.bf16.msra.mxu1 %v13680_v17 }
0x2138   :  { %13682 = vmatprep.subr.bf16.mxu1 %v20696_v38 }
0x213a   :  { %12462 = vmatmul.mubr.msk.f32.gmra.mrb[204].mxu1 %vm1825_vm7, %v14118_v62 }
0x213b   :  { %12464 = vmatprep.mubr.msk.f32.mxu1 %vm14447_vm2, %v20646_v49 }
0x213e   :  { %12465 = vmatmul.mubr.msk.f32.gmra.mrb[206].mxu1 %vm1825_vm7, %v14119_v41 }
0x213f   :  { %12467 = vmatprep.mubr.msk.f32.mxu1 %vm14447_vm2, %v20646_v49 }
0x2142   :  { %12468 = vmatmul.mubr.msk.f32.gmra.mrb[208].mxu1 %vm1825_vm7, %v14120_v50 }
0x2143   :  { %12470 = vmatprep.mubr.msk.f32.mxu1 %vm14447_vm2, %v20646_v49 }
0x2146   :  { %12471 = vmatmul.mubr.msk.f32.gmra.mrb[210].mxu1 %vm1825_vm7, %v14121_v54 }
0x2147   :  { %12473 = vmatprep.mubr.msk.f32.mxu1 %vm14447_vm2, %v20646_v49 }
0x214a   :  { %12474 = vmatmul.mubr.msk.f32.gmra.mrb[212].mxu1 %vm1825_vm7, %v14122_v27 }
0x214b   :  { %12476 = vmatprep.mubr.msk.f32.mxu1 %vm14447_vm2, %v20646_v49 }
0x214e   :  { %12477 = vmatmul.mubr.msk.f32.gmra.mrb[214].mxu1 %vm1825_vm7, %v14123_v63 }
0x214f   :  { %12479 = vmatprep.mubr.msk.f32.mxu1 %vm14447_vm2, %v20646_v49 }
0x2152   :  { %12480 = vmatmul.mubr.msk.f32.gmra.mrb[216].mxu1 %vm1825_vm7, %v14124_v53 }
0x2153   :  { %12563 = vmatprep.mubr.msk.f32.mxu1 %vm14447_vm2, %v20646_v49 }
0x2205   :  { %v6526_v48 = vpop.f32.mrb[200].mxu1 }
0x2206   :  { %v12457_v56 = vpop.f32.mrb[201].mxu1  ;;  %v6527_v61 = vadd.f32 %v10044_v28, %v6526_v48 }
0x2208   :  { %v6570_v24 = vmax.f32 %v6527_v61, 0.0 }
0x2209   :  { %v6531_v29 = vpop.f32.mrb[202].mxu1 }
0x220a   :  { %v6532_v10 = vadd.f32 %v10044_v28, %v6531_v29  ;;  %v12460_v39 = vpop.f32.mrb[203].mxu1 }
0x220c   :  { %v6571_v1 = vmax.f32 %v6532_v10, 0.0 }
0x220d   :  { %v6536_v8 = vpop.f32.mrb[204].mxu1 }
0x220e   :  { %v13665_v15 = vpack.c.bf16 %v6571_v1, %v6570_v24  ;;  %v12463_v40 = vpop.f32.mrb[205].mxu1  ;;  %v6537_v57 = vadd.f32 %v10044_v28, %v6536_v8 }
0x220f   :  { %v14125_v40 = vld [vmem:[%s20446_s6] sm:$0xff] }
0x2210   :  { %13666 = vmatpush3.bf16.msra.mxu0 %v13665_v15  ;;  %v6572_v36 = vmax.f32 %v6537_v57, 0.0  ;;  %v14127_v57 = vld [vmem:[%s20446_s6 + $0x10] sm:$0xff] }
0x2211   :  { %v6541_v37 = vpop.f32.mrb[206].mxu1  ;;  %13667 = vmatprep.subr.bf16.mxu0 %v20696_v38 }
0x2212   :  { %v6542_v47 = vadd.f32 %v10044_v28, %v6541_v37  ;;  %v12466_v34 = vpop.f32.mrb[207].mxu1  ;;  %v14128_v37 = vld [vmem:[%s20446_s6 + $0x18] sm:$0xff] }
0x2213   :  { %v14130_v34 = vld [vmem:[%s20446_s6 + $0x28] sm:$0xff] }
0x2214   :  { %v6573_v5 = vmax.f32 %v6542_v47, 0.0  ;;  %v14129_v47 = vld [vmem:[%s20446_s6 + $0x20] sm:$0xff] }
0x2215   :  { %v6546_v62 = vpop.f32.mrb[208].mxu1 }
0x2216   :  { %v13668_v41 = vpack.c.bf16 %v6573_v5, %v6572_v36  ;;  %v12469_v50 = vpop.f32.mrb[209].mxu1  ;;  %v6547_v54 = vadd.f32 %v10044_v28, %v6546_v62  ;;  %v14131_v36 = vld [vmem:[%s20446_s6 + $0x30] sm:$0xff]  ;;  %v14132_v5 = vld [vmem:[%s20446_s6 + $0x38] sm:$0xff]  ;;  %v14133_v62 = vld [vmem:[%s20446_s6 + $0x40] sm:$0xff] }
0x2217   :  { %v14135_v50 = vld [vmem:[%s20446_s6 + $0x50] sm:$0xff] }
0x2218   :  { %13669 = vmatpush3.bf16.msra.mxu0 %v13668_v41  ;;  %v6574_v18 = vmax.f32 %v6547_v54, 0.0  ;;  %v14134_v41 = vld [vmem:[%s20446_s6 + $0x48] sm:$0xff]  ;;  %v14136_v54 = vld [vmem:[%s20446_s6 + $0x58] sm:$0xff] }
0x2219   :  { %v6551_v27 = vpop.f32.mrb[210].mxu1  ;;  %13670 = vmatprep.subr.bf16.mxu0 %v20696_v38 }
0x221a   :  { %v6552_v63 = vadd.f32 %v10044_v28, %v6551_v27  ;;  %v12472_v53 = vpop.f32.mrb[211].mxu1  ;;  %v14137_v27 = vld [vmem:[%s20446_s6 + $0x60] sm:$0xff] }
0x221b   :  { %v14139_v53 = vld [vmem:[%s20446_s6 + $0x70] sm:$0xff] }
0x221c   :  { %v6575_v21 = vmax.f32 %v6552_v63, 0.0  ;;  %v14138_v63 = vld [vmem:[%s20446_s6 + $0x68] sm:$0xff] }
0x221d   :  { %v6556_v13 = vpop.f32.mrb[212].mxu1 }
0x221e   :  { %v13671_v3 = vpack.c.bf16 %v6575_v21, %v6574_v18  ;;  %v12475_v19 = vpop.f32.mrb[213].mxu1  ;;  %v6557_v17 = vadd.f32 %v10044_v28, %v6556_v13  ;;  %v14140_v18 = vld [vmem:[%s20446_s6 + $0x78] sm:$0xff]  ;;  %v14141_v21 = vld [vmem:[%s20446_s6 + $0x80] sm:$0x1f]  ;;  %v18694_v13 = vld [vmem:[%s20643_s18 + $0x8] sm:$0xff] }
0x221f   :  { %v10078_v19 = vld [vmem:[%s20457_s17 + $0x88] sm:$0xff] }
0x2220   :  { %13672 = vmatpush3.bf16.msra.mxu0 %v13671_v3  ;;  %v6576_v29 = vmax.f32 %v6557_v17, 0.0  ;;  %v10077_v3 = vld [vmem:[%s20457_s17 + $0x80] sm:$0xff] }
0x2221   :  { %v6561_v48 = vpop.f32.mrb[214].mxu1  ;;  %13673 = vmatprep.subr.bf16.mxu0 %v20696_v38  ;;  %v13683_v17 = vpack.c.bf16 %v10078_v19, %v10077_v3 }
0x2222   :  { %v6562_v56 = vadd.f32 %v10044_v28, %v6561_v48  ;;  %v12478_v61 = vpop.f32.mrb[215].mxu1 }
0x2223   :  { %13684 = vmatpush3.bf16.msra.mxu1 %v13683_v17 }
0x2224   :  { %v6577_v10 = vmax.f32 %v6562_v56, 0.0  ;;  %13709 = vmatprep.subr.bf16.mxu1 %v20696_v38  ;;  %v20755_v56 = vmax.f32 %v18063_v9, 0.0  ;;  %v20757_v9 = vmax.f32 %v18076_v59, 0.0  ;;  %v20759_v59 = vmax.f32 %v18094_v42, 0.0 }
0x2225   :  { %v6566_v39 = vpop.f32.mrb[216].mxu1  ;;  %v20761_v42 = vmax.f32 %v18112_v12, 0.0  ;;  %v20763_v12 = vmax.f32 %v18130_v7, 0.0  ;;  %v20765_v7 = vmax.f32 %v18148_v58, 0.0  ;;  %v20767_v58 = vmax.f32 %v18166_v55, 0.0 }
0x2226   :  { %v13674_v24 = vpack.c.bf16 %v6577_v10, %v6576_v29  ;;  %v6567_v1 = vadd.f32 %v10044_v28, %v6566_v39  ;;  %v12481_v8 = vpop.f32.mrb[217].mxu1  ;;  %v14126_v28 = vld [vmem:[%s20446_s6 + $0x8] sm:$0xff]  ;;  %v20756_v39 = vmax.f32 %v18067_v23, 0.0  ;;  %v20758_v23 = vmax.f32 %v18085_v51, 0.0 }
0x2227   :  { %v20760_v51 = vmax.f32 %v18103_v60, 0.0  ;;  %v20762_v60 = vmax.f32 %v18121_v4, 0.0  ;;  %v20764_v4 = vmax.f32 %v18139_v52, 0.0  ;;  %v20766_v52 = vmax.f32 %v18157_v6, 0.0 }
0x2228   :  { %v6578_v15 = vmax.f32 %v6567_v1, 0.0  ;;  %13675 = vmatpush3.bf16.msra.mxu0 %v13674_v24  ;;  %v20768_v6 = vmax.f32 %v18175_v2, 0.0  ;;  %v20769_v55 = vmax.f32 %v18184_v25, 0.0  ;;  %v20770_v2 = vmax.f32 %v18193_v11, 0.0 }
0x2229   :  { %12498 = vmatprep.subr.mxu0 %v20646_v49  ;;  %v20771_v25 = vmax.f32 %v18202_v22, 0.0 }
0x222c   :  { %12499 = vmatpush3.msk.msra.mxu0 %vm1841_vm6, %v6578_v15 }
0x222d   :  { %12501 = vmatmul.mubr.msk.f32.vlgmr.msra.gmra.mrb[182].mxu0 %vm1825_vm7, %v14125_v40  ;;  %13685 = vmatprep.subr.bf16.mxu0 %v20696_v38 }
0x222e   :  { %12503 = vmatprep.mubr.msk.f32.mxu0 %vm14447_vm2, %v20646_v49 }
0x2231   :  { %12504 = vmatmul.mubr.msk.f32.gmra.mrb[184].mxu0 %vm1825_vm7, %v14126_v28 }
0x2232   :  { %12506 = vmatprep.mubr.msk.f32.mxu0 %vm14447_vm2, %v20646_v49 }
0x2235   :  { %12507 = vmatmul.mubr.msk.f32.gmra.mrb[186].mxu0 %vm1825_vm7, %v14127_v57 }
0x2236   :  { %12509 = vmatprep.mubr.msk.f32.mxu0 %vm14447_vm2, %v20646_v49 }
0x2239   :  { %12510 = vmatmul.mubr.msk.f32.gmra.mrb[188].mxu0 %vm1825_vm7, %v14128_v37 }
0x223a   :  { %12512 = vmatprep.mubr.msk.f32.mxu0 %vm14447_vm2, %v20646_v49 }
0x223d   :  { %12513 = vmatmul.mubr.msk.f32.gmra.mrb[190].mxu0 %vm1825_vm7, %v14129_v47 }
0x223e   :  { %12515 = vmatprep.mubr.msk.f32.mxu0 %vm14447_vm2, %v20646_v49 }
0x2241   :  { %12516 = vmatmul.mubr.msk.f32.gmra.mrb[192].mxu0 %vm1825_vm7, %v14130_v34 }
0x2242   :  { %12518 = vmatprep.mubr.msk.f32.mxu0 %vm14447_vm2, %v20646_v49 }
0x2245   :  { %12519 = vmatmul.mubr.msk.f32.gmra.mrb[194].mxu0 %vm1825_vm7, %v14131_v36 }
0x2246   :  { %12521 = vmatprep.mubr.msk.f32.mxu0 %vm14447_vm2, %v20646_v49 }
0x2249   :  { %12522 = vmatmul.mubr.msk.f32.gmra.mrb[196].mxu0 %vm1825_vm7, %v14132_v5 }
0x224a   :  { %12524 = vmatprep.mubr.msk.f32.mxu0 %vm14447_vm2, %v20646_v49 }
0x224d   :  { %12525 = vmatmul.mubr.msk.f32.gmra.mrb[198].mxu0 %vm1825_vm7, %v14133_v62 }
0x224e   :  { %12527 = vmatprep.mubr.msk.f32.mxu0 %vm14447_vm2, %v20646_v49 }
0x2251   :  { %12528 = vmatmul.mubr.msk.f32.gmra.mrb[200].mxu0 %vm1825_vm7, %v14134_v41 }
0x2252   :  { %12530 = vmatprep.mubr.msk.f32.mxu0 %vm14447_vm2, %v20646_v49 }
0x2255   :  { %12531 = vmatmul.mubr.msk.f32.gmra.mrb[202].mxu0 %vm1825_vm7, %v14135_v50 }
0x2256   :  { %12533 = vmatprep.mubr.msk.f32.mxu0 %vm14447_vm2, %v20646_v49 }
0x2259   :  { %12534 = vmatmul.mubr.msk.f32.gmra.mrb[204].mxu0 %vm1825_vm7, %v14136_v54 }
0x225a   :  { %12536 = vmatprep.mubr.msk.f32.mxu0 %vm14447_vm2, %v20646_v49 }
0x225d   :  { %12537 = vmatmul.mubr.msk.f32.gmra.mrb[206].mxu0 %vm1825_vm7, %v14137_v27 }
0x225e   :  { %12539 = vmatprep.mubr.msk.f32.mxu0 %vm14447_vm2, %v20646_v49 }
0x2261   :  { %12540 = vmatmul.mubr.msk.f32.gmra.mrb[208].mxu0 %vm1825_vm7, %v14138_v63 }
0x2262   :  { %12542 = vmatprep.mubr.msk.f32.mxu0 %vm14447_vm2, %v20646_v49 }
0x2265   :  { %12543 = vmatmul.mubr.msk.f32.gmra.mrb[210].mxu0 %vm1825_vm7, %v14139_v53 }
0x2266   :  { %12545 = vmatprep.mubr.msk.f32.mxu0 %vm14447_vm2, %v20646_v49 }
0x2269   :  { %12546 = vmatmul.mubr.msk.f32.gmra.mrb[212].mxu0 %vm1825_vm7, %v14140_v18 }
0x226a   :  { %12548 = vmatprep.mubr.msk.f32.mxu0 %vm14447_vm2, %v20646_v49 }
0x226d   :  { %12549 = vmatmul.mubr.msk.f32.gmra.mrb[214].mxu0 %vm1825_vm7, %v14141_v21 }
0x226e   :  { %10098 = vmatprep.mubr.msk.f32.mxu0 %vm702_vm0, %v18694_v13 }
0x2300   :  { %v6648_v48 = vpop.f32.mrb[182].mxu0 }
0x2301   :  { %v6649_v61 = vadd.f32 %v6648_v48, %v20755_v56  ;;  %v12502_v29 = vpop.f32.mrb[183].mxu0 }
0x2303   :  { %12564 = vmatmul.mubr.msk.f32.vlgmr.msra.gmra.mrb[218].mxu1 %vm1315_vm4, %v6649_v61 }
0x2304   :  { %v6653_v10 = vpop.f32.mrb[184].mxu0  ;;  %12566 = vmatprep.mubr.msk.f32.mxu1 %vm14447_vm2, %v20646_v49 }
0x2305   :  { %v6654_v24 = vadd.f32 %v6653_v10, %v20756_v39  ;;  %v12505_v1 = vpop.f32.mrb[185].mxu0 }
0x2307   :  { %12567 = vmatmul.mubr.msk.f32.gmra.mrb[220].mxu1 %vm1315_vm4, %v6654_v24 }
0x2308   :  { %v6658_v8 = vpop.f32.mrb[186].mxu0  ;;  %12569 = vmatprep.mubr.msk.f32.mxu1 %vm14447_vm2, %v20646_v49 }
0x2309   :  { %v6659_v15 = vadd.f32 %v6658_v8, %v20757_v9  ;;  %v12508_v40 = vpop.f32.mrb[187].mxu0 }
0x230b   :  { %12570 = vmatmul.mubr.msk.f32.gmra.mrb[222].mxu1 %vm1315_vm4, %v6659_v15 }
0x230c   :  { %v6663_v28 = vpop.f32.mrb[188].mxu0  ;;  %12572 = vmatprep.mubr.msk.f32.mxu1 %vm14447_vm2, %v20646_v49 }
0x230d   :  { %v6664_v57 = vadd.f32 %v6663_v28, %v20758_v23  ;;  %v12511_v37 = vpop.f32.mrb[189].mxu0 }
0x230f   :  { %12573 = vmatmul.mubr.msk.f32.gmra.mrb[224].mxu1 %vm1315_vm4, %v6664_v57 }
0x2310   :  { %v6668_v47 = vpop.f32.mrb[190].mxu0  ;;  %12575 = vmatprep.mubr.msk.f32.mxu1 %vm14447_vm2, %v20646_v49 }
0x2311   :  { %v6669_v34 = vadd.f32 %v6668_v47, %v20759_v59  ;;  %v12514_v36 = vpop.f32.mrb[191].mxu0 }
0x2313   :  { %12576 = vmatmul.mubr.msk.f32.gmra.mrb[226].mxu1 %vm1315_vm4, %v6669_v34 }
0x2314   :  { %v6673_v5 = vpop.f32.mrb[192].mxu0  ;;  %12578 = vmatprep.mubr.msk.f32.mxu1 %vm14447_vm2, %v20646_v49 }
0x2315   :  { %v6674_v62 = vadd.f32 %v6673_v5, %v20760_v51  ;;  %v12517_v41 = vpop.f32.mrb[193].mxu0 }
0x2317   :  { %12579 = vmatmul.mubr.msk.f32.gmra.mrb[228].mxu1 %vm1315_vm4, %v6674_v62 }
0x2318   :  { %v6678_v50 = vpop.f32.mrb[194].mxu0  ;;  %12581 = vmatprep.mubr.msk.f32.mxu1 %vm14447_vm2, %v20646_v49 }
0x2319   :  { %v6679_v54 = vadd.f32 %v6678_v50, %v20761_v42  ;;  %v12520_v27 = vpop.f32.mrb[195].mxu0 }
0x231b   :  { %12582 = vmatmul.mubr.msk.f32.gmra.mrb[230].mxu1 %vm1315_vm4, %v6679_v54 }
0x231c   :  { %v6683_v63 = vpop.f32.mrb[196].mxu0  ;;  %12584 = vmatprep.mubr.msk.f32.mxu1 %vm14447_vm2, %v20646_v49 }
0x231d   :  { %v6684_v53 = vadd.f32 %v6683_v63, %v20762_v60  ;;  %v12523_v18 = vpop.f32.mrb[197].mxu0 }
0x231f   :  { %12585 = vmatmul.mubr.msk.f32.gmra.mrb[232].mxu1 %vm1315_vm4, %v6684_v53 }
0x2320   :  { %v6688_v21 = vpop.f32.mrb[198].mxu0  ;;  %12587 = vmatprep.mubr.msk.f32.mxu1 %vm14447_vm2, %v20646_v49 }
0x2321   :  { %v6689_v3 = vadd.f32 %v6688_v21, %v20763_v12  ;;  %v12526_v19 = vpop.f32.mrb[199].mxu0 }
0x2323   :  { %12588 = vmatmul.mubr.msk.f32.gmra.mrb[234].mxu1 %vm1315_vm4, %v6689_v3 }
0x2324   :  { %v6693_v17 = vpop.f32.mrb[200].mxu0  ;;  %12590 = vmatprep.mubr.msk.f32.mxu1 %vm14447_vm2, %v20646_v49 }
0x2325   :  { %v6694_v48 = vadd.f32 %v6693_v17, %v20764_v4  ;;  %v12529_v56 = vpop.f32.mrb[201].mxu0 }
0x2327   :  { %12591 = vmatmul.mubr.msk.f32.gmra.mrb[236].mxu1 %vm1315_vm4, %v6694_v48 }
0x2328   :  { %v6698_v61 = vpop.f32.mrb[202].mxu0  ;;  %12593 = vmatprep.mubr.msk.f32.mxu1 %vm14447_vm2, %v20646_v49 }
0x2329   :  { %v6699_v29 = vadd.f32 %v6698_v61, %v20765_v7  ;;  %v12532_v10 = vpop.f32.mrb[203].mxu0 }
0x232b   :  { %12594 = vmatmul.mubr.msk.f32.gmra.mrb[238].mxu1 %vm1315_vm4, %v6699_v29 }
0x232c   :  { %v6703_v39 = vpop.f32.mrb[204].mxu0  ;;  %12596 = vmatprep.mubr.msk.f32.mxu1 %vm14447_vm2, %v20646_v49 }
0x232d   :  { %v6704_v24 = vadd.f32 %v6703_v39, %v20766_v52  ;;  %v12535_v1 = vpop.f32.mrb[205].mxu0 }
0x232f   :  { %12597 = vmatmul.mubr.msk.f32.gmra.mrb[240].mxu1 %vm1315_vm4, %v6704_v24 }
0x2330   :  { %v6708_v8 = vpop.f32.mrb[206].mxu0  ;;  %12599 = vmatprep.mubr.msk.f32.mxu1 %vm14447_vm2, %v20646_v49 }
0x2331   :  { %v6709_v9 = vadd.f32 %v6708_v8, %v20767_v58  ;;  %v12538_v15 = vpop.f32.mrb[207].mxu0 }
0x2333   :  { %12600 = vmatmul.mubr.msk.f32.gmra.mrb[242].mxu1 %vm1315_vm4, %v6709_v9 }
0x2334   :  { %v6713_v40 = vpop.f32.mrb[208].mxu0  ;;  %12602 = vmatprep.mubr.msk.f32.mxu1 %vm14447_vm2, %v20646_v49 }
0x2335   :  { %v6714_v28 = vadd.f32 %v6713_v40, %v20768_v6  ;;  %v12541_v23 = vpop.f32.mrb[209].mxu0 }
0x2337   :  { %12603 = vmatmul.mubr.msk.f32.gmra.mrb[244].mxu1 %vm1315_vm4, %v6714_v28 }
0x2338   :  { %v6718_v57 = vpop.f32.mrb[210].mxu0  ;;  %12605 = vmatprep.mubr.msk.f32.mxu1 %vm14447_vm2, %v20646_v49 }
0x2339   :  { %v6719_v37 = vadd.f32 %v6718_v57, %v20769_v55  ;;  %v12544_v47 = vpop.f32.mrb[211].mxu0 }
0x233b   :  { %12606 = vmatmul.mubr.msk.f32.gmra.mrb[246].mxu1 %vm1315_vm4, %v6719_v37 }
0x233c   :  { %v6723_v59 = vpop.f32.mrb[212].mxu0  ;;  %12608 = vmatprep.mubr.msk.f32.mxu1 %vm14447_vm2, %v20646_v49 }
0x233d   :  { %v6724_v34 = vadd.f32 %v6723_v59, %v20770_v2  ;;  %v12547_v36 = vpop.f32.mrb[213].mxu0  ;;  %v10136_v2 = vld [vmem:[%s20449_s9 + $0x60] sm:$0xff] }
0x233f   :  { %12609 = vmatmul.mubr.msk.f32.gmra.mrb[248].mxu1 %vm1315_vm4, %v6724_v34  ;;  %v10137_v34 = vld [vmem:[%s20449_s9 + $0x68] sm:$0xff] }
0x2340   :  { %v6728_v5 = vpop.f32.mrb[214].mxu0  ;;  %12611 = vmatprep.mubr.msk.f32.mxu1 %vm14447_vm2, %v20646_v49 }
0x2341   :  { %v6729_v51 = vadd.f32 %v6728_v5, %v20771_v25  ;;  %v12550_v62 = vpop.f32.mrb[215].mxu0  ;;  %v13716_v25 = vpack.c.bf16 %v10137_v34, %v10136_v2  ;;  %v19044_v2 = vld [vmem:[#allocation10 + $0x2] ss:$0 sm:$0xff] }
0x2342   :  { %v18815_v62 = vld [vmem:[%s20643_s18 + $0x18] sm:$0xff] }
0x2343   :  { %12612 = vmatmul.mubr.msk.f32.gmra.mrb[250].mxu1 %vm1315_vm4, %v6729_v51  ;;  %v18808_v51 = vld [vmem:[%s20643_s18] sm:$0xff] }
0x2344   :  { %12622 = vmatprep.mubr.msk.f32.mxu1 %vm14447_vm2, %v20646_v49 }
0x23d6   :  { %v6858_v41 = vpop.f32.mrb[218].mxu1 }
0x23d7   :  { %v12565_v50 = vpop.f32.mrb[219].mxu1 }
0x23d8   :  { %v18829_v50 = vld [vmem:[%s20643_s18 + $0x28] sm:$0xff] }
0x23da   :  { %v6863_v11 = vpop.f32.mrb[220].mxu1 }
0x23db   :  { %v13686_v42 = vpack.c.bf16 %v6863_v11, %v6858_v41  ;;  %v12568_v54 = vpop.f32.mrb[221].mxu1  ;;  %v18823_v41 = vld [vmem:[%s20643_s18 + $0x10] sm:$0xff]  ;;  %v18836_v11 = vld [vmem:[%s20643_s18 + $0x20] sm:$0xff] }
0x23dc   :  { %v18849_v54 = vld [vmem:[%s20643_s18 + $0x30] sm:$0xff] }
0x23dd   :  { %13687 = vmatpush1.bf16.msra.mxu0 %v13686_v42  ;;  %v18842_v42 = vld [vmem:[%s20643_s18 + $0x38] sm:$0xff] }
0x23de   :  { %v6868_v27 = vpop.f32.mrb[222].mxu1  ;;  %13688 = vmatprep.subr.bf16.mxu0 %v20696_v38 }
0x23df   :  { %v12571_v63 = vpop.f32.mrb[223].mxu1 }
0x23e0   :  { %v18862_v63 = vld [vmem:[%s20643_s18 + $0x40] sm:$0xff] }
0x23e2   :  { %v6873_v60 = vpop.f32.mrb[224].mxu1 }
0x23e3   :  { %v13689_v53 = vpack.c.bf16 %v6873_v60, %v6868_v27  ;;  %v12574_v22 = vpop.f32.mrb[225].mxu1  ;;  %v18855_v27 = vld [vmem:[%s20643_s18 + $0x48] sm:$0xff]  ;;  %v18868_v60 = vld [vmem:[%s20643_s18 + $0x58] sm:$0xff] }
0x23e4   :  { %v18881_v22 = vld [vmem:[%s20643_s18 + $0x68] sm:$0xff] }
0x23e5   :  { %13690 = vmatpush1.bf16.msra.mxu0 %v13689_v53  ;;  %v18875_v53 = vld [vmem:[%s20643_s18 + $0x50] sm:$0xff] }
0x23e6   :  { %v6878_v18 = vpop.f32.mrb[226].mxu1  ;;  %13691 = vmatprep.subr.bf16.mxu0 %v20696_v38 }
0x23e7   :  { %v12577_v21 = vpop.f32.mrb[227].mxu1 }
0x23e8   :  { %v18894_v21 = vld [vmem:[%s20643_s18 + $0x78] sm:$0xff] }
0x23ea   :  { %v6883_v12 = vpop.f32.mrb[228].mxu1 }
0x23eb   :  { %v13692_v3 = vpack.c.bf16 %v6883_v12, %v6878_v18  ;;  %v12580_v19 = vpop.f32.mrb[229].mxu1  ;;  %v18888_v18 = vld [vmem:[%s20643_s18 + $0x60] sm:$0xff]  ;;  %v18901_v12 = vld [vmem:[%s20643_s18 + $0x70] sm:$0xff] }
0x23ec   :  { %v18914_v19 = vld [vmem:[%s20643_s18 + $0x80] sm:$0xff] }
0x23ed   :  { %13693 = vmatpush1.bf16.msra.mxu0 %v13692_v3  ;;  %v18907_v3 = vld [vmem:[%s20643_s18 + $0x88] sm:$0xff] }
0x23ee   :  { %v6888_v17 = vpop.f32.mrb[230].mxu1  ;;  %13694 = vmatprep.subr.bf16.mxu0 %v20696_v38 }
0x23ef   :  { %v12583_v4 = vpop.f32.mrb[231].mxu1 }
0x23f0   :  { %v18927_v4 = vld [vmem:[%s20643_s18 + $0x90] sm:$0xff] }
0x23f2   :  { %v6893_v48 = vpop.f32.mrb[232].mxu1 }
0x23f3   :  { %v13695_v56 = vpack.c.bf16 %v6893_v48, %v6888_v17  ;;  %v12586_v61 = vpop.f32.mrb[233].mxu1  ;;  %v18920_v17 = vld [vmem:[%s20643_s18 + $0x98] sm:$0xff]  ;;  %v18933_v48 = vld [vmem:[%s20643_s18 + $0xa8] sm:$0xff] }
0x23f4   :  { %v18946_v61 = vld [vmem:[%s20643_s18 + $0xb8] sm:$0xff] }
0x23f5   :  { %13696 = vmatpush1.bf16.msra.mxu0 %v13695_v56  ;;  %v18940_v56 = vld [vmem:[%s20643_s18 + $0xa0] sm:$0xff] }
0x23f6   :  { %v6898_v7 = vpop.f32.mrb[234].mxu1  ;;  %13697 = vmatprep.subr.bf16.mxu0 %v20696_v38 }
0x23f7   :  { %v12589_v29 = vpop.f32.mrb[235].mxu1 }
0x23f8   :  { %v18959_v29 = vld [vmem:[%s20643_s18 + $0xc8] sm:$0xff] }
0x23fa   :  { %v6903_v10 = vpop.f32.mrb[236].mxu1 }
0x23fb   :  { %v13698_v39 = vpack.c.bf16 %v6903_v10, %v6898_v7  ;;  %v12592_v52 = vpop.f32.mrb[237].mxu1  ;;  %v18953_v7 = vld [vmem:[%s20643_s18 + $0xb0] sm:$0xff]  ;;  %v18966_v10 = vld [vmem:[%s20643_s18 + $0xc0] sm:$0xff] }
0x23fc   :  { %v18979_v52 = vld [vmem:[%s20643_s18 + $0xd0] sm:$0xff] }
0x23fd   :  { %13699 = vmatpush1.bf16.msra.mxu0 %v13698_v39  ;;  %v18972_v39 = vld [vmem:[%s20643_s18 + $0xd8] sm:$0xff] }
0x23fe   :  { %v6908_v24 = vpop.f32.mrb[238].mxu1  ;;  %13700 = vmatprep.subr.bf16.mxu0 %v20696_v38 }
0x23ff   :  { %v12595_v1 = vpop.f32.mrb[239].mxu1 }
0x2400   :  { %v18992_v1 = vld [vmem:[%s20643_s18 + $0xe0] sm:$0xff] }
0x2402   :  { %v6913_v8 = vpop.f32.mrb[240].mxu1 }
0x2403   :  { %v13701_v58 = vpack.c.bf16 %v6913_v8, %v6908_v24  ;;  %v12598_v9 = vpop.f32.mrb[241].mxu1  ;;  %v18985_v24 = vld [vmem:[%s20643_s18 + $0xe8] sm:$0xff]  ;;  %v18998_v8 = vld [vmem:[%s20643_s18 + $0xf8] sm:$0xff] }
0x2404   :  { %v19011_v9 = vld [vmem:[%s20643_s18 + $0x108] sm:$0x1f] }
0x2405   :  { %13702 = vmatpush1.bf16.msra.mxu0 %v13701_v58  ;;  %v19005_v58 = vld [vmem:[%s20643_s18 + $0xf0] sm:$0xff] }
0x2406   :  { %v6918_v15 = vpop.f32.mrb[242].mxu1  ;;  %13703 = vmatprep.subr.bf16.mxu0 %v20696_v38 }
0x2407   :  { %v12601_v40 = vpop.f32.mrb[243].mxu1 }
0x2408   :  { %v10115_v40 = vld [vmem:[%s20723_s29 + $0x40] sm:$0xff] }
0x240a   :  { %v6923_v6 = vpop.f32.mrb[244].mxu1 }
0x240b   :  { %v13704_v28 = vpack.c.bf16 %v6923_v6, %v6918_v15  ;;  %v12604_v23 = vpop.f32.mrb[245].mxu1  ;;  %v19018_v15 = vld [vmem:[%s20643_s18 + $0x100] sm:$0x1f]  ;;  %v10116_v6 = vld [vmem:[%s20723_s29 + $0x48] sm:$0xff] }
0x240c   :  { %v10117_v23 = vld [vmem:[%s20723_s29 + $0x50] sm:$0xff] }
0x240d   :  { %13705 = vmatpush1.bf16.msra.mxu0 %v13704_v28  ;;  %v13710_v28 = vpack.c.bf16 %v10116_v6, %v10115_v40  ;;  %v20772_v6 = vld [vmem:[#allocation17_spill] sm:$0xff] }
0x240e   :  { %v6928_v57 = vpop.f32.mrb[246].mxu1  ;;  %13706 = vmatprep.subr.bf16.mxu0 %v20696_v38 }
0x240f   :  { %v12607_v55 = vpop.f32.mrb[247].mxu1  ;;  %13711 = vmatpush3.bf16.msra.mxu1 %v13710_v28 }
0x2410   :  { %13712 = vmatprep.subr.bf16.mxu1 %v20696_v38  ;;  %v10138_v55 = vld [vmem:[%s20449_s9 + $0x70] sm:$0xff] }
0x2412   :  { %v6933_v37 = vpop.f32.mrb[248].mxu1 }
0x2413   :  { %v13707_v47 = vpack.c.bf16 %v6933_v37, %v6928_v57  ;;  %v12610_v59 = vpop.f32.mrb[249].mxu1  ;;  %v10118_v57 = vld [vmem:[%s20723_s29 + $0x58] sm:$0xff] }
0x2414   :  { %v13713_v37 = vpack.c.bf16 %v10118_v57, %v10117_v23 }
0x2415   :  { %13708 = vmatpush1.bf16.msra.mxu0 %v13707_v47  ;;  %v10139_v47 = vld [vmem:[%s20449_s9 + $0x78] sm:$0xff] }
0x2416   :  { %v6938_v36 = vpop.f32.mrb[250].mxu1  ;;  %6983 = vmatprep.subr.mxu0 %v20646_v49  ;;  %v13719_v59 = vpack.c.bf16 %v10139_v47, %v10138_v55  ;;  %13714 = vmatpush3.bf16.msra.mxu1 %v13713_v37  ;;  %v20773_v47 = vld [vmem:[#allocation18_spill] sm:$0xff] }
0x2417   :  { %v12613_v5 = vpop.f32.mrb[251].mxu1  ;;  %13721 = vmatprep.subr.bf16.mxu1 %v20696_v38 }
0x2419   :  { %10097 = vmatpush1.msk.msra.mxu0 %vm754_vm1, %v6938_v36 }
0x241a   :  { %7016 = vmatmul.mubr.f32.vlgmr.msra.gmra.mrb[216].mxu0 %v18808_v51  ;;  %13715 = vmatprep.subr.bf16.mxu0 %v20696_v38 }
0x241b   :  { %10099 = vmatprep.mubr.msk.f32.mxu0 %vm702_vm0, %v18815_v62  ;;  %13717 = vmatpush3.bf16.msra.mxu0 %v13716_v25 }
0x241c   :  { %13718 = vmatprep.subr.bf16.mxu0 %v20696_v38 }
0x241e   :  { %7021 = vmatmul.mubr.f32.gmra.mrb[218].mxu0 %v18823_v41 }
0x241f   :  { %10100 = vmatprep.mubr.msk.f32.mxu0 %vm702_vm0, %v18829_v50  ;;  %13720 = vmatpush3.bf16.msra.mxu0 %v13719_v59 }
0x2420   :  { %13745 = vmatprep.subr.bf16.mxu0 %v20696_v38 }
0x2422   :  { %7026 = vmatmul.mubr.f32.gmra.mrb[220].mxu0 %v18836_v11 }
0x2423   :  { %10101 = vmatprep.mubr.msk.f32.mxu0 %vm702_vm0, %v18842_v42 }
0x2426   :  { %7031 = vmatmul.mubr.f32.gmra.mrb[222].mxu0 %v18849_v54 }
0x2427   :  { %10102 = vmatprep.mubr.msk.f32.mxu0 %vm702_vm0, %v18855_v27 }
0x242a   :  { %7036 = vmatmul.mubr.f32.gmra.mrb[224].mxu0 %v18862_v63 }
0x242b   :  { %10103 = vmatprep.mubr.msk.f32.mxu0 %vm702_vm0, %v18868_v60 }
0x242e   :  { %7041 = vmatmul.mubr.f32.gmra.mrb[226].mxu0 %v18875_v53 }
0x242f   :  { %10104 = vmatprep.mubr.msk.f32.mxu0 %vm702_vm0, %v18881_v22 }
0x2432   :  { %7046 = vmatmul.mubr.f32.gmra.mrb[228].mxu0 %v18888_v18 }
0x2433   :  { %10105 = vmatprep.mubr.msk.f32.mxu0 %vm702_vm0, %v18894_v21 }
0x2436   :  { %7051 = vmatmul.mubr.f32.gmra.mrb[230].mxu0 %v18901_v12 }
0x2437   :  { %10106 = vmatprep.mubr.msk.f32.mxu0 %vm702_vm0, %v18907_v3 }
0x243a   :  { %7056 = vmatmul.mubr.f32.gmra.mrb[232].mxu0 %v18914_v19 }
0x243b   :  { %10107 = vmatprep.mubr.msk.f32.mxu0 %vm702_vm0, %v18920_v17 }
0x243e   :  { %7061 = vmatmul.mubr.f32.gmra.mrb[234].mxu0 %v18927_v4 }
0x243f   :  { %10108 = vmatprep.mubr.msk.f32.mxu0 %vm702_vm0, %v18933_v48 }
0x2442   :  { %7066 = vmatmul.mubr.f32.gmra.mrb[236].mxu0 %v18940_v56 }
0x2443   :  { %10109 = vmatprep.mubr.msk.f32.mxu0 %vm702_vm0, %v18946_v61 }
0x2446   :  { %7071 = vmatmul.mubr.f32.gmra.mrb[238].mxu0 %v18953_v7 }
0x2447   :  { %10110 = vmatprep.mubr.msk.f32.mxu0 %vm702_vm0, %v18959_v29 }
0x244a   :  { %7076 = vmatmul.mubr.f32.gmra.mrb[240].mxu0 %v18966_v10 }
0x244b   :  { %10111 = vmatprep.mubr.msk.f32.mxu0 %vm702_vm0, %v18972_v39 }
0x244e   :  { %7081 = vmatmul.mubr.f32.gmra.mrb[242].mxu0 %v18979_v52 }
0x244f   :  { %10112 = vmatprep.mubr.msk.f32.mxu0 %vm702_vm0, %v18985_v24 }
0x2452   :  { %7086 = vmatmul.mubr.f32.gmra.mrb[244].mxu0 %v18992_v1 }
0x2453   :  { %10113 = vmatprep.mubr.msk.f32.mxu0 %vm702_vm0, %v18998_v8 }
0x2456   :  { %7091 = vmatmul.mubr.f32.gmra.mrb[246].mxu0 %v19005_v58 }
0x2457   :  { %10114 = vmatprep.mubr.msk.f32.mxu0 %vm702_vm0, %v19011_v9 }
0x245a   :  { %7096 = vmatmul.mubr.f32.gmra.mrb[248].mxu0 %v19018_v15 }
0x245b   :  { %12681 = vmatprep.mubr.msk.f32.mxu0 %vm14447_vm2, %v20646_v49 }
0x24ed   :  { %v7017_v34 = vpop.f32.mrb[216].mxu0 }
0x24ee   :  { %v7018_v36 = vadd.f32 %v19044_v2, %v7017_v34  ;;  %v7019_v5 = vpop.f32.mrb[217].mxu0 }
0x24f0   :  { %v7101_v25 = vmax.f32 %v7018_v36, 0.0 }
0x24f1   :  { %v7022_v40 = vpop.f32.mrb[218].mxu0 }
0x24f2   :  { %v19048_v28 = vadd.f32 %v7101_v25, %v20772_v6  ;;  %v7023_v23 = vadd.f32 %v19044_v2, %v7022_v40  ;;  %v7024_v57 = vpop.f32.mrb[219].mxu0  ;;  %v20775_v40 = vld [vmem:[#allocation20_spill] sm:$0xff] }
0x24f4   :  { %v7102_v55 = vmax.f32 %v7023_v23, 0.0  ;;  %12623 = vmatmul.mubr.msk.f32.vlgmr.msra.gmra.mrb[252].mxu1 %vm930_vm3, %v19048_v28  ;;  %12682 = vmatmul.mubr.msk.f32.vlgmr.msra.gmra.mrb[250].mxu0 %vm930_vm3, %v19048_v28 }
0x24f5   :  { %v7027_v37 = vpop.f32.mrb[220].mxu0  ;;  %12625 = vmatprep.mubr.msk.f32.mxu1 %vm14447_vm2, %v20646_v49  ;;  %12684 = vmatprep.mubr.msk.f32.mxu0 %vm14447_vm2, %v20646_v49 }
0x24f6   :  { %v19060_v59 = vadd.f32 %v7102_v55, %v20773_v47  ;;  %v7028_v34 = vadd.f32 %v19044_v2, %v7027_v37  ;;  %v7029_v36 = vpop.f32.mrb[221].mxu0  ;;  %v20777_v47 = vld [vmem:[#allocation21_spill] sm:$0xff] }
0x24f8   :  { %20774 = vst [vmem:[#allocation19_spill] sm:$0xff] %v19060_v59  ;;  %v7103_v5 = vmax.f32 %v7028_v34, 0.0  ;;  %12626 = vmatmul.mubr.msk.f32.gmra.mrb[254].mxu1 %vm930_vm3, %v19060_v59  ;;  %12685 = vmatmul.mubr.msk.f32.gmra.mrb[252].mxu0 %vm930_vm3, %v19060_v59 }
0x24f9   :  { %v7032_v25 = vpop.f32.mrb[222].mxu0  ;;  %12628 = vmatprep.mubr.msk.f32.mxu1 %vm14447_vm2, %v20646_v49  ;;  %12687 = vmatprep.mubr.msk.f32.mxu0 %vm14447_vm2, %v20646_v49 }
0x24fa   :  { %v19072_v6 = vadd.f32 %v7103_v5, %v20775_v40  ;;  %v7033_v23 = vadd.f32 %v19044_v2, %v7032_v25  ;;  %v7034_v57 = vpop.f32.mrb[223].mxu0 }
0x24fc   :  { %20776 = vst [vmem:[#allocation17_spill] sm:$0xff] %v19072_v6  ;;  %v7104_v55 = vmax.f32 %v7033_v23, 0.0  ;;  %12629 = vmatmul.mubr.msk.f32.gmra.mrb[0].mxu1 %vm930_vm3, %v19072_v6  ;;  %12688 = vmatmul.mubr.msk.f32.gmra.mrb[254].mxu0 %vm930_vm3, %v19072_v6  ;;  %v20779_v23 = vld [vmem:[#allocation22_spill] sm:$0xff] }
0x24fd   :  { %v7037_v37 = vpop.f32.mrb[224].mxu0  ;;  %12631 = vmatprep.mubr.msk.f32.mxu1 %vm14447_vm2, %v20646_v49  ;;  %12690 = vmatprep.mubr.msk.f32.mxu0 %vm14447_vm2, %v20646_v49 }
0x24fe   :  { %v19084_v34 = vadd.f32 %v7104_v55, %v20777_v47  ;;  %v7038_v36 = vadd.f32 %v19044_v2, %v7037_v37  ;;  %v7039_v5 = vpop.f32.mrb[225].mxu0 }
0x24ff   :  { %v20781_v5 = vld [vmem:[#allocation23_spill] sm:$0xff] }
0x2500   :  { %20778 = vst [vmem:[#allocation18_spill] sm:$0xff] %v19084_v34  ;;  %v7105_v25 = vmax.f32 %v7038_v36, 0.0  ;;  %12632 = vmatmul.mubr.msk.f32.gmra.mrb[2].mxu1 %vm930_vm3, %v19084_v34  ;;  %12691 = vmatmul.mubr.msk.f32.gmra.mrb[0].mxu0 %vm930_vm3, %v19084_v34 }
0x2501   :  { %v7042_v40 = vpop.f32.mrb[226].mxu0  ;;  %12634 = vmatprep.mubr.msk.f32.mxu1 %vm14447_vm2, %v20646_v49  ;;  %12693 = vmatprep.mubr.msk.f32.mxu0 %vm14447_vm2, %v20646_v49 }
0x2502   :  { %v19096_v57 = vadd.f32 %v7105_v25, %v20779_v23  ;;  %v7043_v55 = vadd.f32 %v19044_v2, %v7042_v40  ;;  %v7044_v37 = vpop.f32.mrb[227].mxu0 }
0x2504   :  { %20780 = vst [vmem:[#allocation20_spill] sm:$0xff] %v19096_v57  ;;  %v7106_v47 = vmax.f32 %v7043_v55, 0.0  ;;  %12635 = vmatmul.mubr.msk.f32.gmra.mrb[4].mxu1 %vm930_vm3, %v19096_v57  ;;  %12694 = vmatmul.mubr.msk.f32.gmra.mrb[2].mxu0 %vm930_vm3, %v19096_v57  ;;  %v20783_v57 = vld [vmem:[#allocation24_spill] sm:$0xff] }
0x2505   :  { %v7047_v36 = vpop.f32.mrb[228].mxu0  ;;  %12637 = vmatprep.mubr.msk.f32.mxu1 %vm14447_vm2, %v20646_v49  ;;  %12696 = vmatprep.mubr.msk.f32.mxu0 %vm14447_vm2, %v20646_v49 }
0x2506   :  { %v19108_v25 = vadd.f32 %v7106_v47, %v20781_v5  ;;  %v7048_v40 = vadd.f32 %v19044_v2, %v7047_v36  ;;  %v7049_v23 = vpop.f32.mrb[229].mxu0 }
0x2508   :  { %20782 = vst [vmem:[#allocation21_spill] sm:$0xff] %v19108_v25  ;;  %v7107_v55 = vmax.f32 %v7048_v40, 0.0  ;;  %12638 = vmatmul.mubr.msk.f32.gmra.mrb[6].mxu1 %vm930_vm3, %v19108_v25  ;;  %12697 = vmatmul.mubr.msk.f32.gmra.mrb[4].mxu0 %vm930_vm3, %v19108_v25  ;;  %v20785_v25 = vld [vmem:[#allocation25_spill] sm:$0xff] }
0x2509   :  { %v7052_v37 = vpop.f32.mrb[230].mxu0  ;;  %12640 = vmatprep.mubr.msk.f32.mxu1 %vm14447_vm2, %v20646_v49  ;;  %12699 = vmatprep.mubr.msk.f32.mxu0 %vm14447_vm2, %v20646_v49 }
0x250a   :  { %v19120_v47 = vadd.f32 %v7107_v55, %v20783_v57  ;;  %v7053_v36 = vadd.f32 %v19044_v2, %v7052_v37  ;;  %v7054_v5 = vpop.f32.mrb[231].mxu0 }
0x250c   :  { %20784 = vst [vmem:[#allocation22_spill] sm:$0xff] %v19120_v47  ;;  %v7108_v40 = vmax.f32 %v7053_v36, 0.0  ;;  %12641 = vmatmul.mubr.msk.f32.gmra.mrb[8].mxu1 %vm930_vm3, %v19120_v47  ;;  %12700 = vmatmul.mubr.msk.f32.gmra.mrb[6].mxu0 %vm930_vm3, %v19120_v47  ;;  %v20787_v47 = vld [vmem:[#allocation26_spill] sm:$0xff] }
0x250d   :  { %v7057_v23 = vpop.f32.mrb[232].mxu0  ;;  %12643 = vmatprep.mubr.msk.f32.mxu1 %vm14447_vm2, %v20646_v49  ;;  %12702 = vmatprep.mubr.msk.f32.mxu0 %vm14447_vm2, %v20646_v49 }
0x250e   :  { %v19132_v57 = vadd.f32 %v7108_v40, %v20785_v25  ;;  %v7058_v55 = vadd.f32 %v19044_v2, %v7057_v23  ;;  %v7059_v37 = vpop.f32.mrb[233].mxu0 }
0x2510   :  { %20786 = vst [vmem:[#allocation23_spill] sm:$0xff] %v19132_v57  ;;  %v7109_v36 = vmax.f32 %v7058_v55, 0.0  ;;  %12644 = vmatmul.mubr.msk.f32.gmra.mrb[10].mxu1 %vm930_vm3, %v19132_v57  ;;  %12703 = vmatmul.mubr.msk.f32.gmra.mrb[8].mxu0 %vm930_vm3, %v19132_v57  ;;  %v20789_v57 = vld [vmem:[#allocation27_spill] sm:$0xff] }
0x2511   :  { %v7062_v5 = vpop.f32.mrb[234].mxu0  ;;  %12646 = vmatprep.mubr.msk.f32.mxu1 %vm14447_vm2, %v20646_v49  ;;  %12705 = vmatprep.mubr.msk.f32.mxu0 %vm14447_vm2, %v20646_v49 }
0x2512   :  { %v19144_v25 = vadd.f32 %v7109_v36, %v20787_v47  ;;  %v7063_v40 = vadd.f32 %v19044_v2, %v7062_v5  ;;  %v7064_v23 = vpop.f32.mrb[235].mxu0 }
0x2514   :  { %20788 = vst [vmem:[#allocation24_spill] sm:$0xff] %v19144_v25  ;;  %v7110_v55 = vmax.f32 %v7063_v40, 0.0  ;;  %12647 = vmatmul.mubr.msk.f32.gmra.mrb[12].mxu1 %vm930_vm3, %v19144_v25  ;;  %12706 = vmatmul.mubr.msk.f32.gmra.mrb[10].mxu0 %vm930_vm3, %v19144_v25  ;;  %v20791_v25 = vld [vmem:[#allocation28_spill] sm:$0xff] }
0x2515   :  { %v7067_v37 = vpop.f32.mrb[236].mxu0  ;;  %12649 = vmatprep.mubr.msk.f32.mxu1 %vm14447_vm2, %v20646_v49  ;;  %12708 = vmatprep.mubr.msk.f32.mxu0 %vm14447_vm2, %v20646_v49 }
0x2516   :  { %v19156_v47 = vadd.f32 %v7110_v55, %v20789_v57  ;;  %v7068_v36 = vadd.f32 %v19044_v2, %v7067_v37  ;;  %v7069_v5 = vpop.f32.mrb[237].mxu0 }
0x2518   :  { %20790 = vst [vmem:[#allocation25_spill] sm:$0xff] %v19156_v47  ;;  %v7111_v40 = vmax.f32 %v7068_v36, 0.0  ;;  %12650 = vmatmul.mubr.msk.f32.gmra.mrb[14].mxu1 %vm930_vm3, %v19156_v47  ;;  %12709 = vmatmul.mubr.msk.f32.gmra.mrb[12].mxu0 %vm930_vm3, %v19156_v47  ;;  %v20793_v47 = vld [vmem:[#allocation29_spill] sm:$0xff] }
0x2519   :  { %v7072_v23 = vpop.f32.mrb[238].mxu0  ;;  %12652 = vmatprep.mubr.msk.f32.mxu1 %vm14447_vm2, %v20646_v49  ;;  %12711 = vmatprep.mubr.msk.f32.mxu0 %vm14447_vm2, %v20646_v49 }
0x251a   :  { %v19168_v57 = vadd.f32 %v7111_v40, %v20791_v25  ;;  %v7073_v55 = vadd.f32 %v19044_v2, %v7072_v23  ;;  %v7074_v37 = vpop.f32.mrb[239].mxu0 }
0x251c   :  { %20792 = vst [vmem:[#allocation26_spill] sm:$0xff] %v19168_v57  ;;  %v7112_v36 = vmax.f32 %v7073_v55, 0.0  ;;  %12653 = vmatmul.mubr.msk.f32.gmra.mrb[16].mxu1 %vm930_vm3, %v19168_v57  ;;  %12712 = vmatmul.mubr.msk.f32.gmra.mrb[14].mxu0 %vm930_vm3, %v19168_v57  ;;  %v20795_v57 = vld [vmem:[#allocation30_spill] sm:$0xff] }
0x251d   :  { %v7077_v5 = vpop.f32.mrb[240].mxu0  ;;  %12655 = vmatprep.mubr.msk.f32.mxu1 %vm14447_vm2, %v20646_v49  ;;  %12714 = vmatprep.mubr.msk.f32.mxu0 %vm14447_vm2, %v20646_v49 }
0x251e   :  { %v19180_v25 = vadd.f32 %v7112_v36, %v20793_v47  ;;  %v7078_v40 = vadd.f32 %v19044_v2, %v7077_v5  ;;  %v7079_v23 = vpop.f32.mrb[241].mxu0 }
0x2520   :  { %20794 = vst [vmem:[#allocation27_spill] sm:$0xff] %v19180_v25  ;;  %v7113_v55 = vmax.f32 %v7078_v40, 0.0  ;;  %12656 = vmatmul.mubr.msk.f32.gmra.mrb[18].mxu1 %vm930_vm3, %v19180_v25  ;;  %12715 = vmatmul.mubr.msk.f32.gmra.mrb[16].mxu0 %vm930_vm3, %v19180_v25  ;;  %v20797_v25 = vld [vmem:[#allocation31_spill] sm:$0xff] }
0x2521   :  { %v7082_v37 = vpop.f32.mrb[242].mxu0  ;;  %12658 = vmatprep.mubr.msk.f32.mxu1 %vm14447_vm2, %v20646_v49  ;;  %12717 = vmatprep.mubr.msk.f32.mxu0 %vm14447_vm2, %v20646_v49 }
0x2522   :  { %v19192_v47 = vadd.f32 %v7113_v55, %v20795_v57  ;;  %v7083_v36 = vadd.f32 %v19044_v2, %v7082_v37  ;;  %v7084_v5 = vpop.f32.mrb[243].mxu0 }
0x2524   :  { %20796 = vst [vmem:[#allocation28_spill] sm:$0xff] %v19192_v47  ;;  %v7114_v40 = vmax.f32 %v7083_v36, 0.0  ;;  %12659 = vmatmul.mubr.msk.f32.gmra.mrb[20].mxu1 %vm930_vm3, %v19192_v47  ;;  %12718 = vmatmul.mubr.msk.f32.gmra.mrb[18].mxu0 %vm930_vm3, %v19192_v47  ;;  %v20799_v47 = vld [vmem:[#allocation32_spill] sm:$0xff] }
0x2525   :  { %v7087_v23 = vpop.f32.mrb[244].mxu0  ;;  %12661 = vmatprep.mubr.msk.f32.mxu1 %vm14447_vm2, %v20646_v49  ;;  %12720 = vmatprep.mubr.msk.f32.mxu0 %vm14447_vm2, %v20646_v49 }
0x2526   :  { %v19204_v57 = vadd.f32 %v7114_v40, %v20797_v25  ;;  %v7088_v55 = vadd.f32 %v19044_v2, %v7087_v23  ;;  %v7089_v37 = vpop.f32.mrb[245].mxu0 }
0x2528   :  { %20798 = vst [vmem:[#allocation29_spill] sm:$0xff] %v19204_v57  ;;  %v7115_v36 = vmax.f32 %v7088_v55, 0.0  ;;  %12662 = vmatmul.mubr.msk.f32.gmra.mrb[22].mxu1 %vm930_vm3, %v19204_v57  ;;  %12721 = vmatmul.mubr.msk.f32.gmra.mrb[20].mxu0 %vm930_vm3, %v19204_v57  ;;  %v20801_v57 = vld [vmem:[#allocation33_spill] sm:$0xff] }
0x2529   :  { %v7092_v5 = vpop.f32.mrb[246].mxu0  ;;  %12664 = vmatprep.mubr.msk.f32.mxu1 %vm14447_vm2, %v20646_v49  ;;  %12723 = vmatprep.mubr.msk.f32.mxu0 %vm14447_vm2, %v20646_v49 }
0x252a   :  { %v19216_v25 = vadd.f32 %v7115_v36, %v20799_v47  ;;  %v7093_v40 = vadd.f32 %v19044_v2, %v7092_v5  ;;  %v7094_v23 = vpop.f32.mrb[247].mxu0 }
0x252b   :  { %v20803_v23 = vld [vmem:[#allocation34_spill] sm:$0xff] }
0x252c   :  { %20800 = vst [vmem:[#allocation30_spill] sm:$0xff] %v19216_v25  ;;  %v7116_v55 = vmax.f32 %v7093_v40, 0.0  ;;  %12665 = vmatmul.mubr.msk.f32.gmra.mrb[24].mxu1 %vm930_vm3, %v19216_v25  ;;  %12724 = vmatmul.mubr.msk.f32.gmra.mrb[22].mxu0 %vm930_vm3, %v19216_v25 }
0x252d   :  { %v7097_v37 = vpop.f32.mrb[248].mxu0  ;;  %12667 = vmatprep.mubr.msk.f32.mxu1 %vm14447_vm2, %v20646_v49  ;;  %12726 = vmatprep.mubr.msk.f32.mxu0 %vm14447_vm2, %v20646_v49 }
0x252e   :  { %v19228_v47 = vadd.f32 %v7116_v55, %v20801_v57  ;;  %v7098_v36 = vadd.f32 %v19044_v2, %v7097_v37  ;;  %v7099_v5 = vpop.f32.mrb[249].mxu0 }
0x2530   :  { %20802 = vst [vmem:[#allocation31_spill] sm:$0xff] %v19228_v47  ;;  %v7117_v40 = vmax.f32 %v7098_v36, 0.0  ;;  %12668 = vmatmul.mubr.msk.f32.gmra.mrb[26].mxu1 %vm930_vm3, %v19228_v47  ;;  %12727 = vmatmul.mubr.msk.f32.gmra.mrb[24].mxu0 %vm930_vm3, %v19228_v47 }
0x2531   :  { %12670 = vmatprep.mubr.msk.f32.mxu1 %vm14447_vm2, %v20646_v49  ;;  %12729 = vmatprep.mubr.msk.f32.mxu0 %vm14447_vm2, %v20646_v49 }
0x2532   :  { %v19240_v25 = vadd.f32 %v7117_v40, %v20803_v23  ;;  %v10177_v23 = vld [vmem:[%s20451_s11 + $0x90] sm:$0xff] }
0x2534   :  { %20804 = vst [vmem:[#allocation32_spill] sm:$0xff] %v19240_v25  ;;  %12671 = vmatmul.mubr.msk.f32.gmra.mrb[28].mxu1 %vm930_vm3, %v19240_v25  ;;  %12730 = vmatmul.mubr.msk.f32.gmra.mrb[26].mxu0 %vm930_vm3, %v19240_v25  ;;  %v10179_v25 = vld [vmem:[%s20451_s11 + $0xa0] sm:$0xff] }
0x2535   :  { %10160 = vmatprep.mubr.msk.f32.mxu1 %vm702_vm0, %v18694_v13  ;;  %12744 = vmatprep.mubr.msk.f32.mxu0 %vm14447_vm2, %v20646_v49  ;;  %v10178_v13 = vld [vmem:[%s20451_s11 + $0x98] sm:$0xff] }
0x25c7   :  { %v7257_v2 = vpop.f32.mrb[252].mxu1  ;;  %v7431_v57 = vpop.f32.mrb[250].mxu0 }
0x25c8   :  { %v19251_v55 = vadd.f32 %v7257_v2, %v17929_v0  ;;  %v12624_v37 = vpop.f32.mrb[253].mxu1  ;;  %v12683_v36 = vpop.f32.mrb[251].mxu0 }
0x25c9   :  { %v13746_v36 = vpack.c.bf16 %v10178_v13, %v10177_v23 }
0x25ca   :  { %20805 = vst [vmem:[#allocation33_spill] sm:$0xff] %v19251_v55  ;;  %v10180_v55 = vld [vmem:[%s20451_s11 + $0xa8] sm:$0xff] }
0x25cb   :  { %v7262_v5 = vpop.f32.mrb[254].mxu1  ;;  %v7436_v40 = vpop.f32.mrb[252].mxu0  ;;  %13747 = vmatpush3.bf16.msra.mxu0 %v13746_v36  ;;  %v13749_v34 = vpack.c.bf16 %v10180_v55, %v10179_v25 }
0x25cc   :  { %v19263_v47 = vadd.f32 %v7262_v5, %v17932_v45  ;;  %v13722_v0 = vpack.c.bf16 %v7436_v40, %v7431_v57  ;;  %v12627_v2 = vpop.f32.mrb[255].mxu1  ;;  %v12686_v37 = vpop.f32.mrb[253].mxu0  ;;  %13748 = vmatprep.subr.bf16.mxu0 %v20696_v38 }
0x25ce   :  { %13723 = vmatpush1.bf16.msra.mxu1 %v13722_v0 }
0x25cf   :  { %v7267_v6 = vpop.f32.mrb[0].mxu1  ;;  %v7441_v59 = vpop.f32.mrb[254].mxu0  ;;  %13724 = vmatprep.subr.bf16.mxu1 %v20696_v38  ;;  %13750 = vmatpush3.bf16.msra.mxu0 %v13749_v34 }
0x25d0   :  { %v19271_v45 = vadd.f32 %v7267_v6, %v17935_v35  ;;  %v12630_v57 = vpop.f32.mrb[1].mxu1  ;;  %v12689_v5 = vpop.f32.mrb[255].mxu0  ;;  %13751 = vmatprep.subr.bf16.mxu0 %v20696_v38 }
0x25d3   :  { %v7272_v40 = vpop.f32.mrb[2].mxu1  ;;  %v7446_v23 = vpop.f32.mrb[0].mxu0 }
0x25d4   :  { %v19275_v13 = vadd.f32 %v7272_v40, %v17938_v46  ;;  %v13725_v25 = vpack.c.bf16 %v7446_v23, %v7441_v59  ;;  %v12633_v55 = vpop.f32.mrb[3].mxu1  ;;  %v12692_v0 = vpop.f32.mrb[1].mxu0 }
0x25d5   :  { %v20808_v55 = vld [vmem:[#allocation35_spill] sm:$0xff] }
0x25d6   :  { %13726 = vmatpush1.bf16.msra.mxu1 %v13725_v25 }
0x25d7   :  { %v7277_v2 = vpop.f32.mrb[4].mxu1  ;;  %v7451_v37 = vpop.f32.mrb[2].mxu0  ;;  %13727 = vmatprep.subr.bf16.mxu1 %v20696_v38 }
0x25d8   :  { %v19279_v35 = vadd.f32 %v7277_v2, %v17941_v26  ;;  %v12636_v6 = vpop.f32.mrb[5].mxu1  ;;  %v12695_v34 = vpop.f32.mrb[3].mxu0 }
0x25da   :  { %20806 = vst [vmem:[#allocation34_spill] sm:$0xff] %v19279_v35 }
0x25db   :  { %v7282_v36 = vpop.f32.mrb[6].mxu1  ;;  %v7456_v57 = vpop.f32.mrb[4].mxu0 }
0x25dc   :  { %v19282_v5 = vadd.f32 %v7282_v36, %v17944_v30  ;;  %v13728_v46 = vpack.c.bf16 %v7456_v57, %v7451_v37  ;;  %v12639_v40 = vpop.f32.mrb[7].mxu1  ;;  %v12698_v59 = vpop.f32.mrb[5].mxu0 }
0x25dd   :  { %v20810_v40 = vld [vmem:[#allocation36_spill] sm:$0xff] }
0x25de   :  { %20807 = vst [vmem:[#allocation38_spill] sm:$0xff] %v19282_v5  ;;  %13729 = vmatpush1.bf16.msra.mxu1 %v13728_v46 }
0x25df   :  { %v7287_v23 = vpop.f32.mrb[8].mxu1  ;;  %v7461_v25 = vpop.f32.mrb[6].mxu0  ;;  %13730 = vmatprep.subr.bf16.mxu1 %v20696_v38 }
0x25e0   :  { %v19286_v0 = vadd.f32 %v7287_v23, %v20808_v55  ;;  %v12642_v26 = vpop.f32.mrb[9].mxu1  ;;  %v12701_v2 = vpop.f32.mrb[7].mxu0 }
0x25e2   :  { %20809 = vst [vmem:[#allocation35_spill] sm:$0xff] %v19286_v0  ;;  %v20811_v0 = vld [vmem:[#allocation37_spill] sm:$0xff] }
0x25e3   :  { %v7292_v6 = vpop.f32.mrb[10].mxu1  ;;  %v7466_v34 = vpop.f32.mrb[8].mxu0 }
0x25e4   :  { %v19289_v35 = vadd.f32 %v7292_v6, %v17950_v33  ;;  %v13731_v30 = vpack.c.bf16 %v7466_v34, %v7461_v25  ;;  %v12645_v36 = vpop.f32.mrb[11].mxu1  ;;  %v12704_v37 = vpop.f32.mrb[9].mxu0 }
0x25e6   :  { %13732 = vmatpush1.bf16.msra.mxu1 %v13731_v30 }
0x25e7   :  { %v7297_v57 = vpop.f32.mrb[12].mxu1  ;;  %v7471_v46 = vpop.f32.mrb[10].mxu0  ;;  %13733 = vmatprep.subr.bf16.mxu1 %v20696_v38 }
0x25e8   :  { %v19293_v59 = vadd.f32 %v7297_v57, %v20810_v40  ;;  %v12648_v23 = vpop.f32.mrb[13].mxu1  ;;  %v12707_v55 = vpop.f32.mrb[11].mxu0 }
0x25eb   :  { %v7302_v26 = vpop.f32.mrb[14].mxu1  ;;  %v7476_v2 = vpop.f32.mrb[12].mxu0 }
0x25ec   :  { %v19296_v5 = vadd.f32 %v7302_v26, %v20811_v0  ;;  %v13734_v33 = vpack.c.bf16 %v7476_v2, %v7471_v46  ;;  %v12651_v6 = vpop.f32.mrb[15].mxu1  ;;  %v12710_v25 = vpop.f32.mrb[13].mxu0 }
0x25ee   :  { %13735 = vmatpush1.bf16.msra.mxu1 %v13734_v33 }
0x25ef   :  { %v7307_v34 = vpop.f32.mrb[16].mxu1  ;;  %v7481_v30 = vpop.f32.mrb[14].mxu0  ;;  %13736 = vmatprep.subr.bf16.mxu1 %v20696_v38 }
0x25f0   :  { %v19300_v36 = vadd.f32 %v7307_v34, %v17959_v32  ;;  %v12654_v37 = vpop.f32.mrb[17].mxu1  ;;  %v12713_v57 = vpop.f32.mrb[15].mxu0 }
0x25f3   :  { %v7312_v40 = vpop.f32.mrb[18].mxu1  ;;  %v7486_v23 = vpop.f32.mrb[16].mxu0 }
0x25f4   :  { %v19303_v55 = vadd.f32 %v7312_v40, %v17961_v31  ;;  %v13737_v0 = vpack.c.bf16 %v7486_v23, %v7481_v30  ;;  %v12657_v26 = vpop.f32.mrb[19].mxu1  ;;  %v12716_v46 = vpop.f32.mrb[17].mxu0 }
0x25f6   :  { %13738 = vmatpush1.bf16.msra.mxu1 %v13737_v0 }
0x25f7   :  { %v7317_v2 = vpop.f32.mrb[20].mxu1  ;;  %v7491_v33 = vpop.f32.mrb[18].mxu0  ;;  %13739 = vmatprep.subr.bf16.mxu1 %v20696_v38 }
0x25f8   :  { %v19307_v6 = vadd.f32 %v7317_v2, %v17963_v16  ;;  %v12660_v32 = vpop.f32.mrb[21].mxu1  ;;  %v12719_v25 = vpop.f32.mrb[19].mxu0 }
0x25fb   :  { %v7322_v34 = vpop.f32.mrb[22].mxu1  ;;  %v7496_v37 = vpop.f32.mrb[20].mxu0 }
0x25fc   :  { %v19310_v57 = vadd.f32 %v7322_v34, %v17965_v14  ;;  %v13740_v31 = vpack.c.bf16 %v7496_v37, %v7491_v33  ;;  %v12663_v40 = vpop.f32.mrb[23].mxu1  ;;  %v12722_v30 = vpop.f32.mrb[21].mxu0 }
0x25fe   :  { %13741 = vmatpush1.bf16.msra.mxu1 %v13740_v31 }
0x25ff   :  { %v7327_v23 = vpop.f32.mrb[24].mxu1  ;;  %v7501_v0 = vpop.f32.mrb[22].mxu0  ;;  %13742 = vmatprep.subr.bf16.mxu1 %v20696_v38 }
0x2600   :  { %v19314_v26 = vadd.f32 %v7327_v23, %v17967_v44  ;;  %v12666_v16 = vpop.f32.mrb[25].mxu1  ;;  %v12725_v46 = vpop.f32.mrb[23].mxu0 }
0x2603   :  { %v7332_v2 = vpop.f32.mrb[26].mxu1  ;;  %v7506_v32 = vpop.f32.mrb[24].mxu0 }
0x2604   :  { %v19317_v25 = vadd.f32 %v7332_v2, %v17969_v20  ;;  %v13743_v14 = vpack.c.bf16 %v7506_v32, %v7501_v0  ;;  %v12669_v34 = vpop.f32.mrb[27].mxu1  ;;  %v12728_v33 = vpop.f32.mrb[25].mxu0  ;;  %v14176_v20 = vld [vmem:[%s20647_s16 + $0x8] sm:$0xff] }
0x2606   :  { %13744 = vmatpush1.bf16.msra.mxu1 %v13743_v14 }
0x2607   :  { %v7337_v37 = vpop.f32.mrb[28].mxu1  ;;  %v7511_v31 = vpop.f32.mrb[26].mxu0  ;;  %7556 = vmatprep.subr.mxu1 %v20646_v49 }
0x2608   :  { %v19321_v40 = vadd.f32 %v7337_v37, %v17971_v43  ;;  %v12672_v44 = vpop.f32.mrb[29].mxu1  ;;  %v12731_v30 = vpop.f32.mrb[27].mxu0  ;;  %v10181_v43 = vld [vmem:[%s20451_s11 + $0xb0] sm:$0xff] }
0x260a   :  { %10159 = vmatpush1.msk.msra.mxu1 %vm754_vm1, %v7511_v31 }
0x260b   :  { %7589 = vmatmul.mubr.f32.vlgmr.msra.gmra.mrb[30].mxu1 %v18808_v51  ;;  %13754 = vmatprep.subr.bf16.mxu1 %v20696_v38  ;;  %v10182_v51 = vld [vmem:[%s20451_s11 + $0xb8] sm:$0xff] }
0x260c   :  { %10161 = vmatprep.mubr.msk.f32.mxu1 %vm702_vm0, %v18815_v62  ;;  %v13752_v62 = vpack.c.bf16 %v10182_v51, %v10181_v43 }
0x260e   :  { %13753 = vmatpush3.bf16.msra.mxu0 %v13752_v62 }
0x260f   :  { %7594 = vmatmul.mubr.f32.gmra.mrb[32].mxu1 %v18823_v41  ;;  %13790 = vmatprep.subr.bf16.mxu0 %v20696_v38  ;;  %v19388_v41 = vld [vmem:[%s20450_s10 + $0x3] ss:$0 sm:$0xff] }
0x2610   :  { %10162 = vmatprep.mubr.msk.f32.mxu1 %vm702_vm0, %v18829_v50 }
0x2613   :  { %7599 = vmatmul.mubr.f32.gmra.mrb[34].mxu1 %v18836_v11 }
0x2614   :  { %10163 = vmatprep.mubr.msk.f32.mxu1 %vm702_vm0, %v18842_v42 }
0x2617   :  { %7604 = vmatmul.mubr.f32.gmra.mrb[36].mxu1 %v18849_v54 }
0x2618   :  { %10164 = vmatprep.mubr.msk.f32.mxu1 %vm702_vm0, %v18855_v27 }
0x261b   :  { %7609 = vmatmul.mubr.f32.gmra.mrb[38].mxu1 %v18862_v63 }
0x261c   :  { %10165 = vmatprep.mubr.msk.f32.mxu1 %vm702_vm0, %v18868_v60 }
0x261f   :  { %7614 = vmatmul.mubr.f32.gmra.mrb[40].mxu1 %v18875_v53 }
0x2620   :  { %10166 = vmatprep.mubr.msk.f32.mxu1 %vm702_vm0, %v18881_v22 }
0x2623   :  { %7619 = vmatmul.mubr.f32.gmra.mrb[42].mxu1 %v18888_v18 }
0x2624   :  { %10167 = vmatprep.mubr.msk.f32.mxu1 %vm702_vm0, %v18894_v21 }
0x2627   :  { %7624 = vmatmul.mubr.f32.gmra.mrb[44].mxu1 %v18901_v12 }
0x2628   :  { %10168 = vmatprep.mubr.msk.f32.mxu1 %vm702_vm0, %v18907_v3 }
0x262b   :  { %7629 = vmatmul.mubr.f32.gmra.mrb[46].mxu1 %v18914_v19 }
0x262c   :  { %10169 = vmatprep.mubr.msk.f32.mxu1 %vm702_vm0, %v18920_v17 }
0x262f   :  { %7634 = vmatmul.mubr.f32.gmra.mrb[48].mxu1 %v18927_v4 }
0x2630   :  { %10170 = vmatprep.mubr.msk.f32.mxu1 %vm702_vm0, %v18933_v48 }
0x2633   :  { %7639 = vmatmul.mubr.f32.gmra.mrb[50].mxu1 %v18940_v56 }
0x2634   :  { %10171 = vmatprep.mubr.msk.f32.mxu1 %vm702_vm0, %v18946_v61 }
0x2637   :  { %7644 = vmatmul.mubr.f32.gmra.mrb[52].mxu1 %v18953_v7 }
0x2638   :  { %10172 = vmatprep.mubr.msk.f32.mxu1 %vm702_vm0, %v18959_v29 }
0x263b   :  { %7649 = vmatmul.mubr.f32.gmra.mrb[54].mxu1 %v18966_v10 }
0x263c   :  { %10173 = vmatprep.mubr.msk.f32.mxu1 %vm702_vm0, %v18972_v39 }
0x263f   :  { %7654 = vmatmul.mubr.f32.gmra.mrb[56].mxu1 %v18979_v52 }
0x2640   :  { %10174 = vmatprep.mubr.msk.f32.mxu1 %vm702_vm0, %v18985_v24 }
0x2643   :  { %7659 = vmatmul.mubr.f32.gmra.mrb[58].mxu1 %v18992_v1 }
0x2644   :  { %10175 = vmatprep.mubr.msk.f32.mxu1 %vm702_vm0, %v18998_v8 }
0x2647   :  { %7664 = vmatmul.mubr.f32.gmra.mrb[60].mxu1 %v19005_v58 }
0x2648   :  { %10176 = vmatprep.mubr.msk.f32.mxu1 %vm702_vm0, %v19011_v9 }
0x264b   :  { %7669 = vmatmul.mubr.f32.gmra.mrb[62].mxu1 %v19018_v15 }
0x264c   :  { %10202 = vmatprep.mubr.msk.f32.mxu1 %vm702_vm0, %v14176_v20 }
0x26de   :  { %v7590_v50 = vpop.f32.mrb[30].mxu1 }
0x26df   :  { %v19391_v11 = vadd.f32 %v19388_v41, %v7590_v50  ;;  %v7592_v42 = vpop.f32.mrb[31].mxu1 }
0x26e1   :  { %v20623_v54 = vmax.f32 %v19391_v11, 0.0 }
0x26e2   :  { %v7595_v27 = vpop.f32.mrb[32].mxu1 }
0x26e3   :  { %v19395_v63 = vadd.f32 %v19388_v41, %v7595_v27  ;;  %v7597_v60 = vpop.f32.mrb[33].mxu1  ;;  %12745 = vmatmul.mubr.msk.f32.vlgmr.msra.gmra.mrb[28].mxu0 %vm1315_vm4, %v20623_v54 }
0x26e4   :  { %12747 = vmatprep.mubr.msk.f32.mxu0 %vm14447_vm2, %v20646_v49 }
0x26e5   :  { %v20622_v53 = vmax.f32 %v19395_v63, 0.0 }
0x26e6   :  { %v7600_v22 = vpop.f32.mrb[34].mxu1 }
0x26e7   :  { %v19404_v18 = vadd.f32 %v19388_v41, %v7600_v22  ;;  %v7602_v21 = vpop.f32.mrb[35].mxu1  ;;  %12748 = vmatmul.mubr.msk.f32.gmra.mrb[30].mxu0 %vm1315_vm4, %v20622_v53 }
0x26e8   :  { %12750 = vmatprep.mubr.msk.f32.mxu0 %vm14447_vm2, %v20646_v49 }
0x26e9   :  { %v20621_v12 = vmax.f32 %v19404_v18, 0.0 }
0x26ea   :  { %v7605_v3 = vpop.f32.mrb[36].mxu1 }
0x26eb   :  { %v19413_v19 = vadd.f32 %v19388_v41, %v7605_v3  ;;  %v7607_v17 = vpop.f32.mrb[37].mxu1  ;;  %12751 = vmatmul.mubr.msk.f32.gmra.mrb[32].mxu0 %vm1315_vm4, %v20621_v12 }
0x26ec   :  { %12753 = vmatprep.mubr.msk.f32.mxu0 %vm14447_vm2, %v20646_v49 }
0x26ed   :  { %v20620_v4 = vmax.f32 %v19413_v19, 0.0 }
0x26ee   :  { %v7610_v48 = vpop.f32.mrb[38].mxu1 }
0x26ef   :  { %v19422_v56 = vadd.f32 %v19388_v41, %v7610_v48  ;;  %v7612_v61 = vpop.f32.mrb[39].mxu1  ;;  %12754 = vmatmul.mubr.msk.f32.gmra.mrb[34].mxu0 %vm1315_vm4, %v20620_v4 }
0x26f0   :  { %12756 = vmatprep.mubr.msk.f32.mxu0 %vm14447_vm2, %v20646_v49 }
0x26f1   :  { %v20619_v7 = vmax.f32 %v19422_v56, 0.0 }
0x26f2   :  { %v7615_v29 = vpop.f32.mrb[40].mxu1 }
0x26f3   :  { %v19431_v10 = vadd.f32 %v19388_v41, %v7615_v29  ;;  %v7617_v39 = vpop.f32.mrb[41].mxu1  ;;  %12757 = vmatmul.mubr.msk.f32.gmra.mrb[36].mxu0 %vm1315_vm4, %v20619_v7 }
0x26f4   :  { %12759 = vmatprep.mubr.msk.f32.mxu0 %vm14447_vm2, %v20646_v49 }
0x26f5   :  { %v20618_v52 = vmax.f32 %v19431_v10, 0.0 }
0x26f6   :  { %v7620_v24 = vpop.f32.mrb[42].mxu1 }
0x26f7   :  { %v19440_v1 = vadd.f32 %v19388_v41, %v7620_v24  ;;  %v7622_v8 = vpop.f32.mrb[43].mxu1  ;;  %12760 = vmatmul.mubr.msk.f32.gmra.mrb[38].mxu0 %vm1315_vm4, %v20618_v52 }
0x26f8   :  { %12762 = vmatprep.mubr.msk.f32.mxu0 %vm14447_vm2, %v20646_v49 }
0x26f9   :  { %v20617_v58 = vmax.f32 %v19440_v1, 0.0 }
0x26fa   :  { %v7625_v9 = vpop.f32.mrb[44].mxu1 }
0x26fb   :  { %v19449_v15 = vadd.f32 %v19388_v41, %v7625_v9  ;;  %v7627_v23 = vpop.f32.mrb[45].mxu1  ;;  %12763 = vmatmul.mubr.msk.f32.gmra.mrb[40].mxu0 %vm1315_vm4, %v20617_v58 }
0x26fc   :  { %12765 = vmatprep.mubr.msk.f32.mxu0 %vm14447_vm2, %v20646_v49 }
0x26fd   :  { %v20616_v0 = vmax.f32 %v19449_v15, 0.0 }
0x26fe   :  { %v7630_v16 = vpop.f32.mrb[46].mxu1 }
0x26ff   :  { %v19458_v46 = vadd.f32 %v19388_v41, %v7630_v16  ;;  %v7632_v2 = vpop.f32.mrb[47].mxu1  ;;  %12766 = vmatmul.mubr.msk.f32.gmra.mrb[42].mxu0 %vm1315_vm4, %v20616_v0 }
0x2700   :  { %12768 = vmatprep.mubr.msk.f32.mxu0 %vm14447_vm2, %v20646_v49 }
0x2701   :  { %v20615_v32 = vmax.f32 %v19458_v46, 0.0 }
0x2702   :  { %v7635_v14 = vpop.f32.mrb[48].mxu1 }
0x2703   :  { %v19467_v34 = vadd.f32 %v19388_v41, %v7635_v14  ;;  %v7637_v33 = vpop.f32.mrb[49].mxu1  ;;  %12769 = vmatmul.mubr.msk.f32.gmra.mrb[44].mxu0 %vm1315_vm4, %v20615_v32 }
0x2704   :  { %12771 = vmatprep.mubr.msk.f32.mxu0 %vm14447_vm2, %v20646_v49 }
0x2705   :  { %v20614_v37 = vmax.f32 %v19467_v34, 0.0 }
0x2706   :  { %v7640_v31 = vpop.f32.mrb[50].mxu1 }
0x2707   :  { %v19476_v44 = vadd.f32 %v19388_v41, %v7640_v31  ;;  %v7642_v30 = vpop.f32.mrb[51].mxu1  ;;  %12772 = vmatmul.mubr.msk.f32.gmra.mrb[46].mxu0 %vm1315_vm4, %v20614_v37 }
0x2708   :  { %12774 = vmatprep.mubr.msk.f32.mxu0 %vm14447_vm2, %v20646_v49 }
0x2709   :  { %v20613_v20 = vmax.f32 %v19476_v44, 0.0 }
0x270a   :  { %v7645_v43 = vpop.f32.mrb[52].mxu1 }
0x270b   :  { %v19485_v51 = vadd.f32 %v19388_v41, %v7645_v43  ;;  %v7647_v62 = vpop.f32.mrb[53].mxu1  ;;  %12775 = vmatmul.mubr.msk.f32.gmra.mrb[48].mxu0 %vm1315_vm4, %v20613_v20 }
0x270c   :  { %12777 = vmatprep.mubr.msk.f32.mxu0 %vm14447_vm2, %v20646_v49 }
0x270d   :  { %v20612_v50 = vmax.f32 %v19485_v51, 0.0 }
0x270e   :  { %v7650_v42 = vpop.f32.mrb[54].mxu1 }
0x270f   :  { %v19494_v27 = vadd.f32 %v19388_v41, %v7650_v42  ;;  %v7652_v60 = vpop.f32.mrb[55].mxu1  ;;  %12778 = vmatmul.mubr.msk.f32.gmra.mrb[50].mxu0 %vm1315_vm4, %v20612_v50 }
0x2710   :  { %12780 = vmatprep.mubr.msk.f32.mxu0 %vm14447_vm2, %v20646_v49 }
0x2711   :  { %v20611_v22 = vmax.f32 %v19494_v27, 0.0 }
0x2712   :  { %v7655_v21 = vpop.f32.mrb[56].mxu1 }
0x2713   :  { %v19503_v3 = vadd.f32 %v19388_v41, %v7655_v21  ;;  %v7657_v17 = vpop.f32.mrb[57].mxu1  ;;  %12781 = vmatmul.mubr.msk.f32.gmra.mrb[52].mxu0 %vm1315_vm4, %v20611_v22 }
0x2714   :  { %12783 = vmatprep.mubr.msk.f32.mxu0 %vm14447_vm2, %v20646_v49 }
0x2715   :  { %v20610_v48 = vmax.f32 %v19503_v3, 0.0 }
0x2716   :  { %v7660_v61 = vpop.f32.mrb[58].mxu1 }
0x2717   :  { %v19512_v29 = vadd.f32 %v19388_v41, %v7660_v61  ;;  %v7662_v39 = vpop.f32.mrb[59].mxu1  ;;  %12784 = vmatmul.mubr.msk.f32.gmra.mrb[54].mxu0 %vm1315_vm4, %v20610_v48 }
0x2718   :  { %12786 = vmatprep.mubr.msk.f32.mxu0 %vm14447_vm2, %v20646_v49 }
0x2719   :  { %v20609_v24 = vmax.f32 %v19512_v29, 0.0 }
0x271a   :  { %v7665_v8 = vpop.f32.mrb[60].mxu1 }
0x271b   :  { %v19521_v9 = vadd.f32 %v19388_v41, %v7665_v8  ;;  %v7667_v23 = vpop.f32.mrb[61].mxu1  ;;  %12787 = vmatmul.mubr.msk.f32.gmra.mrb[56].mxu0 %vm1315_vm4, %v20609_v24 }
0x271c   :  { %12789 = vmatprep.mubr.msk.f32.mxu0 %vm14447_vm2, %v20646_v49 }
0x271d   :  { %v20608_v16 = vmax.f32 %v19521_v9, 0.0 }
0x271e   :  { %v7670_v2 = vpop.f32.mrb[62].mxu1 }
0x271f   :  { %v19530_v14 = vadd.f32 %v19388_v41, %v7670_v2  ;;  %12790 = vmatmul.mubr.msk.f32.gmra.mrb[58].mxu0 %vm1315_vm4, %v20608_v16  ;;  %v7672_v33 = vpop.f32.mrb[63].mxu1 }
0x2720   :  { %12792 = vmatprep.mubr.msk.f32.mxu0 %vm14447_vm2, %v20646_v49 }
0x2721   :  { %v20607_v31 = vmax.f32 %v19530_v14, 0.0 }
0x2723   :  { %12793 = vmatmul.mubr.msk.f32.gmra.mrb[60].mxu0 %vm1315_vm4, %v20607_v31 }
0x2724   :  { %12856 = vmatprep.mubr.msk.f32.mxu0 %vm14447_vm2, %v20646_v49 }
0x27b6   :  { %v7817_v30 = vpop.f32.mrb[28].mxu0 }
0x27b7   :  { %v12746_v41 = vpop.f32.mrb[29].mxu0 }
0x27ba   :  { %v7822_v43 = vpop.f32.mrb[30].mxu0 }
0x27bb   :  { %v13755_v62 = vpack.c.bf16 %v7822_v43, %v7817_v30  ;;  %v12749_v42 = vpop.f32.mrb[31].mxu0 }
0x27bd   :  { %13756 = vmatpush1.bf16.msra.mxu1 %v13755_v62 }
0x27be   :  { %v7827_v60 = vpop.f32.mrb[32].mxu0  ;;  %13757 = vmatprep.subr.bf16.mxu1 %v20696_v38 }
0x27bf   :  { %v12752_v21 = vpop.f32.mrb[33].mxu0 }
0x27c2   :  { %v7832_v17 = vpop.f32.mrb[34].mxu0 }
0x27c3   :  { %v13758_v61 = vpack.c.bf16 %v7832_v17, %v7827_v60  ;;  %v12755_v39 = vpop.f32.mrb[35].mxu0 }
0x27c5   :  { %13759 = vmatpush1.bf16.msra.mxu1 %v13758_v61 }
0x27c6   :  { %v7837_v8 = vpop.f32.mrb[36].mxu0  ;;  %13760 = vmatprep.subr.bf16.mxu1 %v20696_v38 }
0x27c7   :  { %v12758_v23 = vpop.f32.mrb[37].mxu0 }
0x27ca   :  { %v7842_v2 = vpop.f32.mrb[38].mxu0 }
0x27cb   :  { %v13761_v33 = vpack.c.bf16 %v7842_v2, %v7837_v8  ;;  %v12761_v31 = vpop.f32.mrb[39].mxu0 }
0x27cd   :  { %13762 = vmatpush1.bf16.msra.mxu1 %v13761_v33 }
0x27ce   :  { %v7847_v41 = vpop.f32.mrb[40].mxu0  ;;  %13763 = vmatprep.subr.bf16.mxu1 %v20696_v38 }
0x27cf   :  { %v12764_v30 = vpop.f32.mrb[41].mxu0 }
0x27d2   :  { %v7852_v43 = vpop.f32.mrb[42].mxu0 }
0x27d3   :  { %v13764_v62 = vpack.c.bf16 %v7852_v43, %v7847_v41  ;;  %v12767_v42 = vpop.f32.mrb[43].mxu0 }
0x27d5   :  { %13765 = vmatpush1.bf16.msra.mxu1 %v13764_v62 }
0x27d6   :  { %v7857_v21 = vpop.f32.mrb[44].mxu0  ;;  %13766 = vmatprep.subr.bf16.mxu1 %v20696_v38 }
0x27d7   :  { %v12770_v60 = vpop.f32.mrb[45].mxu0 }
0x27da   :  { %v7862_v17 = vpop.f32.mrb[46].mxu0 }
0x27db   :  { %v13767_v61 = vpack.c.bf16 %v7862_v17, %v7857_v21  ;;  %v12773_v39 = vpop.f32.mrb[47].mxu0 }
0x27dd   :  { %13768 = vmatpush1.bf16.msra.mxu1 %v13767_v61 }
0x27de   :  { %v7867_v23 = vpop.f32.mrb[48].mxu0  ;;  %13769 = vmatprep.subr.bf16.mxu1 %v20696_v38 }
0x27df   :  { %v12776_v31 = vpop.f32.mrb[49].mxu0 }
0x27e0   :  { %v10212_v31 = vld [vmem:[%s20453_s13 + $0xc8] sm:$0xff] }
0x27e2   :  { %v7872_v8 = vpop.f32.mrb[50].mxu0 }
0x27e3   :  { %v13770_v2 = vpack.c.bf16 %v7872_v8, %v7867_v23  ;;  %v12779_v33 = vpop.f32.mrb[51].mxu0  ;;  %v10211_v23 = vld [vmem:[%s20453_s13 + $0xc0] sm:$0xff] }
0x27e4   :  { %v13779_v33 = vpack.c.bf16 %v10212_v31, %v10211_v23  ;;  %v14181_v23 = vld [vmem:[%s20647_s16 + $0x20] sm:$0xff]  ;;  %v14182_v31 = vld [vmem:[%s20647_s16 + $0x38] sm:$0xff] }
0x27e5   :  { %13771 = vmatpush1.bf16.msra.mxu1 %v13770_v2 }
0x27e6   :  { %v7877_v30 = vpop.f32.mrb[52].mxu0  ;;  %13772 = vmatprep.subr.bf16.mxu1 %v20696_v38 }
0x27e7   :  { %v12782_v41 = vpop.f32.mrb[53].mxu0 }
0x27e8   :  { %v10214_v41 = vld [vmem:[%s20453_s13 + $0xd8] sm:$0xff] }
0x27ea   :  { %v7882_v43 = vpop.f32.mrb[54].mxu0 }
0x27eb   :  { %v13773_v62 = vpack.c.bf16 %v7882_v43, %v7877_v30  ;;  %v12785_v42 = vpop.f32.mrb[55].mxu0  ;;  %v10213_v30 = vld [vmem:[%s20453_s13 + $0xd0] sm:$0xff]  ;;  %v14177_v43 = vld [vmem:[%s20647_s16] sm:$0xff] }
0x27ec   :  { %v13782_v42 = vpack.c.bf16 %v10214_v41, %v10213_v30  ;;  %v14186_v30 = vld [vmem:[%s20647_s16 + $0x58] sm:$0xff]  ;;  %v14187_v41 = vld [vmem:[%s20647_s16 + $0x50] sm:$0xff] }
0x27ed   :  { %13774 = vmatpush1.bf16.msra.mxu1 %v13773_v62  ;;  %v14178_v62 = vld [vmem:[%s20647_s16 + $0x18] sm:$0xff] }
0x27ee   :  { %v7887_v60 = vpop.f32.mrb[56].mxu0  ;;  %13775 = vmatprep.subr.bf16.mxu1 %v20696_v38 }
0x27ef   :  { %v12788_v21 = vpop.f32.mrb[57].mxu0 }
0x27f0   :  { %v10216_v21 = vld [vmem:[%s20453_s13 + $0xe8] sm:$0xff] }
0x27f2   :  { %v7892_v17 = vpop.f32.mrb[58].mxu0 }
0x27f3   :  { %v13776_v61 = vpack.c.bf16 %v7892_v17, %v7887_v60  ;;  %v12791_v39 = vpop.f32.mrb[59].mxu0  ;;  %v10215_v60 = vld [vmem:[%s20453_s13 + $0xe0] sm:$0xff]  ;;  %v14179_v17 = vld [vmem:[%s20647_s16 + $0x10] sm:$0xff] }
0x27f4   :  { %v13785_v39 = vpack.c.bf16 %v10216_v21, %v10215_v60  ;;  %v14191_v60 = vld [vmem:[%s20647_s16 + $0x70] sm:$0xff]  ;;  %v14192_v21 = vld [vmem:[%s20647_s16 + $0x88] sm:$0xf] }
0x27f5   :  { %13777 = vmatpush1.bf16.msra.mxu1 %v13776_v61  ;;  %v14180_v61 = vld [vmem:[%s20647_s16 + $0x28] sm:$0xff] }
0x27f6   :  { %v7897_v8 = vpop.f32.mrb[60].mxu0  ;;  %7942 = vmatprep.subr.mxu1 %v20646_v49 }
0x27f7   :  { %v12794_v2 = vpop.f32.mrb[61].mxu0 }
0x27f8   :  { %v14184_v2 = vld [vmem:[%s20647_s16 + $0x48] sm:$0xff] }
0x27f9   :  { %10201 = vmatpush1.msk.msra.mxu1 %vm754_vm1, %v7897_v8  ;;  %v14183_v8 = vld [vmem:[%s20647_s16 + $0x30] sm:$0xff] }
0x27fa   :  { %7975 = vmatmul.mubr.f32.vlgmr.msra.gmra.mrb[64].mxu1 %v14177_v43  ;;  %13778 = vmatprep.subr.bf16.mxu1 %v20696_v38  ;;  %v14188_v43 = vld [vmem:[%s20647_s16 + $0x68] sm:$0xff] }
0x27fb   :  { %10203 = vmatprep.mubr.msk.f32.mxu1 %vm702_vm0, %v14178_v62  ;;  %13780 = vmatpush3.bf16.msra.mxu1 %v13779_v33  ;;  %v14185_v33 = vld [vmem:[%s20647_s16 + $0x40] sm:$0xff] }
0x27fc   :  { %13781 = vmatprep.subr.bf16.mxu1 %v20696_v38  ;;  %v14189_v62 = vld [vmem:[%s20647_s16 + $0x60] sm:$0xff] }
0x27fe   :  { %7980 = vmatmul.mubr.f32.gmra.mrb[66].mxu1 %v14179_v17  ;;  %v14193_v17 = vld [vmem:[%s20647_s16 + $0x80] sm:$0xf] }
0x27ff   :  { %10204 = vmatprep.mubr.msk.f32.mxu1 %vm702_vm0, %v14180_v61  ;;  %13783 = vmatpush3.bf16.msra.mxu1 %v13782_v42  ;;  %v14190_v42 = vld [vmem:[%s20647_s16 + $0x78] sm:$0xff]  ;;  %v10217_v61 = vld [vmem:[%s20453_s13 + $0xf0] sm:$0xff] }
0x2800   :  { %13784 = vmatprep.subr.bf16.mxu1 %v20696_v38 }
0x2802   :  { %7985 = vmatmul.mubr.f32.gmra.mrb[68].mxu1 %v14181_v23 }
0x2803   :  { %10205 = vmatprep.mubr.msk.f32.mxu1 %vm702_vm0, %v14182_v31  ;;  %13786 = vmatpush3.bf16.msra.mxu1 %v13785_v39  ;;  %v10218_v39 = vld [vmem:[%s20453_s13 + $0xf8] sm:$0xff]  ;;  %v10200_v31 = vld [vmem:[#allocation6 + $0x3] ss:$0 sm:$0xff] }
0x2804   :  { %13787 = vmatprep.subr.bf16.mxu1 %v20696_v38  ;;  %v13788_v23 = vpack.c.bf16 %v10218_v39, %v10217_v61 }
0x2806   :  { %7990 = vmatmul.mubr.f32.gmra.mrb[70].mxu1 %v14183_v8 }
0x2807   :  { %10206 = vmatprep.mubr.msk.f32.mxu1 %vm702_vm0, %v14184_v2  ;;  %13789 = vmatpush3.bf16.msra.mxu1 %v13788_v23 }
0x2808   :  { %13808 = vmatprep.subr.bf16.mxu1 %v20696_v38 }
0x280a   :  { %7995 = vmatmul.mubr.f32.gmra.mrb[72].mxu1 %v14185_v33 }
0x280b   :  { %10207 = vmatprep.mubr.msk.f32.mxu1 %vm702_vm0, %v14186_v30 }
0x280e   :  { %8000 = vmatmul.mubr.f32.gmra.mrb[74].mxu1 %v14187_v41 }
0x280f   :  { %10208 = vmatprep.mubr.msk.f32.mxu1 %vm702_vm0, %v14188_v43 }
0x2812   :  { %8005 = vmatmul.mubr.f32.gmra.mrb[76].mxu1 %v14189_v62 }
0x2813   :  { %10209 = vmatprep.mubr.msk.f32.mxu1 %vm702_vm0, %v14190_v42 }
0x2816   :  { %8010 = vmatmul.mubr.f32.gmra.mrb[78].mxu1 %v14191_v60 }
0x2817   :  { %10210 = vmatprep.mubr.msk.f32.mxu1 %vm702_vm0, %v14192_v21 }
0x281a   :  { %8015 = vmatmul.mubr.f32.gmra.mrb[80].mxu1 %v14193_v17 }
0x281b   :  { %12811 = vmatprep.mubr.msk.f32.mxu1 %vm14447_vm2, %v20646_v49 }
0x28cd   :  { %v7976_v8 = vpop.f32.mrb[64].mxu1 }
0x28ce   :  { %v19642_v2 = vadd.f32 %v10200_v31, %v7976_v8  ;;  %v7978_v33 = vpop.f32.mrb[65].mxu1 }
0x28d0   :  { %v8020_v30 = vmax.f32 %v19642_v2, 0.0 }
0x28d1   :  { %v7981_v41 = vpop.f32.mrb[66].mxu1 }
0x28d2   :  { %v19645_v43 = vadd.f32 %v10200_v31, %v7981_v41  ;;  %v7983_v62 = vpop.f32.mrb[67].mxu1  ;;  %12812 = vmatmul.mubr.msk.f32.vlgmr.msra.gmra.mrb[82].mxu1 %vm1681_vm5, %v8020_v30 }
0x28d3   :  { %12814 = vmatprep.mubr.msk.f32.mxu1 %vm14447_vm2, %v20646_v49 }
0x28d4   :  { %v8021_v42 = vmax.f32 %v19645_v43, 0.0 }
0x28d5   :  { %v7986_v60 = vpop.f32.mrb[68].mxu1 }
0x28d6   :  { %v19653_v21 = vadd.f32 %v10200_v31, %v7986_v60  ;;  %12815 = vmatmul.mubr.msk.f32.gmra.mrb[84].mxu1 %vm1681_vm5, %v8021_v42  ;;  %v7988_v17 = vpop.f32.mrb[69].mxu1 }
0x28d7   :  { %12817 = vmatprep.mubr.msk.f32.mxu1 %vm14447_vm2, %v20646_v49 }
0x28d8   :  { %v20630_v61 = vmax.f32 %v19653_v21, 0.0  ;;  %v20812_v2 = vmax.f32 %v19653_v21, 0.0 }
0x28d9   :  { %v7991_v39 = vpop.f32.mrb[70].mxu1 }
0x28da   :  { %v19661_v23 = vadd.f32 %v10200_v31, %v7991_v39  ;;  %12818 = vmatmul.mubr.msk.f32.gmra.mrb[86].mxu1 %vm1681_vm5, %v20630_v61  ;;  %v7993_v8 = vpop.f32.mrb[71].mxu1 }
0x28db   :  { %12820 = vmatprep.mubr.msk.f32.mxu1 %vm14447_vm2, %v20646_v49 }
0x28dc   :  { %v20629_v33 = vmax.f32 %v19661_v23, 0.0  ;;  %v20813_v43 = vmax.f32 %v19661_v23, 0.0 }
0x28dd   :  { %v7996_v41 = vpop.f32.mrb[72].mxu1 }
0x28de   :  { %v19669_v62 = vadd.f32 %v10200_v31, %v7996_v41  ;;  %12821 = vmatmul.mubr.msk.f32.gmra.mrb[88].mxu1 %vm1681_vm5, %v20629_v33  ;;  %v7998_v60 = vpop.f32.mrb[73].mxu1 }
0x28df   :  { %12823 = vmatprep.mubr.msk.f32.mxu1 %vm14447_vm2, %v20646_v49 }
0x28e0   :  { %v20628_v17 = vmax.f32 %v19669_v62, 0.0  ;;  %v20814_v21 = vmax.f32 %v19669_v62, 0.0 }
0x28e1   :  { %v8001_v39 = vpop.f32.mrb[74].mxu1 }
0x28e2   :  { %v19677_v8 = vadd.f32 %v10200_v31, %v8001_v39  ;;  %12824 = vmatmul.mubr.msk.f32.gmra.mrb[90].mxu1 %vm1681_vm5, %v20628_v17  ;;  %v8003_v16 = vpop.f32.mrb[75].mxu1 }
0x28e3   :  { %12826 = vmatprep.mubr.msk.f32.mxu1 %vm14447_vm2, %v20646_v49 }
0x28e4   :  { %v20627_v41 = vmax.f32 %v19677_v8, 0.0  ;;  %v20815_v23 = vmax.f32 %v19677_v8, 0.0 }
0x28e5   :  { %v8006_v24 = vpop.f32.mrb[76].mxu1 }
0x28e6   :  { %v19685_v60 = vadd.f32 %v10200_v31, %v8006_v24  ;;  %12827 = vmatmul.mubr.msk.f32.gmra.mrb[92].mxu1 %vm1681_vm5, %v20627_v41  ;;  %v8008_v48 = vpop.f32.mrb[77].mxu1 }
0x28e7   :  { %12829 = vmatprep.mubr.msk.f32.mxu1 %vm14447_vm2, %v20646_v49 }
0x28e8   :  { %v20626_v39 = vmax.f32 %v19685_v60, 0.0  ;;  %v20816_v62 = vmax.f32 %v19685_v60, 0.0 }
0x28e9   :  { %v8011_v22 = vpop.f32.mrb[78].mxu1 }
0x28ea   :  { %v19693_v16 = vadd.f32 %v10200_v31, %v8011_v22  ;;  %12830 = vmatmul.mubr.msk.f32.gmra.mrb[94].mxu1 %vm1681_vm5, %v20626_v39  ;;  %v8013_v50 = vpop.f32.mrb[79].mxu1 }
0x28eb   :  { %12832 = vmatprep.mubr.msk.f32.mxu1 %vm14447_vm2, %v20646_v49 }
0x28ec   :  { %v20625_v24 = vmax.f32 %v19693_v16, 0.0  ;;  %v20817_v8 = vmax.f32 %v19693_v16, 0.0 }
0x28ed   :  { %v8016_v20 = vpop.f32.mrb[80].mxu1 }
0x28ee   :  { %12833 = vmatmul.mubr.msk.f32.gmra.mrb[96].mxu1 %vm1681_vm5, %v20625_v24  ;;  %v19704_v48 = vadd.f32 %v10200_v31, %v8016_v20  ;;  %v8018_v37 = vpop.f32.mrb[81].mxu1 }
0x28ef   :  { %12835 = vmatprep.mubr.msk.f32.mxu1 %vm14447_vm2, %v20646_v49 }
0x28f0   :  { %v20624_v22 = vmax.f32 %v19704_v48, 0.0  ;;  %v20818_v60 = vmax.f32 %v19704_v48, 0.0 }
0x28f2   :  { %12836 = vmatmul.mubr.msk.f32.gmra.mrb[98].mxu1 %vm1681_vm5, %v20624_v22 }
0x28f3   :  { %12924 = vmatprep.mubr.msk.f32.mxu1 %vm14447_vm2, %v20646_v49 }
0x29a5   :  { %v8133_v50 = vpop.f32.mrb[82].mxu1 }
0x29a6   :  { %v12813_v32 = vpop.f32.mrb[83].mxu1 }
0x29a9   :  { %v8138_v0 = vpop.f32.mrb[84].mxu1 }
0x29aa   :  { %v13791_v58 = vpack.c.bf16 %v8138_v0, %v8133_v50  ;;  %v12816_v52 = vpop.f32.mrb[85].mxu1 }
0x29ac   :  { %13792 = vmatpush3.bf16.msra.mxu0 %v13791_v58 }
0x29ad   :  { %v8143_v20 = vpop.f32.mrb[86].mxu1  ;;  %13793 = vmatprep.subr.bf16.mxu0 %v20696_v38 }
0x29ae   :  { %v12819_v37 = vpop.f32.mrb[87].mxu1 }
0x29b1   :  { %v8148_v31 = vpop.f32.mrb[88].mxu1 }
0x29b2   :  { %v13794_v7 = vpack.c.bf16 %v8148_v31, %v8143_v20  ;;  %v12822_v4 = vpop.f32.mrb[89].mxu1  ;;  %v10246_v20 = vld [vmem:[%s20455_s15 + $0xc8] sm:$0xff]  ;;  %v10247_v31 = vld [vmem:[%s20455_s15 + $0xd0] sm:$0xff] }
0x29b4   :  { %13795 = vmatpush3.bf16.msra.mxu0 %v13794_v7  ;;  %v14194_v7 = vld [vmem:[#allocation4] sm:$0xff] }
0x29b5   :  { %v8153_v12 = vpop.f32.mrb[90].mxu1  ;;  %13796 = vmatprep.subr.bf16.mxu0 %v20696_v38 }
0x29b6   :  { %v12825_v53 = vpop.f32.mrb[91].mxu1 }
0x29b7   :  { %v14196_v53 = vld [vmem:[#allocation4 + $0x10] sm:$0xff] }
0x29b9   :  { %v8158_v54 = vpop.f32.mrb[92].mxu1 }
0x29ba   :  { %v13797_v22 = vpack.c.bf16 %v8158_v54, %v8153_v12  ;;  %v12828_v24 = vpop.f32.mrb[93].mxu1  ;;  %v14195_v54 = vld [vmem:[#allocation4 + $0x8] sm:$0xff]  ;;  %v14197_v12 = vld [vmem:[#allocation4 + $0x18] sm:$0xff] }
0x29bb   :  { %v14198_v24 = vld [vmem:[#allocation4 + $0x20] sm:$0x3] }
0x29bc   :  { %13798 = vmatpush3.bf16.msra.mxu0 %v13797_v22  ;;  %v10245_v22 = vld [vmem:[%s20455_s15 + $0xc0] sm:$0xff] }
0x29bd   :  { %v8163_v32 = vpop.f32.mrb[94].mxu1  ;;  %13799 = vmatprep.subr.bf16.mxu0 %v20696_v38 }
0x29be   :  { %v12831_v52 = vpop.f32.mrb[95].mxu1 }
0x29bf   :  { %v10248_v52 = vld [vmem:[%s20455_s15 + $0xd8] sm:$0xff] }
0x29c1   :  { %v8168_v58 = vpop.f32.mrb[96].mxu1 }
0x29c2   :  { %v13800_v0 = vpack.c.bf16 %v8168_v58, %v8163_v32  ;;  %v12834_v50 = vpop.f32.mrb[97].mxu1  ;;  %v13809_v32 = vpack.c.bf16 %v10246_v20, %v10245_v22  ;;  %v13812_v58 = vpack.c.bf16 %v10248_v52, %v10247_v31 }
0x29c3   :  { %v10250_v50 = vld [vmem:[%s20455_s15 + $0xe8] sm:$0xff] }
0x29c4   :  { %13801 = vmatpush3.bf16.msra.mxu0 %v13800_v0  ;;  %13810 = vmatpush3.bf16.msra.mxu1 %v13809_v32  ;;  %v10249_v0 = vld [vmem:[%s20455_s15 + $0xe0] sm:$0xff] }
0x29c5   :  { %v8173_v37 = vpop.f32.mrb[98].mxu1  ;;  %12854 = vmatprep.subr.mxu0 %v20646_v49  ;;  %13811 = vmatprep.subr.bf16.mxu1 %v20696_v38 }
0x29c6   :  { %v12837_v4 = vpop.f32.mrb[99].mxu1 }
0x29c7   :  { %v10228_v4 = vld [vmem:[#allocation7 + $0x3] ss:$0 sm:$0xff] }
0x29c8   :  { %12855 = vmatpush3.msk.msra.mxu0 %vm1841_vm6, %v8173_v37  ;;  %13813 = vmatpush3.bf16.msra.mxu1 %v13812_v58  ;;  %v13815_v37 = vpack.c.bf16 %v10250_v50, %v10249_v0 }
0x29c9   :  { %12857 = vmatmul.mubr.msk.f32.vlgmr.msra.gmra.mrb[62].mxu0 %vm1825_vm7, %v14194_v7  ;;  %13802 = vmatprep.subr.bf16.mxu0 %v20696_v38 }
0x29ca   :  { %12859 = vmatprep.mubr.msk.f32.mxu0 %vm14447_vm2, %v20646_v49  ;;  %13814 = vmatprep.subr.bf16.mxu1 %v20696_v38 }
0x29cc   :  { %13816 = vmatpush3.bf16.msra.mxu1 %v13815_v37 }
0x29cd   :  { %12860 = vmatmul.mubr.msk.f32.gmra.mrb[64].mxu0 %vm1825_vm7, %v14195_v54  ;;  %13817 = vmatprep.subr.bf16.mxu1 %v20696_v38 }
0x29ce   :  { %12862 = vmatprep.mubr.msk.f32.mxu0 %vm14447_vm2, %v20646_v49 }
0x29d1   :  { %12863 = vmatmul.mubr.msk.f32.gmra.mrb[66].mxu0 %vm1825_vm7, %v14196_v53 }
0x29d2   :  { %12865 = vmatprep.mubr.msk.f32.mxu0 %vm14447_vm2, %v20646_v49 }
0x29d5   :  { %12866 = vmatmul.mubr.msk.f32.gmra.mrb[68].mxu0 %vm1825_vm7, %v14197_v12 }
0x29d6   :  { %12868 = vmatprep.mubr.msk.f32.mxu0 %vm14447_vm2, %v20646_v49 }
0x29d9   :  { %12869 = vmatmul.mubr.msk.f32.gmra.mrb[70].mxu0 %vm1825_vm7, %v14198_v24 }
0x29da   :  { %12881 = vmatprep.mubr.msk.f32.mxu0 %vm14447_vm2, %v20646_v49 }
0x2a9c   :  { %v8252_v7 = vpop.f32.mrb[62].mxu0 }
0x2a9d   :  { %v12858_v54 = vpop.f32.mrb[63].mxu0  ;;  %v8253_v53 = vadd.f32 %v10228_v4, %v8252_v7 }
0x2a9f   :  { %v8276_v20 = vmax.f32 %v8253_v53, 0.0  ;;  %v14205_v53 = vld [vmem:[%s20648_s26 + $0x30] sm:$0xff] }
0x2aa0   :  { %v8257_v12 = vpop.f32.mrb[64].mxu0 }
0x2aa1   :  { %v8258_v24 = vadd.f32 %v10228_v4, %v8257_v12  ;;  %v12861_v22 = vpop.f32.mrb[65].mxu0 }
0x2aa2   :  { %v14207_v22 = vld [vmem:[%s20648_s26 + $0x40] sm:$0xf] }
0x2aa3   :  { %v8277_v31 = vmax.f32 %v8258_v24, 0.0  ;;  %v14206_v24 = vld [vmem:[%s20648_s26 + $0x38] sm:$0xff] }
0x2aa4   :  { %v8262_v32 = vpop.f32.mrb[66].mxu0 }
0x2aa5   :  { %v13803_v52 = vpack.c.bf16 %v8277_v31, %v8276_v20  ;;  %v12864_v39 = vpop.f32.mrb[67].mxu0  ;;  %v8263_v41 = vadd.f32 %v10228_v4, %v8262_v32  ;;  %v10251_v20 = vld [vmem:[%s20455_s15 + $0xf0] sm:$0xff]  ;;  %v10252_v31 = vld [vmem:[%s20455_s15 + $0xf8] sm:$0xff] }
0x2aa6   :  { %v14199_v39 = vld [vmem:[%s20648_s26] sm:$0xff]  ;;  %v13818_v32 = vpack.c.bf16 %v10252_v31, %v10251_v20 }
0x2aa7   :  { %13804 = vmatpush3.bf16.msra.mxu0 %v13803_v52  ;;  %v8278_v37 = vmax.f32 %v8263_v41, 0.0  ;;  %v14203_v41 = vld [vmem:[%s20648_s26 + $0x20] sm:$0xff] }
0x2aa8   :  { %v8267_v58 = vpop.f32.mrb[68].mxu0  ;;  %13805 = vmatprep.subr.bf16.mxu0 %v20696_v38  ;;  %13819 = vmatpush3.bf16.msra.mxu1 %v13818_v32 }
0x2aa9   :  { %v8268_v0 = vadd.f32 %v10228_v4, %v8267_v58  ;;  %v12867_v50 = vpop.f32.mrb[69].mxu0  ;;  %13832 = vmatprep.subr.bf16.mxu1 %v20696_v38 }
0x2aab   :  { %v8279_v17 = vmax.f32 %v8268_v0, 0.0 }
0x2aac   :  { %v8272_v33 = vpop.f32.mrb[70].mxu0 }
0x2aad   :  { %v13806_v54 = vpack.c.bf16 %v8279_v17, %v8278_v37  ;;  %v8273_v7 = vadd.f32 %v10228_v4, %v8272_v33  ;;  %v12870_v61 = vpop.f32.mrb[71].mxu0  ;;  %v14201_v33 = vld [vmem:[%s20648_s26 + $0x10] sm:$0xff]  ;;  %v14202_v17 = vld [vmem:[%s20648_s26 + $0x18] sm:$0xff]  ;;  %v14204_v4 = vld [vmem:[%s20648_s26 + $0x28] sm:$0xff] }
0x2aae   :  { %v14200_v61 = vld [vmem:[%s20648_s26 + $0x8] sm:$0xff] }
0x2aaf   :  { %v8280_v12 = vmax.f32 %v8273_v7, 0.0  ;;  %13807 = vmatpush3.bf16.msra.mxu0 %v13806_v54 }
0x2ab0   :  { %12879 = vmatprep.subr.mxu0 %v20646_v49 }
0x2ab3   :  { %12880 = vmatpush3.msk.msra.mxu0 %vm1968_vm8, %v8280_v12 }
0x2ab4   :  { %12882 = vmatmul.mubr.msk.f32.vlgmr.msra.gmra.mrb[72].mxu0 %vm1940_vm9, %v14199_v39  ;;  %13820 = vmatprep.subr.bf16.mxu0 %v20696_v38 }
0x2ab5   :  { %12884 = vmatprep.mubr.msk.f32.mxu0 %vm14447_vm2, %v20646_v49 }
0x2ab8   :  { %12885 = vmatmul.mubr.msk.f32.gmra.mrb[74].mxu0 %vm1940_vm9, %v14200_v61 }
0x2ab9   :  { %12887 = vmatprep.mubr.msk.f32.mxu0 %vm14447_vm2, %v20646_v49 }
0x2abc   :  { %12888 = vmatmul.mubr.msk.f32.gmra.mrb[76].mxu0 %vm1940_vm9, %v14201_v33 }
0x2abd   :  { %12890 = vmatprep.mubr.msk.f32.mxu0 %vm14447_vm2, %v20646_v49 }
0x2ac0   :  { %12891 = vmatmul.mubr.msk.f32.gmra.mrb[78].mxu0 %vm1940_vm9, %v14202_v17 }
0x2ac1   :  { %12893 = vmatprep.mubr.msk.f32.mxu0 %vm14447_vm2, %v20646_v49 }
0x2ac4   :  { %12894 = vmatmul.mubr.msk.f32.gmra.mrb[80].mxu0 %vm1940_vm9, %v14203_v41 }
0x2ac5   :  { %12896 = vmatprep.mubr.msk.f32.mxu0 %vm14447_vm2, %v20646_v49 }
0x2ac8   :  { %12897 = vmatmul.mubr.msk.f32.gmra.mrb[82].mxu0 %vm1940_vm9, %v14204_v4 }
0x2ac9   :  { %12899 = vmatprep.mubr.msk.f32.mxu0 %vm14447_vm2, %v20646_v49 }
0x2acc   :  { %12900 = vmatmul.mubr.msk.f32.gmra.mrb[84].mxu0 %vm1940_vm9, %v14205_v53 }
0x2acd   :  { %12902 = vmatprep.mubr.msk.f32.mxu0 %vm14447_vm2, %v20646_v49 }
0x2ad0   :  { %12903 = vmatmul.mubr.msk.f32.gmra.mrb[86].mxu0 %vm1940_vm9, %v14206_v24 }
0x2ad1   :  { %12905 = vmatprep.mubr.msk.f32.mxu0 %vm14447_vm2, %v20646_v49 }
0x2ad4   :  { %12906 = vmatmul.mubr.msk.f32.gmra.mrb[88].mxu0 %vm1940_vm9, %v14207_v22 }
0x2ad5   :  { %12969 = vmatprep.mubr.msk.f32.mxu0 %vm14447_vm2, %v20646_v49 }
0x2b87   :  { %v8350_v52 = vpop.f32.mrb[72].mxu0 }
0x2b88   :  { %v8351_v58 = vadd.f32 %v8350_v52, %v8020_v30  ;;  %v12883_v0 = vpop.f32.mrb[73].mxu0 }
0x2b8a   :  { %12925 = vmatmul.mubr.msk.f32.vlgmr.msra.gmra.mrb[100].mxu1 %vm1681_vm5, %v8351_v58 }
0x2b8b   :  { %v8355_v50 = vpop.f32.mrb[74].mxu0  ;;  %12927 = vmatprep.mubr.msk.f32.mxu1 %vm14447_vm2, %v20646_v49 }
0x2b8c   :  { %v8356_v37 = vadd.f32 %v8355_v50, %v8021_v42  ;;  %v12886_v54 = vpop.f32.mrb[75].mxu0 }
0x2b8e   :  { %12928 = vmatmul.mubr.msk.f32.gmra.mrb[102].mxu1 %vm1681_vm5, %v8356_v37 }
0x2b8f   :  { %v8360_v7 = vpop.f32.mrb[76].mxu0  ;;  %12930 = vmatprep.mubr.msk.f32.mxu1 %vm14447_vm2, %v20646_v49 }
0x2b90   :  { %v8361_v30 = vadd.f32 %v8360_v7, %v20812_v2  ;;  %v12889_v12 = vpop.f32.mrb[77].mxu0 }
0x2b92   :  { %12931 = vmatmul.mubr.msk.f32.gmra.mrb[104].mxu1 %vm1681_vm5, %v8361_v30 }
0x2b93   :  { %v8365_v39 = vpop.f32.mrb[78].mxu0  ;;  %12933 = vmatprep.mubr.msk.f32.mxu1 %vm14447_vm2, %v20646_v49 }
0x2b94   :  { %v8366_v42 = vadd.f32 %v8365_v39, %v20813_v43  ;;  %v12892_v61 = vpop.f32.mrb[79].mxu0 }
0x2b96   :  { %12934 = vmatmul.mubr.msk.f32.gmra.mrb[106].mxu1 %vm1681_vm5, %v8366_v42 }
0x2b97   :  { %v8370_v33 = vpop.f32.mrb[80].mxu0  ;;  %12936 = vmatprep.mubr.msk.f32.mxu1 %vm14447_vm2, %v20646_v49 }
0x2b98   :  { %v8371_v17 = vadd.f32 %v8370_v33, %v20814_v21  ;;  %v12895_v41 = vpop.f32.mrb[81].mxu0 }
0x2b9a   :  { %12937 = vmatmul.mubr.msk.f32.gmra.mrb[108].mxu1 %vm1681_vm5, %v8371_v17 }
0x2b9b   :  { %v8375_v4 = vpop.f32.mrb[82].mxu0  ;;  %12939 = vmatprep.mubr.msk.f32.mxu1 %vm14447_vm2, %v20646_v49 }
0x2b9c   :  { %v8376_v53 = vadd.f32 %v8375_v4, %v20815_v23  ;;  %v12898_v24 = vpop.f32.mrb[83].mxu0 }
0x2b9e   :  { %12940 = vmatmul.mubr.msk.f32.gmra.mrb[110].mxu1 %vm1681_vm5, %v8376_v53 }
0x2b9f   :  { %v8380_v22 = vpop.f32.mrb[84].mxu0  ;;  %12942 = vmatprep.mubr.msk.f32.mxu1 %vm14447_vm2, %v20646_v49 }
0x2ba0   :  { %v8381_v20 = vadd.f32 %v8380_v22, %v20816_v62  ;;  %v12901_v31 = vpop.f32.mrb[85].mxu0 }
0x2ba1   :  { %v14208_v31 = vld [vmem:[#allocation2] sm:$0xff] }
0x2ba2   :  { %12943 = vmatmul.mubr.msk.f32.gmra.mrb[112].mxu1 %vm1681_vm5, %v8381_v20 }
0x2ba3   :  { %v8385_v32 = vpop.f32.mrb[86].mxu0  ;;  %12945 = vmatprep.mubr.msk.f32.mxu1 %vm14447_vm2, %v20646_v49 }
0x2ba4   :  { %v8386_v52 = vadd.f32 %v8385_v32, %v20817_v8  ;;  %v12904_v58 = vpop.f32.mrb[87].mxu0  ;;  %v14209_v32 = vld [vmem:[#allocation2 + $0x8] sm:$0xff]  ;;  %v14210_v8 = vld [vmem:[#allocation2 + $0x10] sm:$0xff] }
0x2ba5   :  { %v14212_v58 = vld [vmem:[#allocation2 + $0x20] sm:$0xff] }
0x2ba6   :  { %12946 = vmatmul.mubr.msk.f32.gmra.mrb[114].mxu1 %vm1681_vm5, %v8386_v52  ;;  %v14211_v52 = vld [vmem:[#allocation2 + $0x18] sm:$0xff] }
0x2ba7   :  { %v8390_v0 = vpop.f32.mrb[88].mxu0  ;;  %12948 = vmatprep.mubr.msk.f32.mxu1 %vm14447_vm2, %v20646_v49 }
0x2ba8   :  { %v8391_v50 = vadd.f32 %v8390_v0, %v20818_v60  ;;  %v12907_v37 = vpop.f32.mrb[89].mxu0  ;;  %v14213_v0 = vld [vmem:[#allocation2 + $0x28] sm:$0xff]  ;;  %v14214_v60 = vld [vmem:[#allocation2 + $0x30] sm:$0xff] }
0x2ba9   :  { %v14216_v37 = vld [vmem:[#allocation2 + $0x40] sm:$0xf] }
0x2baa   :  { %12949 = vmatmul.mubr.msk.f32.gmra.mrb[116].mxu1 %vm1681_vm5, %v8391_v50  ;;  %v14215_v50 = vld [vmem:[#allocation2 + $0x38] sm:$0xff] }
0x2bab   :  { %13014 = vmatprep.mubr.msk.f32.mxu1 %vm14447_vm2, %v20646_v49 }
0x2c5d   :  { %v8498_v54 = vpop.f32.mrb[100].mxu1 }
0x2c5e   :  { %v12926_v7 = vpop.f32.mrb[101].mxu1 }
0x2c5f   :  { %v10292_v7 = vld [vmem:[%s20457_s17 + $0x98] sm:$0xff] }
0x2c61   :  { %v8503_v16 = vpop.f32.mrb[102].mxu1 }
0x2c62   :  { %v13821_v2 = vpack.c.bf16 %v8503_v16, %v8498_v54  ;;  %v12929_v30 = vpop.f32.mrb[103].mxu1  ;;  %v10291_v54 = vld [vmem:[%s20457_s17 + $0x90] sm:$0xff]  ;;  %v10293_v16 = vld [vmem:[%s20457_s17 + $0xa0] sm:$0xff] }
0x2c63   :  { %v10294_v30 = vld [vmem:[%s20457_s17 + $0xa8] sm:$0xff] }
0x2c64   :  { %13822 = vmatpush3.bf16.msra.mxu0 %v13821_v2  ;;  %v13845_v2 = vpack.c.bf16 %v10292_v7, %v10291_v54 }
0x2c65   :  { %v8508_v12 = vpop.f32.mrb[104].mxu1  ;;  %13823 = vmatprep.subr.bf16.mxu0 %v20696_v38 }
0x2c66   :  { %v12932_v39 = vpop.f32.mrb[105].mxu1 }
0x2c67   :  { %v10262_v39 = vld [vmem:[#allocation9 + $0x3] ss:$0 sm:$0xff] }
0x2c69   :  { %v8513_v43 = vpop.f32.mrb[106].mxu1 }
0x2c6a   :  { %v13824_v42 = vpack.c.bf16 %v8513_v43, %v8508_v12  ;;  %v12935_v48 = vpop.f32.mrb[107].mxu1  ;;  %v13848_v12 = vpack.c.bf16 %v10294_v30, %v10293_v16 }
0x2c6c   :  { %13825 = vmatpush3.bf16.msra.mxu0 %v13824_v42 }
0x2c6d   :  { %v8518_v61 = vpop.f32.mrb[108].mxu1  ;;  %13826 = vmatprep.subr.bf16.mxu0 %v20696_v38 }
0x2c6e   :  { %v12938_v33 = vpop.f32.mrb[109].mxu1 }
0x2c71   :  { %v8523_v21 = vpop.f32.mrb[110].mxu1 }
0x2c72   :  { %v13827_v17 = vpack.c.bf16 %v8523_v21, %v8518_v61  ;;  %v12941_v41 = vpop.f32.mrb[111].mxu1 }
0x2c74   :  { %13828 = vmatpush3.bf16.msra.mxu0 %v13827_v17 }
0x2c75   :  { %v8528_v4 = vpop.f32.mrb[112].mxu1  ;;  %13829 = vmatprep.subr.bf16.mxu0 %v20696_v38 }
0x2c76   :  { %v12944_v23 = vpop.f32.mrb[113].mxu1 }
0x2c79   :  { %v8533_v53 = vpop.f32.mrb[114].mxu1 }
0x2c7a   :  { %v13830_v24 = vpack.c.bf16 %v8533_v53, %v8528_v4  ;;  %v12947_v22 = vpop.f32.mrb[115].mxu1 }
0x2c7c   :  { %13831 = vmatpush3.bf16.msra.mxu0 %v13830_v24 }
0x2c7d   :  { %v8538_v62 = vpop.f32.mrb[116].mxu1  ;;  %12967 = vmatprep.subr.mxu0 %v20646_v49 }
0x2c7e   :  { %v12950_v20 = vpop.f32.mrb[117].mxu1 }
0x2c80   :  { %12968 = vmatpush3.msk.msra.mxu0 %vm1841_vm6, %v8538_v62 }
0x2c81   :  { %12970 = vmatmul.mubr.msk.f32.vlgmr.msra.gmra.mrb[90].mxu0 %vm1825_vm7, %v14208_v31  ;;  %13844 = vmatprep.subr.bf16.mxu0 %v20696_v38 }
0x2c82   :  { %12972 = vmatprep.mubr.msk.f32.mxu0 %vm14447_vm2, %v20646_v49  ;;  %13846 = vmatpush3.bf16.msra.mxu0 %v13845_v2 }
0x2c83   :  { %13847 = vmatprep.subr.bf16.mxu0 %v20696_v38 }
0x2c85   :  { %12973 = vmatmul.mubr.msk.f32.gmra.mrb[92].mxu0 %vm1825_vm7, %v14209_v32 }
0x2c86   :  { %12975 = vmatprep.mubr.msk.f32.mxu0 %vm14447_vm2, %v20646_v49  ;;  %13849 = vmatpush3.bf16.msra.mxu0 %v13848_v12 }
0x2c87   :  { %13850 = vmatprep.subr.bf16.mxu0 %v20696_v38 }
0x2c89   :  { %12976 = vmatmul.mubr.msk.f32.gmra.mrb[94].mxu0 %vm1825_vm7, %v14210_v8 }
0x2c8a   :  { %12978 = vmatprep.mubr.msk.f32.mxu0 %vm14447_vm2, %v20646_v49 }
0x2c8d   :  { %12979 = vmatmul.mubr.msk.f32.gmra.mrb[96].mxu0 %vm1825_vm7, %v14211_v52 }
0x2c8e   :  { %12981 = vmatprep.mubr.msk.f32.mxu0 %vm14447_vm2, %v20646_v49 }
0x2c91   :  { %12982 = vmatmul.mubr.msk.f32.gmra.mrb[98].mxu0 %vm1825_vm7, %v14212_v58 }
0x2c92   :  { %12984 = vmatprep.mubr.msk.f32.mxu0 %vm14447_vm2, %v20646_v49 }
0x2c95   :  { %12985 = vmatmul.mubr.msk.f32.gmra.mrb[100].mxu0 %vm1825_vm7, %v14213_v0 }
0x2c96   :  { %12987 = vmatprep.mubr.msk.f32.mxu0 %vm14447_vm2, %v20646_v49 }
0x2c99   :  { %12988 = vmatmul.mubr.msk.f32.gmra.mrb[102].mxu0 %vm1825_vm7, %v14214_v60 }
0x2c9a   :  { %12990 = vmatprep.mubr.msk.f32.mxu0 %vm14447_vm2, %v20646_v49 }
0x2c9d   :  { %12991 = vmatmul.mubr.msk.f32.gmra.mrb[104].mxu0 %vm1825_vm7, %v14215_v50 }
0x2c9e   :  { %12993 = vmatprep.mubr.msk.f32.mxu0 %vm14447_vm2, %v20646_v49 }
0x2ca1   :  { %12994 = vmatmul.mubr.msk.f32.gmra.mrb[106].mxu0 %vm1825_vm7, %v14216_v37 }
0x2ca2   :  { %13077 = vmatprep.mubr.msk.f32.mxu0 %vm14447_vm2, %v20646_v49 }
0x2d54   :  { %v8617_v43 = vpop.f32.mrb[90].mxu0 }
0x2d55   :  { %v12971_v42 = vpop.f32.mrb[91].mxu0  ;;  %v8618_v48 = vadd.f32 %v10262_v39, %v8617_v43 }
0x2d57   :  { %v8661_v17 = vmax.f32 %v8618_v48, 0.0 }
0x2d58   :  { %v8622_v61 = vpop.f32.mrb[92].mxu0 }
0x2d59   :  { %v8623_v33 = vadd.f32 %v10262_v39, %v8622_v61  ;;  %v12974_v21 = vpop.f32.mrb[93].mxu0 }
0x2d5b   :  { %v8662_v41 = vmax.f32 %v8623_v33, 0.0 }
0x2d5c   :  { %v8627_v4 = vpop.f32.mrb[94].mxu0 }
0x2d5d   :  { %v13833_v23 = vpack.c.bf16 %v8662_v41, %v8661_v17  ;;  %v12977_v53 = vpop.f32.mrb[95].mxu0  ;;  %v8628_v24 = vadd.f32 %v10262_v39, %v8627_v4 }
0x2d5e   :  { %v14217_v53 = vld [vmem:[%s20446_s6] sm:$0xff] }
0x2d5f   :  { %13834 = vmatpush3.bf16.msra.mxu1 %v13833_v23  ;;  %v8663_v31 = vmax.f32 %v8628_v24, 0.0  ;;  %v14219_v24 = vld [vmem:[%s20446_s6 + $0x10] sm:$0xff] }
0x2d60   :  { %v8632_v22 = vpop.f32.mrb[96].mxu0  ;;  %13835 = vmatprep.subr.bf16.mxu1 %v20696_v38 }
0x2d61   :  { %v8633_v62 = vadd.f32 %v10262_v39, %v8632_v22  ;;  %v12980_v20 = vpop.f32.mrb[97].mxu0  ;;  %v14220_v22 = vld [vmem:[%s20446_s6 + $0x18] sm:$0xff] }
0x2d62   :  { %v14222_v20 = vld [vmem:[%s20446_s6 + $0x28] sm:$0xff] }
0x2d63   :  { %v8664_v32 = vmax.f32 %v8633_v62, 0.0  ;;  %v14221_v62 = vld [vmem:[%s20446_s6 + $0x20] sm:$0xff] }
0x2d64   :  { %v8637_v8 = vpop.f32.mrb[98].mxu0 }
0x2d65   :  { %v13836_v52 = vpack.c.bf16 %v8664_v32, %v8663_v31  ;;  %v12983_v58 = vpop.f32.mrb[99].mxu0  ;;  %v8638_v0 = vadd.f32 %v10262_v39, %v8637_v8  ;;  %v14223_v31 = vld [vmem:[%s20446_s6 + $0x30] sm:$0xff]  ;;  %v14224_v32 = vld [vmem:[%s20446_s6 + $0x38] sm:$0xff]  ;;  %v14225_v8 = vld [vmem:[%s20446_s6 + $0x40] sm:$0xff] }
0x2d66   :  { %v14227_v58 = vld [vmem:[%s20446_s6 + $0x50] sm:$0xff] }
0x2d67   :  { %13837 = vmatpush3.bf16.msra.mxu1 %v13836_v52  ;;  %v8665_v54 = vmax.f32 %v8638_v0, 0.0  ;;  %v14226_v52 = vld [vmem:[%s20446_s6 + $0x48] sm:$0xff]  ;;  %v14228_v0 = vld [vmem:[%s20446_s6 + $0x58] sm:$0xff] }
0x2d68   :  { %v8642_v60 = vpop.f32.mrb[100].mxu0  ;;  %13838 = vmatprep.subr.bf16.mxu1 %v20696_v38 }
0x2d69   :  { %v8643_v50 = vadd.f32 %v10262_v39, %v8642_v60  ;;  %v12986_v37 = vpop.f32.mrb[101].mxu0  ;;  %v14229_v60 = vld [vmem:[%s20446_s6 + $0x60] sm:$0xff] }
0x2d6a   :  { %v14231_v37 = vld [vmem:[%s20446_s6 + $0x70] sm:$0xff] }
0x2d6b   :  { %v8666_v7 = vmax.f32 %v8643_v50, 0.0  ;;  %v14230_v50 = vld [vmem:[%s20446_s6 + $0x68] sm:$0xff] }
0x2d6c   :  { %v8647_v16 = vpop.f32.mrb[102].mxu0 }
0x2d6d   :  { %v13839_v2 = vpack.c.bf16 %v8666_v7, %v8665_v54  ;;  %v12989_v30 = vpop.f32.mrb[103].mxu0  ;;  %v8648_v12 = vadd.f32 %v10262_v39, %v8647_v16  ;;  %v14232_v54 = vld [vmem:[%s20446_s6 + $0x78] sm:$0xff]  ;;  %v14233_v7 = vld [vmem:[%s20446_s6 + $0x80] sm:$0x1f]  ;;  %v14234_v16 = vld [vmem:[%s20643_s18 + $0x8] sm:$0xff] }
0x2d6e   :  { %v10296_v30 = vld [vmem:[%s20457_s17 + $0xb8] sm:$0xff] }
0x2d6f   :  { %13840 = vmatpush3.bf16.msra.mxu1 %v13839_v2  ;;  %v8667_v61 = vmax.f32 %v8648_v12, 0.0  ;;  %v10295_v2 = vld [vmem:[%s20457_s17 + $0xb0] sm:$0xff] }
0x2d70   :  { %v8652_v43 = vpop.f32.mrb[104].mxu0  ;;  %13841 = vmatprep.subr.bf16.mxu1 %v20696_v38  ;;  %v13851_v12 = vpack.c.bf16 %v10296_v30, %v10295_v2 }
0x2d71   :  { %v8653_v42 = vadd.f32 %v10262_v39, %v8652_v43  ;;  %v12992_v48 = vpop.f32.mrb[105].mxu0 }
0x2d72   :  { %13852 = vmatpush3.bf16.msra.mxu0 %v13851_v12 }
0x2d73   :  { %v8668_v33 = vmax.f32 %v8653_v42, 0.0  ;;  %13877 = vmatprep.subr.bf16.mxu0 %v20696_v38  ;;  %v20819_v42 = vmax.f32 %v19391_v11, 0.0  ;;  %v20821_v11 = vmax.f32 %v19404_v18, 0.0  ;;  %v20823_v18 = vmax.f32 %v19422_v56, 0.0 }
0x2d74   :  { %v8657_v21 = vpop.f32.mrb[106].mxu0  ;;  %v20825_v56 = vmax.f32 %v19440_v1, 0.0  ;;  %v20827_v1 = vmax.f32 %v19458_v46, 0.0  ;;  %v20829_v46 = vmax.f32 %v19476_v44, 0.0  ;;  %v20831_v44 = vmax.f32 %v19494_v27, 0.0 }
0x2d75   :  { %v13842_v17 = vpack.c.bf16 %v8668_v33, %v8667_v61  ;;  %v8658_v41 = vadd.f32 %v10262_v39, %v8657_v21  ;;  %v12995_v4 = vpop.f32.mrb[107].mxu0  ;;  %v14218_v39 = vld [vmem:[%s20446_s6 + $0x8] sm:$0xff]  ;;  %v20820_v21 = vmax.f32 %v19395_v63, 0.0  ;;  %v20822_v63 = vmax.f32 %v19413_v19, 0.0 }
0x2d76   :  { %v20824_v19 = vmax.f32 %v19431_v10, 0.0  ;;  %v20826_v10 = vmax.f32 %v19449_v15, 0.0  ;;  %v20828_v15 = vmax.f32 %v19467_v34, 0.0  ;;  %v20830_v34 = vmax.f32 %v19485_v51, 0.0 }
0x2d77   :  { %v8669_v23 = vmax.f32 %v8658_v41, 0.0  ;;  %13843 = vmatpush3.bf16.msra.mxu1 %v13842_v17  ;;  %v20832_v51 = vmax.f32 %v19503_v3, 0.0  ;;  %v20833_v27 = vmax.f32 %v19512_v29, 0.0  ;;  %v20834_v3 = vmax.f32 %v19521_v9, 0.0 }
0x2d78   :  { %13012 = vmatprep.subr.mxu1 %v20646_v49  ;;  %v20835_v29 = vmax.f32 %v19530_v14, 0.0 }
0x2d7b   :  { %13013 = vmatpush3.msk.msra.mxu1 %vm1841_vm6, %v8669_v23 }
0x2d7c   :  { %13015 = vmatmul.mubr.msk.f32.vlgmr.msra.gmra.mrb[118].mxu1 %vm1825_vm7, %v14217_v53  ;;  %13853 = vmatprep.subr.bf16.mxu1 %v20696_v38 }
0x2d7d   :  { %13017 = vmatprep.mubr.msk.f32.mxu1 %vm14447_vm2, %v20646_v49 }
0x2d80   :  { %13018 = vmatmul.mubr.msk.f32.gmra.mrb[120].mxu1 %vm1825_vm7, %v14218_v39 }
0x2d81   :  { %13020 = vmatprep.mubr.msk.f32.mxu1 %vm14447_vm2, %v20646_v49 }
0x2d84   :  { %13021 = vmatmul.mubr.msk.f32.gmra.mrb[122].mxu1 %vm1825_vm7, %v14219_v24 }
0x2d85   :  { %13023 = vmatprep.mubr.msk.f32.mxu1 %vm14447_vm2, %v20646_v49 }
0x2d88   :  { %13024 = vmatmul.mubr.msk.f32.gmra.mrb[124].mxu1 %vm1825_vm7, %v14220_v22 }
0x2d89   :  { %13026 = vmatprep.mubr.msk.f32.mxu1 %vm14447_vm2, %v20646_v49 }
0x2d8c   :  { %13027 = vmatmul.mubr.msk.f32.gmra.mrb[126].mxu1 %vm1825_vm7, %v14221_v62 }
0x2d8d   :  { %13029 = vmatprep.mubr.msk.f32.mxu1 %vm14447_vm2, %v20646_v49 }
0x2d90   :  { %13030 = vmatmul.mubr.msk.f32.gmra.mrb[128].mxu1 %vm1825_vm7, %v14222_v20 }
0x2d91   :  { %13032 = vmatprep.mubr.msk.f32.mxu1 %vm14447_vm2, %v20646_v49 }
0x2d94   :  { %13033 = vmatmul.mubr.msk.f32.gmra.mrb[130].mxu1 %vm1825_vm7, %v14223_v31 }
0x2d95   :  { %13035 = vmatprep.mubr.msk.f32.mxu1 %vm14447_vm2, %v20646_v49 }
0x2d98   :  { %13036 = vmatmul.mubr.msk.f32.gmra.mrb[132].mxu1 %vm1825_vm7, %v14224_v32 }
0x2d99   :  { %13038 = vmatprep.mubr.msk.f32.mxu1 %vm14447_vm2, %v20646_v49 }
0x2d9c   :  { %13039 = vmatmul.mubr.msk.f32.gmra.mrb[134].mxu1 %vm1825_vm7, %v14225_v8 }
0x2d9d   :  { %13041 = vmatprep.mubr.msk.f32.mxu1 %vm14447_vm2, %v20646_v49 }
0x2da0   :  { %13042 = vmatmul.mubr.msk.f32.gmra.mrb[136].mxu1 %vm1825_vm7, %v14226_v52 }
0x2da1   :  { %13044 = vmatprep.mubr.msk.f32.mxu1 %vm14447_vm2, %v20646_v49 }
0x2da4   :  { %13045 = vmatmul.mubr.msk.f32.gmra.mrb[138].mxu1 %vm1825_vm7, %v14227_v58 }
0x2da5   :  { %13047 = vmatprep.mubr.msk.f32.mxu1 %vm14447_vm2, %v20646_v49 }
0x2da8   :  { %13048 = vmatmul.mubr.msk.f32.gmra.mrb[140].mxu1 %vm1825_vm7, %v14228_v0 }
0x2da9   :  { %13050 = vmatprep.mubr.msk.f32.mxu1 %vm14447_vm2, %v20646_v49 }
0x2dac   :  { %13051 = vmatmul.mubr.msk.f32.gmra.mrb[142].mxu1 %vm1825_vm7, %v14229_v60 }
0x2dad   :  { %13053 = vmatprep.mubr.msk.f32.mxu1 %vm14447_vm2, %v20646_v49 }
0x2db0   :  { %13054 = vmatmul.mubr.msk.f32.gmra.mrb[144].mxu1 %vm1825_vm7, %v14230_v50 }
0x2db1   :  { %13056 = vmatprep.mubr.msk.f32.mxu1 %vm14447_vm2, %v20646_v49 }
0x2db4   :  { %13057 = vmatmul.mubr.msk.f32.gmra.mrb[146].mxu1 %vm1825_vm7, %v14231_v37 }
0x2db5   :  { %13059 = vmatprep.mubr.msk.f32.mxu1 %vm14447_vm2, %v20646_v49 }
0x2db8   :  { %13060 = vmatmul.mubr.msk.f32.gmra.mrb[148].mxu1 %vm1825_vm7, %v14232_v54 }
0x2db9   :  { %13062 = vmatprep.mubr.msk.f32.mxu1 %vm14447_vm2, %v20646_v49 }
0x2dbc   :  { %13063 = vmatmul.mubr.msk.f32.gmra.mrb[150].mxu1 %vm1825_vm7, %v14233_v7 }
0x2dbd   :  { %10316 = vmatprep.mubr.msk.f32.mxu1 %vm702_vm0, %v14234_v16 }
0x2e4f   :  { %v8739_v43 = vpop.f32.mrb[118].mxu1 }
0x2e50   :  { %v8740_v48 = vadd.f32 %v8739_v43, %v20819_v42  ;;  %v13016_v61 = vpop.f32.mrb[119].mxu1 }
0x2e52   :  { %13078 = vmatmul.mubr.msk.f32.vlgmr.msra.gmra.mrb[108].mxu0 %vm1315_vm4, %v8740_v48 }
0x2e53   :  { %v8744_v33 = vpop.f32.mrb[120].mxu1  ;;  %13080 = vmatprep.mubr.msk.f32.mxu0 %vm14447_vm2, %v20646_v49 }
0x2e54   :  { %v8745_v17 = vadd.f32 %v8744_v33, %v20820_v21  ;;  %v13019_v41 = vpop.f32.mrb[121].mxu1 }
0x2e56   :  { %13081 = vmatmul.mubr.msk.f32.gmra.mrb[110].mxu0 %vm1315_vm4, %v8745_v17 }
0x2e57   :  { %v8749_v4 = vpop.f32.mrb[122].mxu1  ;;  %13083 = vmatprep.mubr.msk.f32.mxu0 %vm14447_vm2, %v20646_v49 }
0x2e58   :  { %v8750_v23 = vadd.f32 %v8749_v4, %v20821_v11  ;;  %v13022_v53 = vpop.f32.mrb[123].mxu1 }
0x2e5a   :  { %13084 = vmatmul.mubr.msk.f32.gmra.mrb[112].mxu0 %vm1315_vm4, %v8750_v23 }
0x2e5b   :  { %v8754_v39 = vpop.f32.mrb[124].mxu1  ;;  %13086 = vmatprep.mubr.msk.f32.mxu0 %vm14447_vm2, %v20646_v49 }
0x2e5c   :  { %v8755_v24 = vadd.f32 %v8754_v39, %v20822_v63  ;;  %v13025_v22 = vpop.f32.mrb[125].mxu1 }
0x2e5e   :  { %13087 = vmatmul.mubr.msk.f32.gmra.mrb[114].mxu0 %vm1315_vm4, %v8755_v24 }
0x2e5f   :  { %v8759_v62 = vpop.f32.mrb[126].mxu1  ;;  %13089 = vmatprep.mubr.msk.f32.mxu0 %vm14447_vm2, %v20646_v49 }
0x2e60   :  { %v8760_v20 = vadd.f32 %v8759_v62, %v20823_v18  ;;  %v13028_v31 = vpop.f32.mrb[127].mxu1 }
0x2e62   :  { %13090 = vmatmul.mubr.msk.f32.gmra.mrb[116].mxu0 %vm1315_vm4, %v8760_v20 }
0x2e63   :  { %v8764_v32 = vpop.f32.mrb[128].mxu1  ;;  %13092 = vmatprep.mubr.msk.f32.mxu0 %vm14447_vm2, %v20646_v49 }
0x2e64   :  { %v8765_v8 = vadd.f32 %v8764_v32, %v20824_v19  ;;  %v13031_v52 = vpop.f32.mrb[129].mxu1 }
0x2e66   :  { %13093 = vmatmul.mubr.msk.f32.gmra.mrb[118].mxu0 %vm1315_vm4, %v8765_v8 }
0x2e67   :  { %v8769_v58 = vpop.f32.mrb[130].mxu1  ;;  %13095 = vmatprep.mubr.msk.f32.mxu0 %vm14447_vm2, %v20646_v49 }
0x2e68   :  { %v8770_v0 = vadd.f32 %v8769_v58, %v20825_v56  ;;  %v13034_v60 = vpop.f32.mrb[131].mxu1  ;;  %v10333_v58 = vld [vmem:[%s20723_s29 + $0x60] sm:$0xff]  ;;  %v10334_v56 = vld [vmem:[%s20723_s29 + $0x68] sm:$0xff] }
0x2e69   :  { %v13878_v60 = vpack.c.bf16 %v10334_v56, %v10333_v58  ;;  %v14242_v58 = vld [vmem:[%s20643_s18 + $0x48] sm:$0xff]  ;;  %v14243_v56 = vld [vmem:[%s20643_s18 + $0x40] sm:$0xff] }
0x2e6a   :  { %13096 = vmatmul.mubr.msk.f32.gmra.mrb[120].mxu0 %vm1315_vm4, %v8770_v0 }
0x2e6b   :  { %v8774_v50 = vpop.f32.mrb[132].mxu1  ;;  %13098 = vmatprep.mubr.msk.f32.mxu0 %vm14447_vm2, %v20646_v49  ;;  %13879 = vmatpush3.bf16.msra.mxu0 %v13878_v60  ;;  %v14246_v60 = vld [vmem:[%s20643_s18 + $0x68] sm:$0xff] }
0x2e6c   :  { %v8775_v37 = vadd.f32 %v8774_v50, %v20826_v10  ;;  %v13037_v54 = vpop.f32.mrb[133].mxu1  ;;  %13880 = vmatprep.subr.bf16.mxu0 %v20696_v38 }
0x2e6e   :  { %13099 = vmatmul.mubr.msk.f32.gmra.mrb[122].mxu0 %vm1315_vm4, %v8775_v37 }
0x2e6f   :  { %v8779_v7 = vpop.f32.mrb[134].mxu1  ;;  %13101 = vmatprep.mubr.msk.f32.mxu0 %vm14447_vm2, %v20646_v49 }
0x2e70   :  { %v8780_v16 = vadd.f32 %v8779_v7, %v20827_v1  ;;  %v13040_v2 = vpop.f32.mrb[135].mxu1 }
0x2e72   :  { %13102 = vmatmul.mubr.msk.f32.gmra.mrb[124].mxu0 %vm1315_vm4, %v8780_v16 }
0x2e73   :  { %v8784_v30 = vpop.f32.mrb[136].mxu1  ;;  %13104 = vmatprep.mubr.msk.f32.mxu0 %vm14447_vm2, %v20646_v49 }
0x2e74   :  { %v8785_v12 = vadd.f32 %v8784_v30, %v20828_v15  ;;  %v13043_v43 = vpop.f32.mrb[137].mxu1 }
0x2e76   :  { %13105 = vmatmul.mubr.msk.f32.gmra.mrb[126].mxu0 %vm1315_vm4, %v8785_v12 }
0x2e77   :  { %v8789_v42 = vpop.f32.mrb[138].mxu1  ;;  %13107 = vmatprep.mubr.msk.f32.mxu0 %vm14447_vm2, %v20646_v49 }
0x2e78   :  { %v8790_v48 = vadd.f32 %v8789_v42, %v20829_v46  ;;  %v13046_v61 = vpop.f32.mrb[139].mxu1 }
0x2e7a   :  { %13108 = vmatmul.mubr.msk.f32.gmra.mrb[128].mxu0 %vm1315_vm4, %v8790_v48 }
0x2e7b   :  { %v8794_v33 = vpop.f32.mrb[140].mxu1  ;;  %13110 = vmatprep.mubr.msk.f32.mxu0 %vm14447_vm2, %v20646_v49 }
0x2e7c   :  { %v8795_v21 = vadd.f32 %v8794_v33, %v20830_v34  ;;  %v13049_v17 = vpop.f32.mrb[141].mxu1 }
0x2e7e   :  { %13111 = vmatmul.mubr.msk.f32.gmra.mrb[130].mxu0 %vm1315_vm4, %v8795_v21 }
0x2e7f   :  { %v8799_v41 = vpop.f32.mrb[142].mxu1  ;;  %13113 = vmatprep.mubr.msk.f32.mxu0 %vm14447_vm2, %v20646_v49 }
0x2e80   :  { %v8800_v4 = vadd.f32 %v8799_v41, %v20831_v44  ;;  %v13052_v11 = vpop.f32.mrb[143].mxu1 }
0x2e82   :  { %13114 = vmatmul.mubr.msk.f32.gmra.mrb[132].mxu0 %vm1315_vm4, %v8800_v4 }
0x2e83   :  { %v8804_v23 = vpop.f32.mrb[144].mxu1  ;;  %13116 = vmatprep.mubr.msk.f32.mxu0 %vm14447_vm2, %v20646_v49 }
0x2e84   :  { %v8805_v53 = vadd.f32 %v8804_v23, %v20832_v51  ;;  %v13055_v39 = vpop.f32.mrb[145].mxu1 }
0x2e86   :  { %13117 = vmatmul.mubr.msk.f32.gmra.mrb[134].mxu0 %vm1315_vm4, %v8805_v53 }
0x2e87   :  { %v8809_v63 = vpop.f32.mrb[146].mxu1  ;;  %13119 = vmatprep.mubr.msk.f32.mxu0 %vm14447_vm2, %v20646_v49 }
0x2e88   :  { %v8810_v24 = vadd.f32 %v8809_v63, %v20833_v27  ;;  %v13058_v22 = vpop.f32.mrb[147].mxu1 }
0x2e8a   :  { %13120 = vmatmul.mubr.msk.f32.gmra.mrb[136].mxu0 %vm1315_vm4, %v8810_v24 }
0x2e8b   :  { %v8814_v62 = vpop.f32.mrb[148].mxu1  ;;  %13122 = vmatprep.mubr.msk.f32.mxu0 %vm14447_vm2, %v20646_v49 }
0x2e8c   :  { %v8815_v18 = vadd.f32 %v8814_v62, %v20834_v3  ;;  %v13061_v20 = vpop.f32.mrb[149].mxu1 }
0x2e8e   :  { %13123 = vmatmul.mubr.msk.f32.gmra.mrb[138].mxu0 %vm1315_vm4, %v8815_v18 }
0x2e8f   :  { %v8819_v31 = vpop.f32.mrb[150].mxu1  ;;  %13125 = vmatprep.mubr.msk.f32.mxu0 %vm14447_vm2, %v20646_v49 }
0x2e90   :  { %v8820_v32 = vadd.f32 %v8819_v31, %v20835_v29  ;;  %v13064_v19 = vpop.f32.mrb[151].mxu1  ;;  %v14235_v29 = vld [vmem:[%s20643_s18] sm:$0xff] }
0x2e91   :  { %v14238_v19 = vld [vmem:[%s20643_s18 + $0x28] sm:$0xff] }
0x2e92   :  { %13126 = vmatmul.mubr.msk.f32.gmra.mrb[140].mxu0 %vm1315_vm4, %v8820_v32  ;;  %v14237_v32 = vld [vmem:[%s20643_s18 + $0x10] sm:$0xff] }
0x2e93   :  { %13136 = vmatprep.mubr.msk.f32.mxu0 %vm14447_vm2, %v20646_v49 }
0x2f25   :  { %v8949_v8 = vpop.f32.mrb[108].mxu0 }
0x2f26   :  { %v13079_v52 = vpop.f32.mrb[109].mxu0 }
0x2f27   :  { %v14240_v52 = vld [vmem:[%s20643_s18 + $0x38] sm:$0xff] }
0x2f29   :  { %v8954_v9 = vpop.f32.mrb[110].mxu0 }
0x2f2a   :  { %v13854_v0 = vpack.c.bf16 %v8954_v9, %v8949_v8  ;;  %v13082_v14 = vpop.f32.mrb[111].mxu0  ;;  %v14239_v8 = vld [vmem:[%s20643_s18 + $0x20] sm:$0xff]  ;;  %v14241_v9 = vld [vmem:[%s20643_s18 + $0x30] sm:$0xff] }
0x2f2b   :  { %v14245_v14 = vld [vmem:[%s20643_s18 + $0x50] sm:$0xff] }
0x2f2c   :  { %13855 = vmatpush1.bf16.msra.mxu1 %v13854_v0  ;;  %v14244_v0 = vld [vmem:[%s20643_s18 + $0x58] sm:$0xff] }
0x2f2d   :  { %v8959_v50 = vpop.f32.mrb[112].mxu0  ;;  %13856 = vmatprep.subr.bf16.mxu1 %v20696_v38 }
0x2f2e   :  { %v13085_v10 = vpop.f32.mrb[113].mxu0 }
0x2f2f   :  { %v14248_v10 = vld [vmem:[%s20643_s18 + $0x78] sm:$0xff] }
0x2f31   :  { %v8964_v37 = vpop.f32.mrb[114].mxu0 }
0x2f32   :  { %v13857_v54 = vpack.c.bf16 %v8964_v37, %v8959_v50  ;;  %v13088_v7 = vpop.f32.mrb[115].mxu0  ;;  %v14247_v50 = vld [vmem:[%s20643_s18 + $0x60] sm:$0xff]  ;;  %v14249_v37 = vld [vmem:[%s20643_s18 + $0x70] sm:$0xff] }
0x2f33   :  { %v14251_v7 = vld [vmem:[%s20643_s18 + $0x80] sm:$0xff] }
0x2f34   :  { %13858 = vmatpush1.bf16.msra.mxu1 %v13857_v54  ;;  %v14250_v54 = vld [vmem:[%s20643_s18 + $0x88] sm:$0xff] }
0x2f35   :  { %v8969_v1 = vpop.f32.mrb[116].mxu0  ;;  %13859 = vmatprep.subr.bf16.mxu1 %v20696_v38 }
0x2f36   :  { %v13091_v16 = vpop.f32.mrb[117].mxu0 }
0x2f37   :  { %v14253_v16 = vld [vmem:[%s20643_s18 + $0x90] sm:$0xff] }
0x2f39   :  { %v8974_v2 = vpop.f32.mrb[118].mxu0 }
0x2f3a   :  { %v13860_v30 = vpack.c.bf16 %v8974_v2, %v8969_v1  ;;  %v13094_v15 = vpop.f32.mrb[119].mxu0  ;;  %v14252_v1 = vld [vmem:[%s20643_s18 + $0x98] sm:$0xff]  ;;  %v14254_v2 = vld [vmem:[%s20643_s18 + $0xa8] sm:$0xff] }
0x2f3b   :  { %v14256_v15 = vld [vmem:[%s20643_s18 + $0xb8] sm:$0xff] }
0x2f3c   :  { %13861 = vmatpush1.bf16.msra.mxu1 %v13860_v30  ;;  %v14255_v30 = vld [vmem:[%s20643_s18 + $0xa0] sm:$0xff] }
0x2f3d   :  { %v8979_v12 = vpop.f32.mrb[120].mxu0  ;;  %13862 = vmatprep.subr.bf16.mxu1 %v20696_v38 }
0x2f3e   :  { %v13097_v43 = vpop.f32.mrb[121].mxu0 }
0x2f3f   :  { %v14258_v43 = vld [vmem:[%s20643_s18 + $0xc8] sm:$0xff] }
0x2f41   :  { %v8984_v42 = vpop.f32.mrb[122].mxu0 }
0x2f42   :  { %v13863_v46 = vpack.c.bf16 %v8984_v42, %v8979_v12  ;;  %v13100_v48 = vpop.f32.mrb[123].mxu0  ;;  %v14257_v12 = vld [vmem:[%s20643_s18 + $0xb0] sm:$0xff]  ;;  %v14259_v42 = vld [vmem:[%s20643_s18 + $0xc0] sm:$0xff] }
0x2f43   :  { %v14261_v48 = vld [vmem:[%s20643_s18 + $0xd0] sm:$0xff] }
0x2f44   :  { %13864 = vmatpush1.bf16.msra.mxu1 %v13863_v46  ;;  %v14260_v46 = vld [vmem:[%s20643_s18 + $0xd8] sm:$0xff] }
0x2f45   :  { %v8989_v61 = vpop.f32.mrb[124].mxu0  ;;  %13865 = vmatprep.subr.bf16.mxu1 %v20696_v38 }
0x2f46   :  { %v13103_v33 = vpop.f32.mrb[125].mxu0 }
0x2f47   :  { %v14263_v33 = vld [vmem:[%s20643_s18 + $0xe0] sm:$0xff] }
0x2f49   :  { %v8994_v34 = vpop.f32.mrb[126].mxu0 }
0x2f4a   :  { %v13866_v21 = vpack.c.bf16 %v8994_v34, %v8989_v61  ;;  %v13106_v17 = vpop.f32.mrb[127].mxu0  ;;  %v14262_v61 = vld [vmem:[%s20643_s18 + $0xe8] sm:$0xff]  ;;  %v14264_v34 = vld [vmem:[%s20643_s18 + $0xf8] sm:$0xff] }
0x2f4b   :  { %v14266_v17 = vld [vmem:[%s20643_s18 + $0x108] sm:$0x1f] }
0x2f4c   :  { %13867 = vmatpush1.bf16.msra.mxu1 %v13866_v21  ;;  %v14265_v21 = vld [vmem:[%s20643_s18 + $0xf0] sm:$0xff] }
0x2f4d   :  { %v8999_v41 = vpop.f32.mrb[128].mxu0  ;;  %13868 = vmatprep.subr.bf16.mxu1 %v20696_v38 }
0x2f4e   :  { %v13109_v44 = vpop.f32.mrb[129].mxu0 }
0x2f4f   :  { %v10335_v44 = vld [vmem:[%s20723_s29 + $0x70] sm:$0xff] }
0x2f51   :  { %v9004_v4 = vpop.f32.mrb[130].mxu0 }
0x2f52   :  { %v13869_v11 = vpack.c.bf16 %v9004_v4, %v8999_v41  ;;  %v13112_v23 = vpop.f32.mrb[131].mxu0  ;;  %v14267_v41 = vld [vmem:[%s20643_s18 + $0x100] sm:$0x1f]  ;;  %v10336_v4 = vld [vmem:[%s20723_s29 + $0x78] sm:$0xff] }
0x2f53   :  { %v20252_v23 = vld [vmem:[#allocation10 + $0x3] ss:$0 sm:$0xff] }
0x2f54   :  { %13870 = vmatpush1.bf16.msra.mxu1 %v13869_v11  ;;  %v13881_v11 = vpack.c.bf16 %v10336_v4, %v10335_v44  ;;  %v20842_v44 = vld [vmem:[#allocation23_spill] sm:$0xff] }
0x2f55   :  { %v9009_v51 = vpop.f32.mrb[132].mxu0  ;;  %13871 = vmatprep.subr.bf16.mxu1 %v20696_v38 }
0x2f56   :  { %v13115_v53 = vpop.f32.mrb[133].mxu0  ;;  %13882 = vmatpush3.bf16.msra.mxu0 %v13881_v11 }
0x2f59   :  { %v9014_v39 = vpop.f32.mrb[134].mxu0 }
0x2f5a   :  { %v13872_v63 = vpack.c.bf16 %v9014_v39, %v9009_v51  ;;  %v13118_v27 = vpop.f32.mrb[135].mxu0 }
0x2f5c   :  { %13873 = vmatpush1.bf16.msra.mxu1 %v13872_v63 }
0x2f5d   :  { %v9019_v24 = vpop.f32.mrb[136].mxu0  ;;  %13874 = vmatprep.subr.bf16.mxu1 %v20696_v38  ;;  %v14236_v38 = vld [vmem:[%s20643_s18 + $0x18] sm:$0xff] }
0x2f5e   :  { %v13121_v22 = vpop.f32.mrb[137].mxu0 }
0x2f61   :  { %v9024_v62 = vpop.f32.mrb[138].mxu0 }
0x2f62   :  { %v13875_v3 = vpack.c.bf16 %v9024_v62, %v9019_v24  ;;  %v13124_v18 = vpop.f32.mrb[139].mxu0 }
0x2f64   :  { %13876 = vmatpush1.bf16.msra.mxu1 %v13875_v3 }
0x2f65   :  { %v9029_v20 = vpop.f32.mrb[140].mxu0  ;;  %9074 = vmatprep.subr.mxu1 %v20646_v49 }
0x2f66   :  { %v13127_v31 = vpop.f32.mrb[141].mxu0 }
0x2f68   :  { %10315 = vmatpush1.msk.msra.mxu1 %vm754_vm1, %v9029_v20  ;;  %v20836_v20 = vld [vmem:[#allocation19_spill] sm:$0xff] }
0x2f69   :  { %9107 = vmatmul.mubr.f32.vlgmr.msra.gmra.mrb[152].mxu1 %v14235_v29 }
0x2f6a   :  { %10317 = vmatprep.mubr.msk.f32.mxu1 %vm702_vm0, %v14236_v38 }
0x2f6d   :  { %9112 = vmatmul.mubr.f32.gmra.mrb[154].mxu1 %v14237_v32 }
0x2f6e   :  { %10318 = vmatprep.mubr.msk.f32.mxu1 %vm702_vm0, %v14238_v19 }
0x2f71   :  { %9117 = vmatmul.mubr.f32.gmra.mrb[156].mxu1 %v14239_v8 }
0x2f72   :  { %10319 = vmatprep.mubr.msk.f32.mxu1 %vm702_vm0, %v14240_v52 }
0x2f75   :  { %9122 = vmatmul.mubr.f32.gmra.mrb[158].mxu1 %v14241_v9 }
0x2f76   :  { %10320 = vmatprep.mubr.msk.f32.mxu1 %vm702_vm0, %v14242_v58 }
0x2f79   :  { %9127 = vmatmul.mubr.f32.gmra.mrb[160].mxu1 %v14243_v56 }
0x2f7a   :  { %10321 = vmatprep.mubr.msk.f32.mxu1 %vm702_vm0, %v14244_v0  ;;  %v20838_v0 = vld [vmem:[#allocation18_spill] sm:$0xff] }
0x2f7d   :  { %9132 = vmatmul.mubr.f32.gmra.mrb[162].mxu1 %v14245_v14 }
0x2f7e   :  { %10322 = vmatprep.mubr.msk.f32.mxu1 %vm702_vm0, %v14246_v60 }
0x2f81   :  { %9137 = vmatmul.mubr.f32.gmra.mrb[164].mxu1 %v14247_v50 }
0x2f82   :  { %10323 = vmatprep.mubr.msk.f32.mxu1 %vm702_vm0, %v14248_v10 }
0x2f85   :  { %9142 = vmatmul.mubr.f32.gmra.mrb[166].mxu1 %v14249_v37 }
0x2f86   :  { %10324 = vmatprep.mubr.msk.f32.mxu1 %vm702_vm0, %v14250_v54  ;;  %v20839_v54 = vld [vmem:[#allocation20_spill] sm:$0xff] }
0x2f89   :  { %9147 = vmatmul.mubr.f32.gmra.mrb[168].mxu1 %v14251_v7 }
0x2f8a   :  { %10325 = vmatprep.mubr.msk.f32.mxu1 %vm702_vm0, %v14252_v1 }
0x2f8d   :  { %9152 = vmatmul.mubr.f32.gmra.mrb[170].mxu1 %v14253_v16 }
0x2f8e   :  { %10326 = vmatprep.mubr.msk.f32.mxu1 %vm702_vm0, %v14254_v2 }
0x2f91   :  { %9157 = vmatmul.mubr.f32.gmra.mrb[172].mxu1 %v14255_v30 }
0x2f92   :  { %10327 = vmatprep.mubr.msk.f32.mxu1 %vm702_vm0, %v14256_v15  ;;  %v20840_v15 = vld [vmem:[#allocation21_spill] sm:$0xff] }
0x2f95   :  { %9162 = vmatmul.mubr.f32.gmra.mrb[174].mxu1 %v14257_v12 }
0x2f96   :  { %10328 = vmatprep.mubr.msk.f32.mxu1 %vm702_vm0, %v14258_v43 }
0x2f99   :  { %9167 = vmatmul.mubr.f32.gmra.mrb[176].mxu1 %v14259_v42 }
0x2f9a   :  { %10329 = vmatprep.mubr.msk.f32.mxu1 %vm702_vm0, %v14260_v46 }
0x2f9d   :  { %9172 = vmatmul.mubr.f32.gmra.mrb[178].mxu1 %v14261_v48 }
0x2f9e   :  { %10330 = vmatprep.mubr.msk.f32.mxu1 %vm702_vm0, %v14262_v61  ;;  %v20841_v61 = vld [vmem:[#allocation22_spill] sm:$0xff] }
0x2fa1   :  { %9177 = vmatmul.mubr.f32.gmra.mrb[180].mxu1 %v14263_v33 }
0x2fa2   :  { %10331 = vmatprep.mubr.msk.f32.mxu1 %vm702_vm0, %v14264_v34 }
0x2fa5   :  { %9182 = vmatmul.mubr.f32.gmra.mrb[182].mxu1 %v14265_v21 }
0x2fa6   :  { %10332 = vmatprep.mubr.msk.f32.mxu1 %vm702_vm0, %v14266_v17 }
0x2fa9   :  { %9187 = vmatmul.mubr.f32.gmra.mrb[184].mxu1 %v14267_v41 }
0x303c   :  { %v9108_v51 = vpop.f32.mrb[152].mxu1 }
0x303d   :  { %v9109_v53 = vadd.f32 %v20252_v23, %v9108_v51  ;;  %v9110_v39 = vpop.f32.mrb[153].mxu1 }
0x303f   :  { %v9192_v63 = vmax.f32 %v9109_v53, 0.0 }
0x3040   :  { %v9113_v27 = vpop.f32.mrb[154].mxu1 }
0x3041   :  { %v9209_v24 = vadd.f32 %v9192_v63, %v19048_v28  ;;  %v9114_v22 = vadd.f32 %v20252_v23, %v9113_v27  ;;  %v9115_v62 = vpop.f32.mrb[155].mxu1  ;;  %v20837_v28 = vld [vmem:[#allocation17_spill] sm:$0xff]  ;;  %v20843_v63 = vld [vmem:[#allocation24_spill] sm:$0xff] }
0x3043   :  { %v9193_v3 = vmax.f32 %v9114_v22, 0.0  ;;  %13137 = vmatmul.mubr.msk.f32.vlgmr.msra.gmra.mrb[142].mxu0 %vm930_vm3, %v9209_v24 }
0x3044   :  { %v9118_v18 = vpop.f32.mrb[156].mxu1  ;;  %13139 = vmatprep.mubr.msk.f32.mxu0 %vm14447_vm2, %v20646_v49 }
0x3045   :  { %v9210_v31 = vadd.f32 %v9193_v3, %v20836_v20  ;;  %v9119_v29 = vadd.f32 %v20252_v23, %v9118_v18  ;;  %v9120_v38 = vpop.f32.mrb[157].mxu1  ;;  %v20844_v18 = vld [vmem:[#allocation25_spill] sm:$0xff] }
0x3047   :  { %v9194_v32 = vmax.f32 %v9119_v29, 0.0  ;;  %13140 = vmatmul.mubr.msk.f32.gmra.mrb[144].mxu0 %vm930_vm3, %v9210_v31 }
0x3048   :  { %v9123_v19 = vpop.f32.mrb[158].mxu1  ;;  %13142 = vmatprep.mubr.msk.f32.mxu0 %vm14447_vm2, %v20646_v49 }
0x3049   :  { %v9211_v8 = vadd.f32 %v9194_v32, %v20837_v28  ;;  %v9124_v52 = vadd.f32 %v20252_v23, %v9123_v19  ;;  %v9125_v9 = vpop.f32.mrb[159].mxu1  ;;  %v20845_v19 = vld [vmem:[#allocation26_spill] sm:$0xff] }
0x304b   :  { %v9195_v58 = vmax.f32 %v9124_v52, 0.0  ;;  %13143 = vmatmul.mubr.msk.f32.gmra.mrb[146].mxu0 %vm930_vm3, %v9211_v8 }
0x304c   :  { %v9128_v56 = vpop.f32.mrb[160].mxu1  ;;  %13145 = vmatprep.mubr.msk.f32.mxu0 %vm14447_vm2, %v20646_v49 }
0x304d   :  { %v9212_v14 = vadd.f32 %v9195_v58, %v20838_v0  ;;  %v9129_v60 = vadd.f32 %v20252_v23, %v9128_v56  ;;  %v9130_v50 = vpop.f32.mrb[161].mxu1  ;;  %v20846_v56 = vld [vmem:[#allocation27_spill] sm:$0xff] }
0x304f   :  { %v9196_v10 = vmax.f32 %v9129_v60, 0.0  ;;  %13146 = vmatmul.mubr.msk.f32.gmra.mrb[148].mxu0 %vm930_vm3, %v9212_v14 }
0x3050   :  { %v9133_v37 = vpop.f32.mrb[162].mxu1  ;;  %13148 = vmatprep.mubr.msk.f32.mxu0 %vm14447_vm2, %v20646_v49 }
0x3051   :  { %v9213_v7 = vadd.f32 %v9196_v10, %v20839_v54  ;;  %v9134_v1 = vadd.f32 %v20252_v23, %v9133_v37  ;;  %v9135_v16 = vpop.f32.mrb[163].mxu1  ;;  %v20847_v37 = vld [vmem:[#allocation28_spill] sm:$0xff] }
0x3053   :  { %v9197_v2 = vmax.f32 %v9134_v1, 0.0  ;;  %13149 = vmatmul.mubr.msk.f32.gmra.mrb[150].mxu0 %vm930_vm3, %v9213_v7 }
0x3054   :  { %v9138_v30 = vpop.f32.mrb[164].mxu1  ;;  %13151 = vmatprep.mubr.msk.f32.mxu0 %vm14447_vm2, %v20646_v49 }
0x3055   :  { %v9214_v12 = vadd.f32 %v9197_v2, %v20840_v15  ;;  %v9139_v43 = vadd.f32 %v20252_v23, %v9138_v30  ;;  %v9140_v42 = vpop.f32.mrb[165].mxu1  ;;  %v20848_v30 = vld [vmem:[#allocation29_spill] sm:$0xff] }
0x3057   :  { %v9198_v46 = vmax.f32 %v9139_v43, 0.0  ;;  %13152 = vmatmul.mubr.msk.f32.gmra.mrb[152].mxu0 %vm930_vm3, %v9214_v12 }
0x3058   :  { %v9143_v48 = vpop.f32.mrb[166].mxu1  ;;  %13154 = vmatprep.mubr.msk.f32.mxu0 %vm14447_vm2, %v20646_v49 }
0x3059   :  { %v9215_v33 = vadd.f32 %v9198_v46, %v20841_v61  ;;  %v9144_v34 = vadd.f32 %v20252_v23, %v9143_v48  ;;  %v9145_v21 = vpop.f32.mrb[167].mxu1  ;;  %v20849_v48 = vld [vmem:[#allocation30_spill] sm:$0xff] }
0x305b   :  { %v9199_v17 = vmax.f32 %v9144_v34, 0.0  ;;  %13155 = vmatmul.mubr.msk.f32.gmra.mrb[154].mxu0 %vm930_vm3, %v9215_v33 }
0x305c   :  { %v9148_v41 = vpop.f32.mrb[168].mxu1  ;;  %13157 = vmatprep.mubr.msk.f32.mxu0 %vm14447_vm2, %v20646_v49 }
0x305d   :  { %v9216_v4 = vadd.f32 %v9199_v17, %v20842_v44  ;;  %v9149_v11 = vadd.f32 %v20252_v23, %v9148_v41  ;;  %v9150_v51 = vpop.f32.mrb[169].mxu1  ;;  %v20850_v41 = vld [vmem:[#allocation31_spill] sm:$0xff] }
0x305f   :  { %v9200_v53 = vmax.f32 %v9149_v11, 0.0  ;;  %13158 = vmatmul.mubr.msk.f32.gmra.mrb[156].mxu0 %vm930_vm3, %v9216_v4 }
0x3060   :  { %v9153_v39 = vpop.f32.mrb[170].mxu1  ;;  %13160 = vmatprep.mubr.msk.f32.mxu0 %vm14447_vm2, %v20646_v49 }
0x3061   :  { %v9217_v27 = vadd.f32 %v9200_v53, %v20843_v63  ;;  %v9154_v24 = vadd.f32 %v20252_v23, %v9153_v39  ;;  %v9155_v22 = vpop.f32.mrb[171].mxu1  ;;  %v20851_v53 = vld [vmem:[#allocation32_spill] sm:$0xff] }
0x3063   :  { %v9201_v62 = vmax.f32 %v9154_v24, 0.0  ;;  %13161 = vmatmul.mubr.msk.f32.gmra.mrb[158].mxu0 %vm930_vm3, %v9217_v27  ;;  %v20337_v27 = vld [vmem:[#allocation12] ss:$0 sm:$0xff]  ;;  %v20852_v24 = vld [vmem:[#allocation33_spill] sm:$0xff] }
0x3064   :  { %v9158_v3 = vpop.f32.mrb[172].mxu1  ;;  %13163 = vmatprep.mubr.msk.f32.mxu0 %vm14447_vm2, %v20646_v49 }
0x3065   :  { %v9218_v20 = vadd.f32 %v9201_v62, %v20844_v18  ;;  %v9159_v31 = vadd.f32 %v20252_v23, %v9158_v3  ;;  %v9160_v29 = vpop.f32.mrb[173].mxu1 }
0x3067   :  { %v9202_v38 = vmax.f32 %v9159_v31, 0.0  ;;  %13164 = vmatmul.mubr.msk.f32.gmra.mrb[160].mxu0 %vm930_vm3, %v9218_v20 }
0x3068   :  { %v9163_v32 = vpop.f32.mrb[174].mxu1  ;;  %13166 = vmatprep.mubr.msk.f32.mxu0 %vm14447_vm2, %v20646_v49 }
0x3069   :  { %v9219_v28 = vadd.f32 %v9202_v38, %v20845_v19  ;;  %v9164_v8 = vadd.f32 %v20252_v23, %v9163_v32  ;;  %v9165_v52 = vpop.f32.mrb[175].mxu1 }
0x306b   :  { %v9203_v9 = vmax.f32 %v9164_v8, 0.0  ;;  %13167 = vmatmul.mubr.msk.f32.gmra.mrb[162].mxu0 %vm930_vm3, %v9219_v28 }
0x306c   :  { %v9168_v58 = vpop.f32.mrb[176].mxu1  ;;  %13169 = vmatprep.mubr.msk.f32.mxu0 %vm14447_vm2, %v20646_v49 }
0x306d   :  { %v9220_v0 = vadd.f32 %v9203_v9, %v20846_v56  ;;  %v9169_v14 = vadd.f32 %v20252_v23, %v9168_v58  ;;  %v9170_v60 = vpop.f32.mrb[177].mxu1 }
0x306f   :  { %v9204_v50 = vmax.f32 %v9169_v14, 0.0  ;;  %13170 = vmatmul.mubr.msk.f32.gmra.mrb[164].mxu0 %vm930_vm3, %v9220_v0 }
0x3070   :  { %v9173_v10 = vpop.f32.mrb[178].mxu1  ;;  %13172 = vmatprep.mubr.msk.f32.mxu0 %vm14447_vm2, %v20646_v49 }
0x3071   :  { %v9221_v54 = vadd.f32 %v9204_v50, %v20847_v37  ;;  %v9174_v7 = vadd.f32 %v20252_v23, %v9173_v10  ;;  %v9175_v1 = vpop.f32.mrb[179].mxu1  ;;  %v20856_v37 = vld [vmem:[#allocation35_spill] sm:$0xff] }
0x3073   :  { %v9205_v16 = vmax.f32 %v9174_v7, 0.0  ;;  %13173 = vmatmul.mubr.msk.f32.gmra.mrb[166].mxu0 %vm930_vm3, %v9221_v54 }
0x3074   :  { %v9178_v2 = vpop.f32.mrb[180].mxu1  ;;  %13175 = vmatprep.mubr.msk.f32.mxu0 %vm14447_vm2, %v20646_v49 }
0x3075   :  { %v9222_v15 = vadd.f32 %v9205_v16, %v20848_v30  ;;  %v9179_v12 = vadd.f32 %v20252_v23, %v9178_v2  ;;  %v9180_v43 = vpop.f32.mrb[181].mxu1 }
0x3077   :  { %v9206_v42 = vmax.f32 %v9179_v12, 0.0  ;;  %13176 = vmatmul.mubr.msk.f32.gmra.mrb[168].mxu0 %vm930_vm3, %v9222_v15 }
0x3078   :  { %v9183_v46 = vpop.f32.mrb[182].mxu1  ;;  %13178 = vmatprep.mubr.msk.f32.mxu0 %vm14447_vm2, %v20646_v49 }
0x3079   :  { %v9223_v61 = vadd.f32 %v9206_v42, %v20849_v48  ;;  %v9184_v33 = vadd.f32 %v20252_v23, %v9183_v46  ;;  %v9185_v34 = vpop.f32.mrb[183].mxu1 }
0x307b   :  { %v9207_v21 = vmax.f32 %v9184_v33, 0.0  ;;  %13179 = vmatmul.mubr.msk.f32.gmra.mrb[170].mxu0 %vm930_vm3, %v9223_v61 }
0x307c   :  { %v9188_v17 = vpop.f32.mrb[184].mxu1  ;;  %13181 = vmatprep.mubr.msk.f32.mxu0 %vm14447_vm2, %v20646_v49 }
0x307d   :  { %v9224_v44 = vadd.f32 %v9207_v21, %v20850_v41  ;;  %v9189_v4 = vadd.f32 %v20252_v23, %v9188_v17  ;;  %v9190_v11 = vpop.f32.mrb[185].mxu1 }
0x307f   :  { %v9208_v51 = vmax.f32 %v9189_v4, 0.0  ;;  %13182 = vmatmul.mubr.msk.f32.gmra.mrb[172].mxu0 %vm930_vm3, %v9224_v44 }
0x3080   :  { %13184 = vmatprep.mubr.msk.f32.mxu0 %vm14447_vm2, %v20646_v49 }
0x3081   :  { %v9225_v39 = vadd.f32 %v9208_v51, %v20851_v53 }
0x3083   :  { %13185 = vmatmul.mubr.msk.f32.gmra.mrb[174].mxu0 %vm930_vm3, %v9225_v39 }
0x3116   :  { %v9348_v63 = vpop.f32.mrb[142].mxu0 }
0x3117   :  { %v9432_v22 = vadd.f32 %v9348_v63, %v20852_v24  ;;  %v13138_v62 = vpop.f32.mrb[143].mxu0 }
0x3119   :  { %v9456_v23 = vadd.f32 %v20337_v27, %v9432_v22 }
0x311a   :  { %v9353_v3 = vpop.f32.mrb[144].mxu0 }
0x311b   :  { %9474 = vst.msk [vmem:[%s20853_s2] sm:$0xff] %vm9473_vm10, %v9456_v23  ;;  %v9433_v49 = vadd.f32 %v9353_v3, %v19263_v47  ;;  %v13141_v18 = vpop.f32.mrb[145].mxu0 }
0x311d   :  { %v9457_v20 = vadd.f32 %v20337_v27, %v9433_v49 }
0x311e   :  { %v9358_v31 = vpop.f32.mrb[146].mxu0 }
0x311f   :  { %9475 = vst.msk [vmem:[%s20853_s2 + $0x8] sm:$0xff] %vm9473_vm10, %v9457_v20  ;;  %v9434_v29 = vadd.f32 %v9358_v31, %v19271_v45  ;;  %v13144_v38 = vpop.f32.mrb[147].mxu0  ;;  %v20854_v45 = vld [vmem:[#allocation34_spill] sm:$0xff] }
0x3121   :  { %v9458_v32 = vadd.f32 %v20337_v27, %v9434_v29 }
0x3122   :  { %v9363_v19 = vpop.f32.mrb[148].mxu0 }
0x3123   :  { %9476 = vst.msk [vmem:[%s20853_s2 + $0x10] sm:$0xff] %vm9473_vm10, %v9458_v32  ;;  %v9435_v47 = vadd.f32 %v9363_v19, %v19275_v13  ;;  %v13147_v28 = vpop.f32.mrb[149].mxu0  ;;  %v20855_v13 = vld [vmem:[#allocation38_spill] sm:$0xff] }
0x3125   :  { %v9459_v8 = vadd.f32 %v20337_v27, %v9435_v47 }
0x3126   :  { %v9368_v52 = vpop.f32.mrb[150].mxu0 }
0x3127   :  { %9477 = vst.msk [vmem:[%s20853_s2 + $0x18] sm:$0xff] %vm9473_vm10, %v9459_v8  ;;  %v9436_v9 = vadd.f32 %v9368_v52, %v20854_v45  ;;  %v13150_v58 = vpop.f32.mrb[151].mxu0 }
0x3129   :  { %v9460_v56 = vadd.f32 %v20337_v27, %v9436_v9 }
0x312a   :  { %v9373_v0 = vpop.f32.mrb[152].mxu0 }
0x312b   :  { %9478 = vst.msk [vmem:[%s20853_s2 + $0x20] sm:$0xff] %vm9473_vm10, %v9460_v56  ;;  %v9437_v14 = vadd.f32 %v9373_v0, %v20855_v13  ;;  %v13153_v60 = vpop.f32.mrb[153].mxu0 }
0x312d   :  { %v9461_v50 = vadd.f32 %v20337_v27, %v9437_v14 }
0x312e   :  { %v9378_v10 = vpop.f32.mrb[154].mxu0 }
0x312f   :  { %9479 = vst.msk [vmem:[%s20853_s2 + $0x28] sm:$0xff] %vm9473_vm10, %v9461_v50  ;;  %v9438_v54 = vadd.f32 %v9378_v10, %v20856_v37  ;;  %v13156_v7 = vpop.f32.mrb[155].mxu0 }
0x3131   :  { %v9462_v1 = vadd.f32 %v20337_v27, %v9438_v54 }
0x3132   :  { %v9383_v16 = vpop.f32.mrb[156].mxu0 }
0x3133   :  { %9480 = vst.msk [vmem:[%s20853_s2 + $0x30] sm:$0xff] %vm9473_vm10, %v9462_v1  ;;  %v9439_v2 = vadd.f32 %v9383_v16, %v19289_v35  ;;  %v13159_v30 = vpop.f32.mrb[157].mxu0 }
0x3135   :  { %v9463_v15 = vadd.f32 %v20337_v27, %v9439_v2 }
0x3136   :  { %v9388_v12 = vpop.f32.mrb[158].mxu0 }
0x3137   :  { %9481 = vst.msk [vmem:[%s20853_s2 + $0x38] sm:$0xff] %vm9473_vm10, %v9463_v15  ;;  %v9440_v43 = vadd.f32 %v9388_v12, %v19293_v59  ;;  %v13162_v42 = vpop.f32.mrb[159].mxu0 }
0x3139   :  { %v9464_v46 = vadd.f32 %v20337_v27, %v9440_v43 }
0x313a   :  { %v9393_v48 = vpop.f32.mrb[160].mxu0 }
0x313b   :  { %9482 = vst.msk [vmem:[%s20853_s2 + $0x40] sm:$0xff] %vm9473_vm10, %v9464_v46  ;;  %v9441_v35 = vadd.f32 %v9393_v48, %v19296_v5  ;;  %v13165_v61 = vpop.f32.mrb[161].mxu0 }
0x313d   :  { %v9465_v33 = vadd.f32 %v20337_v27, %v9441_v35 }
0x313e   :  { %v9398_v34 = vpop.f32.mrb[162].mxu0 }
0x313f   :  { %9483 = vst.msk [vmem:[%s20853_s2 + $0x48] sm:$0xff] %vm9473_vm10, %v9465_v33  ;;  %v9442_v59 = vadd.f32 %v9398_v34, %v19300_v36  ;;  %v13168_v21 = vpop.f32.mrb[163].mxu0 }
0x3141   :  { %v9466_v17 = vadd.f32 %v20337_v27, %v9442_v59 }
0x3142   :  { %v9403_v41 = vpop.f32.mrb[164].mxu0 }
0x3143   :  { %9484 = vst.msk [vmem:[%s20853_s2 + $0x50] sm:$0xff] %vm9473_vm10, %v9466_v17  ;;  %v9443_v5 = vadd.f32 %v9403_v41, %v19303_v55  ;;  %v13171_v44 = vpop.f32.mrb[165].mxu0 }
0x3145   :  { %v9467_v4 = vadd.f32 %v20337_v27, %v9443_v5 }
0x3146   :  { %v9408_v11 = vpop.f32.mrb[166].mxu0 }
0x3147   :  { %9485 = vst.msk [vmem:[%s20853_s2 + $0x58] sm:$0xff] %vm9473_vm10, %v9467_v4  ;;  %v9444_v36 = vadd.f32 %v9408_v11, %v19307_v6  ;;  %v13174_v51 = vpop.f32.mrb[167].mxu0 }
0x3149   :  { %v9468_v53 = vadd.f32 %v20337_v27, %v9444_v36 }
0x314a   :  { %v9413_v39 = vpop.f32.mrb[168].mxu0 }
0x314b   :  { %9486 = vst.msk [vmem:[%s20853_s2 + $0x60] sm:$0xff] %vm9473_vm10, %v9468_v53  ;;  %v9445_v55 = vadd.f32 %v9413_v39, %v19310_v57  ;;  %v13177_v63 = vpop.f32.mrb[169].mxu0 }
0x314d   :  { %v9469_v24 = vadd.f32 %v20337_v27, %v9445_v55 }
0x314e   :  { %v9418_v22 = vpop.f32.mrb[170].mxu0 }
0x314f   :  { %9487 = vst.msk [vmem:[%s20853_s2 + $0x68] sm:$0xff] %vm9473_vm10, %v9469_v24  ;;  %v9446_v6 = vadd.f32 %v9418_v22, %v19314_v26  ;;  %v13180_v62 = vpop.f32.mrb[171].mxu0 }
0x3151   :  { %v9470_v23 = vadd.f32 %v20337_v27, %v9446_v6 }
0x3152   :  { %v9423_v3 = vpop.f32.mrb[172].mxu0 }
0x3153   :  { %9488 = vst.msk [vmem:[%s20853_s2 + $0x70] sm:$0xff] %vm9473_vm10, %v9470_v23  ;;  %v9447_v57 = vadd.f32 %v9423_v3, %v19317_v25  ;;  %v13183_v49 = vpop.f32.mrb[173].mxu0 }
0x3155   :  { %v9471_v18 = vadd.f32 %v20337_v27, %v9447_v57 }
0x3156   :  { %v9428_v20 = vpop.f32.mrb[174].mxu0 }
0x3157   :  { %9489 = vst.msk [vmem:[%s20853_s2 + $0x78] sm:$0xff] %vm9473_vm10, %v9471_v18  ;;  %v9448_v26 = vadd.f32 %v9428_v20, %v19321_v40  ;;  %v13186_v31 = vpop.f32.mrb[175].mxu0 }
0x3159   :  { %v9472_v29 = vadd.f32 %v20337_v27, %v9448_v26 }
0x315b   :  { %9491 = vst.msk [vmem:[%s20853_s2 + $0x80] sm:$0x1f] %vm9490_vm11, %v9472_v29 }
0x315c   :  { %9496 = vsyncpa [#allocation3], 1 }
0x315d   :  { %9497 = vsyncpa [#allocation5], 1 }
0x315e   :  { %9498 = vsyncpa [#allocation8], 1 }
0x315f   :  { %9499 = vsyncpa [#allocation11], 1 }

</bundles_post_ra>
